<compile_context>
chip_gen: v7x
topology: tpu7x:2x2x1
jax: 0.10.0
libtpu: 0.0.40
codegen_flags: <defaults>
</compile_context>

<pallas_src>
import functools

import numpy as np
import jax
import jax.numpy as jnp
from jax.experimental import pallas as pl
from jax.experimental.pallas import tpu as pltpu


# --------------------------------------------------------------------------
# single fused kernel: conv stack -> linear1+ReLU -> LSTM -> head
# --------------------------------------------------------------------------
def make_fused_kernel(cfg, B):
    L = cfg['CONV_LAYERS']
    NL = cfg['LSTM_LAYERS']
    has_ff = cfg['FEED_FORWARD'] > 0
    T = cfg['N_DRAWS']
    C0 = cfg['N_TYPES']
    H0, W0 = cfg['HEIGHT'], cfg['WIDTH']
    Hd = cfg['OUTPUT_LSTM']
    N = B * T

    def kernel(*refs):
        it = iter(refs)
        x_ref = next(it)                               # (N, H, W, C0) NHWC, rows t-major
        conv_w = [next(it) for _ in range(L)]          # (9, Cin, Cout) per layer
        conv_b = [next(it) for _ in range(L)]          # (1, Cout)
        lin1_w = next(it)                              # (feat, in_lstm), rows NHWC-ordered
        lin1_b = next(it)                              # (1, in_lstm)
        wih = [next(it) for _ in range(NL)]            # (din, 4H)
        whh = [next(it) for _ in range(NL)]            # (H, 4H)
        lsb = [next(it) for _ in range(NL)]            # (1, 4H)  (= b_ih + b_hh)
        if has_ff:
            ff_w = next(it)                            # (T*H, F)
            ff_b = next(it)                            # (1, F)
        out_w = next(it)                               # (last_in, N_PARAMS)
        out_b = next(it)                               # (1, N_PARAMS)
        o_ref = next(it)                               # (B, N_PARAMS) output
        pads = [next(it) for _ in range(L)]            # VMEM pad scratches

        # ---- conv stack: Conv3x3(pad=1) + ReLU + MaxPool2x2 per layer ------
        # im2col in VMEM: zero-pad the NHWC map into a scratch, then
        # accumulate 9 shifted-tap matmuls on the MXU.
        h, w, cin = H0, W0, C0
        cur = x_ref[...]                               # (N, H, W, C0)
        for i in range(L):
            cout = 64 * (2 ** i)
            pad = pads[i]                              # (N, h+2, w+2, cin)
            pad[...] = jnp.zeros(pad.shape, jnp.float32)
            pad[:, 1:h + 1, 1:w + 1, :] = cur.reshape(N, h, w, cin)
            acc = jnp.zeros((N * h * w, cout), jnp.float32)
            for dh in range(3):
                for dw in range(3):
                    tap = pad[:, dh:dh + h, dw:dw + w, :].reshape(N * h * w, cin)
                    acc = acc + jnp.dot(tap, conv_w[i][dh * 3 + dw],
                                        preferred_element_type=jnp.float32)
            y = jnp.maximum(acc + conv_b[i][...], 0.0)           # bias + ReLU
            # 2x2 max-pool; rows are ordered (n, h, w)
            y = jnp.max(y.reshape(N * (h // 2), 2, w, cout), axis=1)
            y = jnp.max(y.reshape(N * (h // 2) * (w // 2), 2, cout), axis=1)
            h //= 2
            w //= 2
            cur, cin = y, cout                          # (N*h*w, cout)

        feats = cur.reshape(N, h * w * cin)             # rows (t, b); NHWC flatten

        # ---- linear1 + ReLU (lin1_w rows pre-permuted NCHW -> NHWC) --------
        z = jnp.dot(feats, lin1_w[...],
                    preferred_element_type=jnp.float32) + lin1_b[...]
        z = jnp.maximum(z, 0.0)                         # (T*B, in_lstm), rows (t, b)

        # ---- LSTM: x@Wih hoisted out of the recurrence -----------------
        if NL > 0:
            xs = z
            hs = []
            for l in range(NL):
                w_hh = whh[l][...]
                gx = jnp.dot(xs, wih[l][...],
                             preferred_element_type=jnp.float32) + lsb[l][...]
                hcur = jnp.zeros((B, Hd), jnp.float32)
                ccur = jnp.zeros((B, Hd), jnp.float32)
                hs = []
                for t in range(T):                      # timestep = contiguous row slice
                    g = gx[t * B:(t + 1) * B, :] + jnp.dot(
                        hcur, w_hh, preferred_element_type=jnp.float32)
                    sg = jax.nn.sigmoid(g)              # PyTorch gate order i|f|g|o
                    gg = jnp.tanh(g[:, 2 * Hd:3 * Hd])
                    ccur = sg[:, Hd:2 * Hd] * ccur + sg[:, 0:Hd] * gg
                    hcur = sg[:, 3 * Hd:4 * Hd] * jnp.tanh(ccur)
                    hs.append(hcur)
                if l + 1 < NL:
                    xs = jnp.concatenate(hs, axis=0)    # (T*B, Hd), rows (t, b)
            ys = jnp.concatenate(hs, axis=1)            # (B, T*Hd) lane-dense, PyTorch order
        else:
            ys = jnp.concatenate([z[t * B:(t + 1) * B, :] for t in range(T)],
                                 axis=1)                # (B, T*Hd)

        # ---- head: [FF + ReLU] -> output linear -> sigmoid -----------------
        if has_ff:
            yf = jnp.dot(ys, ff_w[...],
                         preferred_element_type=jnp.float32) + ff_b[...]
            yf = jnp.maximum(yf, 0.0)
        else:
            yf = ys
        logits = jnp.dot(yf, out_w[...],
                         preferred_element_type=jnp.float32) + out_b[...]
        o_ref[...] = jax.nn.sigmoid(logits)

    return kernel


# --------------------------------------------------------------------------
# forward (one pallas_call)
# --------------------------------------------------------------------------
def net_forward(x, params, cfg):
    B = x.shape[0]
    T, C0 = cfg['N_DRAWS'], cfg['N_TYPES']
    H, W, L = cfg['HEIGHT'], cfg['WIDTH'], cfg['CONV_LAYERS']
    N = B * T

    # NCHW -> NHWC and reorder images to t-major so LSTM timestep slices are
    # contiguous leading-dim slices inside the kernel (one tiny XLA fusion).
    x = x.reshape(B, T, C0, H, W)
    x = jnp.transpose(x, (1, 0, 3, 4, 2)).reshape(N, H, W, C0)

    args = [x]
    args += list(params['conv_w']) + list(params['conv_b'])
    args += [params['lin1_w'], params['lin1_b']]
    args += list(params['lstm_wih']) + list(params['lstm_whh']) + list(params['lstm_b'])
    if cfg['FEED_FORWARD'] > 0:
        args += [params['ff_w'], params['ff_b']]
    args += [params['out_w'], params['out_b']]

    # one zero-padded VMEM scratch per conv layer (for in-kernel im2col)
    scratch = []
    h, w, cin = H, W, C0
    for i in range(L):
        scratch.append(pltpu.VMEM((N, h + 2, w + 2, cin), jnp.float32))
        cin = 64 * 2 ** i
        h //= 2
        w //= 2

    vmem = pl.BlockSpec(memory_space=pltpu.MemorySpace.VMEM)
    out = pl.pallas_call(
        make_fused_kernel(cfg, B),
        out_shape=jax.ShapeDtypeStruct((B, cfg['N_PARAMS']), jnp.float32),
        in_specs=[vmem] * len(args),
        out_specs=vmem,
        scratch_shapes=scratch,
    )(*args)
    return out


# --------------------------------------------------------------------------
# parameters
# --------------------------------------------------------------------------
def init_params(key, cfg):
    def uinit(k, shape, fan_in):
        lim = 1.0 / np.sqrt(fan_in)
        return jax.random.uniform(k, shape, jnp.float32, -lim, lim)

    keys = iter(jax.random.split(key, 128))
    p = {}

    conv_w, conv_b = [], []
    cin = cfg['N_TYPES']
    for i in range(cfg['CONV_LAYERS']):
        cout = 64 * 2 ** i
        conv_w.append(uinit(next(keys), (3, 3, cin, cout), cin * 9))   # HWIO
        conv_b.append(uinit(next(keys), (cout,), cin * 9))
        cin = cout
    p['conv_w'], p['conv_b'] = conv_w, conv_b

    feat = int(16 / 2 ** (cfg['CONV_LAYERS'] - 1)) * cfg['HEIGHT'] * cfg['WIDTH']
    in_lstm = cfg['INPUT_LSTM'] if cfg['LSTM_LAYERS'] > 0 else cfg['OUTPUT_LSTM']
    # lin1_w rows follow the PyTorch NCHW flatten order (c, h, w)
    p['lin1_w'] = uinit(next(keys), (feat, in_lstm), feat)
    p['lin1_b'] = uinit(next(keys), (in_lstm,), feat)

    Hd = cfg['OUTPUT_LSTM']
    wih, whh, lb = [], [], []
    for l in range(cfg['LSTM_LAYERS']):
        din = in_lstm if l == 0 else Hd
        wih.append(uinit(next(keys), (din, 4 * Hd), Hd))
        whh.append(uinit(next(keys), (Hd, 4 * Hd), Hd))
        # PyTorch has two bias vectors; the forward uses their sum (b_ih + b_hh)
        lb.append(uinit(next(keys), (4 * Hd,), Hd) + uinit(next(keys), (4 * Hd,), Hd))
    p['lstm_wih'], p['lstm_whh'], p['lstm_b'] = wih, whh, lb

    flat = cfg['N_DRAWS'] * Hd
    if cfg['FEED_FORWARD'] > 0:
        p['ff_w'] = uinit(next(keys), (flat, cfg['FEED_FORWARD']), flat)
        p['ff_b'] = uinit(next(keys), (cfg['FEED_FORWARD'],), flat)
        last_in = cfg['FEED_FORWARD']
    else:
        last_in = flat
    p['out_w'] = uinit(next(keys), (last_in, cfg['N_PARAMS']), last_in)
    p['out_b'] = uinit(next(keys), (cfg['N_PARAMS'],), last_in)
    return p


def prepare_params(p, cfg):
    """One-time layout prep: flatten conv taps to (9, Cin, Cout), permute
    lin1 rows from PyTorch NCHW flatten order to the kernel's NHWC flatten
    order, and reshape biases to (1, n)."""
    L = cfg['CONV_LAYERS']
    q = {}
    q['conv_w'] = [w.reshape(9, w.shape[2], w.shape[3]) for w in p['conv_w']]
    q['conv_b'] = [b.reshape(1, -1) for b in p['conv_b']]

    C = 64 * 2 ** (L - 1)
    Hf = cfg['HEIGHT'] // (2 ** L)
    Wf = cfg['WIDTH'] // (2 ** L)
    perm = np.arange(C * Hf * Wf).reshape(C, Hf, Wf).transpose(1, 2, 0).reshape(-1)
    q['lin1_w'] = p['lin1_w'][perm]                    # rows now (h, w, c) order
    q['lin1_b'] = p['lin1_b'].reshape(1, -1)

    q['lstm_wih'] = list(p['lstm_wih'])
    q['lstm_whh'] = list(p['lstm_whh'])
    q['lstm_b'] = [b.reshape(1, -1) for b in p['lstm_b']]

    if cfg['FEED_FORWARD'] > 0:
        q['ff_w'] = p['ff_w']
        q['ff_b'] = p['ff_b'].reshape(1, -1)
    q['out_w'] = p['out_w']
    q['out_b'] = p['out_b'].reshape(1, -1)
    return q


# --------------------------------------------------------------------------
# pure-JAX reference with PyTorch semantics (correctness cross-check)
# --------------------------------------------------------------------------
def net_reference(x, p, cfg):
    hi = jax.lax.Precision.HIGHEST
    B = x.shape[0]
    T, C0, H, W = cfg['N_DRAWS'], cfg['N_TYPES'], cfg['HEIGHT'], cfg['WIDTH']
    Hd = cfg['OUTPUT_LSTM']

    xc = x.reshape(B * T, C0, H, W).transpose(0, 2, 3, 1)        # NHWC, rows b-major
    for i in range(cfg['CONV_LAYERS']):
        xc = jax.lax.conv_general_dilated(
            xc, p['conv_w'][i], window_strides=(1, 1), padding='SAME',
            dimension_numbers=('NHWC', 'HWIO', 'NHWC'), precision=hi)
        xc = jnp.maximum(xc + p['conv_b'][i], 0.0)
        n, hh, ww, cc = xc.shape
        xc = xc.reshape(n, hh // 2, 2, ww // 2, 2, cc).max(axis=(2, 4))

    n, hh, ww, cc = xc.shape
    flat = xc.transpose(0, 3, 1, 2).reshape(n, cc * hh * ww)     # NCHW flatten
    z = jnp.maximum(jnp.dot(flat, p['lin1_w'], precision=hi) + p['lin1_b'], 0.0)
    z = z.reshape(B, T, -1)

    if cfg['LSTM_LAYERS'] > 0:
        xs = z
        for l in range(cfg['LSTM_LAYERS']):
            hcur = jnp.zeros((B, Hd), jnp.float32)
            ccur = jnp.zeros((B, Hd), jnp.float32)
            outs = []
            for t in range(T):
                g = (jnp.dot(xs[:, t, :], p['lstm_wih'][l], precision=hi)
                     + jnp.dot(hcur, p['lstm_whh'][l], precision=hi)
                     + p['lstm_b'][l])
                ig = jax.nn.sigmoid(g[:, 0:Hd])
                fg = jax.nn.sigmoid(g[:, Hd:2 * Hd])
                gg = jnp.tanh(g[:, 2 * Hd:3 * Hd])
                og = jax.nn.sigmoid(g[:, 3 * Hd:4 * Hd])
                ccur = fg * ccur + ig * gg
                hcur = og * jnp.tanh(ccur)
                outs.append(hcur)
            xs = jnp.stack(outs, axis=1)
        z = xs

    y = z.reshape(B, T * Hd)
    if cfg['FEED_FORWARD'] > 0:
        y = jnp.maximum(jnp.dot(y, p['ff_w'], precision=hi) + p['ff_b'], 0.0)
    out = jnp.dot(y, p['out_w'], precision=hi) + p['out_b']
    return jax.nn.sigmoid(out)


if __name__ == "__main__":
    cfg = dict(N_DRAWS=4, N_TYPES=3, INPUT_LSTM=32, OUTPUT_LSTM=32,
               LSTM_LAYERS=1, BATCH_SIZE=2, HEIGHT=8, WIDTH=8,
               N_PARAMS=5, CONV_LAYERS=2, FEED_FORWARD=64)

    key = jax.random.PRNGKey(0)
    kx, kp = jax.random.split(key)
    x = jax.random.normal(
        kx, (cfg['BATCH_SIZE'], cfg['N_DRAWS'], cfg['N_TYPES'],
             cfg['HEIGHT'], cfg['WIDTH']), jnp.float32)

    raw_params = init_params(kp, cfg)
    params = prepare_params(raw_params, cfg)              # one-time layout prep

    fwd = jax.jit(functools.partial(net_forward, cfg=cfg))
    out = jax.block_until_ready(fwd(x, params))

    assert out.shape == (cfg['BATCH_SIZE'], cfg['N_PARAMS']), out.shape
    assert bool(jnp.all(jnp.isfinite(out)))
    assert bool(jnp.all((out > 0.0) & (out < 1.0)))       # sigmoid range

    # numerical cross-check against a pure-JAX reference of the PyTorch model
    ref = net_reference(x, raw_params, cfg)
    err = float(jnp.max(jnp.abs(out - ref)))
    assert err < 5e-3, f"kernel vs reference mismatch: max abs err = {err}"

    print("KERNEL_OK")
</pallas_src>

<mosaic_0001>
module attributes {stable_mosaic.version = 11 : i64} {
  func.func @kernel(%arg0: memref<8x8x8x3xf32, #tpu.memory_space<vmem>>, %arg1: memref<9x3x64xf32, #tpu.memory_space<vmem>>, %arg2: memref<9x64x128xf32, #tpu.memory_space<vmem>>, %arg3: memref<1x64xf32, #tpu.memory_space<vmem>>, %arg4: memref<1x128xf32, #tpu.memory_space<vmem>>, %arg5: memref<512x32xf32, #tpu.memory_space<vmem>>, %arg6: memref<1x32xf32, #tpu.memory_space<vmem>>, %arg7: memref<32x128xf32, #tpu.memory_space<vmem>>, %arg8: memref<32x128xf32, #tpu.memory_space<vmem>>, %arg9: memref<1x128xf32, #tpu.memory_space<vmem>>, %arg10: memref<128x64xf32, #tpu.memory_space<vmem>>, %arg11: memref<1x64xf32, #tpu.memory_space<vmem>>, %arg12: memref<64x5xf32, #tpu.memory_space<vmem>>, %arg13: memref<1x5xf32, #tpu.memory_space<vmem>>, %arg14: memref<2x5xf32, #tpu.memory_space<vmem>>, %arg15: memref<8x10x10x3xf32, #tpu.memory_space<vmem>>, %arg16: memref<8x6x6x64xf32, #tpu.memory_space<vmem>>) attributes {dimension_semantics = [], scalar_prefetch = 0 : i64, scratch_operands = 2 : i64, tpu.core_type = #tpu.core_type<tc>} {
    %c0 = arith.constant 0 : index
    %c0_0 = arith.constant 0 : index
    %c0_1 = arith.constant 0 : index
    %c0_2 = arith.constant 0 : index
    %0 = vector.load %arg0[%c0, %c0_0, %c0_1, %c0_2] : memref<8x8x8x3xf32, #tpu.memory_space<vmem>>, vector<8x8x8x3xf32>
    %cst = arith.constant 0.000000e+00 : f32
    %1 = vector.broadcast %cst : f32 to vector<8x10x10x3xf32>
    %c0_3 = arith.constant 0 : index
    %c0_4 = arith.constant 0 : index
    %c0_5 = arith.constant 0 : index
    %c0_6 = arith.constant 0 : index
    %2 = vector.load %arg15[%c0_3, %c0_4, %c0_5, %c0_6] : memref<8x10x10x3xf32, #tpu.memory_space<vmem>>, vector<8x10x10x3xf32>
    tpu.vector_store %arg15[%c0_3, %c0_4, %c0_5, %c0_6], %1 {strides = array<i32>} : memref<8x10x10x3xf32, #tpu.memory_space<vmem>>, vector<8x10x10x3xf32>,
    %c0_7 = arith.constant 0 : index
    %c1 = arith.constant 1 : index
    %c1_8 = arith.constant 1 : index
    %c0_9 = arith.constant 0 : index
    %3 = vector.load %arg15[%c0_7, %c1, %c1_8, %c0_9] : memref<8x10x10x3xf32, #tpu.memory_space<vmem>>, vector<8x8x8x3xf32>
    tpu.vector_store %arg15[%c0_7, %c1, %c1_8, %c0_9], %0 {strides = array<i32>} : memref<8x10x10x3xf32, #tpu.memory_space<vmem>>, vector<8x8x8x3xf32>,
    %cst_10 = arith.constant 0.000000e+00 : f32
    %4 = vector.broadcast %cst_10 : f32 to vector<512x64xf32>
    %c0_11 = arith.constant 0 : index
    %c0_12 = arith.constant 0 : index
    %c0_13 = arith.constant 0 : index
    %c0_14 = arith.constant 0 : index
    %5 = vector.load %arg15[%c0_11, %c0_12, %c0_13, %c0_14] : memref<8x10x10x3xf32, #tpu.memory_space<vmem>>, vector<8x8x8x3xf32>
    %6 = vector.shape_cast %5 : vector<8x8x8x3xf32> to vector<512x3xf32>
    %c0_15 = arith.constant 0 : index
    %c0_16 = arith.constant 0 : index
    %c0_17 = arith.constant 0 : index
    %7 = vector.load %arg1[%c0_15, %c0_16, %c0_17] : memref<9x3x64xf32, #tpu.memory_space<vmem>>, vector<1x3x64xf32>
    %8 = vector.shape_cast %7 : vector<1x3x64xf32> to vector<3x64xf32>
    %cst_18 = arith.constant dense<0.000000e+00> : vector<512x64xf32>
    %9 = tpu.matmul %6, %8, %cst_18 {dimension_numbers = #tpu.dot_dimension_numbers<[1], [0], [0], [1], [0, 0, 1, 1], [], []>} : vector<512x3xf32>, vector<3x64xf32>, vector<512x64xf32> -> vector<512x64xf32>
    %10 = arith.addf %4, %9 : vector<512x64xf32>
    %c0_19 = arith.constant 0 : index
    %c0_20 = arith.constant 0 : index
    %c1_21 = arith.constant 1 : index
    %c0_22 = arith.constant 0 : index
    %11 = vector.load %arg15[%c0_19, %c0_20, %c1_21, %c0_22] : memref<8x10x10x3xf32, #tpu.memory_space<vmem>>, vector<8x8x8x3xf32>
    %12 = vector.shape_cast %11 : vector<8x8x8x3xf32> to vector<512x3xf32>
    %c1_23 = arith.constant 1 : index
    %c0_24 = arith.constant 0 : index
    %c0_25 = arith.constant 0 : index
    %13 = vector.load %arg1[%c1_23, %c0_24, %c0_25] : memref<9x3x64xf32, #tpu.memory_space<vmem>>, vector<1x3x64xf32>
    %14 = vector.shape_cast %13 : vector<1x3x64xf32> to vector<3x64xf32>
    %cst_26 = arith.constant dense<0.000000e+00> : vector<512x64xf32>
    %15 = tpu.matmul %12, %14, %cst_26 {dimension_numbers = #tpu.dot_dimension_numbers<[1], [0], [0], [1], [0, 0, 1, 1], [], []>} : vector<512x3xf32>, vector<3x64xf32>, vector<512x64xf32> -> vector<512x64xf32>
    %16 = arith.addf %10, %15 : vector<512x64xf32>
    %c0_27 = arith.constant 0 : index
    %c0_28 = arith.constant 0 : index
    %c2 = arith.constant 2 : index
    %c0_29 = arith.constant 0 : index
    %17 = vector.load %arg15[%c0_27, %c0_28, %c2, %c0_29] : memref<8x10x10x3xf32, #tpu.memory_space<vmem>>, vector<8x8x8x3xf32>
    %18 = vector.shape_cast %17 : vector<8x8x8x3xf32> to vector<512x3xf32>
    %c2_30 = arith.constant 2 : index
    %c0_31 = arith.constant 0 : index
    %c0_32 = arith.constant 0 : index
    %19 = vector.load %arg1[%c2_30, %c0_31, %c0_32] : memref<9x3x64xf32, #tpu.memory_space<vmem>>, vector<1x3x64xf32>
    %20 = vector.shape_cast %19 : vector<1x3x64xf32> to vector<3x64xf32>
    %cst_33 = arith.constant dense<0.000000e+00> : vector<512x64xf32>
    %21 = tpu.matmul %18, %20, %cst_33 {dimension_numbers = #tpu.dot_dimension_numbers<[1], [0], [0], [1], [0, 0, 1, 1], [], []>} : vector<512x3xf32>, vector<3x64xf32>, vector<512x64xf32> -> vector<512x64xf32>
    %22 = arith.addf %16, %21 : vector<512x64xf32>
    %c0_34 = arith.constant 0 : index
    %c1_35 = arith.constant 1 : index
    %c0_36 = arith.constant 0 : index
    %c0_37 = arith.constant 0 : index
    %23 = vector.load %arg15[%c0_34, %c1_35, %c0_36, %c0_37] : memref<8x10x10x3xf32, #tpu.memory_space<vmem>>, vector<8x8x8x3xf32>
    %24 = vector.shape_cast %23 : vector<8x8x8x3xf32> to vector<512x3xf32>
    %c3 = arith.constant 3 : index
    %c0_38 = arith.constant 0 : index
    %c0_39 = arith.constant 0 : index
    %25 = vector.load %arg1[%c3, %c0_38, %c0_39] : memref<9x3x64xf32, #tpu.memory_space<vmem>>, vector<1x3x64xf32>
    %26 = vector.shape_cast %25 : vector<1x3x64xf32> to vector<3x64xf32>
    %cst_40 = arith.constant dense<0.000000e+00> : vector<512x64xf32>
    %27 = tpu.matmul %24, %26, %cst_40 {dimension_numbers = #tpu.dot_dimension_numbers<[1], [0], [0], [1], [0, 0, 1, 1], [], []>} : vector<512x3xf32>, vector<3x64xf32>, vector<512x64xf32> -> vector<512x64xf32>
    %28 = arith.addf %22, %27 : vector<512x64xf32>
    %c0_41 = arith.constant 0 : index
    %c1_42 = arith.constant 1 : index
    %c1_43 = arith.constant 1 : index
    %c0_44 = arith.constant 0 : index
    %29 = vector.load %arg15[%c0_41, %c1_42, %c1_43, %c0_44] : memref<8x10x10x3xf32, #tpu.memory_space<vmem>>, vector<8x8x8x3xf32>
    %30 = vector.shape_cast %29 : vector<8x8x8x3xf32> to vector<512x3xf32>
    %c4 = arith.constant 4 : index
    %c0_45 = arith.constant 0 : index
    %c0_46 = arith.constant 0 : index
    %31 = vector.load %arg1[%c4, %c0_45, %c0_46] : memref<9x3x64xf32, #tpu.memory_space<vmem>>, vector<1x3x64xf32>
    %32 = vector.shape_cast %31 : vector<1x3x64xf32> to vector<3x64xf32>
    %cst_47 = arith.constant dense<0.000000e+00> : vector<512x64xf32>
    %33 = tpu.matmul %30, %32, %cst_47 {dimension_numbers = #tpu.dot_dimension_numbers<[1], [0], [0], [1], [0, 0, 1, 1], [], []>} : vector<512x3xf32>, vector<3x64xf32>, vector<512x64xf32> -> vector<512x64xf32>
    %34 = arith.addf %28, %33 : vector<512x64xf32>
    %c0_48 = arith.constant 0 : index
    %c1_49 = arith.constant 1 : index
    %c2_50 = arith.constant 2 : index
    %c0_51 = arith.constant 0 : index
    %35 = vector.load %arg15[%c0_48, %c1_49, %c2_50, %c0_51] : memref<8x10x10x3xf32, #tpu.memory_space<vmem>>, vector<8x8x8x3xf32>
    %36 = vector.shape_cast %35 : vector<8x8x8x3xf32> to vector<512x3xf32>
    %c5 = arith.constant 5 : index
    %c0_52 = arith.constant 0 : index
    %c0_53 = arith.constant 0 : index
    %37 = vector.load %arg1[%c5, %c0_52, %c0_53] : memref<9x3x64xf32, #tpu.memory_space<vmem>>, vector<1x3x64xf32>
    %38 = vector.shape_cast %37 : vector<1x3x64xf32> to vector<3x64xf32>
    %cst_54 = arith.constant dense<0.000000e+00> : vector<512x64xf32>
    %39 = tpu.matmul %36, %38, %cst_54 {dimension_numbers = #tpu.dot_dimension_numbers<[1], [0], [0], [1], [0, 0, 1, 1], [], []>} : vector<512x3xf32>, vector<3x64xf32>, vector<512x64xf32> -> vector<512x64xf32>
    %40 = arith.addf %34, %39 : vector<512x64xf32>
    %c0_55 = arith.constant 0 : index
    %c2_56 = arith.constant 2 : index
    %c0_57 = arith.constant 0 : index
    %c0_58 = arith.constant 0 : index
    %41 = vector.load %arg15[%c0_55, %c2_56, %c0_57, %c0_58] : memref<8x10x10x3xf32, #tpu.memory_space<vmem>>, vector<8x8x8x3xf32>
    %42 = vector.shape_cast %41 : vector<8x8x8x3xf32> to vector<512x3xf32>
    %c6 = arith.constant 6 : index
    %c0_59 = arith.constant 0 : index
    %c0_60 = arith.constant 0 : index
    %43 = vector.load %arg1[%c6, %c0_59, %c0_60] : memref<9x3x64xf32, #tpu.memory_space<vmem>>, vector<1x3x64xf32>
    %44 = vector.shape_cast %43 : vector<1x3x64xf32> to vector<3x64xf32>
    %cst_61 = arith.constant dense<0.000000e+00> : vector<512x64xf32>
    %45 = tpu.matmul %42, %44, %cst_61 {dimension_numbers = #tpu.dot_dimension_numbers<[1], [0], [0], [1], [0, 0, 1, 1], [], []>} : vector<512x3xf32>, vector<3x64xf32>, vector<512x64xf32> -> vector<512x64xf32>
    %46 = arith.addf %40, %45 : vector<512x64xf32>
    %c0_62 = arith.constant 0 : index
    %c2_63 = arith.constant 2 : index
    %c1_64 = arith.constant 1 : index
    %c0_65 = arith.constant 0 : index
    %47 = vector.load %arg15[%c0_62, %c2_63, %c1_64, %c0_65] : memref<8x10x10x3xf32, #tpu.memory_space<vmem>>, vector<8x8x8x3xf32>
    %48 = vector.shape_cast %47 : vector<8x8x8x3xf32> to vector<512x3xf32>
    %c7 = arith.constant 7 : index
    %c0_66 = arith.constant 0 : index
    %c0_67 = arith.constant 0 : index
    %49 = vector.load %arg1[%c7, %c0_66, %c0_67] : memref<9x3x64xf32, #tpu.memory_space<vmem>>, vector<1x3x64xf32>
    %50 = vector.shape_cast %49 : vector<1x3x64xf32> to vector<3x64xf32>
    %cst_68 = arith.constant dense<0.000000e+00> : vector<512x64xf32>
    %51 = tpu.matmul %48, %50, %cst_68 {dimension_numbers = #tpu.dot_dimension_numbers<[1], [0], [0], [1], [0, 0, 1, 1], [], []>} : vector<512x3xf32>, vector<3x64xf32>, vector<512x64xf32> -> vector<512x64xf32>
    %52 = arith.addf %46, %51 : vector<512x64xf32>
    %c0_69 = arith.constant 0 : index
    %c2_70 = arith.constant 2 : index
    %c2_71 = arith.constant 2 : index
    %c0_72 = arith.constant 0 : index
    %53 = vector.load %arg15[%c0_69, %c2_70, %c2_71, %c0_72] : memref<8x10x10x3xf32, #tpu.memory_space<vmem>>, vector<8x8x8x3xf32>
    %54 = vector.shape_cast %53 : vector<8x8x8x3xf32> to vector<512x3xf32>
    %c8 = arith.constant 8 : index
    %c0_73 = arith.constant 0 : index
    %c0_74 = arith.constant 0 : index
    %55 = vector.load %arg1[%c8, %c0_73, %c0_74] : memref<9x3x64xf32, #tpu.memory_space<vmem>>, vector<1x3x64xf32>
    %56 = vector.shape_cast %55 : vector<1x3x64xf32> to vector<3x64xf32>
    %cst_75 = arith.constant dense<0.000000e+00> : vector<512x64xf32>
    %57 = tpu.matmul %54, %56, %cst_75 {dimension_numbers = #tpu.dot_dimension_numbers<[1], [0], [0], [1], [0, 0, 1, 1], [], []>} : vector<512x3xf32>, vector<3x64xf32>, vector<512x64xf32> -> vector<512x64xf32>
    %58 = arith.addf %52, %57 : vector<512x64xf32>
    %c0_76 = arith.constant 0 : index
    %c0_77 = arith.constant 0 : index
    %59 = vector.load %arg3[%c0_76, %c0_77] : memref<1x64xf32, #tpu.memory_space<vmem>>, vector<1x64xf32>
    %60 = vector.broadcast %59 : vector<1x64xf32> to vector<512x64xf32>
    %61 = arith.addf %58, %60 : vector<512x64xf32>
    %cst_78 = arith.constant 0.000000e+00 : f32
    %62 = vector.broadcast %cst_78 : f32 to vector<512x64xf32>
    %63 = arith.maximumf %61, %62 : vector<512x64xf32>
    %64 = vector.shape_cast %63 : vector<512x64xf32> to vector<32x2x8x64xf32>
    %cst_79 = arith.constant dense<0xFF800000> : vector<32x8x64xf32>
    %65 = vector.multi_reduction <maximumf>, %64, %cst_79 [1] : vector<32x2x8x64xf32> to vector<32x8x64xf32>
    %66 = vector.shape_cast %65 : vector<32x8x64xf32> to vector<128x2x64xf32>
    %cst_80 = arith.constant dense<0xFF800000> : vector<128x64xf32>
    %67 = vector.multi_reduction <maximumf>, %66, %cst_80 [1] : vector<128x2x64xf32> to vector<128x64xf32>
    %cst_81 = arith.constant 0.000000e+00 : f32
    %68 = vector.broadcast %cst_81 : f32 to vector<8x6x6x64xf32>
    %c0_82 = arith.constant 0 : index
    %c0_83 = arith.constant 0 : index
    %c0_84 = arith.constant 0 : index
    %c0_85 = arith.constant 0 : index
    %69 = vector.load %arg16[%c0_82, %c0_83, %c0_84, %c0_85] : memref<8x6x6x64xf32, #tpu.memory_space<vmem>>, vector<8x6x6x64xf32>
    tpu.vector_store %arg16[%c0_82, %c0_83, %c0_84, %c0_85], %68 {strides = array<i32>} : memref<8x6x6x64xf32, #tpu.memory_space<vmem>>, vector<8x6x6x64xf32>,
    %70 = vector.shape_cast %67 : vector<128x64xf32> to vector<8x4x4x64xf32>
    %c0_86 = arith.constant 0 : index
    %c1_87 = arith.constant 1 : index
    %c1_88 = arith.constant 1 : index
    %c0_89 = arith.constant 0 : index
    %71 = vector.load %arg16[%c0_86, %c1_87, %c1_88, %c0_89] : memref<8x6x6x64xf32, #tpu.memory_space<vmem>>, vector<8x4x4x64xf32>
    tpu.vector_store %arg16[%c0_86, %c1_87, %c1_88, %c0_89], %70 {strides = array<i32>} : memref<8x6x6x64xf32, #tpu.memory_space<vmem>>, vector<8x4x4x64xf32>,
    %cst_90 = arith.constant 0.000000e+00 : f32
    %72 = vector.broadcast %cst_90 : f32 to vector<128x128xf32>
    %c0_91 = arith.constant 0 : index
    %c0_92 = arith.constant 0 : index
    %c0_93 = arith.constant 0 : index
    %c0_94 = arith.constant 0 : index
    %73 = vector.load %arg16[%c0_91, %c0_92, %c0_93, %c0_94] : memref<8x6x6x64xf32, #tpu.memory_space<vmem>>, vector<8x4x4x64xf32>
    %74 = vector.shape_cast %73 : vector<8x4x4x64xf32> to vector<128x64xf32>
    %c0_95 = arith.constant 0 : index
    %c0_96 = arith.constant 0 : index
    %c0_97 = arith.constant 0 : index
    %75 = vector.load %arg2[%c0_95, %c0_96, %c0_97] : memref<9x64x128xf32, #tpu.memory_space<vmem>>, vector<1x64x128xf32>
    %76 = vector.shape_cast %75 : vector<1x64x128xf32> to vector<64x128xf32>
    %cst_98 = arith.constant dense<0.000000e+00> : vector<128x128xf32>
    %77 = tpu.matmul %74, %76, %cst_98 {dimension_numbers = #tpu.dot_dimension_numbers<[1], [0], [0], [1], [0, 0, 1, 1], [], []>} : vector<128x64xf32>, vector<64x128xf32>, vector<128x128xf32> -> vector<128x128xf32>
    %78 = arith.addf %72, %77 : vector<128x128xf32>
    %c0_99 = arith.constant 0 : index
    %c0_100 = arith.constant 0 : index
    %c1_101 = arith.constant 1 : index
    %c0_102 = arith.constant 0 : index
    %79 = vector.load %arg16[%c0_99, %c0_100, %c1_101, %c0_102] : memref<8x6x6x64xf32, #tpu.memory_space<vmem>>, vector<8x4x4x64xf32>
    %80 = vector.shape_cast %79 : vector<8x4x4x64xf32> to vector<128x64xf32>
    %c1_103 = arith.constant 1 : index
    %c0_104 = arith.constant 0 : index
    %c0_105 = arith.constant 0 : index
    %81 = vector.load %arg2[%c1_103, %c0_104, %c0_105] : memref<9x64x128xf32, #tpu.memory_space<vmem>>, vector<1x64x128xf32>
    %82 = vector.shape_cast %81 : vector<1x64x128xf32> to vector<64x128xf32>
    %cst_106 = arith.constant dense<0.000000e+00> : vector<128x128xf32>
    %83 = tpu.matmul %80, %82, %cst_106 {dimension_numbers = #tpu.dot_dimension_numbers<[1], [0], [0], [1], [0, 0, 1, 1], [], []>} : vector<128x64xf32>, vector<64x128xf32>, vector<128x128xf32> -> vector<128x128xf32>
    %84 = arith.addf %78, %83 : vector<128x128xf32>
    %c0_107 = arith.constant 0 : index
    %c0_108 = arith.constant 0 : index
    %c2_109 = arith.constant 2 : index
    %c0_110 = arith.constant 0 : index
    %85 = vector.load %arg16[%c0_107, %c0_108, %c2_109, %c0_110] : memref<8x6x6x64xf32, #tpu.memory_space<vmem>>, vector<8x4x4x64xf32>
    %86 = vector.shape_cast %85 : vector<8x4x4x64xf32> to vector<128x64xf32>
    %c2_111 = arith.constant 2 : index
    %c0_112 = arith.constant 0 : index
    %c0_113 = arith.constant 0 : index
    %87 = vector.load %arg2[%c2_111, %c0_112, %c0_113] : memref<9x64x128xf32, #tpu.memory_space<vmem>>, vector<1x64x128xf32>
    %88 = vector.shape_cast %87 : vector<1x64x128xf32> to vector<64x128xf32>
    %cst_114 = arith.constant dense<0.000000e+00> : vector<128x128xf32>
    %89 = tpu.matmul %86, %88, %cst_114 {dimension_numbers = #tpu.dot_dimension_numbers<[1], [0], [0], [1], [0, 0, 1, 1], [], []>} : vector<128x64xf32>, vector<64x128xf32>, vector<128x128xf32> -> vector<128x128xf32>
    %90 = arith.addf %84, %89 : vector<128x128xf32>
    %c0_115 = arith.constant 0 : index
    %c1_116 = arith.constant 1 : index
    %c0_117 = arith.constant 0 : index
    %c0_118 = arith.constant 0 : index
    %91 = vector.load %arg16[%c0_115, %c1_116, %c0_117, %c0_118] : memref<8x6x6x64xf32, #tpu.memory_space<vmem>>, vector<8x4x4x64xf32>
    %92 = vector.shape_cast %91 : vector<8x4x4x64xf32> to vector<128x64xf32>
    %c3_119 = arith.constant 3 : index
    %c0_120 = arith.constant 0 : index
    %c0_121 = arith.constant 0 : index
    %93 = vector.load %arg2[%c3_119, %c0_120, %c0_121] : memref<9x64x128xf32, #tpu.memory_space<vmem>>, vector<1x64x128xf32>
    %94 = vector.shape_cast %93 : vector<1x64x128xf32> to vector<64x128xf32>
    %cst_122 = arith.constant dense<0.000000e+00> : vector<128x128xf32>
    %95 = tpu.matmul %92, %94, %cst_122 {dimension_numbers = #tpu.dot_dimension_numbers<[1], [0], [0], [1], [0, 0, 1, 1], [], []>} : vector<128x64xf32>, vector<64x128xf32>, vector<128x128xf32> -> vector<128x128xf32>
    %96 = arith.addf %90, %95 : vector<128x128xf32>
    %c0_123 = arith.constant 0 : index
    %c1_124 = arith.constant 1 : index
    %c1_125 = arith.constant 1 : index
    %c0_126 = arith.constant 0 : index
    %97 = vector.load %arg16[%c0_123, %c1_124, %c1_125, %c0_126] : memref<8x6x6x64xf32, #tpu.memory_space<vmem>>, vector<8x4x4x64xf32>
    %98 = vector.shape_cast %97 : vector<8x4x4x64xf32> to vector<128x64xf32>
    %c4_127 = arith.constant 4 : index
    %c0_128 = arith.constant 0 : index
    %c0_129 = arith.constant 0 : index
    %99 = vector.load %arg2[%c4_127, %c0_128, %c0_129] : memref<9x64x128xf32, #tpu.memory_space<vmem>>, vector<1x64x128xf32>
    %100 = vector.shape_cast %99 : vector<1x64x128xf32> to vector<64x128xf32>
    %cst_130 = arith.constant dense<0.000000e+00> : vector<128x128xf32>
    %101 = tpu.matmul %98, %100, %cst_130 {dimension_numbers = #tpu.dot_dimension_numbers<[1], [0], [0], [1], [0, 0, 1, 1], [], []>} : vector<128x64xf32>, vector<64x128xf32>, vector<128x128xf32> -> vector<128x128xf32>
    %102 = arith.addf %96, %101 : vector<128x128xf32>
    %c0_131 = arith.constant 0 : index
    %c1_132 = arith.constant 1 : index
    %c2_133 = arith.constant 2 : index
    %c0_134 = arith.constant 0 : index
    %103 = vector.load %arg16[%c0_131, %c1_132, %c2_133, %c0_134] : memref<8x6x6x64xf32, #tpu.memory_space<vmem>>, vector<8x4x4x64xf32>
    %104 = vector.shape_cast %103 : vector<8x4x4x64xf32> to vector<128x64xf32>
    %c5_135 = arith.constant 5 : index
    %c0_136 = arith.constant 0 : index
    %c0_137 = arith.constant 0 : index
    %105 = vector.load %arg2[%c5_135, %c0_136, %c0_137] : memref<9x64x128xf32, #tpu.memory_space<vmem>>, vector<1x64x128xf32>
    %106 = vector.shape_cast %105 : vector<1x64x128xf32> to vector<64x128xf32>
    %cst_138 = arith.constant dense<0.000000e+00> : vector<128x128xf32>
    %107 = tpu.matmul %104, %106, %cst_138 {dimension_numbers = #tpu.dot_dimension_numbers<[1], [0], [0], [1], [0, 0, 1, 1], [], []>} : vector<128x64xf32>, vector<64x128xf32>, vector<128x128xf32> -> vector<128x128xf32>
    %108 = arith.addf %102, %107 : vector<128x128xf32>
    %c0_139 = arith.constant 0 : index
    %c2_140 = arith.constant 2 : index
    %c0_141 = arith.constant 0 : index
    %c0_142 = arith.constant 0 : index
    %109 = vector.load %arg16[%c0_139, %c2_140, %c0_141, %c0_142] : memref<8x6x6x64xf32, #tpu.memory_space<vmem>>, vector<8x4x4x64xf32>
    %110 = vector.shape_cast %109 : vector<8x4x4x64xf32> to vector<128x64xf32>
    %c6_143 = arith.constant 6 : index
    %c0_144 = arith.constant 0 : index
    %c0_145 = arith.constant 0 : index
    %111 = vector.load %arg2[%c6_143, %c0_144, %c0_145] : memref<9x64x128xf32, #tpu.memory_space<vmem>>, vector<1x64x128xf32>
    %112 = vector.shape_cast %111 : vector<1x64x128xf32> to vector<64x128xf32>
    %cst_146 = arith.constant dense<0.000000e+00> : vector<128x128xf32>
    %113 = tpu.matmul %110, %112, %cst_146 {dimension_numbers = #tpu.dot_dimension_numbers<[1], [0], [0], [1], [0, 0, 1, 1], [], []>} : vector<128x64xf32>, vector<64x128xf32>, vector<128x128xf32> -> vector<128x128xf32>
    %114 = arith.addf %108, %113 : vector<128x128xf32>
    %c0_147 = arith.constant 0 : index
    %c2_148 = arith.constant 2 : index
    %c1_149 = arith.constant 1 : index
    %c0_150 = arith.constant 0 : index
    %115 = vector.load %arg16[%c0_147, %c2_148, %c1_149, %c0_150] : memref<8x6x6x64xf32, #tpu.memory_space<vmem>>, vector<8x4x4x64xf32>
    %116 = vector.shape_cast %115 : vector<8x4x4x64xf32> to vector<128x64xf32>
    %c7_151 = arith.constant 7 : index
    %c0_152 = arith.constant 0 : index
    %c0_153 = arith.constant 0 : index
    %117 = vector.load %arg2[%c7_151, %c0_152, %c0_153] : memref<9x64x128xf32, #tpu.memory_space<vmem>>, vector<1x64x128xf32>
    %118 = vector.shape_cast %117 : vector<1x64x128xf32> to vector<64x128xf32>
    %cst_154 = arith.constant dense<0.000000e+00> : vector<128x128xf32>
    %119 = tpu.matmul %116, %118, %cst_154 {dimension_numbers = #tpu.dot_dimension_numbers<[1], [0], [0], [1], [0, 0, 1, 1], [], []>} : vector<128x64xf32>, vector<64x128xf32>, vector<128x128xf32> -> vector<128x128xf32>
    %120 = arith.addf %114, %119 : vector<128x128xf32>
    %c0_155 = arith.constant 0 : index
    %c2_156 = arith.constant 2 : index
    %c2_157 = arith.constant 2 : index
    %c0_158 = arith.constant 0 : index
    %121 = vector.load %arg16[%c0_155, %c2_156, %c2_157, %c0_158] : memref<8x6x6x64xf32, #tpu.memory_space<vmem>>, vector<8x4x4x64xf32>
    %122 = vector.shape_cast %121 : vector<8x4x4x64xf32> to vector<128x64xf32>
    %c8_159 = arith.constant 8 : index
    %c0_160 = arith.constant 0 : index
    %c0_161 = arith.constant 0 : index
    %123 = vector.load %arg2[%c8_159, %c0_160, %c0_161] : memref<9x64x128xf32, #tpu.memory_space<vmem>>, vector<1x64x128xf32>
    %124 = vector.shape_cast %123 : vector<1x64x128xf32> to vector<64x128xf32>
    %cst_162 = arith.constant dense<0.000000e+00> : vector<128x128xf32>
    %125 = tpu.matmul %122, %124, %cst_162 {dimension_numbers = #tpu.dot_dimension_numbers<[1], [0], [0], [1], [0, 0, 1, 1], [], []>} : vector<128x64xf32>, vector<64x128xf32>, vector<128x128xf32> -> vector<128x128xf32>
    %126 = arith.addf %120, %125 : vector<128x128xf32>
    %c0_163 = arith.constant 0 : index
    %c0_164 = arith.constant 0 : index
    %127 = vector.load %arg4[%c0_163, %c0_164] : memref<1x128xf32, #tpu.memory_space<vmem>>, vector<1x128xf32>
    %128 = vector.broadcast %127 : vector<1x128xf32> to vector<128x128xf32>
    %129 = arith.addf %126, %128 : vector<128x128xf32>
    %cst_165 = arith.constant 0.000000e+00 : f32
    %130 = vector.broadcast %cst_165 : f32 to vector<128x128xf32>
    %131 = arith.maximumf %129, %130 : vector<128x128xf32>
    %132 = vector.shape_cast %131 : vector<128x128xf32> to vector<16x2x4x128xf32>
    %cst_166 = arith.constant dense<0xFF800000> : vector<16x4x128xf32>
    %133 = vector.multi_reduction <maximumf>, %132, %cst_166 [1] : vector<16x2x4x128xf32> to vector<16x4x128xf32>
    %134 = vector.shape_cast %133 : vector<16x4x128xf32> to vector<32x2x128xf32>
    %cst_167 = arith.constant dense<0xFF800000> : vector<32x128xf32>
    %135 = vector.multi_reduction <maximumf>, %134, %cst_167 [1] : vector<32x2x128xf32> to vector<32x128xf32>
    %136 = vector.shape_cast %135 : vector<32x128xf32> to vector<8x512xf32>
    %c0_168 = arith.constant 0 : index
    %c0_169 = arith.constant 0 : index
    %137 = vector.load %arg5[%c0_168, %c0_169] : memref<512x32xf32, #tpu.memory_space<vmem>>, vector<512x32xf32>
    %cst_170 = arith.constant dense<0.000000e+00> : vector<8x32xf32>
    %138 = tpu.matmul %136, %137, %cst_170 {dimension_numbers = #tpu.dot_dimension_numbers<[1], [0], [0], [1], [0, 0, 1, 1], [], []>} : vector<8x512xf32>, vector<512x32xf32>, vector<8x32xf32> -> vector<8x32xf32>
    %c0_171 = arith.constant 0 : index
    %c0_172 = arith.constant 0 : index
    %139 = vector.load %arg6[%c0_171, %c0_172] : memref<1x32xf32, #tpu.memory_space<vmem>>, vector<1x32xf32>
    %140 = vector.broadcast %139 : vector<1x32xf32> to vector<8x32xf32>
    %141 = arith.addf %138, %140 : vector<8x32xf32>
    %cst_173 = arith.constant 0.000000e+00 : f32
    %142 = vector.broadcast %cst_173 : f32 to vector<8x32xf32>
    %143 = arith.maximumf %141, %142 : vector<8x32xf32>
    %c0_174 = arith.constant 0 : index
    %c0_175 = arith.constant 0 : index
    %144 = vector.load %arg8[%c0_174, %c0_175] : memref<32x128xf32, #tpu.memory_space<vmem>>, vector<32x128xf32>
    %c0_176 = arith.constant 0 : index
    %c0_177 = arith.constant 0 : index
    %145 = vector.load %arg7[%c0_176, %c0_177] : memref<32x128xf32, #tpu.memory_space<vmem>>, vector<32x128xf32>
    %cst_178 = arith.constant dense<0.000000e+00> : vector<8x128xf32>
    %146 = tpu.matmul %143, %145, %cst_178 {dimension_numbers = #tpu.dot_dimension_numbers<[1], [0], [0], [1], [0, 0, 1, 1], [], []>} : vector<8x32xf32>, vector<32x128xf32>, vector<8x128xf32> -> vector<8x128xf32>
    %c0_179 = arith.constant 0 : index
    %c0_180 = arith.constant 0 : index
    %147 = vector.load %arg9[%c0_179, %c0_180] : memref<1x128xf32, #tpu.memory_space<vmem>>, vector<1x128xf32>
    %148 = vector.broadcast %147 : vector<1x128xf32> to vector<8x128xf32>
    %149 = arith.addf %146, %148 : vector<8x128xf32>
    %cst_181 = arith.constant 0.000000e+00 : f32
    %150 = vector.broadcast %cst_181 : f32 to vector<2x32xf32>
    %cst_182 = arith.constant 0.000000e+00 : f32
    %151 = vector.broadcast %cst_182 : f32 to vector<2x32xf32>
    %152 = vector.extract_strided_slice %149 {offsets = [0, 0], sizes = [2, 128], strides = [1, 1]} : vector<8x128xf32> to vector<2x128xf32>
    %cst_183 = arith.constant dense<0.000000e+00> : vector<2x128xf32>
    %153 = tpu.matmul %150, %144, %cst_183 {dimension_numbers = #tpu.dot_dimension_numbers<[1], [0], [0], [1], [0, 0, 1, 1], [], []>} : vector<2x32xf32>, vector<32x128xf32>, vector<2x128xf32> -> vector<2x128xf32>
    %154 = arith.addf %152, %153 : vector<2x128xf32>
    %155 = arith.negf %154 : vector<2x128xf32>
    %156 = math.exp %155 : vector<2x128xf32>
    %cst_184 = arith.constant 1.000000e+00 : f32
    %157 = vector.broadcast %cst_184 : f32 to vector<2x128xf32>
    %158 = arith.addf %157, %156 : vector<2x128xf32>
    %159 = arith.divf %157, %158 : vector<2x128xf32>
    %160 = vector.extract_strided_slice %154 {offsets = [0, 64], sizes = [2, 32], strides = [1, 1]} : vector<2x128xf32> to vector<2x32xf32>
    %161 = math.tanh %160 : vector<2x32xf32>
    %162 = vector.extract_strided_slice %159 {offsets = [0, 32], sizes = [2, 32], strides = [1, 1]} : vector<2x128xf32> to vector<2x32xf32>
    %163 = arith.mulf %162, %151 : vector<2x32xf32>
    %164 = vector.extract_strided_slice %159 {offsets = [0, 0], sizes = [2, 32], strides = [1, 1]} : vector<2x128xf32> to vector<2x32xf32>
    %165 = arith.mulf %164, %161 : vector<2x32xf32>
    %166 = arith.addf %163, %165 : vector<2x32xf32>
    %167 = vector.extract_strided_slice %159 {offsets = [0, 96], sizes = [2, 32], strides = [1, 1]} : vector<2x128xf32> to vector<2x32xf32>
    %168 = math.tanh %166 : vector<2x32xf32>
    %169 = arith.mulf %167, %168 : vector<2x32xf32>
    %170 = vector.extract_strided_slice %149 {offsets = [2, 0], sizes = [2, 128], strides = [1, 1]} : vector<8x128xf32> to vector<2x128xf32>
    %cst_185 = arith.constant dense<0.000000e+00> : vector<2x128xf32>
    %171 = tpu.matmul %169, %144, %cst_185 {dimension_numbers = #tpu.dot_dimension_numbers<[1], [0], [0], [1], [0, 0, 1, 1], [], []>} : vector<2x32xf32>, vector<32x128xf32>, vector<2x128xf32> -> vector<2x128xf32>
    %172 = arith.addf %170, %171 : vector<2x128xf32>
    %173 = arith.negf %172 : vector<2x128xf32>
    %174 = math.exp %173 : vector<2x128xf32>
    %cst_186 = arith.constant 1.000000e+00 : f32
    %175 = vector.broadcast %cst_186 : f32 to vector<2x128xf32>
    %176 = arith.addf %175, %174 : vector<2x128xf32>
    %177 = arith.divf %175, %176 : vector<2x128xf32>
    %178 = vector.extract_strided_slice %172 {offsets = [0, 64], sizes = [2, 32], strides = [1, 1]} : vector<2x128xf32> to vector<2x32xf32>
    %179 = math.tanh %178 : vector<2x32xf32>
    %180 = vector.extract_strided_slice %177 {offsets = [0, 32], sizes = [2, 32], strides = [1, 1]} : vector<2x128xf32> to vector<2x32xf32>
    %181 = arith.mulf %180, %166 : vector<2x32xf32>
    %182 = vector.extract_strided_slice %177 {offsets = [0, 0], sizes = [2, 32], strides = [1, 1]} : vector<2x128xf32> to vector<2x32xf32>
    %183 = arith.mulf %182, %179 : vector<2x32xf32>
    %184 = arith.addf %181, %183 : vector<2x32xf32>
    %185 = vector.extract_strided_slice %177 {offsets = [0, 96], sizes = [2, 32], strides = [1, 1]} : vector<2x128xf32> to vector<2x32xf32>
    %186 = math.tanh %184 : vector<2x32xf32>
    %187 = arith.mulf %185, %186 : vector<2x32xf32>
    %188 = vector.extract_strided_slice %149 {offsets = [4, 0], sizes = [2, 128], strides = [1, 1]} : vector<8x128xf32> to vector<2x128xf32>
    %cst_187 = arith.constant dense<0.000000e+00> : vector<2x128xf32>
    %189 = tpu.matmul %187, %144, %cst_187 {dimension_numbers = #tpu.dot_dimension_numbers<[1], [0], [0], [1], [0, 0, 1, 1], [], []>} : vector<2x32xf32>, vector<32x128xf32>, vector<2x128xf32> -> vector<2x128xf32>
    %190 = arith.addf %188, %189 : vector<2x128xf32>
    %191 = arith.negf %190 : vector<2x128xf32>
    %192 = math.exp %191 : vector<2x128xf32>
    %cst_188 = arith.constant 1.000000e+00 : f32
    %193 = vector.broadcast %cst_188 : f32 to vector<2x128xf32>
    %194 = arith.addf %193, %192 : vector<2x128xf32>
    %195 = arith.divf %193, %194 : vector<2x128xf32>
    %196 = vector.extract_strided_slice %190 {offsets = [0, 64], sizes = [2, 32], strides = [1, 1]} : vector<2x128xf32> to vector<2x32xf32>
    %197 = math.tanh %196 : vector<2x32xf32>
    %198 = vector.extract_strided_slice %195 {offsets = [0, 32], sizes = [2, 32], strides = [1, 1]} : vector<2x128xf32> to vector<2x32xf32>
    %199 = arith.mulf %198, %184 : vector<2x32xf32>
    %200 = vector.extract_strided_slice %195 {offsets = [0, 0], sizes = [2, 32], strides = [1, 1]} : vector<2x128xf32> to vector<2x32xf32>
    %201 = arith.mulf %200, %197 : vector<2x32xf32>
    %202 = arith.addf %199, %201 : vector<2x32xf32>
    %203 = vector.extract_strided_slice %195 {offsets = [0, 96], sizes = [2, 32], strides = [1, 1]} : vector<2x128xf32> to vector<2x32xf32>
    %204 = math.tanh %202 : vector<2x32xf32>
    %205 = arith.mulf %203, %204 : vector<2x32xf32>
    %206 = vector.extract_strided_slice %149 {offsets = [6, 0], sizes = [2, 128], strides = [1, 1]} : vector<8x128xf32> to vector<2x128xf32>
    %cst_189 = arith.constant dense<0.000000e+00> : vector<2x128xf32>
    %207 = tpu.matmul %205, %144, %cst_189 {dimension_numbers = #tpu.dot_dimension_numbers<[1], [0], [0], [1], [0, 0, 1, 1], [], []>} : vector<2x32xf32>, vector<32x128xf32>, vector<2x128xf32> -> vector<2x128xf32>
    %208 = arith.addf %206, %207 : vector<2x128xf32>
    %209 = arith.negf %208 : vector<2x128xf32>
    %210 = math.exp %209 : vector<2x128xf32>
    %cst_190 = arith.constant 1.000000e+00 : f32
    %211 = vector.broadcast %cst_190 : f32 to vector<2x128xf32>
    %212 = arith.addf %211, %210 : vector<2x128xf32>
    %213 = arith.divf %211, %212 : vector<2x128xf32>
    %214 = vector.extract_strided_slice %208 {offsets = [0, 64], sizes = [2, 32], strides = [1, 1]} : vector<2x128xf32> to vector<2x32xf32>
    %215 = math.tanh %214 : vector<2x32xf32>
    %216 = vector.extract_strided_slice %213 {offsets = [0, 32], sizes = [2, 32], strides = [1, 1]} : vector<2x128xf32> to vector<2x32xf32>
    %217 = arith.mulf %216, %202 : vector<2x32xf32>
    %218 = vector.extract_strided_slice %213 {offsets = [0, 0], sizes = [2, 32], strides = [1, 1]} : vector<2x128xf32> to vector<2x32xf32>
    %219 = arith.mulf %218, %215 : vector<2x32xf32>
    %220 = arith.addf %217, %219 : vector<2x32xf32>
    %221 = vector.extract_strided_slice %213 {offsets = [0, 96], sizes = [2, 32], strides = [1, 1]} : vector<2x128xf32> to vector<2x32xf32>
    %222 = math.tanh %220 : vector<2x32xf32>
    %223 = arith.mulf %221, %222 : vector<2x32xf32>
    %224 = tpu.concatenate %169, %187, %205, %223 in 1 : vector<2x32xf32>, vector<2x32xf32>, vector<2x32xf32>, vector<2x32xf32> -> vector<2x128xf32>
    %c0_191 = arith.constant 0 : index
    %c0_192 = arith.constant 0 : index
    %225 = vector.load %arg10[%c0_191, %c0_192] : memref<128x64xf32, #tpu.memory_space<vmem>>, vector<128x64xf32>
    %cst_193 = arith.constant dense<0.000000e+00> : vector<2x64xf32>
    %226 = tpu.matmul %224, %225, %cst_193 {dimension_numbers = #tpu.dot_dimension_numbers<[1], [0], [0], [1], [0, 0, 1, 1], [], []>} : vector<2x128xf32>, vector<128x64xf32>, vector<2x64xf32> -> vector<2x64xf32>
    %c0_194 = arith.constant 0 : index
    %c0_195 = arith.constant 0 : index
    %227 = vector.load %arg11[%c0_194, %c0_195] : memref<1x64xf32, #tpu.memory_space<vmem>>, vector<1x64xf32>
    %228 = vector.broadcast %227 : vector<1x64xf32> to vector<2x64xf32>
    %229 = arith.addf %226, %228 : vector<2x64xf32>
    %cst_196 = arith.constant 0.000000e+00 : f32
    %230 = vector.broadcast %cst_196 : f32 to vector<2x64xf32>
    %231 = arith.maximumf %229, %230 : vector<2x64xf32>
    %c0_197 = arith.constant 0 : index
    %c0_198 = arith.constant 0 : index
    %232 = vector.load %arg12[%c0_197, %c0_198] : memref<64x5xf32, #tpu.memory_space<vmem>>, vector<64x5xf32>
    %cst_199 = arith.constant dense<0.000000e+00> : vector<2x5xf32>
    %233 = tpu.matmul %231, %232, %cst_199 {dimension_numbers = #tpu.dot_dimension_numbers<[1], [0], [0], [1], [0, 0, 1, 1], [], []>} : vector<2x64xf32>, vector<64x5xf32>, vector<2x5xf32> -> vector<2x5xf32>
    %c0_200 = arith.constant 0 : index
    %c0_201 = arith.constant 0 : index
    %234 = vector.load %arg13[%c0_200, %c0_201] : memref<1x5xf32, #tpu.memory_space<vmem>>, vector<1x5xf32>
    %235 = vector.broadcast %234 : vector<1x5xf32> to vector<2x5xf32>
    %236 = arith.addf %233, %235 : vector<2x5xf32>
    %237 = arith.negf %236 : vector<2x5xf32>
    %238 = math.exp %237 : vector<2x5xf32>
    %cst_202 = arith.constant 1.000000e+00 : f32
    %239 = vector.broadcast %cst_202 : f32 to vector<2x5xf32>
    %240 = arith.addf %239, %238 : vector<2x5xf32>
    %241 = arith.divf %239, %240 : vector<2x5xf32>
    %c0_203 = arith.constant 0 : index
    %c0_204 = arith.constant 0 : index
    %242 = vector.load %arg14[%c0_203, %c0_204] : memref<2x5xf32, #tpu.memory_space<vmem>>, vector<2x5xf32>
    tpu.vector_store %arg14[%c0_203, %c0_204], %241 {strides = array<i32>} : memref<2x5xf32, #tpu.memory_space<vmem>>, vector<2x5xf32>,
    return
  }
}

</mosaic_0001>

<bundles_post_ra>
// kernel: net_forward.1
= control target key start
LH: loop header
LB: loop body
LE: loop exit
PB: predicated region body
PF: predicated region fallthrough
CT: control target
= control target key end

     0   :  { %vm662_vm0 = vcmask 1042432   ;;  %vm112_vm1 = vcmask 23552   ;;  %vm114_vm2 = vcmask 17408   ;;  %v20825_v1 = vmov 0.0   ;;  %s20810_s0 = inlined_call_operand.vmem [shape: f32[8,8,8,3], index: 0, kind: input, shape index: {}]   ;;  %s20811_s1 = inlined_call_operand.vmem [shape: f32[9,3,64], index: 1, kind: input, shape index: {}]   ;;  %s20812_s2 = inlined_call_operand.vmem [shape: f32[9,64,128], index: 2, kind: input, shape index: {}]   ;;  %s20813_s3 = inlined_call_operand.vmem [shape: f32[1,64], index: 3, kind: input, shape index: {}]   ;;  %s20814_s4 = inlined_call_operand.vmem [shape: f32[1,128], index: 4, kind: input, shape index: {}]   ;;  %s20815_s5 = inlined_call_operand.vmem [shape: f32[512,32], index: 5, kind: input, shape index: {}]   ;;  %s20816_s6 = inlined_call_operand.vmem [shape: f32[1,32], index: 6, kind: input, shape index: {}]   ;;  %s20817_s7 = inlined_call_operand.vmem [shape: f32[32,128], index: 7, kind: input, shape index: {}]   ;;  %s20818_s8 = inlined_call_operand.vmem [shape: f32[32,128], index: 8, kind: input, shape index: {}]   ;;  %s20819_s9 = inlined_call_operand.vmem [shape: f32[1,128], index: 9, kind: input, shape index: {}]   ;;  %s20820_s10 = inlined_call_operand.vmem [shape: f32[128,64], index: 10, kind: input, shape index: {}]   ;;  %s20821_s11 = inlined_call_operand.vmem [shape: f32[1,64], index: 11, kind: input, shape index: {}]   ;;  %s20822_s12 = inlined_call_operand.vmem [shape: f32[64,5], index: 12, kind: input, shape index: {}]   ;;  %s20823_s13 = inlined_call_operand.vmem [shape: f32[1,5], index: 13, kind: input, shape index: {}]   ;;  %s20824_s14 = inlined_call_operand.hbm [shape: f32[2,5], index: 14, kind: output, shape index: {}]  }
   0x1   :  { %v17214_v0 = vld [vmem:[%s20811_s1 + $0x8] sm:$0x7]  ;;  %113 = vst.msk [vmem:[#allocation2] sm:$0xff] %vm112_vm1, %v20825_v1  ;;  %116 = vst.msk [vmem:[#allocation2 + $0x10] sm:$0xff] %vm112_vm1, %v20825_v1  ;;  %v13094_v2 = vld [vmem:[%s20811_s1 + $0xc] sm:$0x7] }
   0x2   :  { %14832 = vmatprep.subr.msk.mxu0 %vm662_vm0, %v17214_v0  ;;  %115 = vst.msk [vmem:[#allocation2 + $0x8] sm:$0x3] %vm114_vm2, %v20825_v1  ;;  %117 = vst.msk [vmem:[#allocation2 + $0x18] sm:$0x3] %vm114_vm2, %v20825_v1  ;;  %v48_v3 = vld [vmem:[%s20810_s0] sm:$0xff]  ;;  %v49_v4 = vld [vmem:[%s20810_s0 + $0x8] sm:$0xff] }
   0x3   :  { %118 = vst.msk [vmem:[#allocation2 + $0x20] sm:$0xff] %vm112_vm1, %v20825_v1  ;;  %120 = vst.msk [vmem:[#allocation2 + $0x30] sm:$0xff] %vm112_vm1, %v20825_v1  ;;  %14833 = vmatpush3.msk.msra.mxu0 %vm662_vm0, %v17214_v0  ;;  %v50_v5 = vld [vmem:[%s20810_s0 + $0x10] sm:$0xff]  ;;  %v51_v6 = vld [vmem:[%s20810_s0 + $0x18] sm:$0xff] }
   0x4   :  { %119 = vst.msk [vmem:[#allocation2 + $0x28] sm:$0x3] %vm114_vm2, %v20825_v1  ;;  %121 = vst.msk [vmem:[#allocation2 + $0x38] sm:$0x3] %vm114_vm2, %v20825_v1  ;;  %v52_v7 = vld [vmem:[%s20810_s0 + $0x20] sm:$0xff]  ;;  %14930 = vmatprep.subr.msk.mxu0 %vm662_vm0, %v13094_v2  ;;  %v53_v8 = vld [vmem:[%s20810_s0 + $0x28] sm:$0xff] }
   0x5   :  { %122 = vst.msk [vmem:[#allocation2 + $0x40] sm:$0xff] %vm112_vm1, %v20825_v1  ;;  %124 = vst.msk [vmem:[#allocation2 + $0x50] sm:$0xff] %vm112_vm1, %v20825_v1  ;;  %v54_v9 = vld [vmem:[%s20810_s0 + $0x30] sm:$0xff]  ;;  %v55_v10 = vld [vmem:[%s20810_s0 + $0x38] sm:$0xff] }
   0x6   :  { %123 = vst.msk [vmem:[#allocation2 + $0x48] sm:$0x3] %vm114_vm2, %v20825_v1  ;;  %125 = vst.msk [vmem:[#allocation2 + $0x58] sm:$0x3] %vm114_vm2, %v20825_v1  ;;  %v56_v11 = vld [vmem:[%s20810_s0 + $0x40] sm:$0xff]  ;;  %v57_v12 = vld [vmem:[%s20810_s0 + $0x48] sm:$0xff] }
   0x7   :  { %126 = vst.msk [vmem:[#allocation2 + $0x60] sm:$0xff] %vm112_vm1, %v20825_v1  ;;  %128 = vst.msk [vmem:[#allocation2 + $0x70] sm:$0xff] %vm112_vm1, %v20825_v1  ;;  %v58_v13 = vld [vmem:[%s20810_s0 + $0x50] sm:$0xff]  ;;  %v59_v14 = vld [vmem:[%s20810_s0 + $0x58] sm:$0xff] }
   0x8   :  { %127 = vst.msk [vmem:[#allocation2 + $0x68] sm:$0x3] %vm114_vm2, %v20825_v1  ;;  %129 = vst.msk [vmem:[#allocation2 + $0x78] sm:$0x3] %vm114_vm2, %v20825_v1  ;;  %v60_v15 = vld [vmem:[%s20810_s0 + $0x60] sm:$0xff]  ;;  %v61_v16 = vld [vmem:[%s20810_s0 + $0x68] sm:$0xff] }
   0x9   :  { %130 = vst.msk [vmem:[#allocation2 + $0x80] sm:$0xff] %vm112_vm1, %v20825_v1  ;;  %132 = vst.msk [vmem:[#allocation2 + $0x90] sm:$0xff] %vm112_vm1, %v20825_v1  ;;  %v62_v17 = vld [vmem:[%s20810_s0 + $0x70] sm:$0xff]  ;;  %v63_v18 = vld [vmem:[%s20810_s0 + $0x78] sm:$0xff] }
   0xa   :  { %131 = vst.msk [vmem:[#allocation2 + $0x88] sm:$0x3] %vm114_vm2, %v20825_v1  ;;  %133 = vst.msk [vmem:[#allocation2 + $0x98] sm:$0x3] %vm114_vm2, %v20825_v1  ;;  %v64_v19 = vld [vmem:[%s20810_s0 + $0x80] sm:$0xff]  ;;  %v65_v20 = vld [vmem:[%s20810_s0 + $0x88] sm:$0xff] }
   0xb   :  { %134 = vst.msk [vmem:[#allocation2 + $0xa0] sm:$0xff] %vm112_vm1, %v20825_v1  ;;  %136 = vst.msk [vmem:[#allocation2 + $0xb0] sm:$0xff] %vm112_vm1, %v20825_v1  ;;  %v66_v21 = vld [vmem:[%s20810_s0 + $0x90] sm:$0xff]  ;;  %v1631_v22 = vld [vmem:[#allocation2 + $0x2] sm:$0xff] }
   0xc   :  { %135 = vst.msk [vmem:[#allocation2 + $0xa8] sm:$0x3] %vm114_vm2, %v20825_v1  ;;  %137 = vst.msk [vmem:[#allocation2 + $0xb8] sm:$0x3] %vm114_vm2, %v20825_v1  ;;  %v67_v23 = vld [vmem:[%s20810_s0 + $0x98] sm:$0xff]  ;;  %v68_v24 = vld [vmem:[%s20810_s0 + $0xa0] sm:$0xff]  ;;  %14834 = vmatprep.mubr.msk.f32.mxu0 %vm112_vm1, %v1631_v22 }
   0xd   :  { %138 = vst.msk [vmem:[#allocation2 + $0xc0] sm:$0xff] %vm112_vm1, %v20825_v1  ;;  %140 = vst.msk [vmem:[#allocation2 + $0xd0] sm:$0xff] %vm112_vm1, %v20825_v1  ;;  %v17630_v27 = vld [vmem:[%s20811_s1 + $0x10] sm:$0x7]  ;;  %v69_v34 = vld [vmem:[%s20810_s0 + $0xa8] sm:$0xff] }
   0xe   :  { %139 = vst.msk [vmem:[#allocation2 + $0xc8] sm:$0x3] %vm114_vm2, %v20825_v1  ;;  %141 = vst.msk [vmem:[#allocation2 + $0xd8] sm:$0x3] %vm114_vm2, %v20825_v1  ;;  %v70_v35 = vld [vmem:[%s20810_s0 + $0xb0] sm:$0xff]  ;;  %v71_v36 = vld [vmem:[%s20810_s0 + $0xb8] sm:$0xff] }
   0xf   :  { %142 = vst.msk [vmem:[#allocation2 + $0xe0] sm:$0xff] %vm112_vm1, %v20825_v1  ;;  %144 = vst.msk [vmem:[#allocation2 + $0xf0] sm:$0xff] %vm112_vm1, %v20825_v1  ;;  %v72_v37 = vld [vmem:[%s20810_s0 + $0xc0] sm:$0xff]  ;;  %v73_v38 = vld [vmem:[%s20810_s0 + $0xc8] sm:$0xff] }
  0x10   :  { %143 = vst.msk [vmem:[#allocation2 + $0xe8] sm:$0x3] %vm114_vm2, %v20825_v1  ;;  %145 = vst.msk [vmem:[#allocation2 + $0xf8] sm:$0x3] %vm114_vm2, %v20825_v1  ;;  %v74_v39 = vld [vmem:[%s20810_s0 + $0xd0] sm:$0xff]  ;;  %v75_v40 = vld [vmem:[%s20810_s0 + $0xd8] sm:$0xff] }
  0x11   :  { %146 = vst.msk [vmem:[#allocation2 + $0x100] sm:$0xff] %vm112_vm1, %v20825_v1  ;;  %148 = vst.msk [vmem:[#allocation2 + $0x110] sm:$0xff] %vm112_vm1, %v20825_v1  ;;  %v76_v41 = vld [vmem:[%s20810_s0 + $0xe0] sm:$0xff]  ;;  %v77_v43 = vld [vmem:[%s20810_s0 + $0xe8] sm:$0xff] }
  0x12   :  { %147 = vst.msk [vmem:[#allocation2 + $0x108] sm:$0x3] %vm114_vm2, %v20825_v1  ;;  %149 = vst.msk [vmem:[#allocation2 + $0x118] sm:$0x3] %vm114_vm2, %v20825_v1  ;;  %v78_v44 = vld [vmem:[%s20810_s0 + $0xf0] sm:$0xff]  ;;  %v79_v45 = vld [vmem:[%s20810_s0 + $0xf8] sm:$0xff] }
  0x13   :  { %150 = vst.msk [vmem:[#allocation2 + $0x120] sm:$0xff] %vm112_vm1, %v20825_v1  ;;  %152 = vst.msk [vmem:[#allocation2 + $0x130] sm:$0xff] %vm112_vm1, %v20825_v1  ;;  %v80_v47 = vld [vmem:[%s20810_s0 + $0x100] sm:$0xff]  ;;  %v81_v48 = vld [vmem:[%s20810_s0 + $0x108] sm:$0xff] }
  0x14   :  { %151 = vst.msk [vmem:[#allocation2 + $0x128] sm:$0x3] %vm114_vm2, %v20825_v1  ;;  %153 = vst.msk [vmem:[#allocation2 + $0x138] sm:$0x3] %vm114_vm2, %v20825_v1  ;;  %v82_v49 = vld [vmem:[%s20810_s0 + $0x110] sm:$0xff]  ;;  %v83_v50 = vld [vmem:[%s20810_s0 + $0x118] sm:$0xff] }
  0x15   :  { %154 = vst.msk [vmem:[#allocation2 + $0x140] sm:$0xff] %vm112_vm1, %v20825_v1  ;;  %156 = vst.msk [vmem:[#allocation2 + $0x150] sm:$0xff] %vm112_vm1, %v20825_v1  ;;  %v84_v51 = vld [vmem:[%s20810_s0 + $0x120] sm:$0xff]  ;;  %v85_v52 = vld [vmem:[%s20810_s0 + $0x128] sm:$0xff] }
  0x16   :  { %155 = vst.msk [vmem:[#allocation2 + $0x148] sm:$0x3] %vm114_vm2, %v20825_v1  ;;  %157 = vst.msk [vmem:[#allocation2 + $0x158] sm:$0x3] %vm114_vm2, %v20825_v1  ;;  %v86_v53 = vld [vmem:[%s20810_s0 + $0x130] sm:$0xff]  ;;  %v87_v54 = vld [vmem:[%s20810_s0 + $0x138] sm:$0xff] }
  0x17   :  { %158 = vst.msk [vmem:[#allocation2 + $0x160] sm:$0xff] %vm112_vm1, %v20825_v1  ;;  %160 = vst.msk [vmem:[#allocation2 + $0x170] sm:$0xff] %vm112_vm1, %v20825_v1  ;;  %v88_v55 = vld [vmem:[%s20810_s0 + $0x140] sm:$0xff]  ;;  %v89_v56 = vld [vmem:[%s20810_s0 + $0x148] sm:$0xff] }
  0x18   :  { %159 = vst.msk [vmem:[#allocation2 + $0x168] sm:$0x3] %vm114_vm2, %v20825_v1  ;;  %161 = vst.msk [vmem:[#allocation2 + $0x178] sm:$0x3] %vm114_vm2, %v20825_v1  ;;  %v90_v57 = vld [vmem:[%s20810_s0 + $0x150] sm:$0xff]  ;;  %v91_v58 = vld [vmem:[%s20810_s0 + $0x158] sm:$0xff] }
  0x19   :  { %162 = vst.msk [vmem:[#allocation2 + $0x180] sm:$0xff] %vm112_vm1, %v20825_v1  ;;  %164 = vst.msk [vmem:[#allocation2 + $0x190] sm:$0xff] %vm112_vm1, %v20825_v1  ;;  %v92_v59 = vld [vmem:[%s20810_s0 + $0x160] sm:$0xff]  ;;  %v110_v22 = vld [vmem:[%s20810_s0 + $0x1f0] sm:$0xff] }
  0x1a   :  { %163 = vst.msk [vmem:[#allocation2 + $0x188] sm:$0x3] %vm114_vm2, %v20825_v1  ;;  %165 = vst.msk [vmem:[#allocation2 + $0x198] sm:$0x3] %vm114_vm2, %v20825_v1 }
  0x1b   :  { %166 = vst.msk [vmem:[#allocation2 + $0x1a0] sm:$0xff] %vm112_vm1, %v20825_v1  ;;  %168 = vst.msk [vmem:[#allocation2 + $0x1b0] sm:$0xff] %vm112_vm1, %v20825_v1 }
  0x1c   :  { %167 = vst.msk [vmem:[#allocation2 + $0x1a8] sm:$0x3] %vm114_vm2, %v20825_v1  ;;  %169 = vst.msk [vmem:[#allocation2 + $0x1b8] sm:$0x3] %vm114_vm2, %v20825_v1 }
  0x1d   :  { %170 = vst.msk [vmem:[#allocation2 + $0x1c0] sm:$0xff] %vm112_vm1, %v20825_v1  ;;  %172 = vst.msk [vmem:[#allocation2 + $0x1d0] sm:$0xff] %vm112_vm1, %v20825_v1 }
  0x1e   :  { %171 = vst.msk [vmem:[#allocation2 + $0x1c8] sm:$0x3] %vm114_vm2, %v20825_v1  ;;  %173 = vst.msk [vmem:[#allocation2 + $0x1d8] sm:$0x3] %vm114_vm2, %v20825_v1 }
  0x1f   :  { %174 = vst.msk [vmem:[#allocation2 + $0x1e0] sm:$0xff] %vm112_vm1, %v20825_v1  ;;  %176 = vst.msk [vmem:[#allocation2 + $0x1f0] sm:$0xff] %vm112_vm1, %v20825_v1 }
  0x20   :  { %175 = vst.msk [vmem:[#allocation2 + $0x1e8] sm:$0x3] %vm114_vm2, %v20825_v1  ;;  %177 = vst.msk [vmem:[#allocation2 + $0x1f8] sm:$0x3] %vm114_vm2, %v20825_v1 }
  0x21   :  { %178 = vst.msk [vmem:[#allocation2 + $0x200] sm:$0xff] %vm112_vm1, %v20825_v1  ;;  %180 = vst.msk [vmem:[#allocation2 + $0x210] sm:$0xff] %vm112_vm1, %v20825_v1 }
  0x22   :  { %179 = vst.msk [vmem:[#allocation2 + $0x208] sm:$0x3] %vm114_vm2, %v20825_v1  ;;  %181 = vst.msk [vmem:[#allocation2 + $0x218] sm:$0x3] %vm114_vm2, %v20825_v1 }
  0x23   :  { %182 = vst.msk [vmem:[#allocation2 + $0x220] sm:$0xff] %vm112_vm1, %v20825_v1  ;;  %184 = vst.msk [vmem:[#allocation2 + $0x230] sm:$0xff] %vm112_vm1, %v20825_v1 }
  0x24   :  { %183 = vst.msk [vmem:[#allocation2 + $0x228] sm:$0x3] %vm114_vm2, %v20825_v1  ;;  %185 = vst.msk [vmem:[#allocation2 + $0x238] sm:$0x3] %vm114_vm2, %v20825_v1 }
  0x25   :  { %186 = vst.msk [vmem:[#allocation2 + $0x240] sm:$0xff] %vm112_vm1, %v20825_v1  ;;  %188 = vst.msk [vmem:[#allocation2 + $0x250] sm:$0xff] %vm112_vm1, %v20825_v1 }
  0x26   :  { %187 = vst.msk [vmem:[#allocation2 + $0x248] sm:$0x3] %vm114_vm2, %v20825_v1  ;;  %189 = vst.msk [vmem:[#allocation2 + $0x258] sm:$0x3] %vm114_vm2, %v20825_v1 }
  0x27   :  { %190 = vst.msk [vmem:[#allocation2 + $0x260] sm:$0xff] %vm112_vm1, %v20825_v1  ;;  %192 = vst.msk [vmem:[#allocation2 + $0x270] sm:$0xff] %vm112_vm1, %v20825_v1 }
  0x28   :  { %191 = vst.msk [vmem:[#allocation2 + $0x268] sm:$0x3] %vm114_vm2, %v20825_v1  ;;  %193 = vst.msk [vmem:[#allocation2 + $0x278] sm:$0x3] %vm114_vm2, %v20825_v1 }
  0x29   :  { %194 = vst.msk [vmem:[#allocation2 + $0x280] sm:$0xff] %vm112_vm1, %v20825_v1  ;;  %196 = vst.msk [vmem:[#allocation2 + $0x290] sm:$0xff] %vm112_vm1, %v20825_v1 }
  0x2a   :  { %195 = vst.msk [vmem:[#allocation2 + $0x288] sm:$0x3] %vm114_vm2, %v20825_v1  ;;  %197 = vst.msk [vmem:[#allocation2 + $0x298] sm:$0x3] %vm114_vm2, %v20825_v1 }
  0x2b   :  { %198 = vst.msk [vmem:[#allocation2 + $0x2a0] sm:$0xff] %vm112_vm1, %v20825_v1  ;;  %200 = vst.msk [vmem:[#allocation2 + $0x2b0] sm:$0xff] %vm112_vm1, %v20825_v1 }
  0x2c   :  { %199 = vst.msk [vmem:[#allocation2 + $0x2a8] sm:$0x3] %vm114_vm2, %v20825_v1  ;;  %201 = vst.msk [vmem:[#allocation2 + $0x2b8] sm:$0x3] %vm114_vm2, %v20825_v1 }
  0x2d   :  { %202 = vst.msk [vmem:[#allocation2 + $0x2c0] sm:$0xff] %vm112_vm1, %v20825_v1  ;;  %204 = vst.msk [vmem:[#allocation2 + $0x2d0] sm:$0xff] %vm112_vm1, %v20825_v1 }
  0x2e   :  { %203 = vst.msk [vmem:[#allocation2 + $0x2c8] sm:$0x3] %vm114_vm2, %v20825_v1  ;;  %205 = vst.msk [vmem:[#allocation2 + $0x2d8] sm:$0x3] %vm114_vm2, %v20825_v1 }
  0x2f   :  { %206 = vst.msk [vmem:[#allocation2 + $0x2e0] sm:$0xff] %vm112_vm1, %v20825_v1  ;;  %208 = vst.msk [vmem:[#allocation2 + $0x2f0] sm:$0xff] %vm112_vm1, %v20825_v1 }
  0x30   :  { %207 = vst.msk [vmem:[#allocation2 + $0x2e8] sm:$0x3] %vm114_vm2, %v20825_v1  ;;  %209 = vst.msk [vmem:[#allocation2 + $0x2f8] sm:$0x3] %vm114_vm2, %v20825_v1 }
  0x31   :  { %210 = vst.msk [vmem:[#allocation2 + $0x300] sm:$0xff] %vm112_vm1, %v20825_v1  ;;  %212 = vst.msk [vmem:[#allocation2 + $0x310] sm:$0xff] %vm112_vm1, %v20825_v1 }
  0x32   :  { %211 = vst.msk [vmem:[#allocation2 + $0x308] sm:$0x3] %vm114_vm2, %v20825_v1  ;;  %213 = vst.msk [vmem:[#allocation2 + $0x318] sm:$0x3] %vm114_vm2, %v20825_v1 }
  0x33   :  { %214 = vst.msk [vmem:[#allocation2 + $0x320] sm:$0xff] %vm112_vm1, %v20825_v1  ;;  %216 = vst.msk [vmem:[#allocation2 + $0x330] sm:$0xff] %vm112_vm1, %v20825_v1 }
  0x34   :  { %215 = vst.msk [vmem:[#allocation2 + $0x328] sm:$0x3] %vm114_vm2, %v20825_v1  ;;  %217 = vst.msk [vmem:[#allocation2 + $0x338] sm:$0x3] %vm114_vm2, %v20825_v1 }
  0x35   :  { %218 = vst.msk [vmem:[#allocation2 + $0x340] sm:$0xff] %vm112_vm1, %v20825_v1  ;;  %220 = vst.msk [vmem:[#allocation2 + $0x350] sm:$0xff] %vm112_vm1, %v20825_v1 }
  0x36   :  { %219 = vst.msk [vmem:[#allocation2 + $0x348] sm:$0x3] %vm114_vm2, %v20825_v1  ;;  %221 = vst.msk [vmem:[#allocation2 + $0x358] sm:$0x3] %vm114_vm2, %v20825_v1 }
  0x37   :  { %222 = vst.msk [vmem:[#allocation2 + $0x360] sm:$0xff] %vm112_vm1, %v20825_v1  ;;  %224 = vst.msk [vmem:[#allocation2 + $0x370] sm:$0xff] %vm112_vm1, %v20825_v1 }
  0x38   :  { %223 = vst.msk [vmem:[#allocation2 + $0x368] sm:$0x3] %vm114_vm2, %v20825_v1  ;;  %225 = vst.msk [vmem:[#allocation2 + $0x378] sm:$0x3] %vm114_vm2, %v20825_v1 }
  0x39   :  { %226 = vst.msk [vmem:[#allocation2 + $0x380] sm:$0xff] %vm112_vm1, %v20825_v1  ;;  %228 = vst.msk [vmem:[#allocation2 + $0x390] sm:$0xff] %vm112_vm1, %v20825_v1 }
  0x3a   :  { %227 = vst.msk [vmem:[#allocation2 + $0x388] sm:$0x3] %vm114_vm2, %v20825_v1  ;;  %229 = vst.msk [vmem:[#allocation2 + $0x398] sm:$0x3] %vm114_vm2, %v20825_v1 }
  0x3b   :  { %230 = vst.msk [vmem:[#allocation2 + $0x3a0] sm:$0xff] %vm112_vm1, %v20825_v1  ;;  %232 = vst.msk [vmem:[#allocation2 + $0x3b0] sm:$0xff] %vm112_vm1, %v20825_v1 }
  0x3c   :  { %231 = vst.msk [vmem:[#allocation2 + $0x3a8] sm:$0x3] %vm114_vm2, %v20825_v1  ;;  %233 = vst.msk [vmem:[#allocation2 + $0x3b8] sm:$0x3] %vm114_vm2, %v20825_v1 }
  0x3d   :  { %234 = vst.msk [vmem:[#allocation2 + $0x3c0] sm:$0xff] %vm112_vm1, %v20825_v1  ;;  %236 = vst.msk [vmem:[#allocation2 + $0x3d0] sm:$0xff] %vm112_vm1, %v20825_v1 }
  0x3e   :  { %235 = vst.msk [vmem:[#allocation2 + $0x3c8] sm:$0x3] %vm114_vm2, %v20825_v1  ;;  %237 = vst.msk [vmem:[#allocation2 + $0x3d8] sm:$0x3] %vm114_vm2, %v20825_v1 }
  0x3f   :  { %238 = vst.msk [vmem:[#allocation2 + $0x3e0] sm:$0xff] %vm112_vm1, %v20825_v1  ;;  %240 = vst.msk [vmem:[#allocation2 + $0x3f0] sm:$0xff] %vm112_vm1, %v20825_v1 }
  0x40   :  { %239 = vst.msk [vmem:[#allocation2 + $0x3e8] sm:$0x3] %vm114_vm2, %v20825_v1  ;;  %241 = vst.msk [vmem:[#allocation2 + $0x3f8] sm:$0x3] %vm114_vm2, %v20825_v1 }
  0x41   :  { %242 = vst.msk [vmem:[#allocation2 + $0x400] sm:$0xff] %vm112_vm1, %v20825_v1  ;;  %244 = vst.msk [vmem:[#allocation2 + $0x410] sm:$0xff] %vm112_vm1, %v20825_v1 }
  0x42   :  { %243 = vst.msk [vmem:[#allocation2 + $0x408] sm:$0x3] %vm114_vm2, %v20825_v1  ;;  %245 = vst.msk [vmem:[#allocation2 + $0x418] sm:$0x3] %vm114_vm2, %v20825_v1 }
  0x43   :  { %246 = vst.msk [vmem:[#allocation2 + $0x420] sm:$0xff] %vm112_vm1, %v20825_v1  ;;  %248 = vst.msk [vmem:[#allocation2 + $0x430] sm:$0xff] %vm112_vm1, %v20825_v1 }
  0x44   :  { %247 = vst.msk [vmem:[#allocation2 + $0x428] sm:$0x3] %vm114_vm2, %v20825_v1  ;;  %249 = vst.msk [vmem:[#allocation2 + $0x438] sm:$0x3] %vm114_vm2, %v20825_v1 }
  0x45   :  { %250 = vst.msk [vmem:[#allocation2 + $0x440] sm:$0xff] %vm112_vm1, %v20825_v1  ;;  %252 = vst.msk [vmem:[#allocation2 + $0x450] sm:$0xff] %vm112_vm1, %v20825_v1 }
  0x46   :  { %251 = vst.msk [vmem:[#allocation2 + $0x448] sm:$0x3] %vm114_vm2, %v20825_v1  ;;  %253 = vst.msk [vmem:[#allocation2 + $0x458] sm:$0x3] %vm114_vm2, %v20825_v1 }
  0x47   :  { %254 = vst.msk [vmem:[#allocation2 + $0x460] sm:$0xff] %vm112_vm1, %v20825_v1  ;;  %256 = vst.msk [vmem:[#allocation2 + $0x470] sm:$0xff] %vm112_vm1, %v20825_v1 }
  0x48   :  { %255 = vst.msk [vmem:[#allocation2 + $0x468] sm:$0x3] %vm114_vm2, %v20825_v1  ;;  %257 = vst.msk [vmem:[#allocation2 + $0x478] sm:$0x3] %vm114_vm2, %v20825_v1 }
  0x49   :  { %258 = vst.msk [vmem:[#allocation2 + $0x480] sm:$0xff] %vm112_vm1, %v20825_v1  ;;  %260 = vst.msk [vmem:[#allocation2 + $0x490] sm:$0xff] %vm112_vm1, %v20825_v1 }
  0x4a   :  { %259 = vst.msk [vmem:[#allocation2 + $0x488] sm:$0x3] %vm114_vm2, %v20825_v1  ;;  %261 = vst.msk [vmem:[#allocation2 + $0x498] sm:$0x3] %vm114_vm2, %v20825_v1 }
  0x4b   :  { %262 = vst.msk [vmem:[#allocation2 + $0x4a0] sm:$0xff] %vm112_vm1, %v20825_v1  ;;  %264 = vst.msk [vmem:[#allocation2 + $0x4b0] sm:$0xff] %vm112_vm1, %v20825_v1 }
  0x4c   :  { %263 = vst.msk [vmem:[#allocation2 + $0x4a8] sm:$0x3] %vm114_vm2, %v20825_v1  ;;  %265 = vst.msk [vmem:[#allocation2 + $0x4b8] sm:$0x3] %vm114_vm2, %v20825_v1 }
  0x4d   :  { %266 = vst.msk [vmem:[#allocation2 + $0x4c0] sm:$0xff] %vm112_vm1, %v20825_v1  ;;  %268 = vst.msk [vmem:[#allocation2 + $0x4d0] sm:$0xff] %vm112_vm1, %v20825_v1 }
  0x4e   :  { %267 = vst.msk [vmem:[#allocation2 + $0x4c8] sm:$0x3] %vm114_vm2, %v20825_v1  ;;  %269 = vst.msk [vmem:[#allocation2 + $0x4d8] sm:$0x3] %vm114_vm2, %v20825_v1 }
  0x4f   :  { %270 = vst.msk [vmem:[#allocation2 + $0x4e0] sm:$0xff] %vm112_vm1, %v20825_v1  ;;  %272 = vst.msk [vmem:[#allocation2 + $0x4f0] sm:$0xff] %vm112_vm1, %v20825_v1 }
  0x50   :  { %271 = vst.msk [vmem:[#allocation2 + $0x4e8] sm:$0x3] %vm114_vm2, %v20825_v1  ;;  %273 = vst.msk [vmem:[#allocation2 + $0x4f8] sm:$0x3] %vm114_vm2, %v20825_v1 }
  0x51   :  { %275 = vst.msk [vmem:[#allocation2 + $0x11] sm:$0xff] %vm112_vm1, %v48_v3  ;;  %276 = vst.msk [vmem:[#allocation2 + $0x21] sm:$0xff] %vm112_vm1, %v49_v4  ;;  %v93_v3 = vld [vmem:[%s20810_s0 + $0x168] sm:$0xff]  ;;  %v94_v4 = vld [vmem:[%s20810_s0 + $0x170] sm:$0xff] }
  0x52   :  { %277 = vst.msk [vmem:[#allocation2 + $0x31] sm:$0xff] %vm112_vm1, %v50_v5  ;;  %278 = vst.msk [vmem:[#allocation2 + $0x41] sm:$0xff] %vm112_vm1, %v51_v6  ;;  %v95_v5 = vld [vmem:[%s20810_s0 + $0x178] sm:$0xff]  ;;  %v96_v6 = vld [vmem:[%s20810_s0 + $0x180] sm:$0xff] }
  0x53   :  { %279 = vst.msk [vmem:[#allocation2 + $0x51] sm:$0xff] %vm112_vm1, %v52_v7  ;;  %280 = vst.msk [vmem:[#allocation2 + $0x61] sm:$0xff] %vm112_vm1, %v53_v8  ;;  %v97_v7 = vld [vmem:[%s20810_s0 + $0x188] sm:$0xff]  ;;  %v98_v8 = vld [vmem:[%s20810_s0 + $0x190] sm:$0xff] }
  0x54   :  { %281 = vst.msk [vmem:[#allocation2 + $0x71] sm:$0xff] %vm112_vm1, %v54_v9  ;;  %282 = vst.msk [vmem:[#allocation2 + $0x81] sm:$0xff] %vm112_vm1, %v55_v10  ;;  %v99_v9 = vld [vmem:[%s20810_s0 + $0x198] sm:$0xff]  ;;  %v100_v10 = vld [vmem:[%s20810_s0 + $0x1a0] sm:$0xff] }
  0x55   :  { %283 = vst.msk [vmem:[#allocation2 + $0xb1] sm:$0xff] %vm112_vm1, %v56_v11  ;;  %284 = vst.msk [vmem:[#allocation2 + $0xc1] sm:$0xff] %vm112_vm1, %v57_v12  ;;  %v101_v12 = vld [vmem:[%s20810_s0 + $0x1a8] sm:$0xff] }
  0x56   :  { %285 = vst.msk [vmem:[#allocation2 + $0xd1] sm:$0xff] %vm112_vm1, %v58_v13  ;;  %286 = vst.msk [vmem:[#allocation2 + $0xe1] sm:$0xff] %vm112_vm1, %v59_v14  ;;  %v102_v13 = vld [vmem:[%s20810_s0 + $0x1b0] sm:$0xff]  ;;  %v103_v14 = vld [vmem:[%s20810_s0 + $0x1b8] sm:$0xff] }
  0x57   :  { %287 = vst.msk [vmem:[#allocation2 + $0xf1] sm:$0xff] %vm112_vm1, %v60_v15  ;;  %288 = vst.msk [vmem:[#allocation2 + $0x101] sm:$0xff] %vm112_vm1, %v61_v16  ;;  %v104_v15 = vld [vmem:[%s20810_s0 + $0x1c0] sm:$0xff]  ;;  %v105_v16 = vld [vmem:[%s20810_s0 + $0x1c8] sm:$0xff] }
  0x58   :  { %289 = vst.msk [vmem:[#allocation2 + $0x111] sm:$0xff] %vm112_vm1, %v62_v17  ;;  %290 = vst.msk [vmem:[#allocation2 + $0x121] sm:$0xff] %vm112_vm1, %v63_v18  ;;  %v1632_v25 = vld [vmem:[#allocation2 + $0x12] sm:$0xff]  ;;  %v1633_v26 = vld [vmem:[#allocation2 + $0x22] sm:$0xff] }
  0x59   :  { %291 = vst.msk [vmem:[#allocation2 + $0x151] sm:$0xff] %vm112_vm1, %v64_v19  ;;  %292 = vst.msk [vmem:[#allocation2 + $0x161] sm:$0xff] %vm112_vm1, %v65_v20  ;;  %14835 = vmatmul.mubr.msk.f32.vlgmr.msra.gmra.mrb[0].mxu0 %vm112_vm1, %v1632_v25  ;;  %v1634_v28 = vld [vmem:[#allocation2 + $0x32] sm:$0xff]  ;;  %v1635_v29 = vld [vmem:[#allocation2 + $0x42] sm:$0xff] }
  0x5a   :  { %293 = vst.msk [vmem:[#allocation2 + $0x171] sm:$0xff] %vm112_vm1, %v66_v21  ;;  %294 = vst.msk [vmem:[#allocation2 + $0x181] sm:$0xff] %vm112_vm1, %v67_v23  ;;  %14931 = vmatpush3.msk.msra.mxu0 %vm662_vm0, %v13094_v2  ;;  %14837 = vmatprep.mubr.msk.f32.mxu0 %vm112_vm1, %v1633_v26  ;;  %v1636_v30 = vld [vmem:[#allocation2 + $0x52] sm:$0xff]  ;;  %v1637_v31 = vld [vmem:[#allocation2 + $0x62] sm:$0xff] }
  0x5b   :  { %295 = vst.msk [vmem:[#allocation2 + $0x191] sm:$0xff] %vm112_vm1, %v68_v24  ;;  %15028 = vmatprep.subr.msk.mxu0 %vm662_vm0, %v17630_v27  ;;  %v1638_v32 = vld [vmem:[#allocation2 + $0x72] sm:$0xff]  ;;  %296 = vst.msk [vmem:[#allocation2 + $0x1a1] sm:$0xff] %vm112_vm1, %v69_v34  ;;  %v2342_v42 = vld [vmem:[#allocation2 + $0x20] sm:$0xff] }
  0x5c   :  { %v2341_v33 = vld [vmem:[#allocation2 + $0x10] sm:$0xff]  ;;  %297 = vst.msk [vmem:[#allocation2 + $0x1b1] sm:$0xff] %vm112_vm1, %v70_v35  ;;  %298 = vst.msk [vmem:[#allocation2 + $0x1c1] sm:$0xff] %vm112_vm1, %v71_v36  ;;  %v2344_v60 = vld [vmem:[#allocation2 + $0x40] sm:$0xff] }
  0x5d   :  { %14838 = vmatmul.mubr.msk.f32.gmra.mrb[2].mxu0 %vm112_vm1, %v1634_v28  ;;  %299 = vst.msk [vmem:[#allocation2 + $0x1f1] sm:$0xff] %vm112_vm1, %v72_v37  ;;  %300 = vst.msk [vmem:[#allocation2 + $0x201] sm:$0xff] %vm112_vm1, %v73_v38  ;;  %v2343_v46 = vld [vmem:[#allocation2 + $0x30] sm:$0xff]  ;;  %v2346_v62 = vld [vmem:[#allocation2 + $0x60] sm:$0xff] }
  0x5e   :  { %14840 = vmatprep.mubr.msk.f32.mxu0 %vm112_vm1, %v1635_v29  ;;  %301 = vst.msk [vmem:[#allocation2 + $0x211] sm:$0xff] %vm112_vm1, %v74_v39  ;;  %302 = vst.msk [vmem:[#allocation2 + $0x221] sm:$0xff] %vm112_vm1, %v75_v40  ;;  %v2345_v61 = vld [vmem:[#allocation2 + $0x50] sm:$0xff]  ;;  %v2348_v0 = vld [vmem:[#allocation2 + $0x80] sm:$0xff] }
  0x5f   :  { %303 = vst.msk [vmem:[#allocation2 + $0x231] sm:$0xff] %vm112_vm1, %v76_v41  ;;  %304 = vst.msk [vmem:[#allocation2 + $0x241] sm:$0xff] %vm112_vm1, %v77_v43  ;;  %v2347_v63 = vld [vmem:[#allocation2 + $0x70] sm:$0xff]  ;;  %v2350_v11 = vld [vmem:[#allocation2 + $0xc0] sm:$0xff] }
  0x60   :  { %305 = vst.msk [vmem:[#allocation2 + $0x251] sm:$0xff] %vm112_vm1, %v78_v44  ;;  %306 = vst.msk [vmem:[#allocation2 + $0x261] sm:$0xff] %vm112_vm1, %v79_v45  ;;  %v2349_v2 = vld [vmem:[#allocation2 + $0xb0] sm:$0xff]  ;;  %v107_v18 = vld [vmem:[%s20810_s0 + $0x1d8] sm:$0xff] }
  0x61   :  { %14841 = vmatmul.mubr.msk.f32.gmra.mrb[4].mxu0 %vm112_vm1, %v1636_v30  ;;  %307 = vst.msk [vmem:[#allocation2 + $0x291] sm:$0xff] %vm112_vm1, %v80_v47  ;;  %308 = vst.msk [vmem:[#allocation2 + $0x2a1] sm:$0xff] %vm112_vm1, %v81_v48  ;;  %v106_v17 = vld [vmem:[%s20810_s0 + $0x1d0] sm:$0xff]  ;;  %v108_v19 = vld [vmem:[%s20810_s0 + $0x1e0] sm:$0xff] }
  0x62   :  { %14843 = vmatprep.mubr.msk.f32.mxu0 %vm112_vm1, %v1637_v31  ;;  %309 = vst.msk [vmem:[#allocation2 + $0x2b1] sm:$0xff] %vm112_vm1, %v82_v49  ;;  %310 = vst.msk [vmem:[#allocation2 + $0x2c1] sm:$0xff] %vm112_vm1, %v83_v50  ;;  %v109_v20 = vld [vmem:[%s20810_s0 + $0x1e8] sm:$0xff]  ;;  %v2351_v21 = vld [vmem:[#allocation2 + $0xd0] sm:$0xff] }
  0x63   :  { %311 = vst.msk [vmem:[#allocation2 + $0x2d1] sm:$0xff] %vm112_vm1, %v84_v51  ;;  %312 = vst.msk [vmem:[#allocation2 + $0x2e1] sm:$0xff] %vm112_vm1, %v85_v52  ;;  %v111_v23 = vld [vmem:[%s20810_s0 + $0x1f8] sm:$0xff]  ;;  %v17830_v24 = vld [vmem:[%s20811_s1 + $0x14] sm:$0x7] }
  0x64   :  { %313 = vst.msk [vmem:[#allocation2 + $0x2f1] sm:$0xff] %vm112_vm1, %v86_v53  ;;  %314 = vst.msk [vmem:[#allocation2 + $0x301] sm:$0xff] %vm112_vm1, %v87_v54  ;;  %v2352_v25 = vld [vmem:[#allocation2 + $0xe0] sm:$0xff]  ;;  %v2353_v26 = vld [vmem:[#allocation2 + $0xf0] sm:$0xff] }
  0x65   :  { %14844 = vmatmul.mubr.msk.f32.gmra.mrb[6].mxu0 %vm112_vm1, %v1638_v32  ;;  %315 = vst.msk [vmem:[#allocation2 + $0x331] sm:$0xff] %vm112_vm1, %v88_v55  ;;  %316 = vst.msk [vmem:[#allocation2 + $0x341] sm:$0xff] %vm112_vm1, %v89_v56  ;;  %v2355_v28 = vld [vmem:[#allocation2 + $0x110] sm:$0xff]  ;;  %v2356_v29 = vld [vmem:[#allocation2 + $0x120] sm:$0xff] }
  0x66   :  { %14932 = vmatprep.mubr.msk.f32.mxu0 %vm112_vm1, %v2341_v33  ;;  %317 = vst.msk [vmem:[#allocation2 + $0x351] sm:$0xff] %vm112_vm1, %v90_v57  ;;  %318 = vst.msk [vmem:[#allocation2 + $0x361] sm:$0xff] %vm112_vm1, %v91_v58  ;;  %v2357_v30 = vld [vmem:[#allocation2 + $0x150] sm:$0xff] }
  0x67   :  { %319 = vst.msk [vmem:[#allocation2 + $0x371] sm:$0xff] %vm112_vm1, %v92_v59  ;;  %320 = vst.msk [vmem:[#allocation2 + $0x381] sm:$0xff] %vm112_vm1, %v93_v3 }
  0x68   :  { %321 = vst.msk [vmem:[#allocation2 + $0x391] sm:$0xff] %vm112_vm1, %v94_v4  ;;  %322 = vst.msk [vmem:[#allocation2 + $0x3a1] sm:$0xff] %vm112_vm1, %v95_v5 }
  0x69   :  { %14933 = vmatmul.mubr.msk.f32.vlgmr.msra.gmra.mrb[0].mxu0 %vm112_vm1, %v2342_v42  ;;  %323 = vst.msk [vmem:[#allocation2 + $0x3d1] sm:$0xff] %vm112_vm1, %v96_v6  ;;  %324 = vst.msk [vmem:[#allocation2 + $0x3e1] sm:$0xff] %vm112_vm1, %v97_v7 }
  0x6a   :  { %15029 = vmatpush3.msk.msra.mxu0 %vm662_vm0, %v17630_v27  ;;  %14935 = vmatprep.mubr.msk.f32.mxu0 %vm112_vm1, %v2343_v46  ;;  %325 = vst.msk [vmem:[#allocation2 + $0x3f1] sm:$0xff] %vm112_vm1, %v98_v8  ;;  %326 = vst.msk [vmem:[#allocation2 + $0x401] sm:$0xff] %vm112_vm1, %v99_v9  ;;  %v2354_v27 = vld [vmem:[#allocation2 + $0x100] sm:$0xff] }
  0x6b   :  { %327 = vst.msk [vmem:[#allocation2 + $0x411] sm:$0xff] %vm112_vm1, %v100_v10  ;;  %328 = vst.msk [vmem:[#allocation2 + $0x421] sm:$0xff] %vm112_vm1, %v101_v12  ;;  %15126 = vmatprep.subr.msk.mxu0 %vm662_vm0, %v17830_v24 }
  0x6c   :  { %329 = vst.msk [vmem:[#allocation2 + $0x431] sm:$0xff] %vm112_vm1, %v102_v13  ;;  %330 = vst.msk [vmem:[#allocation2 + $0x441] sm:$0xff] %vm112_vm1, %v103_v14 }
  0x6d   :  { %14936 = vmatmul.mubr.msk.f32.gmra.mrb[2].mxu0 %vm112_vm1, %v2344_v60  ;;  %331 = vst.msk [vmem:[#allocation2 + $0x471] sm:$0xff] %vm112_vm1, %v104_v15  ;;  %332 = vst.msk [vmem:[#allocation2 + $0x481] sm:$0xff] %vm112_vm1, %v105_v16 }
  0x6e   :  { %14938 = vmatprep.mubr.msk.f32.mxu0 %vm112_vm1, %v2345_v61  ;;  %333 = vst.msk [vmem:[#allocation2 + $0x491] sm:$0xff] %vm112_vm1, %v106_v17  ;;  %334 = vst.msk [vmem:[#allocation2 + $0x4a1] sm:$0xff] %vm112_vm1, %v107_v18 }
  0x6f   :  { %335 = vst.msk [vmem:[#allocation2 + $0x4b1] sm:$0xff] %vm112_vm1, %v108_v19  ;;  %336 = vst.msk [vmem:[#allocation2 + $0x4c1] sm:$0xff] %vm112_vm1, %v109_v20 }
  0x70   :  { %337 = vst.msk [vmem:[#allocation2 + $0x4d1] sm:$0xff] %vm112_vm1, %v110_v22  ;;  %338 = vst.msk [vmem:[#allocation2 + $0x4e1] sm:$0xff] %vm112_vm1, %v111_v23 }
  0x71   :  { %14939 = vmatmul.mubr.msk.f32.gmra.mrb[4].mxu0 %vm112_vm1, %v2346_v62 }
  0x72   :  { %14941 = vmatprep.mubr.msk.f32.mxu0 %vm112_vm1, %v2347_v63 }
  0x75   :  { %14942 = vmatmul.mubr.msk.f32.gmra.mrb[6].mxu0 %vm112_vm1, %v2348_v0 }
  0x76   :  { %14944 = vmatprep.mubr.msk.f32.mxu0 %vm112_vm1, %v2349_v2 }
  0x79   :  { %14945 = vmatmul.mubr.msk.f32.gmra.mrb[8].mxu0 %vm112_vm1, %v2350_v11 }
  0x7a   :  { %14947 = vmatprep.mubr.msk.f32.mxu0 %vm112_vm1, %v2351_v21 }
  0x7d   :  { %14948 = vmatmul.mubr.msk.f32.gmra.mrb[10].mxu0 %vm112_vm1, %v2352_v25 }
  0x7e   :  { %14950 = vmatprep.mubr.msk.f32.mxu0 %vm112_vm1, %v2353_v26 }
  0x81   :  { %14951 = vmatmul.mubr.msk.f32.gmra.mrb[12].mxu0 %vm112_vm1, %v2354_v27 }
  0x82   :  { %14953 = vmatprep.mubr.msk.f32.mxu0 %vm112_vm1, %v2355_v28 }
  0x83   :  { %19 = vsyncpa [#allocation5], 0  ;;  %v12897_v31 = vld [vmem:[%s20811_s1 + $0x4] sm:$0x7]  ;;  %v2359_v34 = vld [vmem:[#allocation2 + $0x170] sm:$0xff]  ;;  %vm8435_vm3 = vcmask 521216  }
  0x84   :  { %v404_v32 = vld [vmem:[#allocation2 + $0x1] sm:$0xff]  ;;  %14636 = vmatprep.subr.msk.mxu1 %vm662_vm0, %v12897_v31  ;;  %v17846_v35 = vld [vmem:[#allocation2 + $0x11] sm:$0xff]  ;;  %vm6737_vm4 = vcmask 523264   ;;  %vm7538_vm5 = vcmask 517120   ;;  %vm8612_vm6 = vcmask 1041409   ;;  %vm8614_vm7 = vcmask 1042434  }
  0x85   :  { %14954 = vmatmul.mubr.msk.f32.gmra.mrb[14].mxu0 %vm112_vm1, %v2356_v29  ;;  %v2358_v33 = vld [vmem:[#allocation2 + $0x160] sm:$0xff]  ;;  %14637 = vmatpush3.msk.msra.mxu1 %vm662_vm0, %v12897_v31  ;;  %v2361_v38 = vld [vmem:[#allocation2 + $0x190] sm:$0xff]  ;;  %vm8616_vm8 = vcmask 1043459   ;;  %vm8744_vm9 = vcmask 519168   ;;  %vm11370_vm10 = vcmask 1043456   ;;  %vm11595_vm11 = vcmask 1041408  }
  0x86   :  { %14956 = vmatprep.mubr.msk.f32.mxu0 %vm112_vm1, %v2357_v30  ;;  %14638 = vmatprep.mubr.msk.f32.mxu1 %vm112_vm1, %v404_v32  ;;  %v17850_v36 = vld [vmem:[#allocation2 + $0x21] sm:$0xff]  ;;  %v17858_v39 = vld [vmem:[#allocation2 + $0x31] sm:$0xff]  ;;  %vm11855_vm12 = vcmask 1044484   ;;  %vm11857_vm13 = vcmask 1045509   ;;  %vm11859_vm14 = vcmask 1046534   ;;  %vm11861_vm15 = vcmask 1047559  }
  0x87   :  { %14639 = vmatmul.mubr.msk.f32.vlgmr.msra.gmra.mrb[0].mxu1 %vm112_vm1, %v17846_v35  ;;  %v2360_v37 = vld [vmem:[#allocation2 + $0x180] sm:$0xff]  ;;  %v2363_v42 = vld [vmem:[#allocation2 + $0x1b0] sm:$0xff]  ;;  %s17132_s17 = smov 64   ;;  %vm12691_vm2 = vcmask 785408  }
  0x88   :  { %14641 = vmatprep.mubr.msk.f32.mxu1 %vm112_vm1, %v17850_v36  ;;  %v17860_v40 = vld [vmem:[#allocation2 + $0x41] sm:$0xff]  ;;  %v17868_v43 = vld [vmem:[#allocation2 + $0x51] sm:$0xff] }
  0x89   :  { %14957 = vmatmul.mubr.msk.f32.gmra.mrb[16].mxu0 %vm112_vm1, %v2358_v33  ;;  %v2362_v41 = vld [vmem:[#allocation2 + $0x1a0] sm:$0xff]  ;;  %v2365_v46 = vld [vmem:[#allocation2 + $0x1f0] sm:$0xff] }
  0x8a   :  { %14959 = vmatprep.mubr.msk.f32.mxu0 %vm112_vm1, %v2359_v34  ;;  %v17870_v44 = vld [vmem:[#allocation2 + $0x61] sm:$0xff]  ;;  %v17878_v47 = vld [vmem:[#allocation2 + $0x71] sm:$0xff] }
  0x8b   :  { %14642 = vmatmul.mubr.msk.f32.gmra.mrb[2].mxu1 %vm112_vm1, %v17858_v39  ;;  %v2364_v45 = vld [vmem:[#allocation2 + $0x1c0] sm:$0xff]  ;;  %v2367_v50 = vld [vmem:[#allocation2 + $0x210] sm:$0xff] }
  0x8c   :  { %14644 = vmatprep.mubr.msk.f32.mxu1 %vm112_vm1, %v17860_v40  ;;  %v412_v48 = vld [vmem:[#allocation2 + $0xa1] sm:$0xff]  ;;  %v17885_v51 = vld [vmem:[#allocation2 + $0xb1] sm:$0xff] }
  0x8d   :  { %14960 = vmatmul.mubr.msk.f32.gmra.mrb[18].mxu0 %vm112_vm1, %v2360_v37  ;;  %v2366_v49 = vld [vmem:[#allocation2 + $0x200] sm:$0xff]  ;;  %v2369_v54 = vld [vmem:[#allocation2 + $0x230] sm:$0xff] }
  0x8e   :  { %14962 = vmatprep.mubr.msk.f32.mxu0 %vm112_vm1, %v2361_v38  ;;  %v17887_v52 = vld [vmem:[#allocation2 + $0xc1] sm:$0xff]  ;;  %v17895_v55 = vld [vmem:[#allocation2 + $0xd1] sm:$0xff] }
  0x8f   :  { %14645 = vmatmul.mubr.msk.f32.gmra.mrb[4].mxu1 %vm112_vm1, %v17868_v43  ;;  %v2368_v53 = vld [vmem:[#allocation2 + $0x220] sm:$0xff]  ;;  %v2371_v58 = vld [vmem:[#allocation2 + $0x250] sm:$0xff] }
  0x90   :  { %14647 = vmatprep.mubr.msk.f32.mxu1 %vm112_vm1, %v17870_v44  ;;  %v17897_v56 = vld [vmem:[#allocation2 + $0xe1] sm:$0xff]  ;;  %v17905_v59 = vld [vmem:[#allocation2 + $0xf1] sm:$0xff] }
  0x91   :  { %14963 = vmatmul.mubr.msk.f32.gmra.mrb[20].mxu0 %vm112_vm1, %v2362_v41  ;;  %v2370_v57 = vld [vmem:[#allocation2 + $0x240] sm:$0xff]  ;;  %v2373_v62 = vld [vmem:[#allocation2 + $0x290] sm:$0xff] }
  0x92   :  { %14965 = vmatprep.mubr.msk.f32.mxu0 %vm112_vm1, %v2363_v42  ;;  %v17907_v60 = vld [vmem:[#allocation2 + $0x101] sm:$0xff]  ;;  %v17915_v63 = vld [vmem:[#allocation2 + $0x111] sm:$0xff] }
  0x93   :  { %14648 = vmatmul.mubr.msk.f32.gmra.mrb[6].mxu1 %vm112_vm1, %v17878_v47  ;;  %v2372_v61 = vld [vmem:[#allocation2 + $0x260] sm:$0xff]  ;;  %v2375_v3 = vld [vmem:[#allocation2 + $0x2b0] sm:$0xff] }
  0x94   :  { %14650 = vmatprep.mubr.msk.f32.mxu1 %vm112_vm1, %v412_v48  ;;  %v420_v0 = vld [vmem:[#allocation2 + $0x141] sm:$0xff]  ;;  %v17922_v4 = vld [vmem:[#allocation2 + $0x151] sm:$0xff] }
  0x95   :  { %14966 = vmatmul.mubr.msk.f32.gmra.mrb[22].mxu0 %vm112_vm1, %v2364_v45  ;;  %v2374_v2 = vld [vmem:[#allocation2 + $0x2a0] sm:$0xff]  ;;  %v2377_v7 = vld [vmem:[#allocation2 + $0x2d0] sm:$0xff] }
  0x96   :  { %14968 = vmatprep.mubr.msk.f32.mxu0 %vm112_vm1, %v2365_v46  ;;  %v17924_v5 = vld [vmem:[#allocation2 + $0x161] sm:$0xff]  ;;  %v17932_v8 = vld [vmem:[#allocation2 + $0x171] sm:$0xff] }
  0x97   :  { %14651 = vmatmul.mubr.msk.f32.gmra.mrb[8].mxu1 %vm112_vm1, %v17885_v51  ;;  %v2376_v6 = vld [vmem:[#allocation2 + $0x2c0] sm:$0xff]  ;;  %v2379_v11 = vld [vmem:[#allocation2 + $0x2f0] sm:$0xff] }
  0x98   :  { %14653 = vmatprep.mubr.msk.f32.mxu1 %vm112_vm1, %v17887_v52  ;;  %v17934_v9 = vld [vmem:[#allocation2 + $0x181] sm:$0xff]  ;;  %v17942_v12 = vld [vmem:[#allocation2 + $0x191] sm:$0xff] }
  0x99   :  { %14969 = vmatmul.mubr.msk.f32.gmra.mrb[24].mxu0 %vm112_vm1, %v2366_v49  ;;  %v2378_v10 = vld [vmem:[#allocation2 + $0x2e0] sm:$0xff]  ;;  %v2381_v15 = vld [vmem:[#allocation2 + $0x330] sm:$0xff] }
  0x9a   :  { %14971 = vmatprep.mubr.msk.f32.mxu0 %vm112_vm1, %v2367_v50  ;;  %v17944_v13 = vld [vmem:[#allocation2 + $0x1a1] sm:$0xff]  ;;  %v17952_v16 = vld [vmem:[#allocation2 + $0x1b1] sm:$0xff] }
  0x9b   :  { %14654 = vmatmul.mubr.msk.f32.gmra.mrb[10].mxu1 %vm112_vm1, %v17895_v55  ;;  %v2380_v14 = vld [vmem:[#allocation2 + $0x300] sm:$0xff]  ;;  %v2383_v19 = vld [vmem:[#allocation2 + $0x350] sm:$0xff] }
  0x9c   :  { %14656 = vmatprep.mubr.msk.f32.mxu1 %vm112_vm1, %v17897_v56  ;;  %v428_v17 = vld [vmem:[#allocation2 + $0x1e1] sm:$0xff]  ;;  %v17959_v20 = vld [vmem:[#allocation2 + $0x1f1] sm:$0xff] }
  0x9d   :  { %14972 = vmatmul.mubr.msk.f32.gmra.mrb[26].mxu0 %vm112_vm1, %v2368_v53  ;;  %v2382_v18 = vld [vmem:[#allocation2 + $0x340] sm:$0xff]  ;;  %v2385_v23 = vld [vmem:[#allocation2 + $0x370] sm:$0xff] }
  0x9e   :  { %14974 = vmatprep.mubr.msk.f32.mxu0 %vm112_vm1, %v2369_v54  ;;  %v17961_v21 = vld [vmem:[#allocation2 + $0x201] sm:$0xff]  ;;  %v17969_v25 = vld [vmem:[#allocation2 + $0x211] sm:$0xff] }
  0x9f   :  { %14657 = vmatmul.mubr.msk.f32.gmra.mrb[12].mxu1 %vm112_vm1, %v17905_v59  ;;  %v2384_v22 = vld [vmem:[#allocation2 + $0x360] sm:$0xff]  ;;  %v2387_v28 = vld [vmem:[#allocation2 + $0x390] sm:$0xff] }
  0xa0   :  { %14659 = vmatprep.mubr.msk.f32.mxu1 %vm112_vm1, %v17907_v60  ;;  %v17971_v26 = vld [vmem:[#allocation2 + $0x221] sm:$0xff]  ;;  %v17979_v29 = vld [vmem:[#allocation2 + $0x231] sm:$0xff] }
  0xa1   :  { %14975 = vmatmul.mubr.msk.f32.gmra.mrb[28].mxu0 %vm112_vm1, %v2370_v57  ;;  %v2386_v27 = vld [vmem:[#allocation2 + $0x380] sm:$0xff]  ;;  %v2389_v32 = vld [vmem:[#allocation2 + $0x3d0] sm:$0xff] }
  0xa2   :  { %14977 = vmatprep.mubr.msk.f32.mxu0 %vm112_vm1, %v2371_v58  ;;  %v17981_v30 = vld [vmem:[#allocation2 + $0x241] sm:$0xff]  ;;  %v17989_v33 = vld [vmem:[#allocation2 + $0x251] sm:$0xff] }
  0xa3   :  { %14660 = vmatmul.mubr.msk.f32.gmra.mrb[14].mxu1 %vm112_vm1, %v17915_v63  ;;  %v2388_v31 = vld [vmem:[#allocation2 + $0x3a0] sm:$0xff]  ;;  %v2391_v38 = vld [vmem:[#allocation2 + $0x3f0] sm:$0xff] }
  0xa4   :  { %14662 = vmatprep.mubr.msk.f32.mxu1 %vm112_vm1, %v420_v0  ;;  %v436_v34 = vld [vmem:[#allocation2 + $0x281] sm:$0xff]  ;;  %v17996_v41 = vld [vmem:[#allocation2 + $0x291] sm:$0xff] }
  0xa5   :  { %14978 = vmatmul.mubr.msk.f32.gmra.mrb[30].mxu0 %vm112_vm1, %v2372_v61  ;;  %v2390_v37 = vld [vmem:[#allocation2 + $0x3e0] sm:$0xff]  ;;  %v2393_v46 = vld [vmem:[#allocation2 + $0x410] sm:$0xff] }
  0xa6   :  { %14980 = vmatprep.mubr.msk.f32.mxu0 %vm112_vm1, %v2373_v62  ;;  %v17998_v42 = vld [vmem:[#allocation2 + $0x2a1] sm:$0xff]  ;;  %v18006_v48 = vld [vmem:[#allocation2 + $0x2b1] sm:$0xff] }
  0xa7   :  { %14663 = vmatmul.mubr.msk.f32.gmra.mrb[16].mxu1 %vm112_vm1, %v17922_v4  ;;  %v2392_v45 = vld [vmem:[#allocation2 + $0x400] sm:$0xff]  ;;  %v2395_v53 = vld [vmem:[#allocation2 + $0x430] sm:$0xff] }
  0xa8   :  { %14665 = vmatprep.mubr.msk.f32.mxu1 %vm112_vm1, %v17924_v5  ;;  %v18008_v49 = vld [vmem:[#allocation2 + $0x2c1] sm:$0xff]  ;;  %v18016_v54 = vld [vmem:[#allocation2 + $0x2d1] sm:$0xff] }
  0xa9   :  { %14981 = vmatmul.mubr.msk.f32.gmra.mrb[32].mxu0 %vm112_vm1, %v2374_v2  ;;  %v2394_v50 = vld [vmem:[#allocation2 + $0x420] sm:$0xff]  ;;  %v2397_v61 = vld [vmem:[#allocation2 + $0x470] sm:$0xff] }
  0xaa   :  { %14983 = vmatprep.mubr.msk.f32.mxu0 %vm112_vm1, %v2375_v3  ;;  %v18018_v57 = vld [vmem:[#allocation2 + $0x2e1] sm:$0xff]  ;;  %v18026_v62 = vld [vmem:[#allocation2 + $0x2f1] sm:$0xff] }
  0xab   :  { %14666 = vmatmul.mubr.msk.f32.gmra.mrb[18].mxu1 %vm112_vm1, %v17932_v8  ;;  %v2396_v58 = vld [vmem:[#allocation2 + $0x440] sm:$0xff]  ;;  %v2399_v3 = vld [vmem:[#allocation2 + $0x490] sm:$0xff] }
  0xac   :  { %14668 = vmatprep.mubr.msk.f32.mxu1 %vm112_vm1, %v17934_v9  ;;  %v444_v0 = vld [vmem:[#allocation2 + $0x321] sm:$0xff]  ;;  %v3787_v1 = vld [vmem:[#allocation2 + $0x212] sm:$0xff] }
  0xad   :  { %14984 = vmatmul.mubr.msk.f32.gmra.mrb[34].mxu0 %vm112_vm1, %v2376_v6  ;;  %v2398_v2 = vld [vmem:[#allocation2 + $0x480] sm:$0xff]  ;;  %v18033_v6 = vld [vmem:[#allocation2 + $0x331] sm:$0xff] }
  0xae   :  { %14986 = vmatprep.mubr.msk.f32.mxu0 %vm112_vm1, %v2377_v7  ;;  %v18035_v7 = vld [vmem:[#allocation2 + $0x341] sm:$0xff] }
  0xaf   :  { %14669 = vmatmul.mubr.msk.f32.gmra.mrb[20].mxu1 %vm112_vm1, %v17942_v12 }
  0xb0   :  { %14671 = vmatprep.mubr.msk.f32.mxu1 %vm112_vm1, %v17944_v13 }
  0xb1   :  { %14987 = vmatmul.mubr.msk.f32.gmra.mrb[36].mxu0 %vm112_vm1, %v2378_v10  ;;  %v2400_v10 = vld [vmem:[#allocation2 + $0x4a0] sm:$0xff] }
  0xb2   :  { %14989 = vmatprep.mubr.msk.f32.mxu0 %vm112_vm1, %v2379_v11  ;;  %v2401_v11 = vld [vmem:[#allocation2 + $0x4b0] sm:$0xff] }
  0xb3   :  { %14672 = vmatmul.mubr.msk.f32.gmra.mrb[22].mxu1 %vm112_vm1, %v17952_v16 }
  0xb4   :  { %14674 = vmatprep.mubr.msk.f32.mxu1 %vm112_vm1, %v428_v17  ;;  %v2402_v17 = vld [vmem:[#allocation2 + $0x4c0] sm:$0xff] }
  0xb5   :  { %14990 = vmatmul.mubr.msk.f32.gmra.mrb[38].mxu0 %vm112_vm1, %v2380_v14  ;;  %v18043_v14 = vld [vmem:[#allocation2 + $0x351] sm:$0xff] }
  0xb6   :  { %14992 = vmatprep.mubr.msk.f32.mxu0 %vm112_vm1, %v2381_v15  ;;  %v18045_v15 = vld [vmem:[#allocation2 + $0x361] sm:$0xff] }
  0xb7   :  { %14675 = vmatmul.mubr.msk.f32.gmra.mrb[24].mxu1 %vm112_vm1, %v17959_v20 }
  0xb8   :  { %14677 = vmatprep.mubr.msk.f32.mxu1 %vm112_vm1, %v17961_v21 }
  0xb9   :  { %14993 = vmatmul.mubr.msk.f32.gmra.mrb[40].mxu0 %vm112_vm1, %v2382_v18  ;;  %v2403_v18 = vld [vmem:[#allocation2 + $0x4d0] sm:$0xff] }
  0xba   :  { %14995 = vmatprep.mubr.msk.f32.mxu0 %vm112_vm1, %v2383_v19  ;;  %v18053_v19 = vld [vmem:[#allocation2 + $0x371] sm:$0xff] }
  0xbb   :  { %14678 = vmatmul.mubr.msk.f32.gmra.mrb[26].mxu1 %vm112_vm1, %v17969_v25 }
  0xbc   :  { %14680 = vmatprep.mubr.msk.f32.mxu1 %vm112_vm1, %v17971_v26 }
  0xbd   :  { %14996 = vmatmul.mubr.msk.f32.gmra.mrb[42].mxu0 %vm112_vm1, %v2384_v22  ;;  %v18055_v22 = vld [vmem:[#allocation2 + $0x381] sm:$0xff] }
  0xbe   :  { %14998 = vmatprep.mubr.msk.f32.mxu0 %vm112_vm1, %v2385_v23  ;;  %v2404_v23 = vld [vmem:[#allocation2 + $0x4e0] sm:$0xff] }
  0xbf   :  { %14681 = vmatmul.mubr.msk.f32.gmra.mrb[28].mxu1 %vm112_vm1, %v17979_v29 }
  0xc0   :  { %14683 = vmatprep.mubr.msk.f32.mxu1 %vm112_vm1, %v17981_v30 }
  0xc1   :  { %14999 = vmatmul.mubr.msk.f32.gmra.mrb[44].mxu0 %vm112_vm1, %v2386_v27  ;;  %v18063_v27 = vld [vmem:[#allocation2 + $0x391] sm:$0xff] }
  0xc2   :  { %15001 = vmatprep.mubr.msk.f32.mxu0 %vm112_vm1, %v2387_v28  ;;  %v452_v28 = vld [vmem:[#allocation2 + $0x3c1] sm:$0xff] }
  0xc3   :  { %14684 = vmatmul.mubr.msk.f32.gmra.mrb[30].mxu1 %vm112_vm1, %v17989_v33 }
  0xc4   :  { %14686 = vmatprep.mubr.msk.f32.mxu1 %vm112_vm1, %v436_v34  ;;  %v18080_v34 = vld [vmem:[%s20811_s1 + $0x18] sm:$0x7] }
  0xc5   :  { %15002 = vmatmul.mubr.msk.f32.gmra.mrb[46].mxu0 %vm112_vm1, %v2388_v31  ;;  %v18071_v31 = vld [vmem:[#allocation2 + $0x3d1] sm:$0xff] }
  0xc6   :  { %15004 = vmatprep.mubr.msk.f32.mxu0 %vm112_vm1, %v2389_v32  ;;  %v18073_v32 = vld [vmem:[#allocation2 + $0x3e1] sm:$0xff] }
  0xc7   :  { %14687 = vmatmul.mubr.msk.f32.gmra.mrb[32].mxu1 %vm112_vm1, %v17996_v41 }
  0xc8   :  { %14689 = vmatprep.mubr.msk.f32.mxu1 %vm112_vm1, %v17998_v42 }
  0xc9   :  { %15005 = vmatmul.mubr.msk.f32.gmra.mrb[48].mxu0 %vm112_vm1, %v2390_v37  ;;  %v18094_v37 = vld [vmem:[#allocation2 + $0x401] sm:$0xff] }
  0xca   :  { %15007 = vmatprep.mubr.msk.f32.mxu0 %vm112_vm1, %v2391_v38  ;;  %v18126_v38 = vld [vmem:[#allocation2 + $0x481] sm:$0xff] }
  0xcb   :  { %14690 = vmatmul.mubr.msk.f32.gmra.mrb[34].mxu1 %vm112_vm1, %v18006_v48 }
  0xcc   :  { %14692 = vmatprep.mubr.msk.f32.mxu1 %vm112_vm1, %v18008_v49 }
  0xcd   :  { %15008 = vmatmul.mubr.msk.f32.gmra.mrb[50].mxu0 %vm112_vm1, %v2392_v45  ;;  %v18150_v45 = vld [vmem:[#allocation2 + $0x4c1] sm:$0xff] }
  0xce   :  { %15010 = vmatprep.mubr.msk.f32.mxu0 %vm112_vm1, %v2393_v46  ;;  %v339_v46 = vld [vmem:[#allocation2] sm:$0xff] }
  0xcf   :  { %14693 = vmatmul.mubr.msk.f32.gmra.mrb[36].mxu1 %vm112_vm1, %v18016_v54 }
  0xd0   :  { %14695 = vmatprep.mubr.msk.f32.mxu1 %vm112_vm1, %v18018_v57 }
  0xd1   :  { %15011 = vmatmul.mubr.msk.f32.gmra.mrb[52].mxu0 %vm112_vm1, %v2394_v50  ;;  %v18180_v50 = vld [vmem:[#allocation2 + $0x20] sm:$0xff] }
  0xd2   :  { %15013 = vmatprep.mubr.msk.f32.mxu0 %vm112_vm1, %v2395_v53  ;;  %v18193_v53 = vld [vmem:[#allocation2 + $0x40] sm:$0xff] }
  0xd3   :  { %14696 = vmatmul.mubr.msk.f32.gmra.mrb[38].mxu1 %vm112_vm1, %v18026_v62 }
  0xd4   :  { %14698 = vmatprep.mubr.msk.f32.mxu1 %vm112_vm1, %v444_v0  ;;  %v18236_v0 = vld [vmem:[#allocation2 + $0xf0] sm:$0xff] }
  0xd5   :  { %15014 = vmatmul.mubr.msk.f32.gmra.mrb[54].mxu0 %vm112_vm1, %v2396_v58  ;;  %v18207_v58 = vld [vmem:[#allocation2 + $0x70] sm:$0xff] }
  0xd6   :  { %15016 = vmatprep.mubr.msk.f32.mxu0 %vm112_vm1, %v2397_v61  ;;  %v348_v61 = vld [vmem:[#allocation2 + $0xb0] sm:$0xff] }
  0xd7   :  { %14699 = vmatmul.mubr.msk.f32.gmra.mrb[40].mxu1 %vm112_vm1, %v18033_v6 }
  0xd8   :  { %14701 = vmatprep.mubr.msk.f32.mxu1 %vm112_vm1, %v18035_v7 }
  0xd9   :  { %15017 = vmatmul.mubr.msk.f32.gmra.mrb[56].mxu0 %vm112_vm1, %v2398_v2  ;;  %v356_v2 = vld [vmem:[#allocation2 + $0x150] sm:$0xff] }
  0xda   :  { %15019 = vmatprep.mubr.msk.f32.mxu0 %vm112_vm1, %v2399_v3  ;;  %v18277_v3 = vld [vmem:[#allocation2 + $0x190] sm:$0xff] }
  0xdb   :  { %14702 = vmatmul.mubr.msk.f32.gmra.mrb[42].mxu1 %vm112_vm1, %v18043_v14 }
  0xdc   :  { %14704 = vmatprep.mubr.msk.f32.mxu1 %vm112_vm1, %v18045_v15 }
  0xdd   :  { %15020 = vmatmul.mubr.msk.f32.gmra.mrb[58].mxu0 %vm112_vm1, %v2400_v10  ;;  %v364_v10 = vld [vmem:[#allocation2 + $0x1f0] sm:$0xff] }
  0xde   :  { %15022 = vmatprep.mubr.msk.f32.mxu0 %vm112_vm1, %v2401_v11  ;;  %v18318_v11 = vld [vmem:[#allocation2 + $0x230] sm:$0xff] }
  0xdf   :  { %14705 = vmatmul.mubr.msk.f32.gmra.mrb[44].mxu1 %vm112_vm1, %v18053_v19 }
  0xe0   :  { %14707 = vmatprep.mubr.msk.f32.mxu1 %vm112_vm1, %v18055_v22 }
  0xe1   :  { %15023 = vmatmul.mubr.msk.f32.gmra.mrb[60].mxu0 %vm112_vm1, %v2402_v17  ;;  %v371_v17 = vld [vmem:[#allocation2 + $0x280] sm:$0xff] }
  0xe2   :  { %15025 = vmatprep.mubr.msk.f32.mxu0 %vm112_vm1, %v2403_v18  ;;  %v372_v18 = vld [vmem:[#allocation2 + $0x290] sm:$0xff] }
  0xe3   :  { %14708 = vmatmul.mubr.msk.f32.gmra.mrb[46].mxu1 %vm112_vm1, %v18063_v27 }
  0xe4   :  { %14710 = vmatprep.mubr.msk.f32.mxu1 %vm112_vm1, %v452_v28  ;;  %v18369_v28 = vld [vmem:[#allocation2 + $0x2e0] sm:$0xff] }
  0xe5   :  { %15026 = vmatmul.mubr.msk.f32.gmra.mrb[62].mxu0 %vm112_vm1, %v2404_v23  ;;  %v18357_v23 = vld [vmem:[#allocation2 + $0x2c0] sm:$0xff] }
  0xe6   :  { %15030 = vmatprep.mubr.msk.f32.mxu0 %vm112_vm1, %v17846_v35  ;;  %v18090_v35 = vld [vmem:[#allocation2 + $0x3f1] sm:$0xff] }
  0xe7   :  { %14711 = vmatmul.mubr.msk.f32.gmra.mrb[48].mxu1 %vm112_vm1, %v18071_v31 }
  0xe8   :  { %14713 = vmatprep.mubr.msk.f32.mxu1 %vm112_vm1, %v18073_v32 }
  0xe9   :  { %15031 = vmatmul.mubr.msk.f32.vlgmr.msra.gmra.mrb[0].mxu0 %vm112_vm1, %v17850_v36  ;;  %v18106_v36 = vld [vmem:[#allocation2 + $0x421] sm:$0xff] }
  0xea   :  { %15127 = vmatpush3.msk.msra.mxu0 %vm662_vm0, %v17830_v24  ;;  %15033 = vmatprep.mubr.msk.f32.mxu0 %vm112_vm1, %v17858_v39  ;;  %v18104_v24 = vld [vmem:[#allocation2 + $0x411] sm:$0xff]  ;;  %v3058_v39 = vld [vmem:[#allocation2 + $0x81] sm:$0xff] }
  0xeb   :  { %15224 = vmatprep.subr.msk.mxu0 %vm662_vm0, %v18080_v34  ;;  %14714 = vmatmul.mubr.msk.f32.gmra.mrb[50].mxu1 %vm112_vm1, %v18090_v35 }
  0xec   :  { %14716 = vmatprep.mubr.msk.f32.mxu1 %vm112_vm1, %v18094_v37 }
  0xed   :  { %15034 = vmatmul.mubr.msk.f32.gmra.mrb[2].mxu0 %vm112_vm1, %v17860_v40  ;;  %v18116_v40 = vld [vmem:[#allocation2 + $0x431] sm:$0xff] }
  0xee   :  { %15036 = vmatprep.mubr.msk.f32.mxu0 %vm112_vm1, %v17868_v43  ;;  %v460_v43 = vld [vmem:[#allocation2 + $0x461] sm:$0xff] }
  0xef   :  { %14717 = vmatmul.mubr.msk.f32.gmra.mrb[52].mxu1 %vm112_vm1, %v18104_v24 }
  0xf0   :  { %14719 = vmatprep.mubr.msk.f32.mxu1 %vm112_vm1, %v18106_v36 }
  0xf1   :  { %15037 = vmatmul.mubr.msk.f32.gmra.mrb[4].mxu0 %vm112_vm1, %v17870_v44  ;;  %v18124_v44 = vld [vmem:[#allocation2 + $0x471] sm:$0xff] }
  0xf2   :  { %15039 = vmatprep.mubr.msk.f32.mxu0 %vm112_vm1, %v17878_v47  ;;  %v18136_v47 = vld [vmem:[#allocation2 + $0x491] sm:$0xff] }
  0xf3   :  { %14720 = vmatmul.mubr.msk.f32.gmra.mrb[54].mxu1 %vm112_vm1, %v18116_v40 }
  0xf4   :  { %14722 = vmatprep.mubr.msk.f32.mxu1 %vm112_vm1, %v460_v43  ;;  %v18410_v43 = vld [vmem:[#allocation2 + $0x380] sm:$0xff] }
  0xf5   :  { %15040 = vmatmul.mubr.msk.f32.gmra.mrb[6].mxu0 %vm112_vm1, %v3058_v39  ;;  %v18398_v39 = vld [vmem:[#allocation2 + $0x360] sm:$0xff] }
  0xf6   :  { %15042 = vmatprep.mubr.msk.f32.mxu0 %vm112_vm1, %v17885_v51  ;;  %v18138_v51 = vld [vmem:[#allocation2 + $0x4a1] sm:$0xff] }
  0xf7   :  { %14723 = vmatmul.mubr.msk.f32.gmra.mrb[56].mxu1 %vm112_vm1, %v18124_v44 }
  0xf8   :  { %14725 = vmatprep.mubr.msk.f32.mxu1 %vm112_vm1, %v18126_v38 }
  0xf9   :  { %15043 = vmatmul.mubr.msk.f32.gmra.mrb[8].mxu0 %vm112_vm1, %v17887_v52  ;;  %v18148_v52 = vld [vmem:[#allocation2 + $0x4b1] sm:$0xff] }
  0xfa   :  { %15045 = vmatprep.mubr.msk.f32.mxu0 %vm112_vm1, %v17895_v55  ;;  %v3066_v55 = vld [vmem:[#allocation2 + $0x121] sm:$0xff] }
  0xfb   :  { %14726 = vmatmul.mubr.msk.f32.gmra.mrb[58].mxu1 %vm112_vm1, %v18136_v47 }
  0xfc   :  { %14728 = vmatprep.mubr.msk.f32.mxu1 %vm112_vm1, %v18138_v51 }
  0xfd   :  { %15046 = vmatmul.mubr.msk.f32.gmra.mrb[10].mxu0 %vm112_vm1, %v17897_v56  ;;  %v18160_v56 = vld [vmem:[#allocation2 + $0x4d1] sm:$0xff] }
  0xfe   :  { %15048 = vmatprep.mubr.msk.f32.mxu0 %vm112_vm1, %v17905_v59  ;;  %v403_v59 = vld [vmem:[%s20811_s1] sm:$0x7] }
  0xff   :  { %14729 = vmatmul.mubr.msk.f32.gmra.mrb[60].mxu1 %vm112_vm1, %v18148_v52  ;;  %14734 = vmatprep.subr.msk.mxu1 %vm662_vm0, %v403_v59 }
 0x100   :  { %14731 = vmatprep.mubr.msk.f32.mxu1 %vm112_vm1, %v18150_v45  ;;  %14735 = vmatpush3.msk.msra.mxu1 %vm662_vm0, %v403_v59  ;;  %v18433_v59 = vld [vmem:[#allocation2 + $0x3e0] sm:$0xff] }
 0x101   :  { %15049 = vmatmul.mubr.msk.f32.gmra.mrb[12].mxu0 %vm112_vm1, %v17907_v60  ;;  %v340_v60 = vld [vmem:[#allocation2 + $0x10] sm:$0xff] }
 0x102   :  { %15051 = vmatprep.mubr.msk.f32.mxu0 %vm112_vm1, %v17915_v63  ;;  %v17092_v63 = vld [vmem:[%s20811_s1 + $0x8] sm:$0x7] }
 0x103   :  { %14732 = vmatmul.mubr.msk.f32.gmra.mrb[62].mxu1 %vm112_vm1, %v18160_v56  ;;  %16261 = vmatprep.subr.msk.mxu1 %vm662_vm0, %v17092_v63 }
 0x104   :  { %14736 = vmatprep.mubr.msk.f32.mxu1 %vm112_vm1, %v339_v46  ;;  %v18435_v46 = vld [vmem:[#allocation2 + $0x3f0] sm:$0xff] }
 0x105   :  { %15052 = vmatmul.mubr.msk.f32.gmra.mrb[14].mxu0 %vm112_vm1, %v3066_v55  ;;  %v17094_v55 = vld [vmem:[#allocation2 + $0x22] sm:$0xff] }
 0x106   :  { %15054 = vmatprep.mubr.msk.f32.mxu0 %vm112_vm1, %v17922_v4  ;;  %v18182_v4 = vld [vmem:[#allocation2 + $0x30] sm:$0xff] }
 0x107   :  { %14737 = vmatmul.mubr.msk.f32.vlgmr.msra.gmra.mrb[0].mxu1 %vm112_vm1, %v340_v60  ;;  %v17096_v60 = vld [vmem:[#allocation2 + $0x42] sm:$0xff] }
 0x108   :  { %16262 = vmatpush3.msk.msra.mxu1 %vm662_vm0, %v17092_v63  ;;  %14739 = vmatprep.mubr.msk.f32.mxu1 %vm112_vm1, %v18180_v50  ;;  %v18446_v63 = vld [vmem:[#allocation2 + $0x410] sm:$0xff] }
 0x109   :  { %15055 = vmatmul.mubr.msk.f32.gmra.mrb[16].mxu0 %vm112_vm1, %v17924_v5  ;;  %v18195_v5 = vld [vmem:[#allocation2 + $0x50] sm:$0xff] }
 0x10a   :  { %15057 = vmatprep.mubr.msk.f32.mxu0 %vm112_vm1, %v17932_v8  ;;  %v18205_v8 = vld [vmem:[#allocation2 + $0x60] sm:$0xff] }
 0x10b   :  { %14740 = vmatmul.mubr.msk.f32.gmra.mrb[2].mxu1 %vm112_vm1, %v18182_v4 }
 0x10c   :  { %14742 = vmatprep.mubr.msk.f32.mxu1 %vm112_vm1, %v18193_v53 }
 0x10d   :  { %15058 = vmatmul.mubr.msk.f32.gmra.mrb[18].mxu0 %vm112_vm1, %v17934_v9  ;;  %v3074_v9 = vld [vmem:[#allocation2 + $0x1c1] sm:$0xff] }
 0x10e   :  { %15060 = vmatprep.mubr.msk.f32.mxu0 %vm112_vm1, %v17942_v12  ;;  %v347_v12 = vld [vmem:[#allocation2 + $0xa0] sm:$0xff] }
 0x10f   :  { %14743 = vmatmul.mubr.msk.f32.gmra.mrb[4].mxu1 %vm112_vm1, %v18195_v5 }
 0x110   :  { %14745 = vmatprep.mubr.msk.f32.mxu1 %vm112_vm1, %v18205_v8 }
 0x111   :  { %15061 = vmatmul.mubr.msk.f32.gmra.mrb[20].mxu0 %vm112_vm1, %v17944_v13  ;;  %v18222_v13 = vld [vmem:[#allocation2 + $0xc0] sm:$0xff] }
 0x112   :  { %15063 = vmatprep.mubr.msk.f32.mxu0 %vm112_vm1, %v17952_v16  ;;  %v18224_v16 = vld [vmem:[#allocation2 + $0xd0] sm:$0xff] }
 0x113   :  { %14746 = vmatmul.mubr.msk.f32.gmra.mrb[6].mxu1 %vm112_vm1, %v18207_v58 }
 0x114   :  { %14748 = vmatprep.mubr.msk.f32.mxu1 %vm112_vm1, %v347_v12  ;;  %v17098_v12 = vld [vmem:[#allocation2 + $0x62] sm:$0xff] }
 0x115   :  { %15064 = vmatmul.mubr.msk.f32.gmra.mrb[22].mxu0 %vm112_vm1, %v3074_v9  ;;  %v17097_v9 = vld [vmem:[#allocation2 + $0x52] sm:$0xff] }
 0x116   :  { %15066 = vmatprep.mubr.msk.f32.mxu0 %vm112_vm1, %v17959_v20  ;;  %v18234_v20 = vld [vmem:[#allocation2 + $0xe0] sm:$0xff] }
 0x117   :  { %14749 = vmatmul.mubr.msk.f32.gmra.mrb[8].mxu1 %vm112_vm1, %v348_v61  ;;  %v18454_v61 = vld [vmem:[#allocation2 + $0x420] sm:$0xff] }
 0x118   :  { %14751 = vmatprep.mubr.msk.f32.mxu1 %vm112_vm1, %v18222_v13 }
 0x119   :  { %15067 = vmatmul.mubr.msk.f32.gmra.mrb[24].mxu0 %vm112_vm1, %v17961_v21  ;;  %v18246_v21 = vld [vmem:[#allocation2 + $0x100] sm:$0xff] }
 0x11a   :  { %15069 = vmatprep.mubr.msk.f32.mxu0 %vm112_vm1, %v17969_v25  ;;  %v18248_v25 = vld [vmem:[#allocation2 + $0x110] sm:$0xff] }
 0x11b   :  { %14752 = vmatmul.mubr.msk.f32.gmra.mrb[10].mxu1 %vm112_vm1, %v18224_v16 }
 0x11c   :  { %14754 = vmatprep.mubr.msk.f32.mxu1 %vm112_vm1, %v18234_v20 }
 0x11d   :  { %15070 = vmatmul.mubr.msk.f32.gmra.mrb[26].mxu0 %vm112_vm1, %v17971_v26  ;;  %v3082_v26 = vld [vmem:[#allocation2 + $0x261] sm:$0xff] }
 0x11e   :  { %15072 = vmatprep.mubr.msk.f32.mxu0 %vm112_vm1, %v17979_v29  ;;  %v355_v29 = vld [vmem:[#allocation2 + $0x140] sm:$0xff] }
 0x11f   :  { %14755 = vmatmul.mubr.msk.f32.gmra.mrb[12].mxu1 %vm112_vm1, %v18236_v0 }
 0x120   :  { %14757 = vmatprep.mubr.msk.f32.mxu1 %vm112_vm1, %v18246_v21 }
 0x121   :  { %15073 = vmatmul.mubr.msk.f32.gmra.mrb[28].mxu0 %vm112_vm1, %v17981_v30  ;;  %v18263_v30 = vld [vmem:[#allocation2 + $0x160] sm:$0xff] }
 0x122   :  { %15075 = vmatprep.mubr.msk.f32.mxu0 %vm112_vm1, %v17989_v33  ;;  %v18265_v33 = vld [vmem:[#allocation2 + $0x170] sm:$0xff] }
 0x123   :  { %14758 = vmatmul.mubr.msk.f32.gmra.mrb[14].mxu1 %vm112_vm1, %v18248_v25 }
 0x124   :  { %14760 = vmatprep.mubr.msk.f32.mxu1 %vm112_vm1, %v355_v29  ;;  %v17099_v29 = vld [vmem:[#allocation2 + $0x72] sm:$0xff] }
 0x125   :  { %15076 = vmatmul.mubr.msk.f32.gmra.mrb[30].mxu0 %vm112_vm1, %v3082_v26  ;;  %v18456_v26 = vld [vmem:[#allocation2 + $0x430] sm:$0xff] }
 0x126   :  { %15078 = vmatprep.mubr.msk.f32.mxu0 %vm112_vm1, %v17996_v41  ;;  %v18275_v41 = vld [vmem:[#allocation2 + $0x180] sm:$0xff] }
 0x127   :  { %14761 = vmatmul.mubr.msk.f32.gmra.mrb[16].mxu1 %vm112_vm1, %v356_v2  ;;  %v3768_v2 = vld [vmem:[#allocation2 + $0x82] sm:$0xff] }
 0x128   :  { %14763 = vmatprep.mubr.msk.f32.mxu1 %vm112_vm1, %v18263_v30 }
 0x129   :  { %15079 = vmatmul.mubr.msk.f32.gmra.mrb[32].mxu0 %vm112_vm1, %v17998_v42  ;;  %v18287_v42 = vld [vmem:[#allocation2 + $0x1a0] sm:$0xff] }
 0x12a   :  { %15081 = vmatprep.mubr.msk.f32.mxu0 %vm112_vm1, %v18006_v48  ;;  %v18289_v48 = vld [vmem:[#allocation2 + $0x1b0] sm:$0xff] }
 0x12b   :  { %14764 = vmatmul.mubr.msk.f32.gmra.mrb[18].mxu1 %vm112_vm1, %v18265_v33 }
 0x12c   :  { %14766 = vmatprep.mubr.msk.f32.mxu1 %vm112_vm1, %v18275_v41 }
 0x12d   :  { %15082 = vmatmul.mubr.msk.f32.gmra.mrb[34].mxu0 %vm112_vm1, %v18008_v49  ;;  %v3090_v49 = vld [vmem:[#allocation2 + $0x301] sm:$0xff] }
 0x12e   :  { %15084 = vmatprep.mubr.msk.f32.mxu0 %vm112_vm1, %v18016_v54  ;;  %v363_v54 = vld [vmem:[#allocation2 + $0x1e0] sm:$0xff] }
 0x12f   :  { %14767 = vmatmul.mubr.msk.f32.gmra.mrb[20].mxu1 %vm112_vm1, %v18277_v3 }
 0x130   :  { %14769 = vmatprep.mubr.msk.f32.mxu1 %vm112_vm1, %v18287_v42 }
 0x131   :  { %15085 = vmatmul.mubr.msk.f32.gmra.mrb[36].mxu0 %vm112_vm1, %v18018_v57  ;;  %v18304_v57 = vld [vmem:[#allocation2 + $0x200] sm:$0xff] }
 0x132   :  { %15087 = vmatprep.mubr.msk.f32.mxu0 %vm112_vm1, %v18026_v62  ;;  %v18306_v62 = vld [vmem:[#allocation2 + $0x210] sm:$0xff] }
 0x133   :  { %14770 = vmatmul.mubr.msk.f32.gmra.mrb[22].mxu1 %vm112_vm1, %v18289_v48 }
 0x134   :  { %14772 = vmatprep.mubr.msk.f32.mxu1 %vm112_vm1, %v363_v54  ;;  %v395_v54 = vld [vmem:[#allocation2 + $0x460] sm:$0xff] }
 0x135   :  { %15088 = vmatmul.mubr.msk.f32.gmra.mrb[38].mxu0 %vm112_vm1, %v3090_v49  ;;  %v3769_v49 = vld [vmem:[#allocation2 + $0xb2] sm:$0xff] }
 0x136   :  { %15090 = vmatprep.mubr.msk.f32.mxu0 %vm112_vm1, %v18033_v6  ;;  %v18316_v6 = vld [vmem:[#allocation2 + $0x220] sm:$0xff] }
 0x137   :  { %14773 = vmatmul.mubr.msk.f32.gmra.mrb[24].mxu1 %vm112_vm1, %v364_v10  ;;  %v396_v10 = vld [vmem:[#allocation2 + $0x470] sm:$0xff] }
 0x138   :  { %14775 = vmatprep.mubr.msk.f32.mxu1 %vm112_vm1, %v18304_v57 }
 0x139   :  { %15091 = vmatmul.mubr.msk.f32.gmra.mrb[40].mxu0 %vm112_vm1, %v18035_v7  ;;  %v18328_v7 = vld [vmem:[#allocation2 + $0x240] sm:$0xff] }
 0x13a   :  { %15093 = vmatprep.mubr.msk.f32.mxu0 %vm112_vm1, %v18043_v14  ;;  %v18330_v14 = vld [vmem:[#allocation2 + $0x250] sm:$0xff] }
 0x13b   :  { %14776 = vmatmul.mubr.msk.f32.gmra.mrb[26].mxu1 %vm112_vm1, %v18306_v62 }
 0x13c   :  { %14778 = vmatprep.mubr.msk.f32.mxu1 %vm112_vm1, %v18316_v6 }
 0x13d   :  { %15094 = vmatmul.mubr.msk.f32.gmra.mrb[42].mxu0 %vm112_vm1, %v18045_v15  ;;  %v3098_v15 = vld [vmem:[#allocation2 + $0x3a1] sm:$0xff] }
 0x13e   :  { %15096 = vmatprep.mubr.msk.f32.mxu0 %vm112_vm1, %v18053_v19  ;;  %v18345_v19 = vld [vmem:[#allocation2 + $0x2a0] sm:$0xff] }
 0x13f   :  { %14779 = vmatmul.mubr.msk.f32.gmra.mrb[28].mxu1 %vm112_vm1, %v18318_v11 }
 0x140   :  { %14781 = vmatprep.mubr.msk.f32.mxu1 %vm112_vm1, %v18328_v7 }
 0x141   :  { %15097 = vmatmul.mubr.msk.f32.gmra.mrb[44].mxu0 %vm112_vm1, %v18055_v22  ;;  %v18347_v22 = vld [vmem:[#allocation2 + $0x2b0] sm:$0xff] }
 0x142   :  { %15099 = vmatprep.mubr.msk.f32.mxu0 %vm112_vm1, %v18063_v27  ;;  %v18359_v27 = vld [vmem:[#allocation2 + $0x2d0] sm:$0xff] }
 0x143   :  { %14782 = vmatmul.mubr.msk.f32.gmra.mrb[30].mxu1 %vm112_vm1, %v18330_v14 }
 0x144   :  { %14784 = vmatprep.mubr.msk.f32.mxu1 %vm112_vm1, %v371_v17  ;;  %v3771_v17 = vld [vmem:[#allocation2 + $0xd2] sm:$0xff] }
 0x145   :  { %15100 = vmatmul.mubr.msk.f32.gmra.mrb[46].mxu0 %vm112_vm1, %v3098_v15  ;;  %v3770_v15 = vld [vmem:[#allocation2 + $0xc2] sm:$0xff] }
 0x146   :  { %15102 = vmatprep.mubr.msk.f32.mxu0 %vm112_vm1, %v18071_v31  ;;  %v18371_v31 = vld [vmem:[#allocation2 + $0x2f0] sm:$0xff] }
 0x147   :  { %14785 = vmatmul.mubr.msk.f32.gmra.mrb[32].mxu1 %vm112_vm1, %v372_v18  ;;  %v18468_v18 = vld [vmem:[#allocation2 + $0x480] sm:$0xff] }
 0x148   :  { %14787 = vmatprep.mubr.msk.f32.mxu1 %vm112_vm1, %v18345_v19 }
 0x149   :  { %15103 = vmatmul.mubr.msk.f32.gmra.mrb[48].mxu0 %vm112_vm1, %v18073_v32  ;;  %v3106_v32 = vld [vmem:[#allocation2 + $0x441] sm:$0xff] }
 0x14a   :  { %15105 = vmatprep.mubr.msk.f32.mxu0 %vm112_vm1, %v18090_v35  ;;  %v379_v35 = vld [vmem:[#allocation2 + $0x320] sm:$0xff] }
 0x14b   :  { %14788 = vmatmul.mubr.msk.f32.gmra.mrb[34].mxu1 %vm112_vm1, %v18347_v22 }
 0x14c   :  { %14790 = vmatprep.mubr.msk.f32.mxu1 %vm112_vm1, %v18357_v23 }
 0x14d   :  { %15106 = vmatmul.mubr.msk.f32.gmra.mrb[50].mxu0 %vm112_vm1, %v18094_v37  ;;  %v380_v37 = vld [vmem:[#allocation2 + $0x330] sm:$0xff] }
 0x14e   :  { %15108 = vmatprep.mubr.msk.f32.mxu0 %vm112_vm1, %v18104_v24  ;;  %v18386_v24 = vld [vmem:[#allocation2 + $0x340] sm:$0xff] }
 0x14f   :  { %14791 = vmatmul.mubr.msk.f32.gmra.mrb[36].mxu1 %vm112_vm1, %v18359_v27 }
 0x150   :  { %14793 = vmatprep.mubr.msk.f32.mxu1 %vm112_vm1, %v18369_v28 }
 0x151   :  { %15109 = vmatmul.mubr.msk.f32.gmra.mrb[52].mxu0 %vm112_vm1, %v18106_v36  ;;  %v18388_v36 = vld [vmem:[#allocation2 + $0x350] sm:$0xff] }
 0x152   :  { %15111 = vmatprep.mubr.msk.f32.mxu0 %vm112_vm1, %v18116_v40  ;;  %v18400_v40 = vld [vmem:[#allocation2 + $0x370] sm:$0xff] }
 0x153   :  { %14794 = vmatmul.mubr.msk.f32.gmra.mrb[38].mxu1 %vm112_vm1, %v18371_v31 }
 0x154   :  { %14796 = vmatprep.mubr.msk.f32.mxu1 %vm112_vm1, %v379_v35  ;;  %v3772_v35 = vld [vmem:[#allocation2 + $0xe2] sm:$0xff] }
 0x155   :  { %15112 = vmatmul.mubr.msk.f32.gmra.mrb[54].mxu0 %vm112_vm1, %v3106_v32  ;;  %v18470_v32 = vld [vmem:[#allocation2 + $0x490] sm:$0xff] }
 0x156   :  { %15114 = vmatprep.mubr.msk.f32.mxu0 %vm112_vm1, %v18124_v44  ;;  %v18412_v44 = vld [vmem:[#allocation2 + $0x390] sm:$0xff] }
 0x157   :  { %14797 = vmatmul.mubr.msk.f32.gmra.mrb[40].mxu1 %vm112_vm1, %v380_v37  ;;  %v3773_v37 = vld [vmem:[#allocation2 + $0xf2] sm:$0xff] }
 0x158   :  { %14799 = vmatprep.mubr.msk.f32.mxu1 %vm112_vm1, %v18386_v24 }
 0x159   :  { %15115 = vmatmul.mubr.msk.f32.gmra.mrb[56].mxu0 %vm112_vm1, %v18126_v38  ;;  %v3114_v38 = vld [vmem:[#allocation2 + $0x4e1] sm:$0xff] }
 0x15a   :  { %15117 = vmatprep.mubr.msk.f32.mxu0 %vm112_vm1, %v18136_v47  ;;  %v387_v47 = vld [vmem:[#allocation2 + $0x3c0] sm:$0xff] }
 0x15b   :  { %14800 = vmatmul.mubr.msk.f32.gmra.mrb[42].mxu1 %vm112_vm1, %v18388_v36 }
 0x15c   :  { %14802 = vmatprep.mubr.msk.f32.mxu1 %vm112_vm1, %v18398_v39 }
 0x15d   :  { %15118 = vmatmul.mubr.msk.f32.gmra.mrb[58].mxu0 %vm112_vm1, %v18138_v51  ;;  %v388_v51 = vld [vmem:[#allocation2 + $0x3d0] sm:$0xff] }
 0x15e   :  { %15120 = vmatprep.mubr.msk.f32.mxu0 %vm112_vm1, %v18148_v52  ;;  %v17093_v52 = vld [vmem:[#allocation2 + $0x12] sm:$0xff] }
 0x15f   :  { %14803 = vmatmul.mubr.msk.f32.gmra.mrb[44].mxu1 %vm112_vm1, %v18400_v40 }
 0x160   :  { %14805 = vmatprep.mubr.msk.f32.mxu1 %vm112_vm1, %v18410_v43 }
 0x161   :  { %15121 = vmatmul.mubr.msk.f32.gmra.mrb[60].mxu0 %vm112_vm1, %v18150_v45  ;;  %v18427_v45 = vld [vmem:[%s20811_s1 + $0x1c] sm:$0x7] }
 0x162   :  { %15123 = vmatprep.mubr.msk.f32.mxu0 %vm112_vm1, %v18160_v56  ;;  %v17095_v56 = vld [vmem:[#allocation2 + $0x32] sm:$0xff] }
 0x163   :  { %14806 = vmatmul.mubr.msk.f32.gmra.mrb[46].mxu1 %vm112_vm1, %v18412_v44 }
 0x164   :  { %14808 = vmatprep.mubr.msk.f32.mxu1 %vm112_vm1, %v387_v47  ;;  %v18480_v47 = vld [vmem:[#allocation2 + $0x4b0] sm:$0xff] }
 0x165   :  { %15124 = vmatmul.mubr.msk.f32.gmra.mrb[62].mxu0 %vm112_vm1, %v3114_v38  ;;  %v18478_v38 = vld [vmem:[#allocation2 + $0x4a0] sm:$0xff] }
 0x166   :  { %15128 = vmatprep.mubr.msk.f32.mxu0 %vm112_vm1, %v17093_v52  ;;  %v3775_v52 = vld [vmem:[#allocation2 + $0x112] sm:$0xff] }
 0x167   :  { %14809 = vmatmul.mubr.msk.f32.gmra.mrb[48].mxu1 %vm112_vm1, %v388_v51  ;;  %v3774_v51 = vld [vmem:[#allocation2 + $0x102] sm:$0xff] }
 0x168   :  { %14811 = vmatprep.mubr.msk.f32.mxu1 %vm112_vm1, %v18433_v59 }
 0x169   :  { %15129 = vmatmul.mubr.msk.f32.vlgmr.msra.gmra.mrb[0].mxu0 %vm112_vm1, %v17094_v55  ;;  %v18488_v55 = vld [vmem:[#allocation2 + $0x4c0] sm:$0xff] }
 0x16a   :  { %15225 = vmatpush3.msk.msra.mxu0 %vm662_vm0, %v18080_v34  ;;  %15131 = vmatprep.mubr.msk.f32.mxu0 %vm112_vm1, %v17095_v56  ;;  %v18444_v34 = vld [vmem:[#allocation2 + $0x400] sm:$0xff]  ;;  %v18490_v56 = vld [vmem:[#allocation2 + $0x4d0] sm:$0xff] }
 0x16b   :  { %15322 = vmatprep.subr.msk.mxu0 %vm662_vm0, %v18427_v45  ;;  %14812 = vmatmul.mubr.msk.f32.gmra.mrb[50].mxu1 %vm112_vm1, %v18435_v46 }
 0x16c   :  { %14814 = vmatprep.mubr.msk.f32.mxu1 %vm112_vm1, %v18444_v34 }
 0x16d   :  { %15132 = vmatmul.mubr.msk.f32.gmra.mrb[2].mxu0 %vm112_vm1, %v17096_v60  ;;  %v3776_v60 = vld [vmem:[#allocation2 + $0x122] sm:$0xff] }
 0x16e   :  { %15134 = vmatprep.mubr.msk.f32.mxu0 %vm112_vm1, %v17097_v9  ;;  %v3777_v9 = vld [vmem:[#allocation2 + $0x152] sm:$0xff] }
 0x16f   :  { %14815 = vmatmul.mubr.msk.f32.gmra.mrb[52].mxu1 %vm112_vm1, %v18446_v63 }
 0x170   :  { %14817 = vmatprep.mubr.msk.f32.mxu1 %vm112_vm1, %v18454_v61 }
 0x171   :  { %15135 = vmatmul.mubr.msk.f32.gmra.mrb[4].mxu0 %vm112_vm1, %v17098_v12  ;;  %v1639_v12 = vld [vmem:[#allocation2 + $0xa2] sm:$0xff] }
 0x172   :  { %15137 = vmatprep.mubr.msk.f32.mxu0 %vm112_vm1, %v17099_v29  ;;  %v3778_v29 = vld [vmem:[#allocation2 + $0x162] sm:$0xff] }
 0x173   :  { %14818 = vmatmul.mubr.msk.f32.gmra.mrb[54].mxu1 %vm112_vm1, %v18456_v26 }
 0x174   :  { %14820 = vmatprep.mubr.msk.f32.mxu1 %vm112_vm1, %v395_v54  ;;  %v3780_v54 = vld [vmem:[#allocation2 + $0x182] sm:$0xff] }
 0x175   :  { %15138 = vmatmul.mubr.msk.f32.gmra.mrb[6].mxu0 %vm112_vm1, %v3768_v2  ;;  %v3779_v2 = vld [vmem:[#allocation2 + $0x172] sm:$0xff] }
 0x176   :  { %15140 = vmatprep.mubr.msk.f32.mxu0 %vm112_vm1, %v3769_v49 }
 0x177   :  { %14821 = vmatmul.mubr.msk.f32.gmra.mrb[56].mxu1 %vm112_vm1, %v396_v10  ;;  %v3781_v10 = vld [vmem:[#allocation2 + $0x192] sm:$0xff] }
 0x178   :  { %14823 = vmatprep.mubr.msk.f32.mxu1 %vm112_vm1, %v18468_v18 }
 0x179   :  { %15141 = vmatmul.mubr.msk.f32.gmra.mrb[8].mxu0 %vm112_vm1, %v3770_v15 }
 0x17a   :  { %15143 = vmatprep.mubr.msk.f32.mxu0 %vm112_vm1, %v3771_v17 }
 0x17b   :  { %14824 = vmatmul.mubr.msk.f32.gmra.mrb[58].mxu1 %vm112_vm1, %v18470_v32 }
 0x17c   :  { %14826 = vmatprep.mubr.msk.f32.mxu1 %vm112_vm1, %v18478_v38 }
 0x17d   :  { %15144 = vmatmul.mubr.msk.f32.gmra.mrb[10].mxu0 %vm112_vm1, %v3772_v35 }
 0x17e   :  { %15146 = vmatprep.mubr.msk.f32.mxu0 %vm112_vm1, %v3773_v37 }
 0x17f   :  { %14827 = vmatmul.mubr.msk.f32.gmra.mrb[60].mxu1 %vm112_vm1, %v18480_v47 }
 0x180   :  { %14829 = vmatprep.mubr.msk.f32.mxu1 %vm112_vm1, %v18488_v55 }
 0x181   :  { %15147 = vmatmul.mubr.msk.f32.gmra.mrb[12].mxu0 %vm112_vm1, %v3774_v51 }
 0x182   :  { %15149 = vmatprep.mubr.msk.f32.mxu0 %vm112_vm1, %v3775_v52 }
 0x183   :  { %14830 = vmatmul.mubr.msk.f32.gmra.mrb[62].mxu1 %vm112_vm1, %v18490_v56 }
 0x184   :  { %14846 = vmatprep.mubr.msk.f32.mxu1 %vm112_vm1, %v1639_v12  ;;  %v3783_v12 = vld [vmem:[#allocation2 + $0x1b2] sm:$0xff] }
 0x185   :  { %15150 = vmatmul.mubr.msk.f32.gmra.mrb[14].mxu0 %vm112_vm1, %v3776_v60  ;;  %v3782_v60 = vld [vmem:[#allocation2 + $0x1a2] sm:$0xff] }
 0x186   :  { %15152 = vmatprep.mubr.msk.f32.mxu0 %vm112_vm1, %v3777_v9 }
 0x187   :  { %14847 = vmatmul.mubr.msk.f32.vlgmr.msra.gmra.mrb[8].mxu1 %vm112_vm1, %v3769_v49  ;;  %v3784_v49 = vld [vmem:[#allocation2 + $0x1c2] sm:$0xff] }
 0x188   :  { %14849 = vmatprep.mubr.msk.f32.mxu1 %vm112_vm1, %v3770_v15  ;;  %v3785_v15 = vld [vmem:[#allocation2 + $0x1f2] sm:$0xff] }
 0x189   :  { %15153 = vmatmul.mubr.msk.f32.gmra.mrb[16].mxu0 %vm112_vm1, %v3778_v29 }
 0x18a   :  { %15155 = vmatprep.mubr.msk.f32.mxu0 %vm112_vm1, %v3779_v2 }
 0x18b   :  { %14850 = vmatmul.mubr.msk.f32.gmra.mrb[10].mxu1 %vm112_vm1, %v3771_v17  ;;  %v1647_v17 = vld [vmem:[#allocation2 + $0x142] sm:$0xff] }
 0x18c   :  { %14852 = vmatprep.mubr.msk.f32.mxu1 %vm112_vm1, %v3772_v35  ;;  %v3786_v35 = vld [vmem:[#allocation2 + $0x202] sm:$0xff] }
 0x18d   :  { %15156 = vmatmul.mubr.msk.f32.gmra.mrb[18].mxu0 %vm112_vm1, %v3780_v54 }
 0x18e   :  { %15158 = vmatprep.mubr.msk.f32.mxu0 %vm112_vm1, %v3781_v10 }
 0x18f   :  { %14853 = vmatmul.mubr.msk.f32.gmra.mrb[12].mxu1 %vm112_vm1, %v3773_v37  ;;  %v3788_v37 = vld [vmem:[#allocation2 + $0x222] sm:$0xff] }
 0x190   :  { %14855 = vmatprep.mubr.msk.f32.mxu1 %vm112_vm1, %v3774_v51  ;;  %v3789_v51 = vld [vmem:[#allocation2 + $0x232] sm:$0xff] }
 0x191   :  { %15159 = vmatmul.mubr.msk.f32.gmra.mrb[20].mxu0 %vm112_vm1, %v3782_v60 }
 0x192   :  { %15161 = vmatprep.mubr.msk.f32.mxu0 %vm112_vm1, %v3783_v12 }
 0x193   :  { %14856 = vmatmul.mubr.msk.f32.gmra.mrb[14].mxu1 %vm112_vm1, %v3775_v52  ;;  %v3790_v52 = vld [vmem:[#allocation2 + $0x242] sm:$0xff] }
 0x194   :  { %14858 = vmatprep.mubr.msk.f32.mxu1 %vm112_vm1, %v1647_v17  ;;  %v3795_v17 = vld [vmem:[#allocation2 + $0x2b2] sm:$0xff] }
 0x195   :  { %15162 = vmatmul.mubr.msk.f32.gmra.mrb[22].mxu0 %vm112_vm1, %v3784_v49  ;;  %v3791_v49 = vld [vmem:[#allocation2 + $0x252] sm:$0xff] }
 0x196   :  { %15164 = vmatprep.mubr.msk.f32.mxu0 %vm112_vm1, %v3785_v15 }
 0x197   :  { %14859 = vmatmul.mubr.msk.f32.gmra.mrb[16].mxu1 %vm112_vm1, %v3777_v9  ;;  %v3792_v9 = vld [vmem:[#allocation2 + $0x262] sm:$0xff] }
 0x198   :  { %14861 = vmatprep.mubr.msk.f32.mxu1 %vm112_vm1, %v3778_v29  ;;  %v3793_v29 = vld [vmem:[#allocation2 + $0x292] sm:$0xff] }
 0x199   :  { %15165 = vmatmul.mubr.msk.f32.gmra.mrb[24].mxu0 %vm112_vm1, %v3786_v35 }
 0x19a   :  { %15167 = vmatprep.mubr.msk.f32.mxu0 %vm112_vm1, %v3787_v1 }
 0x19b   :  { %14862 = vmatmul.mubr.msk.f32.gmra.mrb[18].mxu1 %vm112_vm1, %v3779_v2  ;;  %v1655_v2 = vld [vmem:[#allocation2 + $0x1e2] sm:$0xff] }
 0x19c   :  { %14864 = vmatprep.mubr.msk.f32.mxu1 %vm112_vm1, %v3780_v54  ;;  %v3794_v54 = vld [vmem:[#allocation2 + $0x2a2] sm:$0xff] }
 0x19d   :  { %15168 = vmatmul.mubr.msk.f32.gmra.mrb[26].mxu0 %vm112_vm1, %v3788_v37 }
 0x19e   :  { %15170 = vmatprep.mubr.msk.f32.mxu0 %vm112_vm1, %v3789_v51 }
 0x19f   :  { %14865 = vmatmul.mubr.msk.f32.gmra.mrb[20].mxu1 %vm112_vm1, %v3781_v10  ;;  %v3796_v10 = vld [vmem:[#allocation2 + $0x2c2] sm:$0xff] }
 0x1a0   :  { %14867 = vmatprep.mubr.msk.f32.mxu1 %vm112_vm1, %v3782_v60  ;;  %v3797_v60 = vld [vmem:[#allocation2 + $0x2d2] sm:$0xff] }
 0x1a1   :  { %15171 = vmatmul.mubr.msk.f32.gmra.mrb[28].mxu0 %vm112_vm1, %v3790_v52 }
 0x1a2   :  { %15173 = vmatprep.mubr.msk.f32.mxu0 %vm112_vm1, %v3791_v49 }
 0x1a3   :  { %14868 = vmatmul.mubr.msk.f32.gmra.mrb[22].mxu1 %vm112_vm1, %v3783_v12  ;;  %v3798_v12 = vld [vmem:[#allocation2 + $0x2e2] sm:$0xff] }
 0x1a4   :  { %14870 = vmatprep.mubr.msk.f32.mxu1 %vm112_vm1, %v1655_v2  ;;  %v3803_v2 = vld [vmem:[#allocation2 + $0x352] sm:$0xff] }
 0x1a5   :  { %15174 = vmatmul.mubr.msk.f32.gmra.mrb[30].mxu0 %vm112_vm1, %v3792_v9  ;;  %v3799_v9 = vld [vmem:[#allocation2 + $0x2f2] sm:$0xff] }
 0x1a6   :  { %15176 = vmatprep.mubr.msk.f32.mxu0 %vm112_vm1, %v3793_v29 }
 0x1a7   :  { %14871 = vmatmul.mubr.msk.f32.gmra.mrb[24].mxu1 %vm112_vm1, %v3785_v15  ;;  %v3800_v15 = vld [vmem:[#allocation2 + $0x302] sm:$0xff] }
 0x1a8   :  { %14873 = vmatprep.mubr.msk.f32.mxu1 %vm112_vm1, %v3786_v35  ;;  %v3801_v35 = vld [vmem:[#allocation2 + $0x332] sm:$0xff] }
 0x1a9   :  { %15177 = vmatmul.mubr.msk.f32.gmra.mrb[32].mxu0 %vm112_vm1, %v3794_v54 }
 0x1aa   :  { %15179 = vmatprep.mubr.msk.f32.mxu0 %vm112_vm1, %v3795_v17 }
 0x1ab   :  { %14874 = vmatmul.mubr.msk.f32.gmra.mrb[26].mxu1 %vm112_vm1, %v3787_v1  ;;  %v1663_v1 = vld [vmem:[#allocation2 + $0x282] sm:$0xff] }
 0x1ac   :  { %14876 = vmatprep.mubr.msk.f32.mxu1 %vm112_vm1, %v3788_v37  ;;  %v3802_v37 = vld [vmem:[#allocation2 + $0x342] sm:$0xff] }
 0x1ad   :  { %15180 = vmatmul.mubr.msk.f32.gmra.mrb[34].mxu0 %vm112_vm1, %v3796_v10 }
 0x1ae   :  { %15182 = vmatprep.mubr.msk.f32.mxu0 %vm112_vm1, %v3797_v60 }
 0x1af   :  { %14877 = vmatmul.mubr.msk.f32.gmra.mrb[28].mxu1 %vm112_vm1, %v3789_v51  ;;  %v3804_v51 = vld [vmem:[#allocation2 + $0x362] sm:$0xff] }
 0x1b0   :  { %14879 = vmatprep.mubr.msk.f32.mxu1 %vm112_vm1, %v3790_v52  ;;  %v3805_v52 = vld [vmem:[#allocation2 + $0x372] sm:$0xff] }
 0x1b1   :  { %15183 = vmatmul.mubr.msk.f32.gmra.mrb[36].mxu0 %vm112_vm1, %v3798_v12 }
 0x1b2   :  { %15185 = vmatprep.mubr.msk.f32.mxu0 %vm112_vm1, %v3799_v9 }
 0x1b3   :  { %14880 = vmatmul.mubr.msk.f32.gmra.mrb[30].mxu1 %vm112_vm1, %v3791_v49  ;;  %v3806_v49 = vld [vmem:[#allocation2 + $0x382] sm:$0xff] }
 0x1b4   :  { %14882 = vmatprep.mubr.msk.f32.mxu1 %vm112_vm1, %v1663_v1  ;;  %v3811_v1 = vld [vmem:[#allocation2 + $0x3f2] sm:$0xff] }
 0x1b5   :  { %15186 = vmatmul.mubr.msk.f32.gmra.mrb[38].mxu0 %vm112_vm1, %v3800_v15  ;;  %v3807_v15 = vld [vmem:[#allocation2 + $0x392] sm:$0xff] }
 0x1b6   :  { %15188 = vmatprep.mubr.msk.f32.mxu0 %vm112_vm1, %v3801_v35 }
 0x1b7   :  { %14883 = vmatmul.mubr.msk.f32.gmra.mrb[32].mxu1 %vm112_vm1, %v3793_v29  ;;  %v3808_v29 = vld [vmem:[#allocation2 + $0x3a2] sm:$0xff] }
 0x1b8   :  { %14885 = vmatprep.mubr.msk.f32.mxu1 %vm112_vm1, %v3794_v54  ;;  %v3809_v54 = vld [vmem:[#allocation2 + $0x3d2] sm:$0xff] }
 0x1b9   :  { %15189 = vmatmul.mubr.msk.f32.gmra.mrb[40].mxu0 %vm112_vm1, %v3802_v37 }
 0x1ba   :  { %15191 = vmatprep.mubr.msk.f32.mxu0 %vm112_vm1, %v3803_v2 }
 0x1bb   :  { %14886 = vmatmul.mubr.msk.f32.gmra.mrb[34].mxu1 %vm112_vm1, %v3795_v17  ;;  %v1671_v17 = vld [vmem:[#allocation2 + $0x322] sm:$0xff] }
 0x1bc   :  { %14888 = vmatprep.mubr.msk.f32.mxu1 %vm112_vm1, %v3796_v10  ;;  %v3810_v10 = vld [vmem:[#allocation2 + $0x3e2] sm:$0xff] }
 0x1bd   :  { %15192 = vmatmul.mubr.msk.f32.gmra.mrb[42].mxu0 %vm112_vm1, %v3804_v51 }
 0x1be   :  { %15194 = vmatprep.mubr.msk.f32.mxu0 %vm112_vm1, %v3805_v52 }
 0x1bf   :  { %14889 = vmatmul.mubr.msk.f32.gmra.mrb[36].mxu1 %vm112_vm1, %v3797_v60  ;;  %v3812_v60 = vld [vmem:[#allocation2 + $0x402] sm:$0xff] }
 0x1c0   :  { %14891 = vmatprep.mubr.msk.f32.mxu1 %vm112_vm1, %v3798_v12  ;;  %v3813_v12 = vld [vmem:[#allocation2 + $0x412] sm:$0xff] }
 0x1c1   :  { %15195 = vmatmul.mubr.msk.f32.gmra.mrb[44].mxu0 %vm112_vm1, %v3806_v49 }
 0x1c2   :  { %15197 = vmatprep.mubr.msk.f32.mxu0 %vm112_vm1, %v3807_v15 }
 0x1c3   :  { %14892 = vmatmul.mubr.msk.f32.gmra.mrb[38].mxu1 %vm112_vm1, %v3799_v9  ;;  %v3814_v9 = vld [vmem:[#allocation2 + $0x422] sm:$0xff] }
 0x1c4   :  { %14894 = vmatprep.mubr.msk.f32.mxu1 %vm112_vm1, %v1671_v17  ;;  %v3819_v17 = vld [vmem:[#allocation2 + $0x492] sm:$0xff] }
 0x1c5   :  { %15198 = vmatmul.mubr.msk.f32.gmra.mrb[46].mxu0 %vm112_vm1, %v3808_v29  ;;  %v3815_v29 = vld [vmem:[#allocation2 + $0x432] sm:$0xff] }
 0x1c6   :  { %15200 = vmatprep.mubr.msk.f32.mxu0 %vm112_vm1, %v3809_v54 }
 0x1c7   :  { %14895 = vmatmul.mubr.msk.f32.gmra.mrb[40].mxu1 %vm112_vm1, %v3801_v35  ;;  %v3816_v35 = vld [vmem:[#allocation2 + $0x442] sm:$0xff] }
 0x1c8   :  { %14897 = vmatprep.mubr.msk.f32.mxu1 %vm112_vm1, %v3802_v37  ;;  %v3817_v37 = vld [vmem:[#allocation2 + $0x472] sm:$0xff] }
 0x1c9   :  { %15201 = vmatmul.mubr.msk.f32.gmra.mrb[48].mxu0 %vm112_vm1, %v3810_v10 }
 0x1ca   :  { %15203 = vmatprep.mubr.msk.f32.mxu0 %vm112_vm1, %v3811_v1 }
 0x1cb   :  { %14898 = vmatmul.mubr.msk.f32.gmra.mrb[42].mxu1 %vm112_vm1, %v3803_v2  ;;  %v1679_v2 = vld [vmem:[#allocation2 + $0x3c2] sm:$0xff] }
 0x1cc   :  { %14900 = vmatprep.mubr.msk.f32.mxu1 %vm112_vm1, %v3804_v51  ;;  %v3818_v51 = vld [vmem:[#allocation2 + $0x482] sm:$0xff] }
 0x1cd   :  { %15204 = vmatmul.mubr.msk.f32.gmra.mrb[50].mxu0 %vm112_vm1, %v3812_v60 }
 0x1ce   :  { %15206 = vmatprep.mubr.msk.f32.mxu0 %vm112_vm1, %v3813_v12 }
 0x1cf   :  { %14901 = vmatmul.mubr.msk.f32.gmra.mrb[44].mxu1 %vm112_vm1, %v3805_v52  ;;  %v3820_v52 = vld [vmem:[#allocation2 + $0x4a2] sm:$0xff] }
 0x1d0   :  { %14903 = vmatprep.mubr.msk.f32.mxu1 %vm112_vm1, %v3806_v49  ;;  %v3821_v49 = vld [vmem:[#allocation2 + $0x4b2] sm:$0xff] }
 0x1d1   :  { %15207 = vmatmul.mubr.msk.f32.gmra.mrb[52].mxu0 %vm112_vm1, %v3814_v9 }
 0x1d2   :  { %15209 = vmatprep.mubr.msk.f32.mxu0 %vm112_vm1, %v3815_v29 }
 0x1d3   :  { %14904 = vmatmul.mubr.msk.f32.gmra.mrb[46].mxu1 %vm112_vm1, %v3807_v15  ;;  %v3822_v15 = vld [vmem:[#allocation2 + $0x4c2] sm:$0xff] }
 0x1d4   :  { %14906 = vmatprep.mubr.msk.f32.mxu1 %vm112_vm1, %v1679_v2 }
 0x1d5   :  { %15210 = vmatmul.mubr.msk.f32.gmra.mrb[54].mxu0 %vm112_vm1, %v3816_v35  ;;  %v3823_v35 = vld [vmem:[#allocation2 + $0x4d2] sm:$0xff] }
 0x1d6   :  { %15212 = vmatprep.mubr.msk.f32.mxu0 %vm112_vm1, %v3817_v37 }
 0x1d7   :  { %14907 = vmatmul.mubr.msk.f32.gmra.mrb[48].mxu1 %vm112_vm1, %v3809_v54  ;;  %v3824_v54 = vld [vmem:[#allocation2 + $0x4e2] sm:$0xff] }
 0x1d8   :  { %14909 = vmatprep.mubr.msk.f32.mxu1 %vm112_vm1, %v3810_v10  ;;  %v1687_v10 = vld [vmem:[#allocation2 + $0x462] sm:$0xff] }
 0x1d9   :  { %15213 = vmatmul.mubr.msk.f32.gmra.mrb[56].mxu0 %vm112_vm1, %v3818_v51 }
 0x1da   :  { %15215 = vmatprep.mubr.msk.f32.mxu0 %vm112_vm1, %v3819_v17 }
 0x1db   :  { %14910 = vmatmul.mubr.msk.f32.gmra.mrb[50].mxu1 %vm112_vm1, %v3811_v1  ;;  %v18601_v1 = vld [vmem:[%s20811_s1 + $0x20] sm:$0x7] }
 0x1dc   :  { %14912 = vmatprep.mubr.msk.f32.mxu1 %vm112_vm1, %v3812_v60 }
 0x1dd   :  { %15216 = vmatmul.mubr.msk.f32.gmra.mrb[58].mxu0 %vm112_vm1, %v3820_v52 }
 0x1de   :  { %15218 = vmatprep.mubr.msk.f32.mxu0 %vm112_vm1, %v3821_v49 }
 0x1df   :  { %14913 = vmatmul.mubr.msk.f32.gmra.mrb[52].mxu1 %vm112_vm1, %v3813_v12 }
 0x1e0   :  { %14915 = vmatprep.mubr.msk.f32.mxu1 %vm112_vm1, %v3814_v9  ;;  %v5193_v9 = vld [vmem:[#allocation2 + $0xf1] sm:$0xff] }
 0x1e1   :  { %15219 = vmatmul.mubr.msk.f32.gmra.mrb[60].mxu0 %vm112_vm1, %v3822_v15 }
 0x1e2   :  { %15221 = vmatprep.mubr.msk.f32.mxu0 %vm112_vm1, %v3823_v35 }
 0x1e3   :  { %14916 = vmatmul.mubr.msk.f32.gmra.mrb[54].mxu1 %vm112_vm1, %v3815_v29  ;;  %v5194_v29 = vld [vmem:[#allocation2 + $0x101] sm:$0xff] }
 0x1e4   :  { %14918 = vmatprep.mubr.msk.f32.mxu1 %vm112_vm1, %v1687_v10 }
 0x1e5   :  { %15222 = vmatmul.mubr.msk.f32.gmra.mrb[62].mxu0 %vm112_vm1, %v3824_v54 }
 0x1e6   :  { %15226 = vmatprep.mubr.msk.f32.mxu0 %vm112_vm1, %v18180_v50  ;;  %v4478_v50 = vld [vmem:[#allocation2 + $0x80] sm:$0xff] }
 0x1e7   :  { %14919 = vmatmul.mubr.msk.f32.gmra.mrb[56].mxu1 %vm112_vm1, %v3817_v37 }
 0x1e8   :  { %14921 = vmatprep.mubr.msk.f32.mxu1 %vm112_vm1, %v3818_v51  ;;  %v5195_v51 = vld [vmem:[#allocation2 + $0x111] sm:$0xff] }
 0x1e9   :  { %15227 = vmatmul.mubr.msk.f32.vlgmr.msra.gmra.mrb[0].mxu0 %vm112_vm1, %v18182_v4  ;;  %v4479_v4 = vld [vmem:[#allocation2 + $0x90] sm:$0xff] }
 0x1ea   :  { %15323 = vmatpush3.msk.msra.mxu0 %vm662_vm0, %v18427_v45  ;;  %15229 = vmatprep.mubr.msk.f32.mxu0 %vm112_vm1, %v18193_v53  ;;  %v4486_v53 = vld [vmem:[#allocation2 + $0x120] sm:$0xff] }
 0x1eb   :  { %15420 = vmatprep.subr.msk.mxu0 %vm662_vm0, %v18601_v1  ;;  %14922 = vmatmul.mubr.msk.f32.gmra.mrb[58].mxu1 %vm112_vm1, %v3819_v17  ;;  %v5186_v45 = vld [vmem:[#allocation2 + $0x61] sm:$0xff] }
 0x1ec   :  { %14924 = vmatprep.mubr.msk.f32.mxu1 %vm112_vm1, %v3820_v52  ;;  %v5196_v17 = vld [vmem:[#allocation2 + $0x121] sm:$0xff] }
 0x1ed   :  { %15230 = vmatmul.mubr.msk.f32.gmra.mrb[2].mxu0 %vm112_vm1, %v18195_v5  ;;  %v4487_v5 = vld [vmem:[#allocation2 + $0x130] sm:$0xff] }
 0x1ee   :  { %15232 = vmatprep.mubr.msk.f32.mxu0 %vm112_vm1, %v18205_v8  ;;  %v4494_v8 = vld [vmem:[#allocation2 + $0x1c0] sm:$0xff] }
 0x1ef   :  { %14925 = vmatmul.mubr.msk.f32.gmra.mrb[60].mxu1 %vm112_vm1, %v3821_v49 }
 0x1f0   :  { %14927 = vmatprep.mubr.msk.f32.mxu1 %vm112_vm1, %v3822_v15  ;;  %v5197_v15 = vld [vmem:[#allocation2 + $0x131] sm:$0xff] }
 0x1f1   :  { %15233 = vmatmul.mubr.msk.f32.gmra.mrb[4].mxu0 %vm112_vm1, %v18207_v58  ;;  %v4495_v58 = vld [vmem:[#allocation2 + $0x1d0] sm:$0xff] }
 0x1f2   :  { %15235 = vmatprep.mubr.msk.f32.mxu0 %vm112_vm1, %v4478_v50  ;;  %v5200_v50 = vld [vmem:[#allocation2 + $0x181] sm:$0xff] }
 0x1f3   :  { %14928 = vmatmul.mubr.msk.f32.gmra.mrb[62].mxu1 %vm112_vm1, %v3823_v35  ;;  %v5198_v35 = vld [vmem:[#allocation2 + $0x161] sm:$0xff] }
 0x1f5   :  { %15236 = vmatmul.mubr.msk.f32.gmra.mrb[6].mxu0 %vm112_vm1, %v4479_v4 }
 0x1f6   :  { %15238 = vmatprep.mubr.msk.f32.mxu0 %vm112_vm1, %v18222_v13  ;;  %v4502_v13 = vld [vmem:[#allocation2 + $0x260] sm:$0xff] }
 0x1f9   :  { %15239 = vmatmul.mubr.msk.f32.gmra.mrb[8].mxu0 %vm112_vm1, %v18224_v16  ;;  %v4503_v16 = vld [vmem:[#allocation2 + $0x270] sm:$0xff] }
 0x1fa   :  { %15241 = vmatprep.mubr.msk.f32.mxu0 %vm112_vm1, %v18234_v20  ;;  %v4510_v20 = vld [vmem:[#allocation2 + $0x300] sm:$0xff] }
 0x1fd   :  { %15242 = vmatmul.mubr.msk.f32.gmra.mrb[10].mxu0 %vm112_vm1, %v18236_v0  ;;  %v4511_v0 = vld [vmem:[#allocation2 + $0x310] sm:$0xff] }
 0x1fe   :  { %15244 = vmatprep.mubr.msk.f32.mxu0 %vm112_vm1, %v18246_v21  ;;  %v4518_v21 = vld [vmem:[#allocation2 + $0x3a0] sm:$0xff] }
 0x201   :  { %15245 = vmatmul.mubr.msk.f32.gmra.mrb[12].mxu0 %vm112_vm1, %v18248_v25  ;;  %v4519_v25 = vld [vmem:[#allocation2 + $0x3b0] sm:$0xff] }
 0x202   :  { %15247 = vmatprep.mubr.msk.f32.mxu0 %vm112_vm1, %v4486_v53 }
 0x205   :  { %15248 = vmatmul.mubr.msk.f32.gmra.mrb[14].mxu0 %vm112_vm1, %v4487_v5  ;;  %v5201_v5 = vld [vmem:[#allocation2 + $0x191] sm:$0xff] }
 0x206   :  { %15250 = vmatprep.mubr.msk.f32.mxu0 %vm112_vm1, %v18263_v30  ;;  %v18699_v30 = vpop.f32.mrb[0].mxu1 }
 0x209   :  { %15251 = vmatmul.mubr.msk.f32.gmra.mrb[16].mxu0 %vm112_vm1, %v18265_v33  ;;  %v18703_v33 = vpop.f32.mrb[1].mxu1 }
 0x20a   :  { %15253 = vmatprep.mubr.msk.f32.mxu0 %vm112_vm1, %v18275_v41  ;;  %v18707_v41 = vpop.f32.mrb[2].mxu1 }
 0x20d   :  { %15254 = vmatmul.mubr.msk.f32.gmra.mrb[18].mxu0 %vm112_vm1, %v18277_v3  ;;  %v18711_v3 = vpop.f32.mrb[3].mxu1 }
 0x20e   :  { %15256 = vmatprep.mubr.msk.f32.mxu0 %vm112_vm1, %v18287_v42  ;;  %v4526_v42 = vld [vmem:[#allocation2 + $0x440] sm:$0xff] }
 0x211   :  { %15257 = vmatmul.mubr.msk.f32.gmra.mrb[20].mxu0 %vm112_vm1, %v18289_v48  ;;  %v18715_v48 = vpop.f32.mrb[4].mxu1 }
 0x212   :  { %15259 = vmatprep.mubr.msk.f32.mxu0 %vm112_vm1, %v4494_v8  ;;  %v5202_v8 = vld [vmem:[#allocation2 + $0x1a1] sm:$0xff] }
 0x215   :  { %15260 = vmatmul.mubr.msk.f32.gmra.mrb[22].mxu0 %vm112_vm1, %v4495_v58 }
 0x216   :  { %15262 = vmatprep.mubr.msk.f32.mxu0 %vm112_vm1, %v18304_v57  ;;  %v4527_v57 = vld [vmem:[#allocation2 + $0x450] sm:$0xff] }
 0x219   :  { %15263 = vmatmul.mubr.msk.f32.gmra.mrb[24].mxu0 %vm112_vm1, %v18306_v62  ;;  %v18718_v62 = vpop.f32.mrb[5].mxu1 }
 0x21a   :  { %15265 = vmatprep.mubr.msk.f32.mxu0 %vm112_vm1, %v18316_v6  ;;  %v18721_v6 = vpop.f32.mrb[6].mxu1 }
 0x21d   :  { %15266 = vmatmul.mubr.msk.f32.gmra.mrb[26].mxu0 %vm112_vm1, %v18318_v11  ;;  %v18725_v11 = vpop.f32.mrb[7].mxu1 }
 0x21e   :  { %15268 = vmatprep.mubr.msk.f32.mxu0 %vm112_vm1, %v18328_v7 }
 0x221   :  { %15269 = vmatmul.mubr.msk.f32.gmra.mrb[28].mxu0 %vm112_vm1, %v18330_v14 }
 0x222   :  { %15271 = vmatprep.mubr.msk.f32.mxu0 %vm112_vm1, %v4502_v13 }
 0x225   :  { %15272 = vmatmul.mubr.msk.f32.gmra.mrb[30].mxu0 %vm112_vm1, %v4503_v16  ;;  %v5203_v16 = vld [vmem:[#allocation2 + $0x1b1] sm:$0xff] }
 0x226   :  { %15274 = vmatprep.mubr.msk.f32.mxu0 %vm112_vm1, %v18345_v19  ;;  %v4534_v19 = vld [vmem:[#allocation2 + $0x4e0] sm:$0xff] }
 0x229   :  { %15275 = vmatmul.mubr.msk.f32.gmra.mrb[32].mxu0 %vm112_vm1, %v18347_v22 }
 0x22a   :  { %15277 = vmatprep.mubr.msk.f32.mxu0 %vm112_vm1, %v18357_v23 }
 0x22d   :  { %15278 = vmatmul.mubr.msk.f32.gmra.mrb[34].mxu0 %vm112_vm1, %v18359_v27  ;;  %v4535_v27 = vld [vmem:[#allocation2 + $0x4f0] sm:$0xff] }
 0x22e   :  { %15280 = vmatprep.mubr.msk.f32.mxu0 %vm112_vm1, %v18369_v28  ;;  %v5182_v28 = vld [vmem:[#allocation2 + $0x21] sm:$0xff] }
 0x231   :  { %15281 = vmatmul.mubr.msk.f32.gmra.mrb[36].mxu0 %vm112_vm1, %v18371_v31 }
 0x232   :  { %15283 = vmatprep.mubr.msk.f32.mxu0 %vm112_vm1, %v4510_v20  ;;  %v5204_v20 = vld [vmem:[#allocation2 + $0x1c1] sm:$0xff] }
 0x235   :  { %15284 = vmatmul.mubr.msk.f32.gmra.mrb[38].mxu0 %vm112_vm1, %v4511_v0 }
 0x236   :  { %15286 = vmatprep.mubr.msk.f32.mxu0 %vm112_vm1, %v18386_v24 }
 0x239   :  { %15287 = vmatmul.mubr.msk.f32.gmra.mrb[40].mxu0 %vm112_vm1, %v18388_v36  ;;  %v5183_v36 = vld [vmem:[#allocation2 + $0x31] sm:$0xff] }
 0x23a   :  { %15289 = vmatprep.mubr.msk.f32.mxu0 %vm112_vm1, %v18398_v39  ;;  %v5184_v39 = vld [vmem:[#allocation2 + $0x41] sm:$0xff] }
 0x23d   :  { %15290 = vmatmul.mubr.msk.f32.gmra.mrb[42].mxu0 %vm112_vm1, %v18400_v40 }
 0x23e   :  { %15292 = vmatprep.mubr.msk.f32.mxu0 %vm112_vm1, %v18410_v43 }
 0x241   :  { %15293 = vmatmul.mubr.msk.f32.gmra.mrb[44].mxu0 %vm112_vm1, %v18412_v44  ;;  %v5185_v44 = vld [vmem:[#allocation2 + $0x51] sm:$0xff] }
 0x242   :  { %15295 = vmatprep.mubr.msk.f32.mxu0 %vm112_vm1, %v4518_v21 }
 0x245   :  { %15296 = vmatmul.mubr.msk.f32.gmra.mrb[46].mxu0 %vm112_vm1, %v4519_v25  ;;  %v5205_v25 = vld [vmem:[#allocation2 + $0x1d1] sm:$0xff] }
 0x246   :  { %15298 = vmatprep.mubr.msk.f32.mxu0 %vm112_vm1, %v18433_v59 }
 0x249   :  { %15299 = vmatmul.mubr.msk.f32.gmra.mrb[48].mxu0 %vm112_vm1, %v18435_v46 }
 0x24a   :  { %15301 = vmatprep.mubr.msk.f32.mxu0 %vm112_vm1, %v18444_v34  ;;  %v5187_v34 = vld [vmem:[#allocation2 + $0x71] sm:$0xff] }
 0x24d   :  { %15302 = vmatmul.mubr.msk.f32.gmra.mrb[50].mxu0 %vm112_vm1, %v18446_v63  ;;  %v5188_v63 = vld [vmem:[#allocation2 + $0x81] sm:$0xff] }
 0x24e   :  { %15304 = vmatprep.mubr.msk.f32.mxu0 %vm112_vm1, %v18454_v61 }
 0x251   :  { %15305 = vmatmul.mubr.msk.f32.gmra.mrb[52].mxu0 %vm112_vm1, %v18456_v26 }
 0x252   :  { %15307 = vmatprep.mubr.msk.f32.mxu0 %vm112_vm1, %v4526_v42  ;;  %v5206_v42 = vld [vmem:[#allocation2 + $0x201] sm:$0xff] }
 0x255   :  { %15308 = vmatmul.mubr.msk.f32.gmra.mrb[54].mxu0 %vm112_vm1, %v4527_v57 }
 0x256   :  { %15310 = vmatprep.mubr.msk.f32.mxu0 %vm112_vm1, %v18468_v18  ;;  %v5189_v18 = vld [vmem:[#allocation2 + $0x91] sm:$0xff] }
 0x259   :  { %15311 = vmatmul.mubr.msk.f32.gmra.mrb[56].mxu0 %vm112_vm1, %v18470_v32  ;;  %v5190_v32 = vld [vmem:[#allocation2 + $0xc1] sm:$0xff] }
 0x25a   :  { %15313 = vmatprep.mubr.msk.f32.mxu0 %vm112_vm1, %v18478_v38  ;;  %v18731_v7 = vpop.f32.mrb[8].mxu1 }
 0x25b   :  { %v18733_v14 = vpop.f32.mrb[9].mxu1 }
 0x25d   :  { %15314 = vmatmul.mubr.msk.f32.gmra.mrb[58].mxu0 %vm112_vm1, %v18480_v47 }
 0x25e   :  { %15316 = vmatprep.mubr.msk.f32.mxu0 %vm112_vm1, %v18488_v55  ;;  %v18739_v22 = vpop.f32.mrb[10].mxu1  ;;  %v5191_v55 = vld [vmem:[#allocation2 + $0xd1] sm:$0xff] }
 0x25f   :  { %v18741_v23 = vpop.f32.mrb[11].mxu1 }
 0x261   :  { %15317 = vmatmul.mubr.msk.f32.gmra.mrb[60].mxu0 %vm112_vm1, %v18490_v56  ;;  %v5192_v56 = vld [vmem:[#allocation2 + $0xe1] sm:$0xff] }
 0x262   :  { %15319 = vmatprep.mubr.msk.f32.mxu0 %vm112_vm1, %v4534_v19  ;;  %v18746_v31 = vpop.f32.mrb[12].mxu1 }
 0x263   :  { %v18748_v24 = vpop.f32.mrb[13].mxu1 }
 0x265   :  { %15320 = vmatmul.mubr.msk.f32.gmra.mrb[62].mxu0 %vm112_vm1, %v4535_v27  ;;  %v5207_v27 = vld [vmem:[#allocation2 + $0x211] sm:$0xff] }
 0x266   :  { %15324 = vmatprep.mubr.msk.f32.mxu0 %vm112_vm1, %v5182_v28  ;;  %v18752_v40 = vpop.f32.mrb[14].mxu1  ;;  %v5208_v28 = vld [vmem:[#allocation2 + $0x221] sm:$0xff] }
 0x267   :  { %v18754_v43 = vpop.f32.mrb[15].mxu1 }
 0x269   :  { %15325 = vmatmul.mubr.msk.f32.vlgmr.msra.gmra.mrb[0].mxu0 %vm112_vm1, %v5183_v36 }
 0x26a   :  { %15421 = vmatpush3.msk.msra.mxu0 %vm662_vm0, %v18601_v1  ;;  %15327 = vmatprep.mubr.msk.f32.mxu0 %vm112_vm1, %v5184_v39  ;;  %v18760_v59 = vpop.f32.mrb[16].mxu1  ;;  %v5199_v1 = vld [vmem:[#allocation2 + $0x171] sm:$0xff]  ;;  %vm17131_vm0 = vmmov 0  }
 0x26b   :  { %v18762_v46 = vpop.f32.mrb[17].mxu1 }
 0x26d   :  { %15328 = vmatmul.mubr.msk.f32.gmra.mrb[2].mxu0 %vm112_vm1, %v5185_v44  ;;  %v5209_v44 = vld [vmem:[#allocation2 + $0x231] sm:$0xff] }
 0x26e   :  { %15330 = vmatprep.mubr.msk.f32.mxu0 %vm112_vm1, %v5186_v45  ;;  %v18766_v61 = vpop.f32.mrb[18].mxu1  ;;  %v5210_v45 = vld [vmem:[#allocation2 + $0x241] sm:$0xff] }
 0x26f   :  { %v18768_v26 = vpop.f32.mrb[19].mxu1 }
 0x271   :  { %15331 = vmatmul.mubr.msk.f32.gmra.mrb[4].mxu0 %vm112_vm1, %v5187_v34 }
 0x272   :  { %15333 = vmatprep.mubr.msk.f32.mxu0 %vm112_vm1, %v5188_v63  ;;  %v18772_v38 = vpop.f32.mrb[20].mxu1 }
 0x273   :  { %v18774_v47 = vpop.f32.mrb[21].mxu1 }
 0x275   :  { %15334 = vmatmul.mubr.msk.f32.gmra.mrb[6].mxu0 %vm112_vm1, %v5189_v18  ;;  %v5211_v18 = vld [vmem:[#allocation2 + $0x251] sm:$0xff] }
 0x276   :  { %15336 = vmatprep.mubr.msk.f32.mxu0 %vm112_vm1, %v5190_v32  ;;  %v18778_v60 = vpop.f32.mrb[22].mxu1  ;;  %v5212_v32 = vld [vmem:[#allocation2 + $0x261] sm:$0xff] }
 0x277   :  { %v18780_v12 = vpop.f32.mrb[23].mxu1 }
 0x279   :  { %15337 = vmatmul.mubr.msk.f32.gmra.mrb[8].mxu0 %vm112_vm1, %v5191_v55 }
 0x27a   :  { %15339 = vmatprep.mubr.msk.f32.mxu0 %vm112_vm1, %v5192_v56  ;;  %v18784_v37 = vpop.f32.mrb[24].mxu1 }
 0x27b   :  { %v18786_v2 = vpop.f32.mrb[25].mxu1 }
 0x27d   :  { %15340 = vmatmul.mubr.msk.f32.gmra.mrb[10].mxu0 %vm112_vm1, %v5193_v9  ;;  %v5213_v9 = vld [vmem:[#allocation2 + $0x271] sm:$0xff] }
 0x27e   :  { %15342 = vmatprep.mubr.msk.f32.mxu0 %vm112_vm1, %v5194_v29  ;;  %v18790_v52 = vpop.f32.mrb[26].mxu1  ;;  %v5214_v29 = vld [vmem:[#allocation2 + $0x2a1] sm:$0xff] }
 0x27f   :  { %v18792_v49 = vpop.f32.mrb[27].mxu1 }
 0x281   :  { %15343 = vmatmul.mubr.msk.f32.gmra.mrb[12].mxu0 %vm112_vm1, %v5195_v51 }
 0x282   :  { %15345 = vmatprep.mubr.msk.f32.mxu0 %vm112_vm1, %v5196_v17  ;;  %v18796_v54 = vpop.f32.mrb[28].mxu1 }
 0x283   :  { %v18798_v10 = vpop.f32.mrb[29].mxu1 }
 0x284   :  { %20829 = vst [vmem:[#allocation7_spill] sm:$0xff] %v18798_v10 }
 0x285   :  { %15346 = vmatmul.mubr.msk.f32.gmra.mrb[14].mxu0 %vm112_vm1, %v5197_v15  ;;  %v5215_v15 = vld [vmem:[#allocation2 + $0x2b1] sm:$0xff] }
 0x286   :  { %15348 = vmatprep.mubr.msk.f32.mxu0 %vm112_vm1, %v5198_v35  ;;  %v18802_v4 = vpop.f32.mrb[30].mxu1  ;;  %v5216_v35 = vld [vmem:[#allocation2 + $0x2c1] sm:$0xff] }
 0x287   :  { %20830 = vst [vmem:[#allocation8_spill] sm:$0xff] %v18802_v4  ;;  %v18804_v53 = vpop.f32.mrb[31].mxu1 }
 0x288   :  { %20831 = vst [vmem:[#allocation9_spill] sm:$0xff] %v18804_v53 }
 0x289   :  { %15349 = vmatmul.mubr.msk.f32.gmra.mrb[16].mxu0 %vm112_vm1, %v5199_v1 }
 0x28a   :  { %15351 = vmatprep.mubr.msk.f32.mxu0 %vm112_vm1, %v5200_v50  ;;  %v18808_v58 = vpop.f32.mrb[32].mxu1 }
 0x28b   :  { %20832 = vst [vmem:[#allocation10_spill] sm:$0xff] %v18808_v58  ;;  %v18810_v13 = vpop.f32.mrb[33].mxu1 }
 0x28c   :  { %20833 = vst [vmem:[#allocation11_spill] sm:$0xff] %v18810_v13 }
 0x28d   :  { %15352 = vmatmul.mubr.msk.f32.gmra.mrb[18].mxu0 %vm112_vm1, %v5201_v5  ;;  %v5217_v5 = vld [vmem:[#allocation2 + $0x2d1] sm:$0xff] }
 0x28e   :  { %15354 = vmatprep.mubr.msk.f32.mxu0 %vm112_vm1, %v5202_v8  ;;  %v18814_v0 = vpop.f32.mrb[34].mxu1  ;;  %v5218_v8 = vld [vmem:[#allocation2 + $0x2e1] sm:$0xff] }
 0x28f   :  { %20834 = vst [vmem:[#allocation12_spill] sm:$0xff] %v18814_v0  ;;  %v18816_v21 = vpop.f32.mrb[35].mxu1 }
 0x290   :  { %20835 = vst [vmem:[#allocation13_spill] sm:$0xff] %v18816_v21 }
 0x291   :  { %15355 = vmatmul.mubr.msk.f32.gmra.mrb[20].mxu0 %vm112_vm1, %v5203_v16 }
 0x292   :  { %15357 = vmatprep.mubr.msk.f32.mxu0 %vm112_vm1, %v5204_v20  ;;  %v18820_v57 = vpop.f32.mrb[36].mxu1 }
 0x293   :  { %20836 = vst [vmem:[#allocation14_spill] sm:$0xff] %v18820_v57  ;;  %v18822_v19 = vpop.f32.mrb[37].mxu1 }
 0x294   :  { %20837 = vst [vmem:[#allocation15_spill] sm:$0xff] %v18822_v19 }
 0x295   :  { %15358 = vmatmul.mubr.msk.f32.gmra.mrb[22].mxu0 %vm112_vm1, %v5205_v25  ;;  %v5219_v25 = vld [vmem:[#allocation2 + $0x2f1] sm:$0xff] }
 0x296   :  { %15360 = vmatprep.mubr.msk.f32.mxu0 %vm112_vm1, %v5206_v42  ;;  %v18826_v36 = vpop.f32.mrb[38].mxu1  ;;  %v5220_v42 = vld [vmem:[#allocation2 + $0x301] sm:$0xff] }
 0x297   :  { %20838 = vst [vmem:[#allocation16_spill] sm:$0xff] %v18826_v36  ;;  %v18828_v39 = vpop.f32.mrb[39].mxu1 }
 0x298   :  { %20839 = vst [vmem:[#allocation17_spill] sm:$0xff] %v18828_v39 }
 0x299   :  { %15361 = vmatmul.mubr.msk.f32.gmra.mrb[24].mxu0 %vm112_vm1, %v5207_v27 }
 0x29a   :  { %15363 = vmatprep.mubr.msk.f32.mxu0 %vm112_vm1, %v5208_v28  ;;  %v18832_v34 = vpop.f32.mrb[40].mxu1 }
 0x29b   :  { %20840 = vst [vmem:[#allocation18_spill] sm:$0xff] %v18832_v34  ;;  %v18834_v63 = vpop.f32.mrb[41].mxu1 }
 0x29c   :  { %20841 = vst [vmem:[#allocation19_spill] sm:$0xff] %v18834_v63 }
 0x29d   :  { %15364 = vmatmul.mubr.msk.f32.gmra.mrb[26].mxu0 %vm112_vm1, %v5209_v44  ;;  %v5221_v44 = vld [vmem:[#allocation2 + $0x311] sm:$0xff] }
 0x29e   :  { %15366 = vmatprep.mubr.msk.f32.mxu0 %vm112_vm1, %v5210_v45  ;;  %v18838_v55 = vpop.f32.mrb[42].mxu1  ;;  %v5222_v45 = vld [vmem:[#allocation2 + $0x341] sm:$0xff] }
 0x29f   :  { %20842 = vst [vmem:[#allocation20_spill] sm:$0xff] %v18838_v55  ;;  %v18840_v56 = vpop.f32.mrb[43].mxu1 }
 0x2a0   :  { %20843 = vst [vmem:[#allocation21_spill] sm:$0xff] %v18840_v56 }
 0x2a1   :  { %15367 = vmatmul.mubr.msk.f32.gmra.mrb[28].mxu0 %vm112_vm1, %v5211_v18 }
 0x2a2   :  { %15369 = vmatprep.mubr.msk.f32.mxu0 %vm112_vm1, %v5212_v32  ;;  %v18844_v51 = vpop.f32.mrb[44].mxu1 }
 0x2a3   :  { %20844 = vst [vmem:[#allocation22_spill] sm:$0xff] %v18844_v51  ;;  %v18846_v17 = vpop.f32.mrb[45].mxu1 }
 0x2a4   :  { %20845 = vst [vmem:[#allocation23_spill] sm:$0xff] %v18846_v17 }
 0x2a5   :  { %15370 = vmatmul.mubr.msk.f32.gmra.mrb[30].mxu0 %vm112_vm1, %v5213_v9  ;;  %v5223_v9 = vld [vmem:[#allocation2 + $0x351] sm:$0xff] }
 0x2a6   :  { %15372 = vmatprep.mubr.msk.f32.mxu0 %vm112_vm1, %v5214_v29  ;;  %v18850_v1 = vpop.f32.mrb[46].mxu1  ;;  %v5224_v29 = vld [vmem:[#allocation2 + $0x361] sm:$0xff] }
 0x2a7   :  { %20846 = vst [vmem:[#allocation24_spill] sm:$0xff] %v18850_v1  ;;  %v18852_v50 = vpop.f32.mrb[47].mxu1 }
 0x2a8   :  { %20847 = vst [vmem:[#allocation25_spill] sm:$0xff] %v18852_v50 }
 0x2a9   :  { %15373 = vmatmul.mubr.msk.f32.gmra.mrb[32].mxu0 %vm112_vm1, %v5215_v15 }
 0x2aa   :  { %15375 = vmatprep.mubr.msk.f32.mxu0 %vm112_vm1, %v5216_v35  ;;  %v18856_v16 = vpop.f32.mrb[48].mxu1 }
 0x2ab   :  { %20848 = vst [vmem:[#allocation26_spill] sm:$0xff] %v18856_v16  ;;  %v18858_v20 = vpop.f32.mrb[49].mxu1 }
 0x2ac   :  { %20849 = vst [vmem:[#allocation27_spill] sm:$0xff] %v18858_v20 }
 0x2ad   :  { %15376 = vmatmul.mubr.msk.f32.gmra.mrb[34].mxu0 %vm112_vm1, %v5217_v5  ;;  %v5225_v5 = vld [vmem:[#allocation2 + $0x371] sm:$0xff] }
 0x2ae   :  { %15378 = vmatprep.mubr.msk.f32.mxu0 %vm112_vm1, %v5218_v8  ;;  %v18862_v27 = vpop.f32.mrb[50].mxu1  ;;  %v5226_v8 = vld [vmem:[#allocation2 + $0x381] sm:$0xff] }
 0x2af   :  { %20850 = vst [vmem:[#allocation28_spill] sm:$0xff] %v18862_v27  ;;  %v18864_v28 = vpop.f32.mrb[51].mxu1 }
 0x2b0   :  { %20851 = vst [vmem:[#allocation29_spill] sm:$0xff] %v18864_v28 }
 0x2b1   :  { %15379 = vmatmul.mubr.msk.f32.gmra.mrb[36].mxu0 %vm112_vm1, %v5219_v25 }
 0x2b2   :  { %15381 = vmatprep.mubr.msk.f32.mxu0 %vm112_vm1, %v5220_v42  ;;  %v18868_v18 = vpop.f32.mrb[52].mxu1 }
 0x2b3   :  { %20852 = vst [vmem:[#allocation30_spill] sm:$0xff] %v18868_v18  ;;  %v18870_v32 = vpop.f32.mrb[53].mxu1 }
 0x2b4   :  { %20853 = vst [vmem:[#allocation31_spill] sm:$0xff] %v18870_v32 }
 0x2b5   :  { %15382 = vmatmul.mubr.msk.f32.gmra.mrb[38].mxu0 %vm112_vm1, %v5221_v44  ;;  %v5227_v44 = vld [vmem:[#allocation2 + $0x391] sm:$0xff] }
 0x2b6   :  { %15384 = vmatprep.mubr.msk.f32.mxu0 %vm112_vm1, %v5222_v45  ;;  %v18874_v15 = vpop.f32.mrb[54].mxu1  ;;  %v5228_v45 = vld [vmem:[#allocation2 + $0x3a1] sm:$0xff] }
 0x2b7   :  { %20854 = vst [vmem:[#allocation32_spill] sm:$0xff] %v18874_v15  ;;  %v18876_v35 = vpop.f32.mrb[55].mxu1 }
 0x2b8   :  { %20855 = vst [vmem:[#allocation33_spill] sm:$0xff] %v18876_v35 }
 0x2b9   :  { %15385 = vmatmul.mubr.msk.f32.gmra.mrb[40].mxu0 %vm112_vm1, %v5223_v9  ;;  %v5229_v9 = vld [vmem:[#allocation2 + $0x3b1] sm:$0xff] }
 0x2ba   :  { %15387 = vmatprep.mubr.msk.f32.mxu0 %vm112_vm1, %v5224_v29  ;;  %v18880_v25 = vpop.f32.mrb[56].mxu1  ;;  %v5230_v29 = vld [vmem:[#allocation2 + $0x3e1] sm:$0xff] }
 0x2bb   :  { %20856 = vst [vmem:[#allocation34_spill] sm:$0xff] %v18880_v25  ;;  %v18882_v42 = vpop.f32.mrb[57].mxu1 }
 0x2bc   :  { %20857 = vst [vmem:[#allocation35_spill] sm:$0xff] %v18882_v42 }
 0x2bd   :  { %15388 = vmatmul.mubr.msk.f32.gmra.mrb[42].mxu0 %vm112_vm1, %v5225_v5  ;;  %v5231_v5 = vld [vmem:[#allocation2 + $0x3f1] sm:$0xff] }
 0x2be   :  { %15390 = vmatprep.mubr.msk.f32.mxu0 %vm112_vm1, %v5226_v8  ;;  %v18886_v32 = vpop.f32.mrb[58].mxu1  ;;  %v5232_v8 = vld [vmem:[#allocation2 + $0x401] sm:$0xff] }
 0x2bf   :  { %20858 = vst [vmem:[#allocation36_spill] sm:$0xff] %v18886_v32  ;;  %v18888_v15 = vpop.f32.mrb[59].mxu1 }
 0x2c0   :  { %20859 = vst [vmem:[#allocation37_spill] sm:$0xff] %v18888_v15 }
 0x2c1   :  { %15391 = vmatmul.mubr.msk.f32.gmra.mrb[44].mxu0 %vm112_vm1, %v5227_v44  ;;  %v5233_v44 = vld [vmem:[#allocation2 + $0x411] sm:$0xff] }
 0x2c2   :  { %15393 = vmatprep.mubr.msk.f32.mxu0 %vm112_vm1, %v5228_v45  ;;  %v18892_v35 = vpop.f32.mrb[60].mxu1  ;;  %v5234_v45 = vld [vmem:[#allocation2 + $0x421] sm:$0xff] }
 0x2c3   :  { %20860 = vst [vmem:[#allocation38_spill] sm:$0xff] %v18892_v35  ;;  %v18894_v25 = vpop.f32.mrb[61].mxu1 }
 0x2c4   :  { %20861 = vst [vmem:[#allocation39_spill] sm:$0xff] %v18894_v25  ;;  %v5235_v25 = vld [vmem:[#allocation2 + $0x431] sm:$0xff] }
 0x2c5   :  { %15394 = vmatmul.mubr.msk.f32.gmra.mrb[46].mxu0 %vm112_vm1, %v5229_v9  ;;  %v5236_v9 = vld [vmem:[#allocation2 + $0x441] sm:$0xff] }
 0x2c6   :  { %15396 = vmatprep.mubr.msk.f32.mxu0 %vm112_vm1, %v5230_v29  ;;  %v18898_v42 = vpop.f32.mrb[62].mxu1  ;;  %v5237_v29 = vld [vmem:[#allocation2 + $0x451] sm:$0xff] }
 0x2c7   :  { %20862 = vst [vmem:[#allocation40_spill] sm:$0xff] %v18898_v42  ;;  %v18900_v32 = vpop.f32.mrb[63].mxu1  ;;  %v5238_v42 = vld [vmem:[#allocation2 + $0x481] sm:$0xff] }
 0x2c8   :  { %20863 = vst [vmem:[#allocation41_spill] sm:$0xff] %v18900_v32  ;;  %v6870_v32 = vlaneseq }
 0x2c9   :  { %15397 = vmatmul.mubr.msk.f32.gmra.mrb[48].mxu0 %vm112_vm1, %v5231_v5  ;;  %v5239_v5 = vld [vmem:[#allocation2 + $0x491] sm:$0xff] }
 0x2ca   :  { %15399 = vmatprep.mubr.msk.f32.mxu0 %vm112_vm1, %v5232_v8  ;;  %v5240_v8 = vld [vmem:[#allocation2 + $0x4a1] sm:$0xff] }
 0x2cd   :  { %15400 = vmatmul.mubr.msk.f32.gmra.mrb[50].mxu0 %vm112_vm1, %v5233_v44  ;;  %v5241_v44 = vld [vmem:[#allocation2 + $0x4b1] sm:$0xff] }
 0x2ce   :  { %15402 = vmatprep.mubr.msk.f32.mxu0 %vm112_vm1, %v5234_v45  ;;  %v5242_v45 = vld [vmem:[#allocation2 + $0x4c1] sm:$0xff] }
 0x2d1   :  { %15403 = vmatmul.mubr.msk.f32.gmra.mrb[52].mxu0 %vm112_vm1, %v5235_v25  ;;  %v5243_v25 = vld [vmem:[#allocation2 + $0x4d1] sm:$0xff] }
 0x2d2   :  { %15405 = vmatprep.mubr.msk.f32.mxu0 %vm112_vm1, %v5236_v9  ;;  %v5244_v9 = vld [vmem:[#allocation2 + $0x4e1] sm:$0xff] }
 0x2d5   :  { %15406 = vmatmul.mubr.msk.f32.gmra.mrb[54].mxu0 %vm112_vm1, %v5237_v29  ;;  %v5245_v29 = vld [vmem:[#allocation2 + $0x4f1] sm:$0xff] }
 0x2d6   :  { %15408 = vmatprep.mubr.msk.f32.mxu0 %vm112_vm1, %v5238_v42  ;;  %v5892_v42 = vld [vmem:[#allocation2 + $0x22] sm:$0xff] }
 0x2d9   :  { %15409 = vmatmul.mubr.msk.f32.gmra.mrb[56].mxu0 %vm112_vm1, %v5239_v5  ;;  %v5893_v5 = vld [vmem:[#allocation2 + $0x32] sm:$0xff] }
 0x2da   :  { %15411 = vmatprep.mubr.msk.f32.mxu0 %vm112_vm1, %v5240_v8  ;;  %v5894_v8 = vld [vmem:[#allocation2 + $0x42] sm:$0xff] }
 0x2dd   :  { %15412 = vmatmul.mubr.msk.f32.gmra.mrb[58].mxu0 %vm112_vm1, %v5241_v44  ;;  %v5895_v44 = vld [vmem:[#allocation2 + $0x52] sm:$0xff] }
 0x2de   :  { %15414 = vmatprep.mubr.msk.f32.mxu0 %vm112_vm1, %v5242_v45  ;;  %v5896_v45 = vld [vmem:[#allocation2 + $0x62] sm:$0xff] }
 0x2e1   :  { %15415 = vmatmul.mubr.msk.f32.gmra.mrb[60].mxu0 %vm112_vm1, %v5243_v25  ;;  %v5897_v25 = vld [vmem:[#allocation2 + $0x72] sm:$0xff] }
 0x2e2   :  { %15417 = vmatprep.mubr.msk.f32.mxu0 %vm112_vm1, %v5244_v9  ;;  %v5898_v9 = vld [vmem:[#allocation2 + $0x82] sm:$0xff] }
 0x2e5   :  { %15418 = vmatmul.mubr.msk.f32.gmra.mrb[62].mxu0 %vm112_vm1, %v5245_v29  ;;  %v5899_v29 = vld [vmem:[#allocation2 + $0x92] sm:$0xff] }
 0x2e6   :  { %15422 = vmatprep.mubr.msk.f32.mxu0 %vm112_vm1, %v5892_v42  ;;  %v5900_v42 = vld [vmem:[#allocation2 + $0xc2] sm:$0xff] }
 0x2e9   :  { %15423 = vmatmul.mubr.msk.f32.vlgmr.msra.gmra.mrb[0].mxu0 %vm112_vm1, %v5893_v5  ;;  %v5901_v5 = vld [vmem:[#allocation2 + $0xd2] sm:$0xff] }
 0x2ea   :  { %15425 = vmatprep.mubr.msk.f32.mxu0 %vm112_vm1, %v5894_v8  ;;  %v5902_v8 = vld [vmem:[#allocation2 + $0xe2] sm:$0xff] }
 0x2ed   :  { %15426 = vmatmul.mubr.msk.f32.gmra.mrb[2].mxu0 %vm112_vm1, %v5895_v44  ;;  %v5903_v44 = vld [vmem:[#allocation2 + $0xf2] sm:$0xff] }
 0x2ee   :  { %15428 = vmatprep.mubr.msk.f32.mxu0 %vm112_vm1, %v5896_v45  ;;  %v5904_v45 = vld [vmem:[#allocation2 + $0x102] sm:$0xff] }
 0x2f1   :  { %15429 = vmatmul.mubr.msk.f32.gmra.mrb[4].mxu0 %vm112_vm1, %v5897_v25  ;;  %v5905_v25 = vld [vmem:[#allocation2 + $0x112] sm:$0xff] }
 0x2f2   :  { %15431 = vmatprep.mubr.msk.f32.mxu0 %vm112_vm1, %v5898_v9  ;;  %v5906_v9 = vld [vmem:[#allocation2 + $0x122] sm:$0xff] }
 0x2f5   :  { %15432 = vmatmul.mubr.msk.f32.gmra.mrb[6].mxu0 %vm112_vm1, %v5899_v29  ;;  %v5907_v29 = vld [vmem:[#allocation2 + $0x132] sm:$0xff] }
 0x2f6   :  { %15434 = vmatprep.mubr.msk.f32.mxu0 %vm112_vm1, %v5900_v42  ;;  %v5908_v42 = vld [vmem:[#allocation2 + $0x162] sm:$0xff] }
 0x2f9   :  { %15435 = vmatmul.mubr.msk.f32.gmra.mrb[8].mxu0 %vm112_vm1, %v5901_v5  ;;  %v5909_v5 = vld [vmem:[#allocation2 + $0x172] sm:$0xff] }
 0x2fa   :  { %15437 = vmatprep.mubr.msk.f32.mxu0 %vm112_vm1, %v5902_v8  ;;  %v5910_v8 = vld [vmem:[#allocation2 + $0x182] sm:$0xff] }
 0x2fd   :  { %15438 = vmatmul.mubr.msk.f32.gmra.mrb[10].mxu0 %vm112_vm1, %v5903_v44  ;;  %v5911_v44 = vld [vmem:[#allocation2 + $0x192] sm:$0xff] }
 0x2fe   :  { %15440 = vmatprep.mubr.msk.f32.mxu0 %vm112_vm1, %v5904_v45  ;;  %v5912_v45 = vld [vmem:[#allocation2 + $0x1a2] sm:$0xff] }
 0x301   :  { %15441 = vmatmul.mubr.msk.f32.gmra.mrb[12].mxu0 %vm112_vm1, %v5905_v25  ;;  %v5913_v25 = vld [vmem:[#allocation2 + $0x1b2] sm:$0xff] }
 0x302   :  { %15443 = vmatprep.mubr.msk.f32.mxu0 %vm112_vm1, %v5906_v9  ;;  %v5914_v9 = vld [vmem:[#allocation2 + $0x1c2] sm:$0xff] }
 0x305   :  { %15444 = vmatmul.mubr.msk.f32.gmra.mrb[14].mxu0 %vm112_vm1, %v5907_v29  ;;  %v5915_v29 = vld [vmem:[#allocation2 + $0x1d2] sm:$0xff] }
 0x306   :  { %15446 = vmatprep.mubr.msk.f32.mxu0 %vm112_vm1, %v5908_v42  ;;  %v5916_v42 = vld [vmem:[#allocation2 + $0x202] sm:$0xff] }
 0x309   :  { %15447 = vmatmul.mubr.msk.f32.gmra.mrb[16].mxu0 %vm112_vm1, %v5909_v5  ;;  %v5917_v5 = vld [vmem:[#allocation2 + $0x212] sm:$0xff] }
 0x30a   :  { %15449 = vmatprep.mubr.msk.f32.mxu0 %vm112_vm1, %v5910_v8  ;;  %v5918_v8 = vld [vmem:[#allocation2 + $0x222] sm:$0xff] }
 0x30d   :  { %15450 = vmatmul.mubr.msk.f32.gmra.mrb[18].mxu0 %vm112_vm1, %v5911_v44  ;;  %v5919_v44 = vld [vmem:[#allocation2 + $0x232] sm:$0xff] }
 0x30e   :  { %15452 = vmatprep.mubr.msk.f32.mxu0 %vm112_vm1, %v5912_v45  ;;  %v5920_v45 = vld [vmem:[#allocation2 + $0x242] sm:$0xff] }
 0x311   :  { %15453 = vmatmul.mubr.msk.f32.gmra.mrb[20].mxu0 %vm112_vm1, %v5913_v25  ;;  %v5921_v25 = vld [vmem:[#allocation2 + $0x252] sm:$0xff] }
 0x312   :  { %15455 = vmatprep.mubr.msk.f32.mxu0 %vm112_vm1, %v5914_v9  ;;  %v5922_v9 = vld [vmem:[#allocation2 + $0x262] sm:$0xff] }
 0x315   :  { %15456 = vmatmul.mubr.msk.f32.gmra.mrb[22].mxu0 %vm112_vm1, %v5915_v29  ;;  %v5923_v29 = vld [vmem:[#allocation2 + $0x272] sm:$0xff] }
 0x316   :  { %15458 = vmatprep.mubr.msk.f32.mxu0 %vm112_vm1, %v5916_v42  ;;  %v5924_v42 = vld [vmem:[#allocation2 + $0x2a2] sm:$0xff] }
 0x319   :  { %15459 = vmatmul.mubr.msk.f32.gmra.mrb[24].mxu0 %vm112_vm1, %v5917_v5  ;;  %v5925_v5 = vld [vmem:[#allocation2 + $0x2b2] sm:$0xff] }
 0x31a   :  { %15461 = vmatprep.mubr.msk.f32.mxu0 %vm112_vm1, %v5918_v8  ;;  %v5926_v8 = vld [vmem:[#allocation2 + $0x2c2] sm:$0xff] }
 0x31d   :  { %15462 = vmatmul.mubr.msk.f32.gmra.mrb[26].mxu0 %vm112_vm1, %v5919_v44  ;;  %v5927_v44 = vld [vmem:[#allocation2 + $0x2d2] sm:$0xff] }
 0x31e   :  { %15464 = vmatprep.mubr.msk.f32.mxu0 %vm112_vm1, %v5920_v45  ;;  %v5928_v45 = vld [vmem:[#allocation2 + $0x2e2] sm:$0xff] }
 0x321   :  { %15465 = vmatmul.mubr.msk.f32.gmra.mrb[28].mxu0 %vm112_vm1, %v5921_v25  ;;  %v5929_v25 = vld [vmem:[#allocation2 + $0x2f2] sm:$0xff] }
 0x322   :  { %15467 = vmatprep.mubr.msk.f32.mxu0 %vm112_vm1, %v5922_v9  ;;  %v5930_v9 = vld [vmem:[#allocation2 + $0x302] sm:$0xff] }
 0x325   :  { %15468 = vmatmul.mubr.msk.f32.gmra.mrb[30].mxu0 %vm112_vm1, %v5923_v29  ;;  %v5931_v29 = vld [vmem:[#allocation2 + $0x312] sm:$0xff] }
 0x326   :  { %15470 = vmatprep.mubr.msk.f32.mxu0 %vm112_vm1, %v5924_v42  ;;  %v5932_v42 = vld [vmem:[#allocation2 + $0x342] sm:$0xff] }
 0x329   :  { %15471 = vmatmul.mubr.msk.f32.gmra.mrb[32].mxu0 %vm112_vm1, %v5925_v5  ;;  %v5933_v5 = vld [vmem:[#allocation2 + $0x352] sm:$0xff] }
 0x32a   :  { %15473 = vmatprep.mubr.msk.f32.mxu0 %vm112_vm1, %v5926_v8  ;;  %v5934_v8 = vld [vmem:[#allocation2 + $0x362] sm:$0xff] }
 0x32d   :  { %15474 = vmatmul.mubr.msk.f32.gmra.mrb[34].mxu0 %vm112_vm1, %v5927_v44  ;;  %v5935_v44 = vld [vmem:[#allocation2 + $0x372] sm:$0xff] }
 0x32e   :  { %15476 = vmatprep.mubr.msk.f32.mxu0 %vm112_vm1, %v5928_v45  ;;  %v5936_v45 = vld [vmem:[#allocation2 + $0x382] sm:$0xff] }
 0x331   :  { %15477 = vmatmul.mubr.msk.f32.gmra.mrb[36].mxu0 %vm112_vm1, %v5929_v25  ;;  %v5937_v25 = vld [vmem:[#allocation2 + $0x392] sm:$0xff] }
 0x332   :  { %15479 = vmatprep.mubr.msk.f32.mxu0 %vm112_vm1, %v5930_v9  ;;  %v5938_v9 = vld [vmem:[#allocation2 + $0x3a2] sm:$0xff] }
 0x335   :  { %15480 = vmatmul.mubr.msk.f32.gmra.mrb[38].mxu0 %vm112_vm1, %v5931_v29  ;;  %v5939_v29 = vld [vmem:[#allocation2 + $0x3b2] sm:$0xff] }
 0x336   :  { %15482 = vmatprep.mubr.msk.f32.mxu0 %vm112_vm1, %v5932_v42  ;;  %v5940_v42 = vld [vmem:[#allocation2 + $0x3e2] sm:$0xff] }
 0x339   :  { %15483 = vmatmul.mubr.msk.f32.gmra.mrb[40].mxu0 %vm112_vm1, %v5933_v5  ;;  %v5941_v5 = vld [vmem:[#allocation2 + $0x3f2] sm:$0xff] }
 0x33a   :  { %15485 = vmatprep.mubr.msk.f32.mxu0 %vm112_vm1, %v5934_v8  ;;  %v5942_v8 = vld [vmem:[#allocation2 + $0x402] sm:$0xff] }
 0x33d   :  { %15486 = vmatmul.mubr.msk.f32.gmra.mrb[42].mxu0 %vm112_vm1, %v5935_v44  ;;  %v5943_v44 = vld [vmem:[#allocation2 + $0x412] sm:$0xff] }
 0x33e   :  { %15488 = vmatprep.mubr.msk.f32.mxu0 %vm112_vm1, %v5936_v45  ;;  %v5944_v45 = vld [vmem:[#allocation2 + $0x422] sm:$0xff] }
 0x341   :  { %15489 = vmatmul.mubr.msk.f32.gmra.mrb[44].mxu0 %vm112_vm1, %v5937_v25  ;;  %v5945_v25 = vld [vmem:[#allocation2 + $0x432] sm:$0xff] }
 0x342   :  { %15491 = vmatprep.mubr.msk.f32.mxu0 %vm112_vm1, %v5938_v9  ;;  %v5946_v9 = vld [vmem:[#allocation2 + $0x442] sm:$0xff] }
 0x345   :  { %15492 = vmatmul.mubr.msk.f32.gmra.mrb[46].mxu0 %vm112_vm1, %v5939_v29  ;;  %v5947_v29 = vld [vmem:[#allocation2 + $0x452] sm:$0xff] }
 0x346   :  { %15494 = vmatprep.mubr.msk.f32.mxu0 %vm112_vm1, %v5940_v42  ;;  %v5948_v42 = vld [vmem:[#allocation2 + $0x482] sm:$0xff] }
 0x349   :  { %15495 = vmatmul.mubr.msk.f32.gmra.mrb[48].mxu0 %vm112_vm1, %v5941_v5  ;;  %v5949_v5 = vld [vmem:[#allocation2 + $0x492] sm:$0xff] }
 0x34a   :  { %15497 = vmatprep.mubr.msk.f32.mxu0 %vm112_vm1, %v5942_v8  ;;  %v5950_v8 = vld [vmem:[#allocation2 + $0x4a2] sm:$0xff] }
 0x34d   :  { %15498 = vmatmul.mubr.msk.f32.gmra.mrb[50].mxu0 %vm112_vm1, %v5943_v44  ;;  %v20864_v44 = vmov 0.0  }
 0x34e   :  { %15500 = vmatprep.mubr.msk.f32.mxu0 %vm112_vm1, %v5944_v45  ;;  %8437 = vst.msk [vmem:[#allocation3 + $0x8] sm:$0x3f] %vm8435_vm3, %v20864_v44  ;;  %8436 = vst.msk [vmem:[#allocation3] sm:$0x3f] %vm8435_vm3, %v20864_v44  ;;  %v5951_v45 = vld [vmem:[#allocation2 + $0x4b2] sm:$0xff] }
 0x34f   :  { %8438 = vst.msk [vmem:[#allocation3 + $0x10] sm:$0x3f] %vm8435_vm3, %v20864_v44  ;;  %8439 = vst.msk [vmem:[#allocation3 + $0x18] sm:$0x3f] %vm8435_vm3, %v20864_v44 }
 0x350   :  { %8440 = vst.msk [vmem:[#allocation3 + $0x20] sm:$0x3f] %vm8435_vm3, %v20864_v44  ;;  %8441 = vst.msk [vmem:[#allocation3 + $0x28] sm:$0x3f] %vm8435_vm3, %v20864_v44 }
 0x351   :  { %15501 = vmatmul.mubr.msk.f32.gmra.mrb[52].mxu0 %vm112_vm1, %v5945_v25  ;;  %8442 = vst.msk [vmem:[#allocation3 + $0x30] sm:$0x3f] %vm8435_vm3, %v20864_v44  ;;  %8443 = vst.msk [vmem:[#allocation3 + $0x38] sm:$0x3f] %vm8435_vm3, %v20864_v44  ;;  %v5952_v25 = vld [vmem:[#allocation2 + $0x4c2] sm:$0xff] }
 0x352   :  { %15503 = vmatprep.mubr.msk.f32.mxu0 %vm112_vm1, %v5946_v9  ;;  %8444 = vst.msk [vmem:[#allocation3 + $0x40] sm:$0x3f] %vm8435_vm3, %v20864_v44  ;;  %8445 = vst.msk [vmem:[#allocation3 + $0x48] sm:$0x3f] %vm8435_vm3, %v20864_v44  ;;  %v5953_v9 = vld [vmem:[#allocation2 + $0x4d2] sm:$0xff] }
 0x353   :  { %8446 = vst.msk [vmem:[#allocation3 + $0x50] sm:$0x3f] %vm8435_vm3, %v20864_v44  ;;  %8447 = vst.msk [vmem:[#allocation3 + $0x58] sm:$0x3f] %vm8435_vm3, %v20864_v44 }
 0x354   :  { %8448 = vst.msk [vmem:[#allocation3 + $0x60] sm:$0x3f] %vm8435_vm3, %v20864_v44  ;;  %8449 = vst.msk [vmem:[#allocation3 + $0x68] sm:$0x3f] %vm8435_vm3, %v20864_v44 }
 0x355   :  { %15504 = vmatmul.mubr.msk.f32.gmra.mrb[54].mxu0 %vm112_vm1, %v5947_v29  ;;  %8450 = vst.msk [vmem:[#allocation3 + $0x70] sm:$0x3f] %vm8435_vm3, %v20864_v44  ;;  %8451 = vst.msk [vmem:[#allocation3 + $0x78] sm:$0x3f] %vm8435_vm3, %v20864_v44  ;;  %v5954_v29 = vld [vmem:[#allocation2 + $0x4e2] sm:$0xff] }
 0x356   :  { %15506 = vmatprep.mubr.msk.f32.mxu0 %vm112_vm1, %v5948_v42  ;;  %8452 = vst.msk [vmem:[#allocation3 + $0x80] sm:$0x3f] %vm8435_vm3, %v20864_v44  ;;  %8453 = vst.msk [vmem:[#allocation3 + $0x88] sm:$0x3f] %vm8435_vm3, %v20864_v44  ;;  %v5955_v42 = vld [vmem:[#allocation2 + $0x4f2] sm:$0xff] }
 0x357   :  { %8454 = vst.msk [vmem:[#allocation3 + $0x90] sm:$0x3f] %vm8435_vm3, %v20864_v44  ;;  %8455 = vst.msk [vmem:[#allocation3 + $0x98] sm:$0x3f] %vm8435_vm3, %v20864_v44 }
 0x358   :  { %8456 = vst.msk [vmem:[#allocation3 + $0xa0] sm:$0x3f] %vm8435_vm3, %v20864_v44  ;;  %8457 = vst.msk [vmem:[#allocation3 + $0xa8] sm:$0x3f] %vm8435_vm3, %v20864_v44 }
 0x359   :  { %15507 = vmatmul.mubr.msk.f32.gmra.mrb[56].mxu0 %vm112_vm1, %v5949_v5  ;;  %8458 = vst.msk [vmem:[#allocation3 + $0xb0] sm:$0x3f] %vm8435_vm3, %v20864_v44  ;;  %8459 = vst.msk [vmem:[#allocation3 + $0xb8] sm:$0x3f] %vm8435_vm3, %v20864_v44  ;;  %v13491_v5 = vld [vmem:[%s20812_s2 + $0x40] sm:$0xff] }
 0x35a   :  { %8460 = vst.msk [vmem:[#allocation3 + $0xc0] sm:$0x3f] %vm8435_vm3, %v20864_v44  ;;  %8461 = vst.msk [vmem:[#allocation3 + $0xc8] sm:$0x3f] %vm8435_vm3, %v20864_v44  ;;  %15509 = vmatprep.mubr.msk.f32.mxu0 %vm112_vm1, %v5950_v8  ;;  %v13492_v8 = vld [vmem:[%s20812_s2 + $0x48] sm:$0xff] }
 0x35b   :  { %8462 = vst.msk [vmem:[#allocation3 + $0xd0] sm:$0x3f] %vm8435_vm3, %v20864_v44  ;;  %8463 = vst.msk [vmem:[#allocation3 + $0xd8] sm:$0x3f] %vm8435_vm3, %v20864_v44 }
 0x35c   :  { %8464 = vst.msk [vmem:[#allocation3 + $0xe0] sm:$0x3f] %vm8435_vm3, %v20864_v44  ;;  %8465 = vst.msk [vmem:[#allocation3 + $0xe8] sm:$0x3f] %vm8435_vm3, %v20864_v44 }
 0x35d   :  { %8466 = vst.msk [vmem:[#allocation3 + $0xf0] sm:$0x3f] %vm8435_vm3, %v20864_v44  ;;  %8467 = vst.msk [vmem:[#allocation3 + $0xf8] sm:$0x3f] %vm8435_vm3, %v20864_v44  ;;  %15510 = vmatmul.mubr.msk.f32.gmra.mrb[58].mxu0 %vm112_vm1, %v5951_v45  ;;  %v15987_v45 = vpack.c.bf16 %v13492_v8, %v13491_v5  ;;  %v13496_v5 = vld [vmem:[%s20812_s2 + $0x68] sm:$0xff] }
 0x35e   :  { %8468 = vst.msk [vmem:[#allocation3 + $0x100] sm:$0x3f] %vm8435_vm3, %v20864_v44  ;;  %8469 = vst.msk [vmem:[#allocation3 + $0x108] sm:$0x3f] %vm8435_vm3, %v20864_v44  ;;  %15512 = vmatprep.mubr.msk.f32.mxu0 %vm112_vm1, %v5952_v25  ;;  %v13493_v25 = vld [vmem:[%s20812_s2 + $0x50] sm:$0xff] }
 0x35f   :  { %8470 = vst.msk [vmem:[#allocation3 + $0x110] sm:$0x3f] %vm8435_vm3, %v20864_v44  ;;  %8471 = vst.msk [vmem:[#allocation3 + $0x118] sm:$0x3f] %vm8435_vm3, %v20864_v44  ;;  %15988 = vmatprep.subr.bf16.mxu1 %v15987_v45 }
 0x360   :  { %8472 = vst.msk [vmem:[#allocation3 + $0x120] sm:$0x3f] %vm8435_vm3, %v20864_v44  ;;  %8473 = vst.msk [vmem:[#allocation3 + $0x128] sm:$0x3f] %vm8435_vm3, %v20864_v44  ;;  %15990 = vmatpush3.bf16.msra.mxu1 %v15987_v45  ;;  %v13497_v45 = vld [vmem:[%s20812_s2 + $0x70] sm:$0xff] }
 0x361   :  { %8474 = vst.msk [vmem:[#allocation3 + $0x130] sm:$0x3f] %vm8435_vm3, %v20864_v44  ;;  %8475 = vst.msk [vmem:[#allocation3 + $0x138] sm:$0x3f] %vm8435_vm3, %v20864_v44  ;;  %15513 = vmatmul.mubr.msk.f32.gmra.mrb[60].mxu0 %vm112_vm1, %v5953_v9  ;;  %v13494_v9 = vld [vmem:[%s20812_s2 + $0x58] sm:$0xff] }
 0x362   :  { %8476 = vst.msk [vmem:[#allocation3 + $0x140] sm:$0x3f] %vm8435_vm3, %v20864_v44  ;;  %8477 = vst.msk [vmem:[#allocation3 + $0x148] sm:$0x3f] %vm8435_vm3, %v20864_v44  ;;  %15515 = vmatprep.mubr.msk.f32.mxu0 %vm112_vm1, %v5954_v29  ;;  %v15991_v29 = vpack.c.bf16 %v13494_v9, %v13493_v25  ;;  %v13498_v25 = vld [vmem:[%s20812_s2 + $0x78] sm:$0xff] }
 0x363   :  { %8478 = vst.msk [vmem:[#allocation3 + $0x150] sm:$0x3f] %vm8435_vm3, %v20864_v44  ;;  %8479 = vst.msk [vmem:[#allocation3 + $0x158] sm:$0x3f] %vm8435_vm3, %v20864_v44  ;;  %v15999_v9 = vpack.c.bf16 %v13498_v25, %v13497_v45  ;;  %v19109_v45 = vshrl.u32 %v6870_v32, 7 }
 0x364   :  { %8480 = vst.msk [vmem:[#allocation3 + $0x160] sm:$0x3f] %vm8435_vm3, %v20864_v44  ;;  %8481 = vst.msk [vmem:[#allocation3 + $0x168] sm:$0x3f] %vm8435_vm3, %v20864_v44  ;;  %15992 = vmatprep.subr.bf16.mxu1 %v15991_v29 }
 0x365   :  { %8482 = vst.msk [vmem:[#allocation3 + $0x170] sm:$0x3f] %vm8435_vm3, %v20864_v44  ;;  %8483 = vst.msk [vmem:[#allocation3 + $0x178] sm:$0x3f] %vm8435_vm3, %v20864_v44  ;;  %15516 = vmatmul.mubr.msk.f32.gmra.mrb[62].mxu0 %vm112_vm1, %v5955_v42  ;;  %15994 = vmatpush3.bf16.msra.mxu1 %v15991_v29  ;;  %v13495_v42 = vld [vmem:[%s20812_s2 + $0x60] sm:$0xff]  ;;  %vm12187_vm1 = vcmask 261120  }
 0x366   :  { %v15995_v8 = vpack.c.bf16 %v13496_v5, %v13495_v42  ;;  %v17128_v29 = vmov 1983009808   ;;  %v19104_v42 = vld [vmem:[%s20813_s3] ss:$0 sm:$0xff]  ;;  %20865 = vst [vmem:[#allocation42_spill] sm:$0xff] %v19109_v45  ;;  %vm12881_vm3 = vcmask 33792  }
 0x367   :  { %v6868_v44 = vunpack.c.l.s4 %v17128_v29 }
 0x368   :  { %15996 = vmatprep.subr.bf16.mxu1 %v15995_v8 }
 0x369   :  { %15998 = vmatpush3.bf16.msra.mxu1 %v15995_v8  ;;  %v6869_v28 = vunpack.c.0.s8 %v6868_v44 }
 0x36a   :  { %16000 = vmatprep.subr.bf16.mxu1 %v15999_v9 }
 0x36d   :  { %16002 = vmatpush3.bf16.msra.mxu1 %v15999_v9 }
 0x3bc   :  { %v15424_v35 = vpop.f32.mrb[0].mxu0 }
 0x3bd   :  { %v16263_v5 = vadd.f32 %v15424_v35, %v18699_v30  ;;  %v6219_v8 = vpop.f32.mrb[1].mxu0 }
 0x3be   :  { %v16264_v15 = vadd.f32 %v6219_v8, %v18703_v33  ;;  %v19116_v33 = vsub.s32 %v6869_v28, %v19109_v45 }
 0x3bf   :  { %v6610_v18 = vadd.f32 %v16263_v5, %v19104_v42 }
 0x3c0   :  { %v6609_v25 = vadd.f32 %v16264_v15, %v19104_v42  ;;  %v15427_v9 = vpop.f32.mrb[2].mxu0 }
 0x3c1   :  { %v6674_v29 = vmax.f32 %v6610_v18, 0.0  ;;  %v16265_v27 = vadd.f32 %v15427_v9, %v18707_v41  ;;  %v6229_v20 = vpop.f32.mrb[3].mxu0 }
 0x3c2   :  { %v6673_v16 = vmax.f32 %v6609_v25, 0.0  ;;  %v16266_v50 = vadd.f32 %v6229_v20, %v18711_v3 }
 0x3c3   :  { %v6739_v30 = vsel %vm6737_vm4, %v6674_v29, -inf  ;;  %v6612_v35 = vadd.f32 %v16265_v27, %v19104_v42 }
 0x3c4   :  { %v6738_v32 = vsel %vm6737_vm4, %v6673_v16, -inf  ;;  %v6611_v44 = vadd.f32 %v16266_v50, %v19104_v42  ;;  %v15430_v15 = vpop.f32.mrb[4].mxu0 }
 0x3c5   :  { %v6740_v5 = vmax.f32 %v6738_v32, %v6739_v30  ;;  %v6676_v18 = vmax.f32 %v6612_v35, 0.0  ;;  %v16267_v41 = vadd.f32 %v15430_v15, %v18715_v48  ;;  %v6239_v8 = vpop.f32.mrb[5].mxu0 }
 0x3c6   :  { %v6675_v25 = vmax.f32 %v6611_v44, 0.0  ;;  %v16268_v3 = vadd.f32 %v6239_v8, %v18718_v62 }
 0x3c7   :  { %v6866_v20 = vcombine.high %v6740_v5, %v6740_v5  ;;  %v6873_v28 = vrot.slane %v6740_v5, %v19116_v33  ;;  %v6742_v9 = vsel %vm6737_vm4, %v6676_v18, -inf  ;;  %v6614_v27 = vadd.f32 %v16267_v41, %v19104_v42 }
 0x3c8   :  { %v6741_v16 = vsel %vm6737_vm4, %v6675_v25, -inf  ;;  %v6613_v50 = vadd.f32 %v16268_v3, %v19104_v42  ;;  %v15433_v29 = vpop.f32.mrb[6].mxu0 }
 0x3c9   :  { %v6880_v30 = vrot.slane %v6866_v20, %v19116_v33  ;;  %v6881_v48 = vcombine.high %v6873_v28, %v6873_v28  ;;  %v7539_v35 = vsel %vm7538_vm5, %v6873_v28, -inf  ;;  %v6743_v32 = vmax.f32 %v6741_v16, %v6742_v9  ;;  %v19130_v44 = vpop.f32.mrb[7].mxu0 }
 0x3ca   :  { %v7540_v62 = vrot.slane %v7539_v35, 4  ;;  %v6678_v15 = vmax.f32 %v6614_v27, 0.0  ;;  %v6677_v5 = vmax.f32 %v6613_v50, 0.0  ;;  %v19133_v18 = vadd.f32 %v15433_v29, %v18721_v6 }
 0x3cb   :  { %v6882_v41 = vcombine.high %v6880_v30, %v6880_v30  ;;  %v7546_v8 = vsel %vm7538_vm5, %v6881_v48, -inf  ;;  %v7553_v25 = vsel %vm7538_vm5, %v6880_v30, -inf  ;;  %v6883_v3 = vcombine.high %v6743_v32, %v6743_v32 }
 0x3cc   :  { %v7541_v45 = vmax.f32 %v7539_v35, %v7540_v62  ;;  %v7547_v20 = vrot.slane %v7546_v8, 4  ;;  %v7554_v1 = vrot.slane %v7553_v25, 4  ;;  %v6890_v28 = vrot.slane %v6743_v32, %v19116_v33  ;;  %v19138_v9 = vpop.f32.mrb[8].mxu0 }
 0x3cd   :  { %v7560_v16 = vsel %vm7538_vm5, %v6882_v41, -inf  ;;  %v6897_v27 = vrot.slane %v6883_v3, %v19116_v33  ;;  %v6745_v6 = vsel %vm6737_vm4, %v6678_v15, -inf  ;;  %v6744_v50 = vsel %vm6737_vm4, %v6677_v5, -inf  ;;  %v19144_v29 = vpop.f32.mrb[9].mxu0 }
 0x3ce   :  { %v7542_v30 = vrot.slane %v7541_v45, 2  ;;  %v7548_v48 = vmax.f32 %v7546_v8, %v7547_v20  ;;  %v7555_v35 = vmax.f32 %v7553_v25, %v7554_v1  ;;  %v7561_v62 = vrot.slane %v7560_v16, 4 }
 0x3cf   :  { %v6898_v32 = vcombine.high %v6890_v28, %v6890_v28  ;;  %v6899_v17 = vcombine.high %v6897_v27, %v6897_v27  ;;  %v7567_v51 = vsel %vm7538_vm5, %v6890_v28, -inf  ;;  %v7581_v41 = vsel %vm7538_vm5, %v6897_v27, -inf }
 0x3d0   :  { %v7543_v56 = vmax.f32 %v7541_v45, %v7542_v30  ;;  %v7549_v3 = vrot.slane %v7548_v48, 2  ;;  %v7556_v55 = vrot.slane %v7555_v35, 2  ;;  %v7562_v15 = vmax.f32 %v7560_v16, %v7561_v62  ;;  %v19148_v5 = vpop.f32.mrb[10].mxu0 }
 0x3d1   :  { %v7568_v63 = vrot.slane %v7567_v51, 4  ;;  %v7574_v8 = vsel %vm7538_vm5, %v6898_v32, -inf  ;;  %v7582_v1 = vrot.slane %v7581_v41, 4  ;;  %v7588_v25 = vsel %vm7538_vm5, %v6899_v17, -inf  ;;  %v19152_v20 = vpop.f32.mrb[11].mxu0 }
 0x3d2   :  { %v7544_v34 = vrot.slane %v7543_v56, 1  ;;  %v7550_v39 = vmax.f32 %v7548_v48, %v7549_v3  ;;  %v7557_v28 = vmax.f32 %v7555_v35, %v7556_v55  ;;  %v7563_v36 = vrot.slane %v7562_v15, 2 }
 0x3d3   :  { %v7569_v27 = vmax.f32 %v7567_v51, %v7568_v63  ;;  %v7575_v45 = vrot.slane %v7574_v8, 4  ;;  %v7583_v30 = vmax.f32 %v7581_v41, %v7582_v1  ;;  %v7589_v19 = vrot.slane %v7588_v25, 4 }
 0x3d4   :  { %v7545_v16 = vmax.f32 %v7543_v56, %v7544_v34  ;;  %v7551_v62 = vrot.slane %v7550_v39, 1  ;;  %v7558_v57 = vrot.slane %v7557_v28, 1  ;;  %v7564_v21 = vmax.f32 %v7562_v15, %v7563_v36  ;;  %v19154_v0 = vpop.f32.mrb[12].mxu0 }
 0x3d5   :  { %v7570_v32 = vrot.slane %v7569_v27, 2  ;;  %v7576_v13 = vmax.f32 %v7574_v8, %v7575_v45  ;;  %v7584_v58 = vrot.slane %v7583_v30, 2  ;;  %v7590_v17 = vmax.f32 %v7588_v25, %v7589_v19  ;;  %v19156_v53 = vpop.f32.mrb[13].mxu0 }
 0x3d6   :  { %v7552_v4 = vmax.f32 %v7550_v39, %v7551_v62  ;;  %v7559_v48 = vmax.f32 %v7557_v28, %v7558_v57  ;;  %v7565_v55 = vrot.slane %v7564_v21, 1  ;;  %v6746_v35 = vmax.f32 %v6744_v50, %v6745_v6 }
 0x3d7   :  { %v7571_v63 = vmax.f32 %v7569_v27, %v7570_v32  ;;  %v7577_v51 = vrot.slane %v7576_v13, 2  ;;  %v7585_v41 = vmax.f32 %v7583_v30, %v7584_v58  ;;  %v7591_v3 = vrot.slane %v7590_v17, 2 }
 0x3d8   :  { %v7566_v34 = vmax.f32 %v7564_v21, %v7565_v55  ;;  %v8613_v56 = vsel %vm8612_vm6, %v7552_v4, %v7545_v16  ;;  %v6900_v36 = vcombine.high %v6746_v35, %v6746_v35  ;;  %v6907_v15 = vrot.slane %v6746_v35, %v19116_v33  ;;  %v19160_v1 = vpop.f32.mrb[14].mxu0 }
 0x3d9   :  { %v8615_v19 = vsel %vm8614_vm7, %v7559_v48, %v8613_v56  ;;  %v7572_v8 = vrot.slane %v7571_v63, 1  ;;  %v7578_v25 = vmax.f32 %v7576_v13, %v7577_v51  ;;  %v7586_v39 = vrot.slane %v7585_v41, 1  ;;  %v19163_v57 = vpop.f32.mrb[15].mxu0 }
 0x3da   :  { %v8617_v6 = vsel %vm8616_vm8, %v7566_v34, %v8615_v19  ;;  %v7592_v50 = vmax.f32 %v7590_v17, %v7591_v3  ;;  %v6914_v58 = vrot.slane %v6900_v36, %v19116_v33  ;;  %v6915_v21 = vcombine.high %v6907_v15, %v6907_v15 }
 0x3db   :  { %8745 = vst.msk [vmem:[#allocation3 + $0x9] sm:$0xf] %vm8744_vm9, %v8617_v6  ;;  %v7573_v4 = vmax.f32 %v7571_v63, %v7572_v8  ;;  %v7579_v28 = vrot.slane %v7578_v25, 1  ;;  %v7587_v27 = vmax.f32 %v7585_v41, %v7586_v39  ;;  %v7595_v45 = vsel %vm7538_vm5, %v6907_v15, -inf }
 0x3dc   :  { %v7593_v30 = vrot.slane %v7592_v50, 1  ;;  %v6916_v16 = vcombine.high %v6914_v58, %v6914_v58  ;;  %v7596_v62 = vrot.slane %v7595_v45, 4  ;;  %v7602_v13 = vsel %vm7538_vm5, %v6915_v21, -inf  ;;  %v19170_v32 = vpop.f32.mrb[16].mxu0 }
 0x3dd   :  { %v7580_v48 = vmax.f32 %v7578_v25, %v7579_v28  ;;  %v7603_v55 = vrot.slane %v7602_v13, 4  ;;  %v7609_v17 = vsel %vm7538_vm5, %v6914_v58, -inf  ;;  %v6616_v35 = vadd.f32 %v19133_v18, %v19104_v42  ;;  %v19175_v51 = vpop.f32.mrb[17].mxu0 }
 0x3de   :  { %v7594_v63 = vmax.f32 %v7592_v50, %v7593_v30  ;;  %v7597_v41 = vmax.f32 %v7595_v45, %v7596_v62  ;;  %v7610_v3 = vrot.slane %v7609_v17, 4  ;;  %v7616_v34 = vsel %vm7538_vm5, %v6916_v16, -inf }
 0x3df   :  { %v8618_v56 = vsel %vm8612_vm6, %v7580_v48, %v7573_v4  ;;  %v7604_v36 = vmax.f32 %v7602_v13, %v7603_v55  ;;  %v7617_v15 = vrot.slane %v7616_v34, 4  ;;  %v6680_v19 = vmax.f32 %v6616_v35, 0.0 }
 0x3e0   :  { %v8619_v8 = vsel %vm8614_vm7, %v7587_v27, %v8618_v56  ;;  %v7598_v25 = vrot.slane %v7597_v41, 2  ;;  %v7611_v39 = vmax.f32 %v7609_v17, %v7610_v3  ;;  %v16270_v6 = vadd.f32 %v19130_v44, %v18725_v11  ;;  %v19182_v18 = vpop.f32.mrb[18].mxu0 }
 0x3e1   :  { %v8620_v50 = vsel %vm8616_vm8, %v7594_v63, %v8619_v8  ;;  %v7605_v58 = vrot.slane %v7604_v36, 2  ;;  %v7618_v21 = vmax.f32 %v7616_v34, %v7617_v15  ;;  %v6748_v28 = vsel %vm6737_vm4, %v6680_v19, -inf  ;;  %v19186_v45 = vpop.f32.mrb[19].mxu0 }
 0x3e2   :  { %8746 = vst.msk [vmem:[#allocation3 + $0x11] sm:$0xf] %vm8744_vm9, %v8620_v50  ;;  %v7599_v4 = vmax.f32 %v7597_v41, %v7598_v25  ;;  %v7612_v30 = vrot.slane %v7611_v39, 2  ;;  %v6615_v27 = vadd.f32 %v16270_v6, %v19104_v42  ;;  %v16271_v16 = vadd.f32 %v19138_v9, %v18731_v7  ;;  %v16912_v11 = vld [vmem:[#allocation3 + $0x1] ss:$8 sps:$4 sm:$0xff]  }
 0x3e3   :  { %v7606_v44 = vmax.f32 %v7604_v36, %v7605_v58  ;;  %v7619_v62 = vrot.slane %v7618_v21, 2  ;;  %v16272_v13 = vadd.f32 %v19144_v29, %v18733_v14  ;;  %v16273_v48 = vadd.f32 %v19148_v5, %v18739_v22  ;;  %15534 = vmatprep.mubr.msk.f32.mxu1 %vm6737_vm4, %v16912_v11 }
 0x3e4   :  { %v7600_v55 = vrot.slane %v7599_v4, 1  ;;  %v7613_v17 = vmax.f32 %v7611_v39, %v7612_v30  ;;  %v6679_v35 = vmax.f32 %v6615_v27, 0.0  ;;  %v6618_v63 = vadd.f32 %v16271_v16, %v19104_v42  ;;  %v19197_v41 = vpop.f32.mrb[20].mxu0 }
 0x3e5   :  { %v7607_v3 = vrot.slane %v7606_v44, 1  ;;  %v7620_v7 = vmax.f32 %v7618_v21, %v7619_v62  ;;  %v6617_v9 = vadd.f32 %v16272_v13, %v19104_v42  ;;  %v6620_v34 = vadd.f32 %v16273_v48, %v19104_v42  ;;  %v19202_v56 = vpop.f32.mrb[21].mxu0 }
 0x3e6   :  { %v7601_v14 = vmax.f32 %v7599_v4, %v7600_v55  ;;  %v7614_v29 = vrot.slane %v7613_v17, 1  ;;  %v6747_v22 = vsel %vm6737_vm4, %v6679_v35, -inf  ;;  %v6682_v5 = vmax.f32 %v6618_v63, 0.0 }
 0x3e7   :  { %v7608_v36 = vmax.f32 %v7606_v44, %v7607_v3  ;;  %v7621_v15 = vrot.slane %v7620_v7, 1  ;;  %v6749_v19 = vmax.f32 %v6747_v22, %v6748_v28  ;;  %v6681_v8 = vmax.f32 %v6617_v9, 0.0 }
 0x3e8   :  { %v7615_v25 = vmax.f32 %v7613_v17, %v7614_v29  ;;  %v6751_v39 = vsel %vm6737_vm4, %v6682_v5, -inf  ;;  %v6684_v6 = vmax.f32 %v6620_v34, 0.0  ;;  %v16274_v50 = vadd.f32 %v19152_v20, %v18741_v23  ;;  %v19208_v58 = vpop.f32.mrb[22].mxu0 }
 0x3e9   :  { %v7622_v21 = vmax.f32 %v7620_v7, %v7621_v15  ;;  %v8621_v4 = vsel %vm8612_vm6, %v7608_v36, %v7601_v14  ;;  %v6917_v30 = vcombine.high %v6749_v19, %v6749_v19  ;;  %v6924_v27 = vrot.slane %v6749_v19, %v19116_v33  ;;  %v19212_v16 = vpop.f32.mrb[23].mxu0 }
 0x3ea   :  { %v8622_v28 = vsel %vm8614_vm7, %v7615_v25, %v8621_v4  ;;  %v6750_v11 = vsel %vm6737_vm4, %v6681_v8, -inf  ;;  %v6754_v44 = vsel %vm6737_vm4, %v6684_v6, -inf  ;;  %v6619_v62 = vadd.f32 %v16274_v50, %v19104_v42 }
 0x3eb   :  { %v8623_v23 = vsel %vm8616_vm8, %v7622_v21, %v8622_v28  ;;  %v6931_v20 = vrot.slane %v6917_v30, %v19116_v33  ;;  %v6932_v13 = vcombine.high %v6924_v27, %v6924_v27  ;;  %v7623_v48 = vsel %vm7538_vm5, %v6924_v27, -inf }
 0x3ec   :  { %8747 = vst.msk [vmem:[#allocation3 + $0x19] sm:$0xf] %vm8744_vm9, %v8623_v23  ;;  %v7624_v55 = vrot.slane %v7623_v48, 4  ;;  %v6752_v17 = vmax.f32 %v6750_v11, %v6751_v39  ;;  %v6683_v35 = vmax.f32 %v6619_v62, 0.0  ;;  %v16275_v63 = vadd.f32 %v19154_v0, %v18746_v31  ;;  %v19224_v3 = vpop.f32.mrb[24].mxu0 }
 0x3ed   :  { %v6933_v7 = vcombine.high %v6931_v20, %v6931_v20  ;;  %v7630_v9 = vsel %vm7538_vm5, %v6932_v13, -inf  ;;  %v7637_v34 = vsel %vm7538_vm5, %v6931_v20, -inf  ;;  %v19230_v14 = vadd.f32 %v19156_v53, %v18748_v24  ;;  %v19232_v29 = vpop.f32.mrb[25].mxu0 }
 0x3ee   :  { %v7625_v22 = vmax.f32 %v7623_v48, %v7624_v55  ;;  %v7631_v5 = vrot.slane %v7630_v9, 4  ;;  %v7638_v36 = vrot.slane %v7637_v34, 4  ;;  %v6934_v15 = vcombine.high %v6752_v17, %v6752_v17 }
 0x3ef   :  { %v7644_v19 = vsel %vm7538_vm5, %v6933_v7, -inf  ;;  %v6941_v31 = vrot.slane %v6752_v17, %v19116_v33  ;;  %v6753_v0 = vsel %vm6737_vm4, %v6683_v35, -inf  ;;  %v19238_v8 = vadd.f32 %v16275_v63, %v19104_v42 }
 0x3f0   :  { %v7626_v25 = vrot.slane %v7625_v22, 2  ;;  %v7632_v39 = vmax.f32 %v7630_v9, %v7631_v5  ;;  %v7639_v6 = vmax.f32 %v7637_v34, %v7638_v36  ;;  %v7645_v24 = vrot.slane %v7644_v19, 4  ;;  %v19240_v53 = vpop.f32.mrb[26].mxu0 }
 0x3f1   :  { %v6948_v50 = vrot.slane %v6934_v15, %v19116_v33  ;;  %v6949_v21 = vcombine.high %v6941_v31, %v6941_v31  ;;  %v7651_v4 = vsel %vm7538_vm5, %v6941_v31, -inf  ;;  %v6755_v30 = vmax.f32 %v6753_v0, %v6754_v44  ;;  %v19244_v27 = vpop.f32.mrb[27].mxu0 }
 0x3f2   :  { %v7627_v28 = vmax.f32 %v7625_v22, %v7626_v25  ;;  %v7633_v11 = vrot.slane %v7632_v39, 2  ;;  %v7640_v62 = vrot.slane %v7639_v6, 2  ;;  %v7646_v23 = vmax.f32 %v7644_v19, %v7645_v24 }
 0x3f3   :  { %v6950_v20 = vcombine.high %v6948_v50, %v6948_v50  ;;  %v7652_v13 = vrot.slane %v7651_v4, 4  ;;  %v7658_v48 = vsel %vm7538_vm5, %v6949_v21, -inf  ;;  %v7665_v55 = vsel %vm7538_vm5, %v6948_v50, -inf  ;;  %v16913_v9 = vld [vmem:[#allocation3 + $0x11] ss:$8 sps:$4 sm:$0xff]  }
 0x3f4   :  { %v7628_v17 = vrot.slane %v7627_v28, 1  ;;  %v7634_v35 = vmax.f32 %v7632_v39, %v7633_v11  ;;  %v7641_v63 = vmax.f32 %v7639_v6, %v7640_v62  ;;  %v7647_v7 = vrot.slane %v7646_v23, 2  ;;  %v19248_v34 = vpop.f32.mrb[28].mxu0  ;;  %15535 = vmatmul.mubr.msk.f32.vlgmr.msra.gmra.mrb[64].mxu1 %vm6737_vm4, %v16913_v9 }
 0x3f5   :  { %20866 = vst [vmem:[#allocation43_spill] sm:$0xff] %v19248_v34  ;;  %v7653_v44 = vmax.f32 %v7651_v4, %v7652_v13  ;;  %v7659_v5 = vrot.slane %v7658_v48, 4  ;;  %v7666_v36 = vrot.slane %v7665_v55, 4  ;;  %v7672_v22 = vsel %vm7538_vm5, %v6950_v20, -inf  ;;  %v19251_v15 = vpop.f32.mrb[29].mxu0 }
 0x3f6   :  { %20867 = vst [vmem:[#allocation44_spill] sm:$0xff] %v19251_v15  ;;  %v7629_v19 = vmax.f32 %v7627_v28, %v7628_v17  ;;  %v7635_v31 = vrot.slane %v7634_v35, 1  ;;  %v7642_v0 = vrot.slane %v7641_v63, 1  ;;  %v7648_v25 = vmax.f32 %v7646_v23, %v7647_v7 }
 0x3f7   :  { %v7654_v24 = vrot.slane %v7653_v44, 2  ;;  %v7660_v39 = vmax.f32 %v7658_v48, %v7659_v5  ;;  %v7667_v6 = vmax.f32 %v7665_v55, %v7666_v36  ;;  %v7673_v50 = vrot.slane %v7672_v22, 4 }
 0x3f8   :  { %v7636_v21 = vmax.f32 %v7634_v35, %v7635_v31  ;;  %v7643_v11 = vmax.f32 %v7641_v63, %v7642_v0  ;;  %v7649_v62 = vrot.slane %v7648_v25, 1  ;;  %v6951_v4 = vcombine.high %v6755_v30, %v6755_v30  ;;  %v19254_v13 = vpop.f32.mrb[30].mxu0 }
 0x3f9   :  { %v7655_v10 = vmax.f32 %v7653_v44, %v7654_v24  ;;  %v7661_v20 = vrot.slane %v7660_v39, 2  ;;  %v7668_v34 = vrot.slane %v7667_v6, 2  ;;  %v7674_v15 = vmax.f32 %v7672_v22, %v7673_v50  ;;  %v19256_v28 = vpop.f32.mrb[31].mxu0 }
 0x3fa   :  { %v7650_v17 = vmax.f32 %v7648_v25, %v7649_v62  ;;  %v8624_v23 = vsel %vm8612_vm6, %v7636_v21, %v7629_v19  ;;  %v6958_v7 = vrot.slane %v6755_v30, %v19116_v33  ;;  %v6965_v48 = vrot.slane %v6951_v4, %v19116_v33 }
 0x3fb   :  { %v8625_v55 = vsel %vm8614_vm7, %v7643_v11, %v8624_v23  ;;  %v7656_v35 = vrot.slane %v7655_v10, 1  ;;  %v7662_v63 = vmax.f32 %v7660_v39, %v7661_v20  ;;  %v7669_v9 = vmax.f32 %v7667_v6, %v7668_v34 }
 0x3fc   :  { %v8626_v5 = vsel %vm8616_vm8, %v7650_v17, %v8625_v55  ;;  %v7675_v44 = vrot.slane %v7674_v15, 2  ;;  %v6966_v36 = vcombine.high %v6958_v7, %v6958_v7  ;;  %v6967_v31 = vcombine.high %v6965_v48, %v6965_v48  ;;  %v19263_v22 = vpop.f32.mrb[32].mxu0 }
 0x3fd   :  { %8748 = vst.msk [vmem:[#allocation3 + $0x21] sm:$0xf] %vm8744_vm9, %v8626_v5  ;;  %v7657_v0 = vmax.f32 %v7655_v10, %v7656_v35  ;;  %v7663_v19 = vrot.slane %v7662_v63, 1  ;;  %v7670_v25 = vrot.slane %v7669_v9, 1  ;;  %v7679_v30 = vsel %vm7538_vm5, %v6958_v7, -inf  ;;  %v19267_v24 = vpop.f32.mrb[33].mxu0 }
 0x3fe   :  { %v7676_v50 = vmax.f32 %v7674_v15, %v7675_v44  ;;  %v7680_v21 = vrot.slane %v7679_v30, 4  ;;  %v7686_v34 = vsel %vm7538_vm5, %v6966_v36, -inf  ;;  %v7693_v39 = vsel %vm7538_vm5, %v6965_v48, -inf }
 0x3ff   :  { %v7664_v6 = vmax.f32 %v7662_v63, %v7663_v19  ;;  %v7671_v11 = vmax.f32 %v7669_v9, %v7670_v25  ;;  %v7687_v62 = vrot.slane %v7686_v34, 4  ;;  %v7694_v4 = vrot.slane %v7693_v39, 4 }
 0x400   :  { %v7677_v20 = vrot.slane %v7676_v50, 1  ;;  %v7681_v17 = vmax.f32 %v7679_v30, %v7680_v21  ;;  %v7700_v10 = vsel %vm7538_vm5, %v6967_v31, -inf  ;;  %v6686_v23 = vmax.f32 %v19238_v8, 0.0  ;;  %v19273_v55 = vpop.f32.mrb[34].mxu0 }
 0x401   :  { %v8627_v7 = vsel %vm8612_vm6, %v7664_v6, %v7657_v0  ;;  %v7688_v15 = vmax.f32 %v7686_v34, %v7687_v62  ;;  %v7695_v35 = vmax.f32 %v7693_v39, %v7694_v4  ;;  %v7701_v5 = vrot.slane %v7700_v10, 4  ;;  %v19276_v44 = vpop.f32.mrb[35].mxu0 }
 0x402   :  { %v7678_v48 = vmax.f32 %v7676_v50, %v7677_v20  ;;  %v8628_v63 = vsel %vm8614_vm7, %v7671_v11, %v8627_v7  ;;  %v7682_v9 = vrot.slane %v7681_v17, 2  ;;  %v6757_v36 = vsel %vm6737_vm4, %v6686_v23, -inf }
 0x403   :  { %v7689_v19 = vrot.slane %v7688_v15, 2  ;;  %v7696_v25 = vrot.slane %v7695_v35, 2  ;;  %v7702_v31 = vmax.f32 %v7700_v10, %v7701_v5  ;;  %v6621_v8 = vadd.f32 %v19230_v14, %v19104_v42 }
 0x404   :  { %v8629_v30 = vsel %vm8616_vm8, %v7678_v48, %v8628_v63  ;;  %v7683_v0 = vmax.f32 %v7681_v17, %v7682_v9  ;;  %v16277_v21 = vadd.f32 %v19160_v1, %v18752_v40  ;;  %v16278_v50 = vadd.f32 %v19163_v57, %v18754_v43  ;;  %v19287_v34 = vpop.f32.mrb[36].mxu0 }
 0x405   :  { %8749 = vst.msk [vmem:[#allocation3 + $0x39] sm:$0xf] %vm8744_vm9, %v8629_v30  ;;  %v7690_v39 = vmax.f32 %v7688_v15, %v7689_v19  ;;  %v7697_v6 = vmax.f32 %v7695_v35, %v7696_v25  ;;  %v7703_v11 = vrot.slane %v7702_v31, 2  ;;  %v6685_v62 = vmax.f32 %v6621_v8, 0.0  ;;  %v19290_v4 = vpop.f32.mrb[37].mxu0 }
 0x406   :  { %v7684_v14 = vrot.slane %v7683_v0, 1  ;;  %v6624_v20 = vadd.f32 %v16277_v21, %v19104_v42  ;;  %v6623_v17 = vadd.f32 %v16278_v50, %v19104_v42  ;;  %v16279_v40 = vadd.f32 %v19170_v32, %v18760_v59 }
 0x407   :  { %v7691_v1 = vrot.slane %v7690_v39, 1  ;;  %v7698_v43 = vrot.slane %v7697_v6, 1  ;;  %v7704_v57 = vmax.f32 %v7702_v31, %v7703_v11  ;;  %v6756_v10 = vsel %vm6737_vm4, %v6685_v62, -inf }
 0x408   :  { %v7685_v23 = vmax.f32 %v7683_v0, %v7684_v14  ;;  %v6758_v7 = vmax.f32 %v6756_v10, %v6757_v36  ;;  %v6688_v15 = vmax.f32 %v6624_v20, 0.0  ;;  %v6687_v35 = vmax.f32 %v6623_v17, 0.0  ;;  %v19297_v5 = vpop.f32.mrb[38].mxu0 }
 0x409   :  { %20868 = vst [vmem:[#allocation45_spill] sm:$0xff] %v19297_v5  ;;  %v7692_v48 = vmax.f32 %v7690_v39, %v7691_v1  ;;  %v7699_v63 = vmax.f32 %v7697_v6, %v7698_v43  ;;  %v7705_v9 = vrot.slane %v7704_v57, 1  ;;  %v6626_v19 = vadd.f32 %v16279_v40, %v19104_v42 }
 0x40a   :  { %v6968_v25 = vcombine.high %v6758_v7, %v6758_v7  ;;  %v6975_v8 = vrot.slane %v6758_v7, %v19116_v33  ;;  %v6760_v59 = vsel %vm6737_vm4, %v6688_v15, -inf  ;;  %v6759_v32 = vsel %vm6737_vm4, %v6687_v35, -inf  ;;  %v19317_v35 = vpop.f32.mrb[39].mxu0 }
 0x40b   :  { %v7706_v31 = vmax.f32 %v7704_v57, %v7705_v9  ;;  %v8630_v30 = vsel %vm8612_vm6, %v7692_v48, %v7685_v23  ;;  %v6761_v36 = vmax.f32 %v6759_v32, %v6760_v59  ;;  %v6690_v0 = vmax.f32 %v6626_v19, 0.0  ;;  %20869 = vst [vmem:[#allocation46_spill] sm:$0xff] %v19317_v35 }
 0x40c   :  { %v8631_v21 = vsel %vm8614_vm7, %v7699_v63, %v8630_v30  ;;  %v6982_v50 = vrot.slane %v6968_v25, %v19116_v33  ;;  %v6983_v39 = vcombine.high %v6975_v8, %v6975_v8  ;;  %v7707_v6 = vsel %vm7538_vm5, %v6975_v8, -inf  ;;  %v16914_v11 = vld [vmem:[#allocation3 + $0x31] ss:$8 sps:$4 sm:$0xff]  }
 0x40d   :  { %v8632_v62 = vsel %vm8616_vm8, %v7706_v31, %v8631_v21  ;;  %v7708_v14 = vrot.slane %v7707_v6, 4  ;;  %v6985_v20 = vcombine.high %v6761_v36, %v6761_v36  ;;  %v6992_v17 = vrot.slane %v6761_v36, %v19116_v33  ;;  %15537 = vmatprep.mubr.msk.f32.mxu1 %vm6737_vm4, %v16914_v11 }
 0x40e   :  { %8750 = vst.msk [vmem:[#allocation3 + $0x41] sm:$0xf] %vm8744_vm9, %v8632_v62  ;;  %v6984_v40 = vcombine.high %v6982_v50, %v6982_v50  ;;  %v7714_v1 = vsel %vm7538_vm5, %v6983_v39, -inf  ;;  %v7721_v43 = vsel %vm7538_vm5, %v6982_v50, -inf  ;;  %v19313_v57 = vsel %vm6737_vm4, %v6690_v0, -inf }
 0x40f   :  { %v7709_v10 = vmax.f32 %v7707_v6, %v7708_v14  ;;  %v7715_v23 = vrot.slane %v7714_v1, 4  ;;  %v7722_v7 = vrot.slane %v7721_v43, 4  ;;  %v6999_v15 = vrot.slane %v6985_v20, %v19116_v33 }
 0x410   :  { %v7728_v48 = vsel %vm7538_vm5, %v6984_v40, -inf  ;;  %v7000_v63 = vcombine.high %v6992_v17, %v6992_v17  ;;  %v7735_v9 = vsel %vm7538_vm5, %v6992_v17, -inf  ;;  %v16280_v19 = vadd.f32 %v19175_v51, %v18762_v46 }
 0x411   :  { %v7710_v25 = vrot.slane %v7709_v10, 2  ;;  %v7716_v8 = vmax.f32 %v7714_v1, %v7715_v23  ;;  %v7723_v59 = vmax.f32 %v7721_v43, %v7722_v7  ;;  %v7729_v32 = vrot.slane %v7728_v48, 4 }
 0x412   :  { %v7001_v31 = vcombine.high %v6999_v15, %v6999_v15  ;;  %v7736_v30 = vrot.slane %v7735_v9, 4  ;;  %v7742_v36 = vsel %vm7538_vm5, %v7000_v63, -inf  ;;  %v7749_v0 = vsel %vm7538_vm5, %v6999_v15, -inf  ;;  %v19326_v63 = vpop.f32.mrb[40].mxu0 }
 0x413   :  { %v7711_v21 = vmax.f32 %v7709_v10, %v7710_v25  ;;  %v7717_v50 = vrot.slane %v7716_v8, 2  ;;  %v7724_v39 = vrot.slane %v7723_v59, 2  ;;  %v7730_v6 = vmax.f32 %v7728_v48, %v7729_v32  ;;  %v19328_v48 = vpop.f32.mrb[41].mxu0 }
 0x414   :  { %v7737_v11 = vmax.f32 %v7735_v9, %v7736_v30  ;;  %v7743_v62 = vrot.slane %v7742_v36, 4  ;;  %v7750_v14 = vrot.slane %v7749_v0, 4  ;;  %v7756_v20 = vsel %vm7538_vm5, %v7001_v31, -inf }
 0x415   :  { %v7712_v46 = vrot.slane %v7711_v21, 1  ;;  %v7718_v51 = vmax.f32 %v7716_v8, %v7717_v50  ;;  %v7725_v17 = vmax.f32 %v7723_v59, %v7724_v39  ;;  %v7731_v40 = vrot.slane %v7730_v6, 2 }
 0x416   :  { %v7738_v1 = vrot.slane %v7737_v11, 2  ;;  %v7744_v43 = vmax.f32 %v7742_v36, %v7743_v62  ;;  %v7751_v23 = vmax.f32 %v7749_v0, %v7750_v14  ;;  %v7757_v7 = vrot.slane %v7756_v20, 4 }
 0x417   :  { %v7713_v15 = vmax.f32 %v7711_v21, %v7712_v46  ;;  %v7719_v10 = vrot.slane %v7718_v51, 1  ;;  %v7726_v25 = vrot.slane %v7725_v17, 1  ;;  %v7732_v35 = vmax.f32 %v7730_v6, %v7731_v40 }
 0x418   :  { %v7739_v9 = vmax.f32 %v7737_v11, %v7738_v1  ;;  %v7745_v32 = vrot.slane %v7744_v43, 2  ;;  %v7752_v30 = vrot.slane %v7751_v23, 2  ;;  %v7758_v31 = vmax.f32 %v7756_v20, %v7757_v7 }
 0x419   :  { %v7720_v5 = vmax.f32 %v7718_v51, %v7719_v10  ;;  %v7727_v8 = vmax.f32 %v7725_v17, %v7726_v25  ;;  %v7733_v59 = vrot.slane %v7732_v35, 1  ;;  %v6625_v50 = vadd.f32 %v16280_v19, %v19104_v42 }
 0x41a   :  { %v7740_v36 = vrot.slane %v7739_v9, 1  ;;  %v7746_v0 = vmax.f32 %v7744_v43, %v7745_v32  ;;  %v7753_v39 = vmax.f32 %v7751_v23, %v7752_v30  ;;  %v7759_v62 = vrot.slane %v7758_v31, 2 }
 0x41b   :  { %v7734_v14 = vmax.f32 %v7732_v35, %v7733_v59  ;;  %v8633_v21 = vsel %vm8612_vm6, %v7720_v5, %v7713_v15  ;;  %v6689_v46 = vmax.f32 %v6625_v50, 0.0  ;;  %v16281_v6 = vadd.f32 %v19182_v18, %v18766_v61  ;;  %v19342_v18 = vpop.f32.mrb[42].mxu0 }
 0x41c   :  { %v8634_v11 = vsel %vm8614_vm7, %v7727_v8, %v8633_v21  ;;  %v7741_v40 = vmax.f32 %v7739_v9, %v7740_v36  ;;  %v7747_v20 = vrot.slane %v7746_v0, 1  ;;  %v7754_v51 = vrot.slane %v7753_v39, 1  ;;  %v19348_v9 = vpop.f32.mrb[43].mxu0 }
 0x41d   :  { %v8635_v17 = vsel %vm8616_vm8, %v7734_v14, %v8634_v11  ;;  %v7760_v1 = vmax.f32 %v7758_v31, %v7759_v62  ;;  %v6762_v19 = vsel %vm6737_vm4, %v6689_v46, -inf  ;;  %v6628_v43 = vadd.f32 %v16281_v6, %v19104_v42 }
 0x41e   :  { %8751 = vst.msk [vmem:[#allocation3 + $0x49] sm:$0xf] %vm8744_vm9, %v8635_v17  ;;  %v7748_v35 = vmax.f32 %v7746_v0, %v7747_v20  ;;  %v7755_v5 = vmax.f32 %v7753_v39, %v7754_v51  ;;  %v6764_v23 = vmax.f32 %v6762_v19, %v19313_v57  ;;  %v16282_v61 = vadd.f32 %v19186_v45, %v18768_v26 }
 0x41f   :  { %v7761_v7 = vrot.slane %v7760_v1, 1  ;;  %v6692_v15 = vmax.f32 %v6628_v43, 0.0  ;;  %v16283_v10 = vadd.f32 %v19197_v41, %v18772_v38  ;;  %v16284_v25 = vadd.f32 %v19202_v56, %v18774_v47 }
 0x420   :  { %v8636_v32 = vsel %vm8612_vm6, %v7748_v35, %v7741_v40  ;;  %v7002_v30 = vcombine.high %v6764_v23, %v6764_v23  ;;  %v7009_v57 = vrot.slane %v6764_v23, %v19116_v33  ;;  %v6627_v31 = vadd.f32 %v16282_v61, %v19104_v42 }
 0x421   :  { %v7762_v26 = vmax.f32 %v7760_v1, %v7761_v7  ;;  %v8637_v45 = vsel %vm8614_vm7, %v7755_v5, %v8636_v32  ;;  %v6766_v8 = vsel %vm6737_vm4, %v6692_v15, -inf  ;;  %v6630_v59 = vadd.f32 %v16283_v10, %v19104_v42  ;;  %v19374_v10 = vld [vmem:[%s20813_s3] ss:$0 sm:$0xff] }
 0x422   :  { %v7016_v38 = vrot.slane %v7002_v30, %v19116_v33  ;;  %v7017_v41 = vcombine.high %v7009_v57, %v7009_v57  ;;  %v7763_v47 = vsel %vm7538_vm5, %v7009_v57, -inf  ;;  %v6691_v56 = vmax.f32 %v6627_v31, 0.0 }
 0x423   :  { %v8638_v50 = vsel %vm8616_vm8, %v7762_v26, %v8637_v45  ;;  %v7764_v36 = vrot.slane %v7763_v47, 4  ;;  %v6694_v0 = vmax.f32 %v6630_v59, 0.0  ;;  %v6629_v39 = vadd.f32 %v16284_v25, %v19104_v42 }
 0x424   :  { %8752 = vst.msk [vmem:[#allocation3 + $0x51] sm:$0xf] %vm8744_vm9, %v8638_v50  ;;  %v7018_v62 = vcombine.high %v7016_v38, %v7016_v38  ;;  %v7770_v14 = vsel %vm7538_vm5, %v7017_v41, -inf  ;;  %v7777_v21 = vsel %vm7538_vm5, %v7016_v38, -inf  ;;  %v6765_v46 = vsel %vm6737_vm4, %v6691_v56, -inf }
 0x425   :  { %v7765_v6 = vmax.f32 %v7763_v47, %v7764_v36  ;;  %v7771_v11 = vrot.slane %v7770_v14, 4  ;;  %v7778_v40 = vrot.slane %v7777_v21, 4  ;;  %v6767_v20 = vmax.f32 %v6765_v46, %v6766_v8  ;;  %v16915_v51 = vld [vmem:[#allocation3 + $0x41] ss:$8 sps:$4 sm:$0xff]  }
 0x426   :  { %v7784_v17 = vsel %vm7538_vm5, %v7018_v62, -inf  ;;  %v6769_v1 = vsel %vm6737_vm4, %v6694_v0, -inf  ;;  %v6693_v19 = vmax.f32 %v6629_v39, 0.0  ;;  %v16285_v42 = vadd.f32 %v19208_v58, %v18778_v60  ;;  %15538 = vmatmul.mubr.msk.f32.gmra.mrb[66].mxu1 %vm6737_vm4, %v16915_v51  ;;  %v19379_v60 = vpop.f32.mrb[44].mxu0 }
 0x427   :  { %v7766_v43 = vrot.slane %v7765_v6, 2  ;;  %v7772_v35 = vmax.f32 %v7770_v14, %v7771_v11  ;;  %v7779_v5 = vmax.f32 %v7777_v21, %v7778_v40  ;;  %v7785_v23 = vrot.slane %v7784_v17, 4 }
 0x428   :  { %v7019_v61 = vcombine.high %v6767_v20, %v6767_v20  ;;  %v7026_v7 = vrot.slane %v6767_v20, %v19116_v33  ;;  %v6768_v15 = vsel %vm6737_vm4, %v6693_v19, -inf  ;;  %v19377_v25 = vadd.f32 %v19374_v10, %v16285_v42 }
 0x429   :  { %v7767_v58 = vmax.f32 %v7765_v6, %v7766_v43  ;;  %v7773_v32 = vrot.slane %v7772_v35, 2  ;;  %v7780_v30 = vrot.slane %v7779_v5, 2  ;;  %v7786_v57 = vmax.f32 %v7784_v17, %v7785_v23 }
 0x42a   :  { %v7033_v31 = vrot.slane %v7019_v61, %v19116_v33  ;;  %v7034_v26 = vcombine.high %v7026_v7, %v7026_v7  ;;  %v7791_v45 = vsel %vm7538_vm5, %v7026_v7, -inf  ;;  %v6770_v8 = vmax.f32 %v6768_v15, %v6769_v1 }
 0x42b   :  { %v7768_v59 = vrot.slane %v7767_v58, 1  ;;  %v7774_v38 = vmax.f32 %v7772_v35, %v7773_v32  ;;  %v7781_v41 = vmax.f32 %v7779_v5, %v7780_v30  ;;  %v7787_v47 = vrot.slane %v7786_v57, 2  ;;  %v19386_v5 = vpop.f32.mrb[45].mxu0 }
 0x42c   :  { %v7035_v56 = vcombine.high %v7033_v31, %v7033_v31  ;;  %v7792_v50 = vrot.slane %v7791_v45, 4  ;;  %v7798_v36 = vsel %vm7538_vm5, %v7034_v26, -inf  ;;  %v7805_v0 = vsel %vm7538_vm5, %v7033_v31, -inf }
 0x42d   :  { %v7769_v39 = vmax.f32 %v7767_v58, %v7768_v59  ;;  %v7775_v62 = vrot.slane %v7774_v38, 1  ;;  %v7782_v14 = vrot.slane %v7781_v41, 1  ;;  %v7788_v21 = vmax.f32 %v7786_v57, %v7787_v47 }
 0x42e   :  { %v7793_v46 = vmax.f32 %v7791_v45, %v7792_v50  ;;  %v7799_v6 = vrot.slane %v7798_v36, 4  ;;  %v7806_v11 = vrot.slane %v7805_v0, 4  ;;  %v7812_v40 = vsel %vm7538_vm5, %v7035_v56, -inf }
 0x42f   :  { %v7776_v20 = vmax.f32 %v7774_v38, %v7775_v62  ;;  %v7783_v51 = vmax.f32 %v7781_v41, %v7782_v14  ;;  %v7789_v17 = vrot.slane %v7788_v21, 1  ;;  %v7813_v1 = vrot.slane %v7812_v40, 4 }
 0x430   :  { %v7794_v19 = vrot.slane %v7793_v46, 2  ;;  %v7800_v42 = vmax.f32 %v7798_v36, %v7799_v6  ;;  %v7807_v43 = vmax.f32 %v7805_v0, %v7806_v11  ;;  %v7036_v35 = vcombine.high %v6770_v8, %v6770_v8 }
 0x431   :  { %v7790_v23 = vmax.f32 %v7788_v21, %v7789_v17  ;;  %v8639_v61 = vsel %vm8612_vm6, %v7776_v20, %v7769_v39  ;;  %v7814_v7 = vmax.f32 %v7812_v40, %v7813_v1  ;;  %v7043_v15 = vrot.slane %v6770_v8, %v19116_v33  ;;  %v19398_v20 = vpop.f32.mrb[46].mxu0 }
 0x432   :  { %v8640_v58 = vsel %vm8614_vm7, %v7783_v51, %v8639_v61  ;;  %v7795_v32 = vmax.f32 %v7793_v46, %v7794_v19  ;;  %v7801_v30 = vrot.slane %v7800_v42, 2  ;;  %v7808_v57 = vrot.slane %v7807_v43, 2 }
 0x433   :  { %v8641_v31 = vsel %vm8616_vm8, %v7790_v23, %v8640_v58  ;;  %v7815_v26 = vrot.slane %v7814_v7, 2  ;;  %v7050_v45 = vrot.slane %v7036_v35, %v19116_v33  ;;  %v7051_v59 = vcombine.high %v7043_v15, %v7043_v15 }
 0x434   :  { %8753 = vst.msk [vmem:[#allocation3 + $0x69] sm:$0xf] %vm8744_vm9, %v8641_v31  ;;  %v7796_v38 = vrot.slane %v7795_v32, 1  ;;  %v7802_v41 = vmax.f32 %v7800_v42, %v7801_v30  ;;  %v7809_v47 = vmax.f32 %v7807_v43, %v7808_v57  ;;  %v7819_v56 = vsel %vm7538_vm5, %v7043_v15, -inf  ;;  %v19400_v42 = vpop.f32.mrb[47].mxu0 }
 0x435   :  { %v7816_v50 = vmax.f32 %v7814_v7, %v7815_v26  ;;  %v7052_v8 = vcombine.high %v7050_v45, %v7050_v45  ;;  %v7820_v36 = vrot.slane %v7819_v56, 4  ;;  %v7826_v0 = vsel %vm7538_vm5, %v7051_v59, -inf }
 0x436   :  { %v7797_v39 = vmax.f32 %v7795_v32, %v7796_v38  ;;  %v7803_v62 = vrot.slane %v7802_v41, 1  ;;  %v7810_v14 = vrot.slane %v7809_v47, 1  ;;  %v7827_v21 = vrot.slane %v7826_v0, 4 }
 0x437   :  { %v7817_v46 = vrot.slane %v7816_v50, 1  ;;  %v7821_v6 = vmax.f32 %v7819_v56, %v7820_v36  ;;  %v7833_v11 = vsel %vm7538_vm5, %v7050_v45, -inf  ;;  %v7840_v40 = vsel %vm7538_vm5, %v7052_v8, -inf }
 0x438   :  { %v7804_v51 = vmax.f32 %v7802_v41, %v7803_v62  ;;  %v7811_v17 = vmax.f32 %v7809_v47, %v7810_v14  ;;  %v7828_v1 = vmax.f32 %v7826_v0, %v7827_v21  ;;  %v7834_v19 = vrot.slane %v7833_v11, 4 }
 0x439   :  { %v7818_v43 = vmax.f32 %v7816_v50, %v7817_v46  ;;  %v7822_v35 = vrot.slane %v7821_v6, 2  ;;  %v7841_v23 = vrot.slane %v7840_v40, 4  ;;  %v6696_v61 = vmax.f32 %v19377_v25, 0.0  ;;  %v19416_v50 = vpop.f32.mrb[48].mxu0 }
 0x43a   :  { %v8642_v7 = vsel %vm8612_vm6, %v7804_v51, %v7797_v39  ;;  %v7829_v15 = vrot.slane %v7828_v1, 2  ;;  %v7835_v58 = vmax.f32 %v7833_v11, %v7834_v19  ;;  %v16286_v32 = vadd.f32 %v19212_v16, %v18780_v12  ;;  %v19420_v62 = vpop.f32.mrb[49].mxu0 }
 0x43b   :  { %v8643_v30 = vsel %vm8614_vm7, %v7811_v17, %v8642_v7  ;;  %v7823_v57 = vmax.f32 %v7821_v6, %v7822_v35  ;;  %v7842_v31 = vmax.f32 %v7840_v40, %v7841_v23  ;;  %v6772_v26 = vsel %vm6737_vm4, %v6696_v61, -inf  ;;  %v16916_v45 = vld [vmem:[#allocation3 + $0x61] ss:$8 sps:$4 sm:$0xff]  }
 0x43c   :  { %v8644_v59 = vsel %vm8616_vm8, %v7818_v43, %v8643_v30  ;;  %v7830_v38 = vmax.f32 %v7828_v1, %v7829_v15  ;;  %v7836_v41 = vrot.slane %v7835_v58, 2  ;;  %v6631_v25 = vadd.f32 %v19374_v10, %v16286_v32  ;;  %15540 = vmatprep.mubr.msk.f32.mxu1 %vm6737_vm4, %v16916_v45 }
 0x43d   :  { %8754 = vst.msk [vmem:[#allocation3 + $0x71] sm:$0xf] %vm8744_vm9, %v8644_v59  ;;  %v7824_v47 = vrot.slane %v7823_v57, 1  ;;  %v7843_v56 = vrot.slane %v7842_v31, 2  ;;  %v16287_v12 = vadd.f32 %v19224_v3, %v18784_v37  ;;  %v16288_v16 = vadd.f32 %v19232_v29, %v18786_v2  ;;  %v20870_v59 = vld [vmem:[#allocation43_spill] sm:$0xff] }
 0x43e   :  { %v7831_v8 = vrot.slane %v7830_v38, 1  ;;  %v7837_v36 = vmax.f32 %v7835_v58, %v7836_v41  ;;  %v6695_v0 = vmax.f32 %v6631_v25, 0.0  ;;  %v16289_v39 = vadd.f32 %v19240_v53, %v18790_v52 }
 0x43f   :  { %v7825_v14 = vmax.f32 %v7823_v57, %v7824_v47  ;;  %v7844_v21 = vmax.f32 %v7842_v31, %v7843_v56  ;;  %v6634_v46 = vadd.f32 %v19374_v10, %v16287_v12  ;;  %v6633_v37 = vadd.f32 %v19374_v10, %v16288_v16  ;;  %v20871_v56 = vld [vmem:[#allocation7_spill] sm:$0xff]  ;;  %v20872_v12 = vld [vmem:[#allocation44_spill] sm:$0xff] }
 0x440   :  { %v7832_v3 = vmax.f32 %v7830_v38, %v7831_v8  ;;  %v7838_v2 = vrot.slane %v7837_v36, 1  ;;  %v6771_v29 = vsel %vm6737_vm4, %v6695_v0, -inf  ;;  %v6636_v6 = vadd.f32 %v19374_v10, %v16289_v39 }
 0x441   :  { %v7845_v11 = vrot.slane %v7844_v21, 1  ;;  %v6773_v40 = vmax.f32 %v6771_v29, %v6772_v26  ;;  %v6698_v51 = vmax.f32 %v6634_v46, 0.0  ;;  %v6697_v17 = vmax.f32 %v6633_v37, 0.0 }
 0x442   :  { %v7839_v1 = vmax.f32 %v7837_v36, %v7838_v2  ;;  %v8645_v52 = vsel %vm8612_vm6, %v7832_v3, %v7825_v14  ;;  %v6700_v53 = vmax.f32 %v6636_v6, 0.0  ;;  %v16290_v19 = vadd.f32 %v19244_v27, %v18792_v49 }
 0x443   :  { %v7846_v43 = vmax.f32 %v7844_v21, %v7845_v11  ;;  %v7053_v35 = vcombine.high %v6773_v40, %v6773_v40  ;;  %v7060_v23 = vrot.slane %v6773_v40, %v19116_v33  ;;  %v6775_v61 = vsel %vm6737_vm4, %v6698_v51, -inf }
 0x444   :  { %v8646_v7 = vsel %vm8614_vm7, %v7839_v1, %v8645_v52  ;;  %v6774_v15 = vsel %vm6737_vm4, %v6697_v17, -inf  ;;  %v6778_v58 = vsel %vm6737_vm4, %v6700_v53, -inf  ;;  %v6635_v32 = vadd.f32 %v19374_v10, %v16290_v19 }
 0x445   :  { %v8647_v30 = vsel %vm8616_vm8, %v7846_v43, %v8646_v7  ;;  %v7067_v57 = vrot.slane %v7053_v35, %v19116_v33  ;;  %v7068_v31 = vcombine.high %v7060_v23, %v7060_v23  ;;  %v7847_v49 = vsel %vm7538_vm5, %v7060_v23, -inf }
 0x446   :  { %8755 = vst.msk [vmem:[#allocation3 + $0x79] sm:$0xf] %vm8744_vm9, %v8647_v30  ;;  %v7848_v27 = vrot.slane %v7847_v49, 4  ;;  %v6776_v26 = vmax.f32 %v6774_v15, %v6775_v61  ;;  %v6699_v45 = vmax.f32 %v6635_v32, 0.0  ;;  %v16291_v38 = vadd.f32 %v20870_v59, %v18796_v54  ;;  %v19457_v61 = vpop.f32.mrb[50].mxu0 }
 0x447   :  { %v7069_v41 = vcombine.high %v7067_v57, %v7067_v57  ;;  %v7854_v25 = vsel %vm7538_vm5, %v7068_v31, -inf  ;;  %v7861_v47 = vsel %vm7538_vm5, %v7067_v57, -inf  ;;  %v19445_v16 = vadd.f32 %v20872_v12, %v20871_v56 }
 0x448   :  { %v7849_v8 = vmax.f32 %v7847_v49, %v7848_v27  ;;  %v7855_v36 = vrot.slane %v7854_v25, 4  ;;  %v7862_v0 = vrot.slane %v7861_v47, 4  ;;  %v7070_v39 = vcombine.high %v6776_v26, %v6776_v26 }
 0x449   :  { %v7868_v14 = vsel %vm7538_vm5, %v7069_v41, -inf  ;;  %v7077_v21 = vrot.slane %v6776_v26, %v19116_v33  ;;  %v6777_v46 = vsel %vm6737_vm4, %v6699_v45, -inf  ;;  %v19451_v54 = vadd.f32 %v19374_v10, %v16291_v38  ;;  %v19460_v26 = vpop.f32.mrb[51].mxu0 }
 0x44a   :  { %v7850_v37 = vrot.slane %v7849_v8, 2  ;;  %v7856_v3 = vmax.f32 %v7854_v25, %v7855_v36  ;;  %v7863_v2 = vmax.f32 %v7861_v47, %v7862_v0  ;;  %v7869_v29 = vrot.slane %v7868_v14, 4 }
 0x44b   :  { %v7084_v6 = vrot.slane %v7070_v39, %v19116_v33  ;;  %v7085_v11 = vcombine.high %v7077_v21, %v7077_v21  ;;  %v7875_v40 = vsel %vm7538_vm5, %v7077_v21, -inf  ;;  %v6779_v51 = vmax.f32 %v6777_v46, %v6778_v58 }
 0x44c   :  { %v7851_v17 = vmax.f32 %v7849_v8, %v7850_v37  ;;  %v7857_v1 = vrot.slane %v7856_v3, 2  ;;  %v7864_v52 = vrot.slane %v7863_v2, 2  ;;  %v7870_v53 = vmax.f32 %v7868_v14, %v7869_v29 }
 0x44d   :  { %v7086_v19 = vcombine.high %v7084_v6, %v7084_v6  ;;  %v7876_v43 = vrot.slane %v7875_v40, 4  ;;  %v7882_v35 = vsel %vm7538_vm5, %v7085_v11, -inf  ;;  %v7889_v23 = vsel %vm7538_vm5, %v7084_v6, -inf  ;;  %v16917_v57 = vld [vmem:[#allocation3 + $0x71] ss:$8 sps:$4 sm:$0xff]  }
 0x44e   :  { %v7852_v7 = vrot.slane %v7851_v17, 1  ;;  %v7858_v15 = vmax.f32 %v7856_v3, %v7857_v1  ;;  %v7865_v32 = vmax.f32 %v7863_v2, %v7864_v52  ;;  %v7871_v30 = vrot.slane %v7870_v53, 2  ;;  %15541 = vmatmul.mubr.msk.f32.gmra.mrb[68].mxu1 %vm6737_vm4, %v16917_v57 }
 0x44f   :  { %v7877_v31 = vmax.f32 %v7875_v40, %v7876_v43  ;;  %v7883_v49 = vrot.slane %v7882_v35, 4  ;;  %v7890_v58 = vrot.slane %v7889_v23, 4  ;;  %v7896_v27 = vsel %vm7538_vm5, %v7086_v19, -inf }
 0x450   :  { %v7853_v45 = vmax.f32 %v7851_v17, %v7852_v7  ;;  %v7859_v59 = vrot.slane %v7858_v15, 1  ;;  %v7866_v38 = vrot.slane %v7865_v32, 1  ;;  %v7872_v41 = vmax.f32 %v7870_v53, %v7871_v30 }
 0x451   :  { %v7878_v25 = vrot.slane %v7877_v31, 2  ;;  %v7884_v47 = vmax.f32 %v7882_v35, %v7883_v49  ;;  %v7891_v56 = vmax.f32 %v7889_v23, %v7890_v58  ;;  %v7897_v12 = vrot.slane %v7896_v27, 4  ;;  %v19468_v35 = vpop.f32.mrb[52].mxu0 }
 0x452   :  { %v7860_v8 = vmax.f32 %v7858_v15, %v7859_v59  ;;  %v7867_v36 = vmax.f32 %v7865_v32, %v7866_v38  ;;  %v7873_v0 = vrot.slane %v7872_v41, 1  ;;  %v7087_v39 = vcombine.high %v6779_v51, %v6779_v51  ;;  %v19472_v32 = vpop.f32.mrb[53].mxu0 }
 0x453   :  { %v7879_v14 = vmax.f32 %v7877_v31, %v7878_v25  ;;  %v7885_v21 = vrot.slane %v7884_v47, 2  ;;  %v7892_v46 = vrot.slane %v7891_v56, 2  ;;  %v7898_v37 = vmax.f32 %v7896_v27, %v7897_v12 }
 0x454   :  { %v7874_v3 = vmax.f32 %v7872_v41, %v7873_v0  ;;  %v8648_v2 = vsel %vm8612_vm6, %v7860_v8, %v7853_v45  ;;  %v7094_v29 = vrot.slane %v6779_v51, %v19116_v33  ;;  %v7101_v6 = vrot.slane %v7087_v39, %v19116_v33 }
 0x455   :  { %v8649_v11 = vsel %vm8614_vm7, %v7867_v36, %v8648_v2  ;;  %v7880_v40 = vrot.slane %v7879_v14, 1  ;;  %v7886_v17 = vmax.f32 %v7884_v47, %v7885_v21  ;;  %v7893_v1 = vmax.f32 %v7891_v56, %v7892_v46 }
 0x456   :  { %v8650_v52 = vsel %vm8616_vm8, %v7874_v3, %v8649_v11  ;;  %v7899_v53 = vrot.slane %v7898_v37, 2  ;;  %v7102_v19 = vcombine.high %v7094_v29, %v7094_v29  ;;  %v7103_v43 = vcombine.high %v7101_v6, %v7101_v6 }
 0x457   :  { %8756 = vst.msk [vmem:[#allocation3 + $0x81] sm:$0xf] %vm8744_vm9, %v8650_v52  ;;  %v7881_v23 = vmax.f32 %v7879_v14, %v7880_v40  ;;  %v7887_v7 = vrot.slane %v7886_v17, 1  ;;  %v7894_v15 = vrot.slane %v7893_v1, 1  ;;  %v7903_v51 = vsel %vm7538_vm5, %v7094_v29, -inf  ;;  %v20874_v40 = vld [vmem:[#allocation9_spill] sm:$0xff] }
 0x458   :  { %v7900_v30 = vmax.f32 %v7898_v37, %v7899_v53  ;;  %v7904_v57 = vrot.slane %v7903_v51, 4  ;;  %v7910_v31 = vsel %vm7538_vm5, %v7102_v19, -inf  ;;  %v7917_v49 = vsel %vm7538_vm5, %v7101_v6, -inf  ;;  %v20873_v6 = vld [vmem:[#allocation8_spill] sm:$0xff] }
 0x459   :  { %v7888_v58 = vmax.f32 %v7886_v17, %v7887_v7  ;;  %v7895_v27 = vmax.f32 %v7893_v1, %v7894_v15  ;;  %v7911_v45 = vrot.slane %v7910_v31, 4  ;;  %v7918_v59 = vrot.slane %v7917_v49, 4  ;;  %v20875_v7 = vld [vmem:[#allocation10_spill] sm:$0xff] }
 0x45a   :  { %v7901_v38 = vrot.slane %v7900_v30, 1  ;;  %v7905_v41 = vmax.f32 %v7903_v51, %v7904_v57  ;;  %v7924_v25 = vsel %vm7538_vm5, %v7103_v43, -inf  ;;  %v6702_v47 = vmax.f32 %v19451_v54, 0.0  ;;  %v19493_v51 = vpop.f32.mrb[54].mxu0 }
 0x45b   :  { %v8651_v56 = vsel %vm8612_vm6, %v7888_v58, %v7881_v23  ;;  %v7912_v12 = vmax.f32 %v7910_v31, %v7911_v45  ;;  %v7919_v8 = vmax.f32 %v7917_v49, %v7918_v59  ;;  %v7925_v36 = vrot.slane %v7924_v25, 4 }
 0x45c   :  { %v7902_v0 = vmax.f32 %v7900_v30, %v7901_v38  ;;  %v8652_v39 = vsel %vm8614_vm7, %v7895_v27, %v8651_v56  ;;  %v7906_v14 = vrot.slane %v7905_v41, 2  ;;  %v6781_v21 = vsel %vm6737_vm4, %v6702_v47, -inf }
 0x45d   :  { %v7913_v46 = vrot.slane %v7912_v12, 2  ;;  %v7920_v37 = vrot.slane %v7919_v8, 2  ;;  %v7926_v3 = vmax.f32 %v7924_v25, %v7925_v36  ;;  %v6637_v2 = vadd.f32 %v19374_v10, %v19445_v16 }
 0x45e   :  { %v8653_v29 = vsel %vm8616_vm8, %v7902_v0, %v8652_v39  ;;  %v7907_v54 = vmax.f32 %v7905_v41, %v7906_v14  ;;  %v16293_v11 = vadd.f32 %v19254_v13, %v20873_v6  ;;  %v16294_v17 = vadd.f32 %v19256_v28, %v20874_v40 }
 0x45f   :  { %8757 = vst.msk [vmem:[#allocation3 + $0x99] sm:$0xf] %vm8744_vm9, %v8653_v29  ;;  %v7914_v1 = vmax.f32 %v7912_v12, %v7913_v46  ;;  %v7921_v52 = vmax.f32 %v7919_v8, %v7920_v37  ;;  %v7927_v53 = vrot.slane %v7926_v3, 2  ;;  %v6701_v19 = vmax.f32 %v6637_v2, 0.0 }
 0x460   :  { %v7908_v43 = vrot.slane %v7907_v54, 1  ;;  %v6640_v23 = vadd.f32 %v19374_v10, %v16293_v11  ;;  %v6639_v16 = vadd.f32 %v19374_v10, %v16294_v17  ;;  %v16295_v15 = vadd.f32 %v19263_v22, %v20875_v7 }
 0x461   :  { %v7915_v13 = vrot.slane %v7914_v1, 1  ;;  %v7922_v30 = vrot.slane %v7921_v52, 1  ;;  %v7928_v57 = vmax.f32 %v7926_v3, %v7927_v53  ;;  %v6780_v28 = vsel %vm6737_vm4, %v6701_v19, -inf }
 0x462   :  { %v7909_v31 = vmax.f32 %v7907_v54, %v7908_v43  ;;  %v6782_v49 = vmax.f32 %v6780_v28, %v6781_v21  ;;  %v6704_v58 = vmax.f32 %v6640_v23, 0.0  ;;  %v6703_v27 = vmax.f32 %v6639_v16, 0.0  ;;  %v19514_v43 = vpop.f32.mrb[55].mxu0 }
 0x463   :  { %v7916_v45 = vmax.f32 %v7914_v1, %v7915_v13  ;;  %v7923_v59 = vmax.f32 %v7921_v52, %v7922_v30  ;;  %v7929_v38 = vrot.slane %v7928_v57, 1  ;;  %v6642_v41 = vadd.f32 %v19374_v10, %v16295_v15  ;;  %v20876_v15 = vld [vmem:[#allocation11_spill] sm:$0xff] }
 0x464   :  { %v7104_v25 = vcombine.high %v6782_v49, %v6782_v49  ;;  %v7111_v47 = vrot.slane %v6782_v49, %v19116_v33  ;;  %v6784_v22 = vsel %vm6737_vm4, %v6704_v58, -inf  ;;  %v6783_v56 = vsel %vm6737_vm4, %v6703_v27, -inf }
 0x465   :  { %v7930_v12 = vmax.f32 %v7928_v57, %v7929_v38  ;;  %v8654_v8 = vsel %vm8612_vm6, %v7916_v45, %v7909_v31  ;;  %v6785_v36 = vmax.f32 %v6783_v56, %v6784_v22  ;;  %v6706_v0 = vmax.f32 %v6642_v41, 0.0 }
 0x466   :  { %v8655_v39 = vsel %vm8614_vm7, %v7923_v59, %v8654_v8  ;;  %v7118_v14 = vrot.slane %v7104_v25, %v19116_v33  ;;  %v7119_v21 = vcombine.high %v7111_v47, %v7111_v47  ;;  %v7931_v46 = vsel %vm7538_vm5, %v7111_v47, -inf  ;;  %v16918_v37 = vld [vmem:[#allocation3 + $0x91] ss:$8 sps:$4 sm:$0xff]  }
 0x467   :  { %v8656_v3 = vsel %vm8616_vm8, %v7930_v12, %v8655_v39  ;;  %v7932_v2 = vrot.slane %v7931_v46, 4  ;;  %v7121_v29 = vcombine.high %v6785_v36, %v6785_v36  ;;  %v7128_v54 = vrot.slane %v6785_v36, %v19116_v33  ;;  %15543 = vmatprep.mubr.msk.f32.mxu1 %vm6737_vm4, %v16918_v37  ;;  %v19523_v37 = vpop.f32.mrb[56].mxu0 }
 0x468   :  { %8758 = vst.msk [vmem:[#allocation3 + $0xa1] sm:$0xf] %vm8744_vm9, %v8656_v3  ;;  %v7120_v6 = vcombine.high %v7118_v14, %v7118_v14  ;;  %v7938_v11 = vsel %vm7538_vm5, %v7119_v21, -inf  ;;  %v7945_v40 = vsel %vm7538_vm5, %v7118_v14, -inf  ;;  %v19510_v17 = vsel %vm6737_vm4, %v6706_v0, -inf }
 0x469   :  { %v7933_v1 = vmax.f32 %v7931_v46, %v7932_v2  ;;  %v7939_v52 = vrot.slane %v7938_v11, 4  ;;  %v7946_v53 = vrot.slane %v7945_v40, 4  ;;  %v7135_v19 = vrot.slane %v7121_v29, %v19116_v33 }
 0x46a   :  { %v7952_v23 = vsel %vm7538_vm5, %v7120_v6, -inf  ;;  %v7136_v16 = vcombine.high %v7128_v54, %v7128_v54  ;;  %v7959_v7 = vsel %vm7538_vm5, %v7128_v54, -inf  ;;  %v16296_v13 = vadd.f32 %v19267_v24, %v20876_v15  ;;  %v19525_v6 = vpop.f32.mrb[57].mxu0 }
 0x46b   :  { %v7934_v30 = vrot.slane %v7933_v1, 2  ;;  %v7940_v57 = vmax.f32 %v7938_v11, %v7939_v52  ;;  %v7947_v28 = vmax.f32 %v7945_v40, %v7946_v53  ;;  %v7953_v31 = vrot.slane %v7952_v23, 4 }
 0x46c   :  { %v7137_v49 = vcombine.high %v7135_v19, %v7135_v19  ;;  %v7960_v58 = vrot.slane %v7959_v7, 4  ;;  %v7966_v27 = vsel %vm7538_vm5, %v7136_v16, -inf  ;;  %v7973_v45 = vsel %vm7538_vm5, %v7135_v19, -inf }
 0x46d   :  { %v7935_v59 = vmax.f32 %v7933_v1, %v7934_v30  ;;  %v7941_v38 = vrot.slane %v7940_v57, 2  ;;  %v7948_v41 = vrot.slane %v7947_v28, 2  ;;  %v7954_v25 = vmax.f32 %v7952_v23, %v7953_v31 }
 0x46e   :  { %v7961_v47 = vmax.f32 %v7959_v7, %v7960_v58  ;;  %v7967_v22 = vrot.slane %v7966_v27, 4  ;;  %v7974_v56 = vrot.slane %v7973_v45, 4  ;;  %v7980_v12 = vsel %vm7538_vm5, %v7137_v49, -inf  ;;  %v20877_v58 = vld [vmem:[#allocation12_spill] sm:$0xff] }
 0x46f   :  { %v7936_v24 = vrot.slane %v7935_v59, 1  ;;  %v7942_v8 = vmax.f32 %v7940_v57, %v7941_v38  ;;  %v7949_v36 = vmax.f32 %v7947_v28, %v7948_v41  ;;  %v7955_v0 = vrot.slane %v7954_v25, 2 }
 0x470   :  { %v7962_v39 = vrot.slane %v7961_v47, 2  ;;  %v7968_v14 = vmax.f32 %v7966_v27, %v7967_v22  ;;  %v7975_v21 = vmax.f32 %v7973_v45, %v7974_v56  ;;  %v7981_v46 = vrot.slane %v7980_v12, 4 }
 0x471   :  { %v7937_v3 = vmax.f32 %v7935_v59, %v7936_v24  ;;  %v7943_v2 = vrot.slane %v7942_v8, 1  ;;  %v7950_v29 = vrot.slane %v7949_v36, 1  ;;  %v7956_v54 = vmax.f32 %v7954_v25, %v7955_v0 }
 0x472   :  { %v7963_v11 = vmax.f32 %v7961_v47, %v7962_v39  ;;  %v7969_v40 = vrot.slane %v7968_v14, 2  ;;  %v7976_v1 = vrot.slane %v7975_v21, 2  ;;  %v7982_v52 = vmax.f32 %v7980_v12, %v7981_v46  ;;  %v20880_v46 = vld [vmem:[#allocation15_spill] sm:$0xff] }
 0x473   :  { %v7944_v53 = vmax.f32 %v7942_v8, %v7943_v2  ;;  %v7951_v19 = vmax.f32 %v7949_v36, %v7950_v29  ;;  %v7957_v23 = vrot.slane %v7956_v54, 1  ;;  %v6641_v16 = vadd.f32 %v19374_v10, %v16296_v13  ;;  %v20878_v8 = vld [vmem:[#allocation13_spill] sm:$0xff]  ;;  %v19539_v36 = vpop.f32.mrb[58].mxu0 }
 0x474   :  { %v7964_v7 = vrot.slane %v7963_v11, 1  ;;  %v7970_v15 = vmax.f32 %v7968_v14, %v7969_v40  ;;  %v7977_v30 = vmax.f32 %v7975_v21, %v7976_v1  ;;  %v7983_v57 = vrot.slane %v7982_v52, 2  ;;  %v20879_v14 = vld [vmem:[#allocation14_spill] sm:$0xff]  ;;  %v19545_v2 = vpop.f32.mrb[59].mxu0 }
 0x475   :  { %v7958_v28 = vmax.f32 %v7956_v54, %v7957_v23  ;;  %v8657_v31 = vsel %vm8612_vm6, %v7944_v53, %v7937_v3  ;;  %v6705_v49 = vmax.f32 %v6641_v16, 0.0  ;;  %v16297_v27 = vadd.f32 %v19273_v55, %v20877_v58 }
 0x476   :  { %v8658_v45 = vsel %vm8614_vm7, %v7951_v19, %v8657_v31  ;;  %v7965_v59 = vmax.f32 %v7963_v11, %v7964_v7  ;;  %v7971_v38 = vrot.slane %v7970_v15, 1  ;;  %v7978_v41 = vrot.slane %v7977_v30, 1 }
 0x477   :  { %v8659_v25 = vsel %vm8616_vm8, %v7958_v28, %v8658_v45  ;;  %v7984_v47 = vmax.f32 %v7982_v52, %v7983_v57  ;;  %v6786_v13 = vsel %vm6737_vm4, %v6705_v49, -inf  ;;  %v6644_v22 = vadd.f32 %v19374_v10, %v16297_v27 }
 0x478   :  { %8759 = vst.msk [vmem:[#allocation3 + $0xa9] sm:$0xf] %vm8744_vm9, %v8659_v25  ;;  %v7972_v56 = vmax.f32 %v7970_v15, %v7971_v38  ;;  %v7979_v12 = vmax.f32 %v7977_v30, %v7978_v41  ;;  %v6788_v24 = vmax.f32 %v6786_v13, %v19510_v17  ;;  %v16298_v55 = vadd.f32 %v19276_v44, %v20878_v8  ;;  %v20882_v13 = vld [vmem:[#allocation45_spill] sm:$0xff] }
 0x479   :  { %v7985_v0 = vrot.slane %v7984_v47, 1  ;;  %v6708_v39 = vmax.f32 %v6644_v22, 0.0  ;;  %v16299_v21 = vadd.f32 %v19287_v34, %v20879_v14  ;;  %v16300_v3 = vadd.f32 %v19290_v4, %v20880_v46 }
 0x47a   :  { %v8660_v29 = vsel %vm8612_vm6, %v7972_v56, %v7965_v59  ;;  %v7138_v54 = vcombine.high %v6788_v24, %v6788_v24  ;;  %v7145_v17 = vrot.slane %v6788_v24, %v19116_v33  ;;  %v6643_v11 = vadd.f32 %v19374_v10, %v16298_v55 }
 0x47b   :  { %v7986_v44 = vmax.f32 %v7984_v47, %v7985_v0  ;;  %v8661_v40 = vsel %vm8614_vm7, %v7979_v12, %v8660_v29  ;;  %v6790_v1 = vsel %vm6737_vm4, %v6708_v39, -inf  ;;  %v6646_v52 = vadd.f32 %v19374_v10, %v16299_v21  ;;  %v20881_v47 = vld [vmem:[#allocation16_spill] sm:$0xff]  ;;  %v19571_v21 = vpop.f32.mrb[60].mxu0 }
 0x47c   :  { %v7152_v34 = vrot.slane %v7138_v54, %v19116_v33  ;;  %v7153_v53 = vcombine.high %v7145_v17, %v7145_v17  ;;  %v7987_v4 = vsel %vm7538_vm5, %v7145_v17, -inf  ;;  %v6707_v19 = vmax.f32 %v6643_v11, 0.0 }
 0x47d   :  { %v8662_v23 = vsel %vm8616_vm8, %v7986_v44, %v8661_v40  ;;  %v7988_v16 = vrot.slane %v7987_v4, 4  ;;  %v6710_v7 = vmax.f32 %v6646_v52, 0.0  ;;  %v6645_v15 = vadd.f32 %v19374_v10, %v16300_v3 }
 0x47e   :  { %8760 = vst.msk [vmem:[#allocation3 + $0xb1] sm:$0xf] %vm8744_vm9, %v8662_v23  ;;  %v7154_v30 = vcombine.high %v7152_v34, %v7152_v34  ;;  %v7994_v57 = vsel %vm7538_vm5, %v7153_v53, -inf  ;;  %v8001_v28 = vsel %vm7538_vm5, %v7152_v34, -inf  ;;  %v6789_v31 = vsel %vm6737_vm4, %v6707_v19, -inf }
 0x47f   :  { %v7989_v49 = vmax.f32 %v7987_v4, %v7988_v16  ;;  %v7995_v58 = vrot.slane %v7994_v57, 4  ;;  %v8002_v27 = vrot.slane %v8001_v28, 4  ;;  %v6791_v45 = vmax.f32 %v6789_v31, %v6790_v1  ;;  %v16919_v59 = vld [vmem:[#allocation3 + $0xa1] ss:$8 sps:$4 sm:$0xff]  }
 0x480   :  { %v8008_v38 = vsel %vm7538_vm5, %v7154_v30, -inf  ;;  %v6793_v41 = vsel %vm6737_vm4, %v6710_v7, -inf  ;;  %v6709_v25 = vmax.f32 %v6645_v15, 0.0  ;;  %v16301_v22 = vadd.f32 %v20882_v13, %v20881_v47  ;;  %15544 = vmatmul.mubr.msk.f32.gmra.mrb[70].mxu1 %vm6737_vm4, %v16919_v59  ;;  %v19578_v13 = vpop.f32.mrb[61].mxu0 }
 0x481   :  { %v7990_v56 = vrot.slane %v7989_v49, 2  ;;  %v7996_v12 = vmax.f32 %v7994_v57, %v7995_v58  ;;  %v8003_v24 = vmax.f32 %v8001_v28, %v8002_v27  ;;  %v8009_v8 = vrot.slane %v8008_v38, 4 }
 0x482   :  { %v7155_v55 = vcombine.high %v6791_v45, %v6791_v45  ;;  %v7162_v0 = vrot.slane %v6791_v45, %v19116_v33  ;;  %v6792_v39 = vsel %vm6737_vm4, %v6709_v25, -inf  ;;  %v19569_v14 = vadd.f32 %v19374_v10, %v16301_v22 }
 0x483   :  { %v7991_v46 = vmax.f32 %v7989_v49, %v7990_v56  ;;  %v7997_v3 = vrot.slane %v7996_v12, 2  ;;  %v8004_v29 = vrot.slane %v8003_v24, 2  ;;  %v8010_v54 = vmax.f32 %v8008_v38, %v8009_v8 }
 0x484   :  { %v7169_v17 = vrot.slane %v7155_v55, %v19116_v33  ;;  %v7170_v11 = vcombine.high %v7162_v0, %v7162_v0  ;;  %v8015_v44 = vsel %vm7538_vm5, %v7162_v0, -inf  ;;  %v6794_v40 = vmax.f32 %v6792_v39, %v6793_v41 }
 0x485   :  { %v7992_v1 = vrot.slane %v7991_v46, 1  ;;  %v7998_v52 = vmax.f32 %v7996_v12, %v7997_v3  ;;  %v8005_v34 = vmax.f32 %v8003_v24, %v8004_v29  ;;  %v8011_v53 = vrot.slane %v8010_v54, 2 }
 0x486   :  { %v7171_v4 = vcombine.high %v7169_v17, %v7169_v17  ;;  %v8016_v19 = vrot.slane %v8015_v44, 4  ;;  %v8022_v10 = vsel %vm7538_vm5, %v7170_v11, -inf  ;;  %v8029_v23 = vsel %vm7538_vm5, %v7169_v17, -inf }
 0x487   :  { %v7993_v16 = vmax.f32 %v7991_v46, %v7992_v1  ;;  %v7999_v7 = vrot.slane %v7998_v52, 1  ;;  %v8006_v15 = vrot.slane %v8005_v34, 1  ;;  %v8012_v30 = vmax.f32 %v8010_v54, %v8011_v53 }
 0x488   :  { %v8017_v57 = vmax.f32 %v8015_v44, %v8016_v19  ;;  %v8023_v28 = vrot.slane %v8022_v10, 4  ;;  %v8030_v31 = vrot.slane %v8029_v23, 4  ;;  %v8036_v49 = vsel %vm7538_vm5, %v7171_v4, -inf }
 0x489   :  { %v8000_v58 = vmax.f32 %v7998_v52, %v7999_v7  ;;  %v8007_v27 = vmax.f32 %v8005_v34, %v8006_v15  ;;  %v8013_v45 = vrot.slane %v8012_v30, 1  ;;  %v8037_v59 = vrot.slane %v8036_v49, 4 }
 0x48a   :  { %v8018_v38 = vrot.slane %v8017_v57, 2  ;;  %v8024_v41 = vmax.f32 %v8022_v10, %v8023_v28  ;;  %v8031_v25 = vmax.f32 %v8029_v23, %v8030_v31  ;;  %v7172_v47 = vcombine.high %v6794_v40, %v6794_v40 }
 0x48b   :  { %v8014_v22 = vmax.f32 %v8012_v30, %v8013_v45  ;;  %v8663_v56 = vsel %vm8612_vm6, %v8000_v58, %v7993_v16  ;;  %v8038_v12 = vmax.f32 %v8036_v49, %v8037_v59  ;;  %v7179_v24 = vrot.slane %v6794_v40, %v19116_v33 }
 0x48c   :  { %v8664_v8 = vsel %vm8614_vm7, %v8007_v27, %v8663_v56  ;;  %v8019_v55 = vmax.f32 %v8017_v57, %v8018_v38  ;;  %v8025_v0 = vrot.slane %v8024_v41, 2  ;;  %v8032_v39 = vrot.slane %v8031_v25, 2  ;;  %v19590_v57 = vpop.f32.mrb[62].mxu0  ;;  %v20883_v56 = vld [vmem:[#allocation17_spill] sm:$0xff] }
 0x48d   :  { %v8665_v46 = vsel %vm8616_vm8, %v8014_v22, %v8664_v8  ;;  %v8039_v3 = vrot.slane %v8038_v12, 2  ;;  %v7186_v29 = vrot.slane %v7172_v47, %v19116_v33  ;;  %v7187_v54 = vcombine.high %v7179_v24, %v7179_v24  ;;  %v19592_v27 = vpop.f32.mrb[63].mxu0 }
 0x48e   :  { %8761 = vst.msk [vmem:[#allocation3 + $0xc9] sm:$0xf] %vm8744_vm9, %v8665_v46  ;;  %v8020_v17 = vrot.slane %v8019_v55, 1  ;;  %v8026_v11 = vmax.f32 %v8024_v41, %v8025_v0  ;;  %v8033_v44 = vmax.f32 %v8031_v25, %v8032_v39  ;;  %v8043_v1 = vsel %vm7538_vm5, %v7179_v24, -inf }
 0x48f   :  { %v8040_v52 = vmax.f32 %v8038_v12, %v8039_v3  ;;  %v7188_v40 = vcombine.high %v7186_v29, %v7186_v29  ;;  %v8044_v34 = vrot.slane %v8043_v1, 4  ;;  %v8050_v53 = vsel %vm7538_vm5, %v7187_v54, -inf  ;;  %v20884_v12 = vld [vmem:[#allocation46_spill] sm:$0xff] }
 0x490   :  { %v8021_v4 = vmax.f32 %v8019_v55, %v8020_v17  ;;  %v8027_v19 = vrot.slane %v8026_v11, 1  ;;  %v8034_v10 = vrot.slane %v8033_v44, 1  ;;  %v8051_v23 = vrot.slane %v8050_v53, 4 }
 0x491   :  { %v8041_v16 = vrot.slane %v8040_v52, 1  ;;  %v8045_v7 = vmax.f32 %v8043_v1, %v8044_v34  ;;  %v8057_v15 = vsel %vm7538_vm5, %v7186_v29, -inf  ;;  %v8064_v30 = vsel %vm7538_vm5, %v7188_v40, -inf  ;;  %v20885_v1 = vld [vmem:[#allocation18_spill] sm:$0xff]  ;;  %v20886_v40 = vld [vmem:[#allocation19_spill] sm:$0xff] }
 0x492   :  { %v8028_v28 = vmax.f32 %v8026_v11, %v8027_v19  ;;  %v8035_v31 = vmax.f32 %v8033_v44, %v8034_v10  ;;  %v8052_v49 = vmax.f32 %v8050_v53, %v8051_v23  ;;  %v8058_v58 = vrot.slane %v8057_v15, 4  ;;  %v20887_v10 = vld [vmem:[#allocation20_spill] sm:$0xff] }
 0x493   :  { %v8042_v45 = vmax.f32 %v8040_v52, %v8041_v16  ;;  %v8046_v59 = vrot.slane %v8045_v7, 2  ;;  %v8065_v38 = vrot.slane %v8064_v30, 4  ;;  %v6712_v41 = vmax.f32 %v19569_v14, 0.0  ;;  %v19604_v14 = vld [vmem:[%s20813_s3] ss:$0 sm:$0xff] }
 0x494   :  { %v8666_v25 = vsel %vm8612_vm6, %v8028_v28, %v8021_v4  ;;  %v8053_v47 = vrot.slane %v8052_v49, 2  ;;  %v8059_v22 = vmax.f32 %v8057_v15, %v8058_v58  ;;  %v16302_v24 = vadd.f32 %v20884_v12, %v20883_v56 }
 0x495   :  { %v8667_v8 = vsel %vm8614_vm7, %v8035_v31, %v8666_v25  ;;  %v8047_v55 = vmax.f32 %v8045_v7, %v8046_v59  ;;  %v8066_v0 = vmax.f32 %v8064_v30, %v8065_v38  ;;  %v6796_v39 = vsel %vm6737_vm4, %v6712_v41, -inf  ;;  %v16920_v46 = vld [vmem:[#allocation3 + $0xc1] ss:$8 sps:$4 sm:$0xff]   ;;  %v20888_v25 = vld [vmem:[#allocation21_spill] sm:$0xff] }
 0x496   :  { %v8668_v3 = vsel %vm8616_vm8, %v8042_v45, %v8667_v8  ;;  %v8054_v29 = vmax.f32 %v8052_v49, %v8053_v47  ;;  %v8060_v54 = vrot.slane %v8059_v22, 2  ;;  %v6647_v17 = vadd.f32 %v19604_v14, %v16302_v24  ;;  %15546 = vmatprep.mubr.msk.f32.mxu1 %vm6737_vm4, %v16920_v46 }
 0x497   :  { %8762 = vst.msk [vmem:[#allocation3 + $0xd1] sm:$0xf] %vm8744_vm9, %v8668_v3  ;;  %v8048_v11 = vrot.slane %v8047_v55, 1  ;;  %v8067_v44 = vrot.slane %v8066_v0, 2  ;;  %v16303_v52 = vadd.f32 %v19326_v63, %v20885_v1  ;;  %v16304_v34 = vadd.f32 %v19328_v48, %v20886_v40 }
 0x498   :  { %v8055_v53 = vrot.slane %v8054_v29, 1  ;;  %v8061_v4 = vmax.f32 %v8059_v22, %v8060_v54  ;;  %v6711_v19 = vmax.f32 %v6647_v17, 0.0  ;;  %v16305_v23 = vadd.f32 %v19342_v18, %v20887_v10 }
 0x499   :  { %v8049_v16 = vmax.f32 %v8047_v55, %v8048_v11  ;;  %v8068_v7 = vmax.f32 %v8066_v0, %v8067_v44  ;;  %v6650_v15 = vadd.f32 %v19604_v14, %v16303_v52  ;;  %v6649_v30 = vadd.f32 %v19604_v14, %v16304_v34  ;;  %v20889_v44 = vld [vmem:[#allocation22_spill] sm:$0xff] }
 0x49a   :  { %v8056_v28 = vmax.f32 %v8054_v29, %v8055_v53  ;;  %v8062_v31 = vrot.slane %v8061_v4, 1  ;;  %v6795_v63 = vsel %vm6737_vm4, %v6711_v19, -inf  ;;  %v6652_v48 = vadd.f32 %v19604_v14, %v16305_v23  ;;  %v20890_v53 = vld [vmem:[#allocation23_spill] sm:$0xff] }
 0x49b   :  { %v8069_v49 = vrot.slane %v8068_v7, 1  ;;  %v6797_v58 = vmax.f32 %v6795_v63, %v6796_v39  ;;  %v6714_v45 = vmax.f32 %v6650_v15, 0.0  ;;  %v6713_v59 = vmax.f32 %v6649_v30, 0.0 }
 0x49c   :  { %v8063_v38 = vmax.f32 %v8061_v4, %v8062_v31  ;;  %v8669_v41 = vsel %vm8612_vm6, %v8056_v28, %v8049_v16  ;;  %v6716_v18 = vmax.f32 %v6652_v48, 0.0  ;;  %v16306_v47 = vadd.f32 %v19348_v9, %v20888_v25 }
 0x49d   :  { %v8070_v22 = vmax.f32 %v8068_v7, %v8069_v49  ;;  %v7189_v56 = vcombine.high %v6797_v58, %v6797_v58  ;;  %v7196_v12 = vrot.slane %v6797_v58, %v19116_v33  ;;  %v6799_v24 = vsel %vm6737_vm4, %v6714_v45, -inf }
 0x49e   :  { %v8670_v8 = vsel %vm8614_vm7, %v8063_v38, %v8669_v41  ;;  %v6798_v55 = vsel %vm6737_vm4, %v6713_v59, -inf  ;;  %v6802_v0 = vsel %vm6737_vm4, %v6716_v18, -inf  ;;  %v6651_v39 = vadd.f32 %v19604_v14, %v16306_v47 }
 0x49f   :  { %v8671_v46 = vsel %vm8616_vm8, %v8070_v22, %v8670_v8  ;;  %v7203_v3 = vrot.slane %v7189_v56, %v19116_v33  ;;  %v7204_v29 = vcombine.high %v7196_v12, %v7196_v12  ;;  %v8071_v9 = vsel %vm7538_vm5, %v7196_v12, -inf }
 0x4a0   :  { %8763 = vst.msk [vmem:[#allocation3 + $0xd9] sm:$0xf] %vm8744_vm9, %v8671_v46  ;;  %v8072_v54 = vrot.slane %v8071_v9, 4  ;;  %v6800_v17 = vmax.f32 %v6798_v55, %v6799_v24  ;;  %v6715_v11 = vmax.f32 %v6651_v39, 0.0  ;;  %v16307_v1 = vadd.f32 %v19379_v60, %v20889_v44 }
 0x4a1   :  { %v7205_v52 = vcombine.high %v7203_v3, %v7203_v3  ;;  %v8078_v40 = vsel %vm7538_vm5, %v7204_v29, -inf  ;;  %v8085_v34 = vsel %vm7538_vm5, %v7203_v3, -inf  ;;  %v19638_v4 = vadd.f32 %v19386_v5, %v20890_v53 }
 0x4a2   :  { %v8073_v19 = vmax.f32 %v8071_v9, %v8072_v54  ;;  %v8079_v10 = vrot.slane %v8078_v40, 4  ;;  %v8086_v23 = vrot.slane %v8085_v34, 4  ;;  %v7206_v16 = vcombine.high %v6800_v17, %v6800_v17 }
 0x4a3   :  { %v8092_v7 = vsel %vm7538_vm5, %v7205_v52, -inf  ;;  %v7213_v15 = vrot.slane %v6800_v17, %v19116_v33  ;;  %v6801_v30 = vsel %vm6737_vm4, %v6715_v11, -inf  ;;  %v19644_v60 = vadd.f32 %v19604_v14, %v16307_v1 }
 0x4a4   :  { %v8074_v28 = vrot.slane %v8073_v19, 2  ;;  %v8080_v31 = vmax.f32 %v8078_v40, %v8079_v10  ;;  %v8087_v63 = vmax.f32 %v8085_v34, %v8086_v23  ;;  %v8093_v48 = vrot.slane %v8092_v7, 4 }
 0x4a5   :  { %v7220_v5 = vrot.slane %v7206_v16, %v19116_v33  ;;  %v7221_v49 = vcombine.high %v7213_v15, %v7213_v15  ;;  %v8099_v58 = vsel %vm7538_vm5, %v7213_v15, -inf  ;;  %v6803_v45 = vmax.f32 %v6801_v30, %v6802_v0 }
 0x4a6   :  { %v8075_v59 = vmax.f32 %v8073_v19, %v8074_v28  ;;  %v8081_v38 = vrot.slane %v8080_v31, 2  ;;  %v8088_v41 = vrot.slane %v8087_v63, 2  ;;  %v8094_v18 = vmax.f32 %v8092_v7, %v8093_v48 }
 0x4a7   :  { %v7222_v25 = vcombine.high %v7220_v5, %v7220_v5  ;;  %v8100_v47 = vrot.slane %v8099_v58, 4  ;;  %v8106_v22 = vsel %vm7538_vm5, %v7221_v49, -inf  ;;  %v8113_v56 = vsel %vm7538_vm5, %v7220_v5, -inf  ;;  %v16921_v39 = vld [vmem:[#allocation3 + $0xd1] ss:$8 sps:$4 sm:$0xff]  }
 0x4a8   :  { %v8076_v12 = vrot.slane %v8075_v59, 1  ;;  %v8082_v24 = vmax.f32 %v8080_v31, %v8081_v38  ;;  %v8089_v8 = vmax.f32 %v8087_v63, %v8088_v41  ;;  %v8095_v55 = vrot.slane %v8094_v18, 2  ;;  %15547 = vmatmul.mubr.msk.f32.gmra.mrb[72].mxu1 %vm6737_vm4, %v16921_v39 }
 0x4a9   :  { %v8101_v46 = vmax.f32 %v8099_v58, %v8100_v47  ;;  %v8107_v3 = vrot.slane %v8106_v22, 4  ;;  %v8114_v29 = vrot.slane %v8113_v56, 4  ;;  %v8120_v0 = vsel %vm7538_vm5, %v7222_v25, -inf }
 0x4aa   :  { %v8077_v9 = vmax.f32 %v8075_v59, %v8076_v12  ;;  %v8083_v54 = vrot.slane %v8082_v24, 1  ;;  %v8090_v17 = vrot.slane %v8089_v8, 1  ;;  %v8096_v11 = vmax.f32 %v8094_v18, %v8095_v55 }
 0x4ab   :  { %v8102_v44 = vrot.slane %v8101_v46, 2  ;;  %v8108_v1 = vmax.f32 %v8106_v22, %v8107_v3  ;;  %v8115_v52 = vmax.f32 %v8113_v56, %v8114_v29  ;;  %v8121_v40 = vrot.slane %v8120_v0, 4 }
 0x4ac   :  { %v8084_v34 = vmax.f32 %v8082_v24, %v8083_v54  ;;  %v8091_v53 = vmax.f32 %v8089_v8, %v8090_v17  ;;  %v8097_v19 = vrot.slane %v8096_v11, 1  ;;  %v7223_v10 = vcombine.high %v6803_v45, %v6803_v45 }
 0x4ad   :  { %v8103_v23 = vmax.f32 %v8101_v46, %v8102_v44  ;;  %v8109_v16 = vrot.slane %v8108_v1, 2  ;;  %v8116_v7 = vrot.slane %v8115_v52, 2  ;;  %v8122_v15 = vmax.f32 %v8120_v0, %v8121_v40 }
 0x4ae   :  { %v8098_v30 = vmax.f32 %v8096_v11, %v8097_v19  ;;  %v8672_v28 = vsel %vm8612_vm6, %v8084_v34, %v8077_v9  ;;  %v7230_v31 = vrot.slane %v6803_v45, %v19116_v33  ;;  %v7237_v63 = vrot.slane %v7223_v10, %v19116_v33 }
 0x4af   :  { %v8673_v48 = vsel %vm8614_vm7, %v8091_v53, %v8672_v28  ;;  %v8104_v5 = vrot.slane %v8103_v23, 1  ;;  %v8110_v49 = vmax.f32 %v8108_v1, %v8109_v16  ;;  %v8117_v58 = vmax.f32 %v8115_v52, %v8116_v7  ;;  %v20892_v28 = vld [vmem:[#allocation25_spill] sm:$0xff] }
 0x4b0   :  { %v8674_v59 = vsel %vm8616_vm8, %v8098_v30, %v8673_v48  ;;  %v8123_v38 = vrot.slane %v8122_v15, 2  ;;  %v7238_v41 = vcombine.high %v7230_v31, %v7230_v31  ;;  %v7239_v18 = vcombine.high %v7237_v63, %v7237_v63 }
 0x4b1   :  { %8764 = vst.msk [vmem:[#allocation3 + $0xe1] sm:$0xf] %vm8744_vm9, %v8674_v59  ;;  %v8105_v25 = vmax.f32 %v8103_v23, %v8104_v5  ;;  %v8111_v47 = vrot.slane %v8110_v49, 1  ;;  %v8118_v22 = vrot.slane %v8117_v58, 1  ;;  %v8127_v56 = vsel %vm7538_vm5, %v7230_v31, -inf }
 0x4b2   :  { %v8124_v45 = vmax.f32 %v8122_v15, %v8123_v38  ;;  %v8128_v12 = vrot.slane %v8127_v56, 4  ;;  %v8134_v24 = vsel %vm7538_vm5, %v7238_v41, -inf  ;;  %v8141_v8 = vsel %vm7538_vm5, %v7237_v63, -inf  ;;  %v20891_v15 = vld [vmem:[#allocation24_spill] sm:$0xff]  ;;  %v20893_v38 = vld [vmem:[#allocation26_spill] sm:$0xff] }
 0x4b3   :  { %v8112_v55 = vmax.f32 %v8110_v49, %v8111_v47  ;;  %v8119_v39 = vmax.f32 %v8117_v58, %v8118_v22  ;;  %v8135_v46 = vrot.slane %v8134_v24, 4  ;;  %v8142_v3 = vrot.slane %v8141_v8, 4 }
 0x4b4   :  { %v8125_v29 = vrot.slane %v8124_v45, 1  ;;  %v8129_v0 = vmax.f32 %v8127_v56, %v8128_v12  ;;  %v8148_v9 = vsel %vm7538_vm5, %v7239_v18, -inf  ;;  %v6718_v54 = vmax.f32 %v19644_v60, 0.0 }
 0x4b5   :  { %v8675_v17 = vsel %vm8612_vm6, %v8112_v55, %v8105_v25  ;;  %v8136_v11 = vmax.f32 %v8134_v24, %v8135_v46  ;;  %v8143_v44 = vmax.f32 %v8141_v8, %v8142_v3  ;;  %v8149_v1 = vrot.slane %v8148_v9, 4 }
 0x4b6   :  { %v8126_v52 = vmax.f32 %v8124_v45, %v8125_v29  ;;  %v8676_v40 = vsel %vm8614_vm7, %v8119_v39, %v8675_v17  ;;  %v8130_v34 = vrot.slane %v8129_v0, 2  ;;  %v6805_v53 = vsel %vm6737_vm4, %v6718_v54, -inf }
 0x4b7   :  { %v8137_v19 = vrot.slane %v8136_v11, 2  ;;  %v8144_v10 = vrot.slane %v8143_v44, 2  ;;  %v8150_v23 = vmax.f32 %v8148_v9, %v8149_v1  ;;  %v6653_v16 = vadd.f32 %v19604_v14, %v19638_v4 }
 0x4b8   :  { %v8677_v7 = vsel %vm8616_vm8, %v8126_v52, %v8676_v40  ;;  %v8131_v60 = vmax.f32 %v8129_v0, %v8130_v34  ;;  %v16309_v30 = vadd.f32 %v19398_v20, %v20891_v15  ;;  %v16310_v31 = vadd.f32 %v19400_v42, %v20892_v28 }
 0x4b9   :  { %8765 = vst.msk [vmem:[#allocation3 + $0xf9] sm:$0xf] %vm8744_vm9, %v8677_v7  ;;  %v8138_v63 = vmax.f32 %v8136_v11, %v8137_v19  ;;  %v8145_v48 = vmax.f32 %v8143_v44, %v8144_v10  ;;  %v8151_v5 = vrot.slane %v8150_v23, 2  ;;  %v6717_v49 = vmax.f32 %v6653_v16, 0.0 }
 0x4ba   :  { %v8132_v58 = vrot.slane %v8131_v60, 1  ;;  %v6656_v59 = vadd.f32 %v19604_v14, %v16309_v30  ;;  %v6655_v4 = vadd.f32 %v19604_v14, %v16310_v31  ;;  %v16311_v41 = vadd.f32 %v19416_v50, %v20893_v38 }
 0x4bb   :  { %v8139_v18 = vrot.slane %v8138_v63, 1  ;;  %v8146_v25 = vrot.slane %v8145_v48, 1  ;;  %v8152_v20 = vmax.f32 %v8150_v23, %v8151_v5  ;;  %v6804_v47 = vsel %vm6737_vm4, %v6717_v49, -inf  ;;  %v20894_v5 = vld [vmem:[#allocation27_spill] sm:$0xff] }
 0x4bc   :  { %v8133_v42 = vmax.f32 %v8131_v60, %v8132_v58  ;;  %v6806_v22 = vmax.f32 %v6804_v47, %v6805_v53  ;;  %v6720_v56 = vmax.f32 %v6656_v59, 0.0  ;;  %v6719_v45 = vmax.f32 %v6655_v4, 0.0 }
 0x4bd   :  { %v8140_v12 = vmax.f32 %v8138_v63, %v8139_v18  ;;  %v8147_v24 = vmax.f32 %v8145_v48, %v8146_v25  ;;  %v8153_v8 = vrot.slane %v8152_v20, 1  ;;  %v6658_v55 = vadd.f32 %v19604_v14, %v16311_v41 }
 0x4be   :  { %v7240_v39 = vcombine.high %v6806_v22, %v6806_v22  ;;  %v7247_v46 = vrot.slane %v6806_v22, %v19116_v33  ;;  %v6808_v3 = vsel %vm6737_vm4, %v6720_v56, -inf  ;;  %v6807_v50 = vsel %vm6737_vm4, %v6719_v45, -inf }
 0x4bf   :  { %v8154_v29 = vmax.f32 %v8152_v20, %v8153_v8  ;;  %v8678_v0 = vsel %vm8612_vm6, %v8140_v12, %v8133_v42  ;;  %v6809_v9 = vmax.f32 %v6807_v50, %v6808_v3  ;;  %v6722_v54 = vmax.f32 %v6658_v55, 0.0 }
 0x4c0   :  { %v8679_v17 = vsel %vm8614_vm7, %v8147_v24, %v8678_v0  ;;  %v7254_v11 = vrot.slane %v7240_v39, %v19116_v33  ;;  %v7255_v44 = vcombine.high %v7247_v46, %v7247_v46  ;;  %v8155_v1 = vsel %vm7538_vm5, %v7247_v46, -inf  ;;  %v16922_v52 = vld [vmem:[#allocation3 + $0xf1] ss:$8 sps:$4 sm:$0xff]  }
 0x4c1   :  { %v8680_v40 = vsel %vm8616_vm8, %v8154_v29, %v8679_v17  ;;  %v8156_v34 = vrot.slane %v8155_v1, 4  ;;  %v7257_v53 = vcombine.high %v6809_v9, %v6809_v9  ;;  %v7264_v19 = vrot.slane %v6809_v9, %v19116_v33  ;;  %15549 = vmatprep.mubr.msk.f32.mxu1 %vm6737_vm4, %v16922_v52 }
 0x4c2   :  { %8766 = vst.msk [vmem:[#allocation3 + $0x101] sm:$0xf] %vm8744_vm9, %v8680_v40  ;;  %v7256_v10 = vcombine.high %v7254_v11, %v7254_v11  ;;  %v8162_v23 = vsel %vm7538_vm5, %v7255_v44, -inf  ;;  %v8169_v16 = vsel %vm7538_vm5, %v7254_v11, -inf  ;;  %v19693_v7 = vsel %vm6737_vm4, %v6722_v54, -inf }
 0x4c3   :  { %v8157_v60 = vmax.f32 %v8155_v1, %v8156_v34  ;;  %v8163_v15 = vrot.slane %v8162_v23, 4  ;;  %v8170_v30 = vrot.slane %v8169_v16, 4  ;;  %v7271_v28 = vrot.slane %v7257_v53, %v19116_v33 }
 0x4c4   :  { %v8176_v31 = vsel %vm7538_vm5, %v7256_v10, -inf  ;;  %v7272_v63 = vcombine.high %v7264_v19, %v7264_v19  ;;  %v8183_v48 = vsel %vm7538_vm5, %v7264_v19, -inf  ;;  %v16312_v49 = vadd.f32 %v19420_v62, %v20894_v5 }
 0x4c5   :  { %v8158_v58 = vrot.slane %v8157_v60, 2  ;;  %v8164_v59 = vmax.f32 %v8162_v23, %v8163_v15  ;;  %v8171_v4 = vmax.f32 %v8169_v16, %v8170_v30  ;;  %v8177_v38 = vrot.slane %v8176_v31, 4 }
 0x4c6   :  { %v7273_v41 = vcombine.high %v7271_v28, %v7271_v28  ;;  %v8184_v18 = vrot.slane %v8183_v48, 4  ;;  %v8190_v25 = vsel %vm7538_vm5, %v7272_v63, -inf  ;;  %v8197_v20 = vsel %vm7538_vm5, %v7271_v28, -inf  ;;  %v20895_v63 = vld [vmem:[#allocation28_spill] sm:$0xff] }
 0x4c7   :  { %v8159_v47 = vmax.f32 %v8157_v60, %v8158_v58  ;;  %v8165_v42 = vrot.slane %v8164_v59, 2  ;;  %v8172_v22 = vrot.slane %v8171_v4, 2  ;;  %v8178_v56 = vmax.f32 %v8176_v31, %v8177_v38 }
 0x4c8   :  { %v8185_v45 = vmax.f32 %v8183_v48, %v8184_v18  ;;  %v8191_v12 = vrot.slane %v8190_v25, 4  ;;  %v8198_v24 = vrot.slane %v8197_v20, 4  ;;  %v8204_v8 = vsel %vm7538_vm5, %v7273_v41, -inf }
 0x4c9   :  { %v8160_v62 = vrot.slane %v8159_v47, 1  ;;  %v8166_v55 = vmax.f32 %v8164_v59, %v8165_v42  ;;  %v8173_v39 = vmax.f32 %v8171_v4, %v8172_v22  ;;  %v8179_v46 = vrot.slane %v8178_v56, 2  ;;  %v20896_v42 = vld [vmem:[#allocation29_spill] sm:$0xff] }
 0x4ca   :  { %v8186_v3 = vrot.slane %v8185_v45, 2  ;;  %v8192_v50 = vmax.f32 %v8190_v25, %v8191_v12  ;;  %v8199_v29 = vmax.f32 %v8197_v20, %v8198_v24  ;;  %v8205_v0 = vrot.slane %v8204_v8, 4  ;;  %v20898_v24 = vld [vmem:[#allocation31_spill] sm:$0xff] }
 0x4cb   :  { %v8161_v9 = vmax.f32 %v8159_v47, %v8160_v62  ;;  %v8167_v54 = vrot.slane %v8166_v55, 1  ;;  %v8174_v17 = vrot.slane %v8173_v39, 1  ;;  %v8180_v11 = vmax.f32 %v8178_v56, %v8179_v46 }
 0x4cc   :  { %v8187_v44 = vmax.f32 %v8185_v45, %v8186_v3  ;;  %v8193_v1 = vrot.slane %v8192_v50, 2  ;;  %v8200_v52 = vrot.slane %v8199_v29, 2  ;;  %v8206_v40 = vmax.f32 %v8204_v8, %v8205_v0  ;;  %v20897_v45 = vld [vmem:[#allocation30_spill] sm:$0xff] }
 0x4cd   :  { %v8168_v34 = vmax.f32 %v8166_v55, %v8167_v54  ;;  %v8175_v53 = vmax.f32 %v8173_v39, %v8174_v17  ;;  %v8181_v19 = vrot.slane %v8180_v11, 1  ;;  %v6657_v10 = vadd.f32 %v19604_v14, %v16312_v49 }
 0x4ce   :  { %v8188_v23 = vrot.slane %v8187_v44, 1  ;;  %v8194_v16 = vmax.f32 %v8192_v50, %v8193_v1  ;;  %v8201_v60 = vmax.f32 %v8199_v29, %v8200_v52  ;;  %v8207_v15 = vrot.slane %v8206_v40, 2 }
 0x4cf   :  { %v8182_v30 = vmax.f32 %v8180_v11, %v8181_v19  ;;  %v8681_v28 = vsel %vm8612_vm6, %v8168_v34, %v8161_v9  ;;  %v6721_v31 = vmax.f32 %v6657_v10, 0.0  ;;  %v16313_v48 = vadd.f32 %v19457_v61, %v20895_v63 }
 0x4d0   :  { %v8682_v5 = vsel %vm8614_vm7, %v8175_v53, %v8681_v28  ;;  %v8189_v58 = vmax.f32 %v8187_v44, %v8188_v23  ;;  %v8195_v59 = vrot.slane %v8194_v16, 1  ;;  %v8202_v4 = vrot.slane %v8201_v60, 1 }
 0x4d1   :  { %v8683_v38 = vsel %vm8616_vm8, %v8182_v30, %v8682_v5  ;;  %v8208_v41 = vmax.f32 %v8206_v40, %v8207_v15  ;;  %v6810_v49 = vsel %vm6737_vm4, %v6721_v31, -inf  ;;  %v6660_v18 = vadd.f32 %v19604_v14, %v16313_v48  ;;  %v20899_v30 = vld [vmem:[#allocation32_spill] sm:$0xff] }
 0x4d2   :  { %8767 = vst.msk [vmem:[#allocation3 + $0x109] sm:$0xf] %vm8744_vm9, %v8683_v38  ;;  %v8196_v25 = vmax.f32 %v8194_v16, %v8195_v59  ;;  %v8203_v20 = vmax.f32 %v8201_v60, %v8202_v4  ;;  %v6812_v47 = vmax.f32 %v6810_v49, %v19693_v7  ;;  %v16314_v61 = vadd.f32 %v19460_v26, %v20896_v42 }
 0x4d3   :  { %v8209_v22 = vrot.slane %v8208_v41, 1  ;;  %v6724_v56 = vmax.f32 %v6660_v18, 0.0  ;;  %v16315_v12 = vadd.f32 %v19468_v35, %v20897_v45  ;;  %v16316_v8 = vadd.f32 %v19472_v32, %v20898_v24 }
 0x4d4   :  { %v8684_v62 = vsel %vm8612_vm6, %v8196_v25, %v8189_v58  ;;  %v7274_v55 = vcombine.high %v6812_v47, %v6812_v47  ;;  %v7281_v39 = vrot.slane %v6812_v47, %v19116_v33  ;;  %v6659_v46 = vadd.f32 %v19604_v14, %v16314_v61 }
 0x4d5   :  { %v8210_v3 = vmax.f32 %v8208_v41, %v8209_v22  ;;  %v8685_v7 = vsel %vm8614_vm7, %v8203_v20, %v8684_v62  ;;  %v6814_v26 = vsel %vm6737_vm4, %v6724_v56, -inf  ;;  %v6662_v50 = vadd.f32 %v19604_v14, %v16315_v12 }
 0x4d6   :  { %v7288_v29 = vrot.slane %v7274_v55, %v19116_v33  ;;  %v7289_v35 = vcombine.high %v7281_v39, %v7281_v39  ;;  %v8211_v0 = vsel %vm7538_vm5, %v7281_v39, -inf  ;;  %v6723_v32 = vmax.f32 %v6659_v46, 0.0 }
 0x4d7   :  { %v8686_v9 = vsel %vm8616_vm8, %v8210_v3, %v8685_v7  ;;  %v8212_v54 = vrot.slane %v8211_v0, 4  ;;  %v6726_v17 = vmax.f32 %v6662_v50, 0.0  ;;  %v6661_v11 = vadd.f32 %v19604_v14, %v16316_v8 }
 0x4d8   :  { %8768 = vst.msk [vmem:[#allocation3 + $0x111] sm:$0xf] %vm8744_vm9, %v8686_v9  ;;  %v7290_v44 = vcombine.high %v7288_v29, %v7288_v29  ;;  %v8218_v1 = vsel %vm7538_vm5, %v7289_v35, -inf  ;;  %v8225_v52 = vsel %vm7538_vm5, %v7288_v29, -inf  ;;  %v6813_v40 = vsel %vm6737_vm4, %v6723_v32, -inf }
 0x4d9   :  { %v8213_v34 = vmax.f32 %v8211_v0, %v8212_v54  ;;  %v8219_v53 = vrot.slane %v8218_v1, 4  ;;  %v8226_v19 = vrot.slane %v8225_v52, 4  ;;  %v6815_v10 = vmax.f32 %v6813_v40, %v6814_v26  ;;  %v16923_v23 = vld [vmem:[#allocation3 + $0x101] ss:$8 sps:$4 sm:$0xff]  }
 0x4da   :  { %v8232_v16 = vsel %vm7538_vm5, %v7290_v44, -inf  ;;  %v6817_v60 = vsel %vm6737_vm4, %v6726_v17, -inf  ;;  %v6725_v15 = vmax.f32 %v6661_v11, 0.0  ;;  %v16317_v28 = vadd.f32 %v19493_v51, %v20899_v30  ;;  %15550 = vmatmul.mubr.msk.f32.gmra.mrb[74].mxu1 %vm6737_vm4, %v16923_v23 }
 0x4db   :  { %v8214_v31 = vrot.slane %v8213_v34, 2  ;;  %v8220_v63 = vmax.f32 %v8218_v1, %v8219_v53  ;;  %v8227_v48 = vmax.f32 %v8225_v52, %v8226_v19  ;;  %v8233_v5 = vrot.slane %v8232_v16, 4 }
 0x4dc   :  { %v7291_v58 = vcombine.high %v6815_v10, %v6815_v10  ;;  %v7298_v59 = vrot.slane %v6815_v10, %v19116_v33  ;;  %v6816_v4 = vsel %vm6737_vm4, %v6725_v15, -inf  ;;  %v19742_v38 = vadd.f32 %v19604_v14, %v16317_v28 }
 0x4dd   :  { %v8215_v41 = vmax.f32 %v8213_v34, %v8214_v31  ;;  %v8221_v49 = vrot.slane %v8220_v63, 2  ;;  %v8228_v18 = vrot.slane %v8227_v48, 2  ;;  %v8234_v25 = vmax.f32 %v8232_v16, %v8233_v5 }
 0x4de   :  { %v7305_v51 = vrot.slane %v7291_v58, %v19116_v33  ;;  %v7306_v20 = vcombine.high %v7298_v59, %v7298_v59  ;;  %v8239_v47 = vsel %vm7538_vm5, %v7298_v59, -inf  ;;  %v6818_v42 = vmax.f32 %v6816_v4, %v6817_v60 }
 0x4df   :  { %v8216_v61 = vrot.slane %v8215_v41, 1  ;;  %v8222_v22 = vmax.f32 %v8220_v63, %v8221_v49  ;;  %v8229_v56 = vmax.f32 %v8227_v48, %v8228_v18  ;;  %v8235_v45 = vrot.slane %v8234_v25, 2 }
 0x4e0   :  { %v7307_v12 = vcombine.high %v7305_v51, %v7305_v51  ;;  %v8240_v24 = vrot.slane %v8239_v47, 4  ;;  %v8246_v8 = vsel %vm7538_vm5, %v7306_v20, -inf  ;;  %v8253_v62 = vsel %vm7538_vm5, %v7305_v51, -inf }
 0x4e1   :  { %v8217_v55 = vmax.f32 %v8215_v41, %v8216_v61  ;;  %v8223_v39 = vrot.slane %v8222_v22, 1  ;;  %v8230_v46 = vrot.slane %v8229_v56, 1  ;;  %v8236_v3 = vmax.f32 %v8234_v25, %v8235_v45 }
 0x4e2   :  { %v8241_v7 = vmax.f32 %v8239_v47, %v8240_v24  ;;  %v8247_v26 = vrot.slane %v8246_v8, 4  ;;  %v8254_v50 = vrot.slane %v8253_v62, 4  ;;  %v8260_v29 = vsel %vm7538_vm5, %v7307_v12, -inf }
 0x4e3   :  { %v8224_v35 = vmax.f32 %v8222_v22, %v8223_v39  ;;  %v8231_v0 = vmax.f32 %v8229_v56, %v8230_v46  ;;  %v8237_v32 = vrot.slane %v8236_v3, 1  ;;  %v8261_v9 = vrot.slane %v8260_v29, 4 }
 0x4e4   :  { %v8242_v54 = vrot.slane %v8241_v7, 2  ;;  %v8248_v17 = vmax.f32 %v8246_v8, %v8247_v26  ;;  %v8255_v11 = vmax.f32 %v8253_v62, %v8254_v50  ;;  %v7308_v44 = vcombine.high %v6818_v42, %v6818_v42 }
 0x4e5   :  { %v8238_v1 = vmax.f32 %v8236_v3, %v8237_v32  ;;  %v8687_v52 = vsel %vm8612_vm6, %v8224_v35, %v8217_v55  ;;  %v8262_v40 = vmax.f32 %v8260_v29, %v8261_v9  ;;  %v7315_v34 = vrot.slane %v6818_v42, %v19116_v33  ;;  %v20900_v3 = vld [vmem:[#allocation33_spill] sm:$0xff] }
 0x4e6   :  { %v8688_v53 = vsel %vm8614_vm7, %v8231_v0, %v8687_v52  ;;  %v8243_v19 = vmax.f32 %v8241_v7, %v8242_v54  ;;  %v8249_v10 = vrot.slane %v8248_v17, 2  ;;  %v8256_v23 = vrot.slane %v8255_v11, 2 }
 0x4e7   :  { %v8689_v16 = vsel %vm8616_vm8, %v8238_v1, %v8688_v53  ;;  %v8263_v60 = vrot.slane %v8262_v40, 2  ;;  %v7322_v15 = vrot.slane %v7308_v44, %v19116_v33  ;;  %v7323_v30 = vcombine.high %v7315_v34, %v7315_v34  ;;  %v20901_v44 = vld [vmem:[#allocation34_spill] sm:$0xff]  ;;  %v20902_v1 = vld [vmem:[#allocation35_spill] sm:$0xff] }
 0x4e8   :  { %8769 = vst.msk [vmem:[#allocation3 + $0x129] sm:$0xf] %vm8744_vm9, %v8689_v16  ;;  %v8244_v28 = vrot.slane %v8243_v19, 1  ;;  %v8250_v31 = vmax.f32 %v8248_v17, %v8249_v10  ;;  %v8257_v63 = vmax.f32 %v8255_v11, %v8256_v23  ;;  %v8267_v48 = vsel %vm7538_vm5, %v7315_v34, -inf }
 0x4e9   :  { %v8264_v5 = vmax.f32 %v8262_v40, %v8263_v60  ;;  %v7324_v58 = vcombine.high %v7322_v15, %v7322_v15  ;;  %v8268_v59 = vrot.slane %v8267_v48, 4  ;;  %v8274_v4 = vsel %vm7538_vm5, %v7323_v30, -inf }
 0x4ea   :  { %v8245_v41 = vmax.f32 %v8243_v19, %v8244_v28  ;;  %v8251_v49 = vrot.slane %v8250_v31, 1  ;;  %v8258_v18 = vrot.slane %v8257_v63, 1  ;;  %v8275_v25 = vrot.slane %v8274_v4, 4  ;;  %v20903_v19 = vld [vmem:[#allocation36_spill] sm:$0xff] }
 0x4eb   :  { %v8265_v51 = vrot.slane %v8264_v5, 1  ;;  %v8269_v20 = vmax.f32 %v8267_v48, %v8268_v59  ;;  %v8281_v47 = vsel %vm7538_vm5, %v7322_v15, -inf  ;;  %v8288_v42 = vsel %vm7538_vm5, %v7324_v58, -inf }
 0x4ec   :  { %v8252_v61 = vmax.f32 %v8250_v31, %v8251_v49  ;;  %v8259_v22 = vmax.f32 %v8257_v63, %v8258_v18  ;;  %v8276_v56 = vmax.f32 %v8274_v4, %v8275_v25  ;;  %v8282_v45 = vrot.slane %v8281_v47, 4  ;;  %v20904_v4 = vld [vmem:[#allocation37_spill] sm:$0xff] }
 0x4ed   :  { %v8266_v12 = vmax.f32 %v8264_v5, %v8265_v51  ;;  %v8270_v24 = vrot.slane %v8269_v20, 2  ;;  %v8289_v8 = vrot.slane %v8288_v42, 4  ;;  %v6728_v62 = vmax.f32 %v19742_v38, 0.0 }
 0x4ee   :  { %v8690_v55 = vsel %vm8612_vm6, %v8252_v61, %v8245_v41  ;;  %v8277_v39 = vrot.slane %v8276_v56, 2  ;;  %v8283_v46 = vmax.f32 %v8281_v47, %v8282_v45  ;;  %v16318_v7 = vadd.f32 %v19514_v43, %v20900_v3 }
 0x4ef   :  { %v8691_v26 = vsel %vm8614_vm7, %v8259_v22, %v8690_v55  ;;  %v8271_v50 = vmax.f32 %v8269_v20, %v8270_v24  ;;  %v8290_v29 = vmax.f32 %v8288_v42, %v8289_v8  ;;  %v6820_v35 = vsel %vm6737_vm4, %v6728_v62, -inf  ;;  %v16924_v0 = vld [vmem:[#allocation3 + $0x121] ss:$8 sps:$4 sm:$0xff]  }
 0x4f0   :  { %v8692_v32 = vsel %vm8616_vm8, %v8266_v12, %v8691_v26  ;;  %v8278_v9 = vmax.f32 %v8276_v56, %v8277_v39  ;;  %v8284_v54 = vrot.slane %v8283_v46, 2  ;;  %v6663_v38 = vadd.f32 %v19604_v14, %v16318_v7  ;;  %15552 = vmatprep.mubr.msk.f32.mxu1 %vm6737_vm4, %v16924_v0  ;;  %v20905_v62 = vld [vmem:[#allocation38_spill] sm:$0xff]  ;;  %v20906_v7 = vld [vmem:[#allocation39_spill] sm:$0xff] }
 0x4f1   :  { %8770 = vst.msk [vmem:[#allocation3 + $0x131] sm:$0xf] %vm8744_vm9, %v8692_v32  ;;  %v8272_v17 = vrot.slane %v8271_v50, 1  ;;  %v8291_v11 = vrot.slane %v8290_v29, 2  ;;  %v16319_v43 = vadd.f32 %v19523_v37, %v20901_v44  ;;  %v16320_v52 = vadd.f32 %v19525_v6, %v20902_v1 }
 0x4f2   :  { %v8279_v40 = vrot.slane %v8278_v9, 1  ;;  %v8285_v34 = vmax.f32 %v8283_v46, %v8284_v54  ;;  %v6727_v53 = vmax.f32 %v6663_v38, 0.0  ;;  %v16321_v10 = vadd.f32 %v19539_v36, %v20903_v19 }
 0x4f3   :  { %v8273_v23 = vmax.f32 %v8271_v50, %v8272_v17  ;;  %v8292_v16 = vmax.f32 %v8290_v29, %v8291_v11  ;;  %v6666_v60 = vadd.f32 %v19604_v14, %v16319_v43  ;;  %v6665_v15 = vadd.f32 %v19604_v14, %v16320_v52 }
 0x4f4   :  { %v8280_v30 = vmax.f32 %v8278_v9, %v8279_v40  ;;  %v8286_v28 = vrot.slane %v8285_v34, 1  ;;  %v6819_v37 = vsel %vm6737_vm4, %v6727_v53, -inf  ;;  %v6668_v6 = vadd.f32 %v19604_v14, %v16321_v10 }
 0x4f5   :  { %v8293_v31 = vrot.slane %v8292_v16, 1  ;;  %v6821_v63 = vmax.f32 %v6819_v37, %v6820_v35  ;;  %v6730_v48 = vmax.f32 %v6666_v60, 0.0  ;;  %v6729_v5 = vmax.f32 %v6665_v15, 0.0 }
 0x4f6   :  { %v8287_v58 = vmax.f32 %v8285_v34, %v8286_v28  ;;  %v8693_v59 = vsel %vm8612_vm6, %v8280_v30, %v8273_v23  ;;  %v6732_v36 = vmax.f32 %v6668_v6, 0.0  ;;  %v16322_v41 = vadd.f32 %v19545_v2, %v20904_v4 }
 0x4f7   :  { %v8294_v49 = vmax.f32 %v8292_v16, %v8293_v31  ;;  %v7325_v18 = vcombine.high %v6821_v63, %v6821_v63  ;;  %v7332_v25 = vrot.slane %v6821_v63, %v19116_v33  ;;  %v6823_v51 = vsel %vm6737_vm4, %v6730_v48, -inf }
 0x4f8   :  { %v8694_v20 = vsel %vm8614_vm7, %v8287_v58, %v8693_v59  ;;  %v6822_v47 = vsel %vm6737_vm4, %v6729_v5, -inf  ;;  %v6826_v42 = vsel %vm6737_vm4, %v6732_v36, -inf  ;;  %v6667_v61 = vadd.f32 %v19604_v14, %v16322_v41 }
 0x4f9   :  { %v8695_v22 = vsel %vm8616_vm8, %v8294_v49, %v8694_v20  ;;  %v7339_v56 = vrot.slane %v7325_v18, %v19116_v33  ;;  %v7340_v45 = vcombine.high %v7332_v25, %v7332_v25  ;;  %v8295_v2 = vsel %vm7538_vm5, %v7332_v25, -inf }
 0x4fa   :  { %8771 = vst.msk [vmem:[#allocation3 + $0x139] sm:$0xf] %vm8744_vm9, %v8695_v22  ;;  %v8296_v12 = vrot.slane %v8295_v2, 4  ;;  %v6824_v24 = vmax.f32 %v6822_v47, %v6823_v51  ;;  %v6731_v8 = vmax.f32 %v6667_v61, 0.0  ;;  %v16323_v55 = vadd.f32 %v19571_v21, %v20905_v62 }
 0x4fb   :  { %v7341_v39 = vcombine.high %v7339_v56, %v7339_v56  ;;  %v8302_v46 = vsel %vm7538_vm5, %v7340_v45, -inf  ;;  %v8309_v3 = vsel %vm7538_vm5, %v7339_v56, -inf  ;;  %v19798_v26 = vadd.f32 %v19578_v13, %v20906_v7 }
 0x4fc   :  { %v8297_v50 = vmax.f32 %v8295_v2, %v8296_v12  ;;  %v8303_v29 = vrot.slane %v8302_v46, 4  ;;  %v8310_v35 = vrot.slane %v8309_v3, 4  ;;  %v7342_v0 = vcombine.high %v6824_v24, %v6824_v24 }
 0x4fd   :  { %v8316_v32 = vsel %vm7538_vm5, %v7341_v39, -inf  ;;  %v7349_v9 = vrot.slane %v6824_v24, %v19116_v33  ;;  %v6825_v54 = vsel %vm6737_vm4, %v6731_v8, -inf  ;;  %v19804_v21 = vadd.f32 %v19604_v14, %v16323_v55 }
 0x4fe   :  { %v8298_v38 = vrot.slane %v8297_v50, 2  ;;  %v8304_v17 = vmax.f32 %v8302_v46, %v8303_v29  ;;  %v8311_v11 = vmax.f32 %v8309_v3, %v8310_v35  ;;  %v8317_v44 = vrot.slane %v8316_v32, 4 }
 0x4ff   :  { %v7356_v13 = vrot.slane %v7342_v0, %v19116_v33  ;;  %v7357_v43 = vcombine.high %v7349_v9, %v7349_v9  ;;  %v8323_v1 = vsel %vm7538_vm5, %v7349_v9, -inf  ;;  %v6827_v52 = vmax.f32 %v6825_v54, %v6826_v42 }
 0x500   :  { %v8299_v40 = vmax.f32 %v8297_v50, %v8298_v38  ;;  %v8305_v34 = vrot.slane %v8304_v17, 2  ;;  %v8312_v53 = vrot.slane %v8311_v11, 2  ;;  %v8318_v19 = vmax.f32 %v8316_v32, %v8317_v44 }
 0x501   :  { %v7358_v10 = vcombine.high %v7356_v13, %v7356_v13  ;;  %v8324_v23 = vrot.slane %v8323_v1, 4  ;;  %v8330_v16 = vsel %vm7538_vm5, %v7357_v43, -inf  ;;  %v8337_v14 = vsel %vm7538_vm5, %v7356_v13, -inf  ;;  %v16925_v37 = vld [vmem:[#allocation3 + $0x131] ss:$8 sps:$4 sm:$0xff]  }
 0x502   :  { %v8300_v60 = vrot.slane %v8299_v40, 1  ;;  %v8306_v15 = vmax.f32 %v8304_v17, %v8305_v34  ;;  %v8313_v30 = vmax.f32 %v8311_v11, %v8312_v53  ;;  %v8319_v28 = vrot.slane %v8318_v19, 2  ;;  %15553 = vmatmul.mubr.msk.f32.gmra.mrb[76].mxu1 %vm6737_vm4, %v16925_v37 }
 0x503   :  { %v8325_v6 = vmax.f32 %v8323_v1, %v8324_v23  ;;  %v8331_v31 = vrot.slane %v8330_v16, 4  ;;  %v8338_v63 = vrot.slane %v8337_v14, 4  ;;  %v8344_v48 = vsel %vm7538_vm5, %v7358_v10, -inf }
 0x504   :  { %v8301_v5 = vmax.f32 %v8299_v40, %v8300_v60  ;;  %v8307_v58 = vrot.slane %v8306_v15, 1  ;;  %v8314_v59 = vrot.slane %v8313_v30, 1  ;;  %v8320_v36 = vmax.f32 %v8318_v19, %v8319_v28 }
 0x505   :  { %v8326_v4 = vrot.slane %v8325_v6, 2  ;;  %v8332_v41 = vmax.f32 %v8330_v16, %v8331_v31  ;;  %v8339_v49 = vmax.f32 %v8337_v14, %v8338_v63  ;;  %v8345_v18 = vrot.slane %v8344_v48, 4  ;;  %v8809_v31 = vld [vmem:[%s20812_s2] sm:$0xff]  ;;  %v8810_v63 = vld [vmem:[%s20812_s2 + $0x8] sm:$0xff] }
 0x506   :  { %v8308_v25 = vmax.f32 %v8306_v15, %v8307_v58  ;;  %v8315_v51 = vmax.f32 %v8313_v30, %v8314_v59  ;;  %v8321_v20 = vrot.slane %v8320_v36, 1  ;;  %v7359_v47 = vcombine.high %v6827_v52, %v6827_v52  ;;  %v20907_v58 = vld [vmem:[#allocation40_spill] sm:$0xff] }
 0x507   :  { %v8327_v42 = vmax.f32 %v8325_v6, %v8326_v4  ;;  %v8333_v61 = vrot.slane %v8332_v41, 2  ;;  %v8340_v22 = vrot.slane %v8339_v49, 2  ;;  %v8346_v56 = vmax.f32 %v8344_v48, %v8345_v18  ;;  %v17102_v6 = vld [vmem:[%s20813_s3] ss:$0 sm:$0xff] }
 0x508   :  { %v8322_v45 = vmax.f32 %v8320_v36, %v8321_v20  ;;  %v8696_v2 = vsel %vm8612_vm6, %v8308_v25, %v8301_v5  ;;  %v7366_v12 = vrot.slane %v6827_v52, %v19116_v33  ;;  %v7373_v24 = vrot.slane %v7359_v47, %v19116_v33  ;;  %v20908_v36 = vld [vmem:[#allocation41_spill] sm:$0xff] }
 0x509   :  { %v8697_v8 = vsel %vm8614_vm7, %v8315_v51, %v8696_v2  ;;  %v8328_v62 = vrot.slane %v8327_v42, 1  ;;  %v8334_v55 = vmax.f32 %v8332_v41, %v8333_v61  ;;  %v8341_v39 = vmax.f32 %v8339_v49, %v8340_v22 }
 0x50a   :  { %v8698_v46 = vsel %vm8616_vm8, %v8322_v45, %v8697_v8  ;;  %v8347_v3 = vrot.slane %v8346_v56, 2  ;;  %v7374_v7 = vcombine.high %v7366_v12, %v7366_v12  ;;  %v7375_v50 = vcombine.high %v7373_v24, %v7373_v24  ;;  %v8813_v8 = vld [vmem:[%s20812_s2 + $0x20] sm:$0xff] }
 0x50b   :  { %8772 = vst.msk [vmem:[#allocation3 + $0x141] sm:$0xf] %vm8744_vm9, %v8698_v46  ;;  %v8329_v29 = vmax.f32 %v8327_v42, %v8328_v62  ;;  %v8335_v35 = vrot.slane %v8334_v55, 1  ;;  %v8342_v0 = vrot.slane %v8341_v39, 1  ;;  %v8351_v32 = vsel %vm7538_vm5, %v7366_v12, -inf  ;;  %v8811_v42 = vld [vmem:[%s20812_s2 + $0x10] sm:$0xff] }
 0x50c   :  { %v8348_v9 = vmax.f32 %v8346_v56, %v8347_v3  ;;  %v8352_v54 = vrot.slane %v8351_v32, 4  ;;  %v8358_v38 = vsel %vm7538_vm5, %v7374_v7, -inf  ;;  %v8365_v17 = vsel %vm7538_vm5, %v7373_v24, -inf  ;;  %v8814_v62 = vld [vmem:[%s20812_s2 + $0x28] sm:$0xff] }
 0x50d   :  { %v8336_v11 = vmax.f32 %v8334_v55, %v8335_v35  ;;  %v8343_v44 = vmax.f32 %v8341_v39, %v8342_v0  ;;  %v8359_v13 = vrot.slane %v8358_v38, 4  ;;  %v8366_v43 = vrot.slane %v8365_v17, 4 }
 0x50e   :  { %v8349_v1 = vrot.slane %v8348_v9, 1  ;;  %v8353_v52 = vmax.f32 %v8351_v32, %v8352_v54  ;;  %v8372_v40 = vsel %vm7538_vm5, %v7375_v50, -inf  ;;  %v6734_v34 = vmax.f32 %v19804_v21, 0.0 }
 0x50f   :  { %v8699_v53 = vsel %vm8612_vm6, %v8336_v11, %v8329_v29  ;;  %v8360_v19 = vmax.f32 %v8358_v38, %v8359_v13  ;;  %v8367_v10 = vmax.f32 %v8365_v17, %v8366_v43  ;;  %v8373_v23 = vrot.slane %v8372_v40, 4  ;;  %v8815_v38 = vld [vmem:[%s20812_s2 + $0x30] sm:$0xff]  ;;  %v8816_v17 = vld [vmem:[%s20812_s2 + $0x38] sm:$0xff] }
 0x510   :  { %v8350_v16 = vmax.f32 %v8348_v9, %v8349_v1  ;;  %v8700_v14 = vsel %vm8614_vm7, %v8343_v44, %v8699_v53  ;;  %v8354_v60 = vrot.slane %v8353_v52, 2  ;;  %v6829_v15 = vsel %vm6737_vm4, %v6734_v34, -inf }
 0x511   :  { %v8361_v30 = vrot.slane %v8360_v19, 2  ;;  %v8368_v28 = vrot.slane %v8367_v10, 2  ;;  %v8374_v37 = vmax.f32 %v8372_v40, %v8373_v23  ;;  %v6669_v21 = vadd.f32 %v17102_v6, %v19798_v26 }
 0x512   :  { %v8701_v48 = vsel %vm8616_vm8, %v8350_v16, %v8700_v14  ;;  %v8355_v5 = vmax.f32 %v8353_v52, %v8354_v60  ;;  %v16325_v59 = vadd.f32 %v19590_v57, %v20907_v58  ;;  %v16326_v4 = vadd.f32 %v19592_v27, %v20908_v36  ;;  %v8812_v57 = vld [vmem:[%s20812_s2 + $0x18] sm:$0xff] }
 0x513   :  { %8773 = vst.msk [vmem:[#allocation3 + $0x159] sm:$0xf] %vm8744_vm9, %v8701_v48  ;;  %v8362_v26 = vmax.f32 %v8360_v19, %v8361_v30  ;;  %v8369_v41 = vmax.f32 %v8367_v10, %v8368_v28  ;;  %v8375_v49 = vrot.slane %v8374_v37, 2  ;;  %v6733_v18 = vmax.f32 %v6669_v21, 0.0  ;;  %v13531_v19 = vld [vmem:[%s20812_s2 + $0x80] sm:$0xff]  ;;  %v13532_v10 = vld [vmem:[%s20812_s2 + $0x88] sm:$0xff] }
 0x514   :  { %v8356_v25 = vrot.slane %v8355_v5, 1  ;;  %v6672_v51 = vadd.f32 %v17102_v6, %v16325_v59  ;;  %v6671_v20 = vadd.f32 %v17102_v6, %v16326_v4  ;;  %v16003_v47 = vpack.c.bf16 %v8810_v63, %v8809_v31 }
 0x515   :  { %v8363_v61 = vrot.slane %v8362_v26, 1  ;;  %v8370_v27 = vrot.slane %v8369_v41, 1  ;;  %v8376_v22 = vmax.f32 %v8374_v37, %v8375_v49  ;;  %v6828_v56 = vsel %vm6737_vm4, %v6733_v18, -inf }
 0x516   :  { %v8357_v45 = vmax.f32 %v8355_v5, %v8356_v25  ;;  %v6830_v2 = vmax.f32 %v6828_v56, %v6829_v15  ;;  %v6736_v12 = vmax.f32 %v6672_v51, 0.0  ;;  %v6735_v24 = vmax.f32 %v6671_v20, 0.0  ;;  %16004 = vmatprep.subr.bf16.mxu1 %v16003_v47 }
 0x517   :  { %v8364_v55 = vmax.f32 %v8362_v26, %v8363_v61  ;;  %v8371_v39 = vmax.f32 %v8369_v41, %v8370_v27  ;;  %v8377_v46 = vrot.slane %v8376_v22, 1  ;;  %16006 = vmatpush3.bf16.msra.mxu1 %v16003_v47  ;;  %v16007_v3 = vpack.c.bf16 %v8812_v57, %v8811_v42 }
 0x518   :  { %v7376_v7 = vcombine.high %v6830_v2, %v6830_v2  ;;  %v7383_v50 = vrot.slane %v6830_v2, %v19116_v33  ;;  %v6832_v29 = vsel %vm6737_vm4, %v6736_v12, -inf  ;;  %v6831_v35 = vsel %vm6737_vm4, %v6735_v24, -inf }
 0x519   :  { %v8378_v0 = vmax.f32 %v8376_v22, %v8377_v46  ;;  %v8702_v32 = vsel %vm8612_vm6, %v8364_v55, %v8357_v45  ;;  %v6833_v9 = vmax.f32 %v6831_v35, %v6832_v29  ;;  %16008 = vmatprep.subr.bf16.mxu1 %v16007_v3  ;;  %v16011_v54 = vpack.c.bf16 %v8814_v62, %v8813_v8 }
 0x51a   :  { %v8703_v11 = vsel %vm8614_vm7, %v8371_v39, %v8702_v32  ;;  %v7390_v44 = vrot.slane %v7376_v7, %v19116_v33  ;;  %v7391_v13 = vcombine.high %v7383_v50, %v7383_v50  ;;  %v8379_v43 = vsel %vm7538_vm5, %v7383_v50, -inf  ;;  %v16926_v1 = vld [vmem:[#allocation3 + $0x151] ss:$8 sps:$4 sm:$0xff]  }
 0x51b   :  { %v8704_v52 = vsel %vm8616_vm8, %v8378_v0, %v8703_v11  ;;  %v8380_v40 = vrot.slane %v8379_v43, 4  ;;  %v7393_v34 = vcombine.high %v6833_v9, %v6833_v9  ;;  %v7400_v53 = vrot.slane %v6833_v9, %v19116_v33  ;;  %16010 = vmatpush3.bf16.msra.mxu1 %v16007_v3  ;;  %15555 = vmatprep.mubr.msk.f32.mxu1 %vm6737_vm4, %v16926_v1 }
 0x51c   :  { %8774 = vst.msk [vmem:[#allocation3 + $0x161] sm:$0xf] %vm8744_vm9, %v8704_v52  ;;  %v7392_v23 = vcombine.high %v7390_v44, %v7390_v44  ;;  %v8386_v16 = vsel %vm7538_vm5, %v7391_v13, -inf  ;;  %v8393_v14 = vsel %vm7538_vm5, %v7390_v44, -inf  ;;  %16012 = vmatprep.subr.bf16.mxu1 %v16011_v54  ;;  %v16015_v60 = vpack.c.bf16 %v8816_v17, %v8815_v38 }
 0x51d   :  { %v8381_v15 = vmax.f32 %v8379_v43, %v8380_v40  ;;  %v8387_v30 = vrot.slane %v8386_v16, 4  ;;  %v8394_v28 = vrot.slane %v8393_v14, 4  ;;  %v7407_v37 = vrot.slane %v7393_v34, %v19116_v33 }
 0x51e   :  { %v8400_v6 = vsel %vm7538_vm5, %v7392_v23, -inf  ;;  %v7408_v21 = vcombine.high %v7400_v53, %v7400_v53  ;;  %v8407_v31 = vsel %vm7538_vm5, %v7400_v53, -inf  ;;  %v19883_v63 = vpack.c.bf16 %v13532_v10, %v13531_v19 }
 0x51f   :  { %v8382_v48 = vrot.slane %v8381_v15, 2  ;;  %v8388_v5 = vmax.f32 %v8386_v16, %v8387_v30  ;;  %v8395_v58 = vmax.f32 %v8393_v14, %v8394_v28  ;;  %v8401_v59 = vrot.slane %v8400_v6, 4  ;;  %16014 = vmatpush3.bf16.msra.mxu1 %v16011_v54  ;;  %v13533_v30 = vld [vmem:[%s20812_s2 + $0x90] sm:$0xff]  ;;  %v13534_v28 = vld [vmem:[%s20812_s2 + $0x98] sm:$0xff] }
 0x520   :  { %v7409_v36 = vcombine.high %v7407_v37, %v7407_v37  ;;  %v8408_v4 = vrot.slane %v8407_v31, 4  ;;  %v8414_v26 = vsel %vm7538_vm5, %v7408_v21, -inf  ;;  %v8421_v41 = vsel %vm7538_vm5, %v7407_v37, -inf  ;;  %16016 = vmatprep.subr.bf16.mxu1 %v16015_v60  ;;  %v16929_v37 = vld [vmem:[#allocation3 + $0x10] ss:$8 sps:$4 sm:$0xff]  }
 0x521   :  { %v8383_v49 = vmax.f32 %v8381_v15, %v8382_v48  ;;  %v8389_v18 = vrot.slane %v8388_v5, 2  ;;  %v8396_v25 = vrot.slane %v8395_v58, 2  ;;  %v8402_v51 = vmax.f32 %v8400_v6, %v8401_v59  ;;  %v16930_v6 = vld [vmem:[#allocation3 + $0x30] ss:$8 sps:$4 sm:$0xff]   ;;  %v13536_v48 = vld [vmem:[%s20812_s2 + $0xa8] sm:$0xff] }
 0x522   :  { %v8409_v20 = vmax.f32 %v8407_v31, %v8408_v4  ;;  %v8415_v47 = vrot.slane %v8414_v26, 4  ;;  %v8422_v42 = vrot.slane %v8421_v41, 4  ;;  %v8428_v57 = vsel %vm7538_vm5, %v7409_v36, -inf  ;;  %v13535_v31 = vld [vmem:[%s20812_s2 + $0xa0] sm:$0xff]  ;;  %v13537_v36 = vld [vmem:[%s20812_s2 + $0xb0] sm:$0xff]  ;;  %v13538_v4 = vld [vmem:[%s20812_s2 + $0xb8] sm:$0xff] }
 0x523   :  { %v8384_v61 = vrot.slane %v8383_v49, 1  ;;  %v8390_v27 = vmax.f32 %v8388_v5, %v8389_v18  ;;  %v8397_v22 = vmax.f32 %v8395_v58, %v8396_v25  ;;  %v8403_v56 = vrot.slane %v8402_v51, 2  ;;  %16018 = vmatpush3.bf16.msra.mxu1 %v16015_v60  ;;  %v16928_v60 = vld [vmem:[#allocation3] ss:$8 sps:$4 sm:$0xff]  }
 0x524   :  { %v8410_v45 = vrot.slane %v8409_v20, 2  ;;  %v8416_v2 = vmax.f32 %v8414_v26, %v8415_v47  ;;  %v8423_v12 = vmax.f32 %v8421_v41, %v8422_v42  ;;  %v8429_v24 = vrot.slane %v8428_v57, 4  ;;  %16020 = vmatprep.subr.bf16.mxu1 %v19883_v63  ;;  %v16931_v5 = vld [vmem:[#allocation3 + $0x40] ss:$8 sps:$4 sm:$0xff]   ;;  %v16934_v41 = vld [vmem:[#allocation3 + $0x90] ss:$8 sps:$4 sm:$0xff]  }
 0x525   :  { %v8391_v8 = vrot.slane %v8390_v27, 1  ;;  %v8398_v62 = vrot.slane %v8397_v22, 1  ;;  %v8404_v55 = vmax.f32 %v8402_v51, %v8403_v56  ;;  %v8385_v50 = vmax.f32 %v8383_v49, %v8384_v61  ;;  %v16932_v58 = vld [vmem:[#allocation3 + $0x60] ss:$8 sps:$4 sm:$0xff]   ;;  %v16937_v47 = vld [vmem:[#allocation3 + $0xd0] ss:$8 sps:$4 sm:$0xff]  }
 0x526   :  { %v8411_v39 = vmax.f32 %v8409_v20, %v8410_v45  ;;  %v8417_v46 = vrot.slane %v8416_v2, 2  ;;  %v8424_v3 = vrot.slane %v8423_v12, 2  ;;  %v8430_v7 = vmax.f32 %v8428_v57, %v8429_v24  ;;  %v13555_v49 = vld [vmem:[%s20812_s2 + $0xc0] sm:$0xff]  ;;  %v13556_v18 = vld [vmem:[%s20812_s2 + $0xc8] sm:$0xff]  ;;  %v16938_v42 = vld [vmem:[#allocation3 + $0xf0] ss:$8 sps:$4 sm:$0xff]  }
 0x527   :  { %v8392_v29 = vmax.f32 %v8390_v27, %v8391_v8  ;;  %v8399_v35 = vmax.f32 %v8397_v22, %v8398_v62  ;;  %v8405_v0 = vrot.slane %v8404_v55, 1  ;;  %v16023_v21 = vpack.c.bf16 %v13534_v28, %v13533_v30  ;;  %v16935_v25 = vld [vmem:[#allocation3 + $0xa0] ss:$8 sps:$4 sm:$0xff]   ;;  %v16941_v27 = vld [vmem:[#allocation3 + $0x130] ss:$8 sps:$4 sm:$0xff]  }
 0x528   :  { %v8412_v32 = vrot.slane %v8411_v39, 1  ;;  %v8418_v9 = vmax.f32 %v8416_v2, %v8417_v46  ;;  %v8425_v54 = vmax.f32 %v8423_v12, %v8424_v3  ;;  %v8431_v38 = vrot.slane %v8430_v7, 2  ;;  %v16936_v20 = vld [vmem:[#allocation3 + $0xc0] ss:$8 sps:$4 sm:$0xff]   ;;  %v16942_v22 = vld [vmem:[#allocation3 + $0x150] ss:$8 sps:$4 sm:$0xff]  }
 0x529   :  { %v8406_v17 = vmax.f32 %v8404_v55, %v8405_v0  ;;  %v8705_v11 = vsel %vm8612_vm6, %v8392_v29, %v8385_v50  ;;  %v16027_v59 = vpack.c.bf16 %v13536_v48, %v13535_v31  ;;  %v16031_v26 = vpack.c.bf16 %v13538_v4, %v13537_v36  ;;  %v16939_v57 = vld [vmem:[#allocation3 + $0x100] ss:$8 sps:$4 sm:$0xff]   ;;  %v13557_v2 = vld [vmem:[%s20812_s2 + $0xd0] sm:$0xff]  ;;  %v13558_v12 = vld [vmem:[%s20812_s2 + $0xd8] sm:$0xff] }
 0x52a   :  { %v8706_v44 = vsel %vm8614_vm7, %v8399_v35, %v8705_v11  ;;  %v8419_v13 = vrot.slane %v8418_v9, 1  ;;  %v8426_v43 = vrot.slane %v8425_v54, 1  ;;  %v8432_v52 = vmax.f32 %v8430_v7, %v8431_v38  ;;  %v16940_v61 = vld [vmem:[#allocation3 + $0x120] ss:$8 sps:$4 sm:$0xff]   ;;  %v16945_v24 = vld [vmem:[#allocation3 + $0x12] ss:$8 sps:$4 sm:$0xff]  }
 0x52b   :  { %v8707_v1 = vsel %vm8616_vm8, %v8406_v17, %v8706_v44  ;;  %v8413_v40 = vmax.f32 %v8411_v39, %v8412_v32  ;;  %v16035_v51 = vpack.c.bf16 %v13556_v18, %v13555_v49  ;;  %v16944_v45 = vld [vmem:[#allocation3 + $0x2] ss:$8 sps:$4 sm:$0xff]   ;;  %v16039_v8 = vpack.c.bf16 %v13558_v12, %v13557_v2  ;;  %v16946_v62 = vld [vmem:[#allocation3 + $0x32] ss:$8 sps:$4 sm:$0xff]  }
 0x52c   :  { %8775 = vst.msk [vmem:[#allocation3 + $0x169] sm:$0xf] %vm8744_vm9, %v8707_v1  ;;  %v8420_v34 = vmax.f32 %v8418_v9, %v8419_v13  ;;  %v8427_v53 = vmax.f32 %v8425_v54, %v8426_v43  ;;  %v8433_v19 = vrot.slane %v8432_v52, 1  ;;  %v13559_v55 = vld [vmem:[%s20812_s2 + $0xe0] sm:$0xff]  ;;  %v13560_v39 = vld [vmem:[%s20812_s2 + $0xe8] sm:$0xff]  ;;  %v13561_v50 = vld [vmem:[%s20812_s2 + $0xf0] sm:$0xff] }
 0x52d   :  { %v16947_v46 = vld [vmem:[#allocation3 + $0x42] ss:$8 sps:$4 sm:$0xff]   ;;  %v16043_v3 = vpack.c.bf16 %v13560_v39, %v13559_v55  ;;  %v13562_v29 = vld [vmem:[%s20812_s2 + $0xf8] sm:$0xff] }
 0x52e   :  { %v8708_v10 = vsel %vm8612_vm6, %v8420_v34, %v8413_v40  ;;  %v8434_v23 = vmax.f32 %v8432_v52, %v8433_v19  ;;  %v16948_v7 = vld [vmem:[#allocation3 + $0x62] ss:$8 sps:$4 sm:$0xff]   ;;  %v16949_v35 = vld [vmem:[#allocation3 + $0x72] ss:$8 sps:$4 sm:$0xff]   ;;  %v16047_v0 = vpack.c.bf16 %v13562_v29, %v13561_v50 }
 0x52f   :  { %v8709_v16 = vsel %vm8614_vm7, %v8427_v53, %v8708_v10  ;;  %v16950_v32 = vld [vmem:[#allocation3 + $0x92] ss:$8 sps:$4 sm:$0xff]   ;;  %v13579_v9 = vld [vmem:[%s20812_s2 + $0x100] sm:$0xff]  ;;  %v13580_v54 = vld [vmem:[%s20812_s2 + $0x108] sm:$0xff] }
 0x530   :  { %v8710_v14 = vsel %vm8616_vm8, %v8434_v23, %v8709_v16  ;;  %v16951_v38 = vld [vmem:[#allocation3 + $0xa2] ss:$8 sps:$4 sm:$0xff]   ;;  %v16051_v17 = vpack.c.bf16 %v13580_v54, %v13579_v9  ;;  %v16953_v44 = vld [vmem:[#allocation3 + $0xd2] ss:$8 sps:$4 sm:$0xff]  }
 0x531   :  { %8776 = vst.msk [vmem:[#allocation3 + $0x171] sm:$0xf] %vm8744_vm9, %v8710_v14  ;;  %v16952_v11 = vld [vmem:[#allocation3 + $0xc2] ss:$8 sps:$4 sm:$0xff]   ;;  %v16954_v13 = vld [vmem:[#allocation3 + $0xf2] ss:$8 sps:$4 sm:$0xff]  }
 0x532   :  { %v16955_v43 = vld [vmem:[#allocation3 + $0x102] ss:$8 sps:$4 sm:$0xff]   ;;  %v16957_v52 = vld [vmem:[#allocation3 + $0x132] ss:$8 sps:$4 sm:$0xff]  }
 0x533   :  { %v16927_v15 = vld [vmem:[#allocation3 + $0x161] ss:$8 sps:$4 sm:$0xff]   ;;  %v16958_v40 = vld [vmem:[#allocation3 + $0x152] ss:$8 sps:$4 sm:$0xff]  }
 0x534   :  { %15556 = vmatmul.mubr.msk.f32.gmra.mrb[78].mxu1 %vm6737_vm4, %v16927_v15  ;;  %v16943_v56 = vld [vmem:[#allocation3 + $0x160] ss:$8 sps:$4 sm:$0xff]   ;;  %v13581_v19 = vld [vmem:[%s20812_s2 + $0x110] sm:$0xff]  ;;  %v13582_v10 = vld [vmem:[%s20812_s2 + $0x118] sm:$0xff] }
 0x535   :  { %15574 = vmatprep.mubr.msk.f32.mxu1 %vm6737_vm4, %v16928_v60  ;;  %v16956_v1 = vld [vmem:[#allocation3 + $0x122] ss:$8 sps:$4 sm:$0xff]   ;;  %v16055_v16 = vpack.c.bf16 %v13582_v10, %v13581_v19 }
 0x536   :  { %v16959_v34 = vld [vmem:[#allocation3 + $0x162] ss:$8 sps:$4 sm:$0xff]  }
 0x537   :  { %v16960_v53 = vld [vmem:[#allocation3 + $0x8] ss:$8 sps:$4 sm:$0xff]   ;;  %v16961_v23 = vld [vmem:[#allocation3 + $0x18] ss:$8 sps:$4 sm:$0xff]  }
 0x538   :  { %15575 = vmatmul.mubr.msk.f32.vlgmr.msra.gmra.mrb[64].mxu1 %vm6737_vm4, %v16929_v37  ;;  %v16962_v14 = vld [vmem:[#allocation3 + $0x38] ss:$8 sps:$4 sm:$0xff]   ;;  %v13584_v15 = vld [vmem:[%s20812_s2 + $0x128] sm:$0xff] }
 0x539   :  { %16022 = vmatpush3.bf16.msra.mxu1 %v19883_v63  ;;  %15577 = vmatprep.mubr.msk.f32.mxu1 %vm6737_vm4, %v16930_v6  ;;  %v16933_v63 = vld [vmem:[#allocation3 + $0x70] ss:$8 sps:$4 sm:$0xff]   ;;  %v13583_v60 = vld [vmem:[%s20812_s2 + $0x120] sm:$0xff] }
 0x53a   :  { %16024 = vmatprep.subr.bf16.mxu1 %v16023_v21  ;;  %v16963_v30 = vld [vmem:[#allocation3 + $0x48] ss:$8 sps:$4 sm:$0xff]   ;;  %v16059_v28 = vpack.c.bf16 %v13584_v15, %v13583_v60  ;;  %v16965_v31 = vld [vmem:[#allocation3 + $0x78] ss:$8 sps:$4 sm:$0xff]  }
 0x53b   :  { %v16964_v37 = vld [vmem:[#allocation3 + $0x68] ss:$8 sps:$4 sm:$0xff]   ;;  %v16981_v55 = vld [vmem:[#allocation3 + $0x79] ss:$8 sps:$4 sm:$0xff]  }
 0x53c   :  { %15578 = vmatmul.mubr.msk.f32.gmra.mrb[66].mxu1 %vm6737_vm4, %v16931_v5  ;;  %v13585_v6 = vld [vmem:[%s20812_s2 + $0x130] sm:$0xff]  ;;  %v16966_v5 = vld [vmem:[#allocation3 + $0x98] ss:$8 sps:$4 sm:$0xff]  }
 0x53d   :  { %15580 = vmatprep.mubr.msk.f32.mxu1 %vm6737_vm4, %v16932_v58  ;;  %16026 = vmatpush3.bf16.msra.mxu1 %v16023_v21  ;;  %v13586_v21 = vld [vmem:[%s20812_s2 + $0x138] sm:$0xff]  ;;  %v13603_v58 = vld [vmem:[%s20812_s2 + $0x140] sm:$0xff]  ;;  %v16967_v36 = vld [vmem:[#allocation3 + $0xa8] ss:$8 sps:$4 sm:$0xff]  }
 0x53e   :  { %16028 = vmatprep.subr.bf16.mxu1 %v16027_v59  ;;  %v16063_v48 = vpack.c.bf16 %v13586_v21, %v13585_v6  ;;  %v16971_v49 = vld [vmem:[#allocation3 + $0x108] ss:$8 sps:$4 sm:$0xff]   ;;  %v16997_v60 = vld [vmem:[#allocation3 + $0x7a] ss:$8 sps:$4 sm:$0xff]  }
 0x53f   :  { %v16972_v18 = vld [vmem:[#allocation3 + $0x128] ss:$8 sps:$4 sm:$0xff]  }
 0x540   :  { %15581 = vmatmul.mubr.msk.f32.gmra.mrb[68].mxu1 %vm6737_vm4, %v16933_v63  ;;  %v16968_v63 = vld [vmem:[#allocation3 + $0xc8] ss:$8 sps:$4 sm:$0xff]  }
 0x541   :  { %15583 = vmatprep.mubr.msk.f32.mxu1 %vm6737_vm4, %v16934_v41  ;;  %16030 = vmatpush3.bf16.msra.mxu1 %v16027_v59  ;;  %v13604_v59 = vld [vmem:[%s20812_s2 + $0x148] sm:$0xff]  ;;  %v16970_v41 = vld [vmem:[#allocation3 + $0xf8] ss:$8 sps:$4 sm:$0xff]  }
 0x542   :  { %16032 = vmatprep.subr.bf16.mxu1 %v16031_v26  ;;  %v16067_v4 = vpack.c.bf16 %v13604_v59, %v13603_v58  ;;  %v16979_v2 = vld [vmem:[#allocation3 + $0x49] ss:$8 sps:$4 sm:$0xff]  }
 0x543   :  { %v16983_v50 = vld [vmem:[#allocation3 + $0xa9] ss:$8 sps:$4 sm:$0xff]  }
 0x544   :  { %15584 = vmatmul.mubr.msk.f32.gmra.mrb[70].mxu1 %vm6737_vm4, %v16935_v25  ;;  %v16973_v25 = vld [vmem:[#allocation3 + $0x138] ss:$8 sps:$4 sm:$0xff]   ;;  %v16987_v9 = vld [vmem:[#allocation3 + $0x109] ss:$8 sps:$4 sm:$0xff]  }
 0x545   :  { %15586 = vmatprep.mubr.msk.f32.mxu1 %vm6737_vm4, %v16936_v20  ;;  %16034 = vmatpush3.bf16.msra.mxu1 %v16031_v26  ;;  %v16969_v26 = vld [vmem:[#allocation3 + $0xd8] ss:$8 sps:$4 sm:$0xff]   ;;  %v16975_v20 = vld [vmem:[#allocation3 + $0x168] ss:$8 sps:$4 sm:$0xff]  }
 0x546   :  { %16036 = vmatprep.subr.bf16.mxu1 %v16035_v51  ;;  %v16988_v54 = vld [vmem:[#allocation3 + $0x129] ss:$8 sps:$4 sm:$0xff]  }
 0x547   :  { %v16995_v19 = vld [vmem:[#allocation3 + $0x4a] ss:$8 sps:$4 sm:$0xff]  }
 0x548   :  { %15587 = vmatmul.mubr.msk.f32.gmra.mrb[72].mxu1 %vm6737_vm4, %v16937_v47  ;;  %v16976_v47 = vld [vmem:[#allocation3 + $0x9] ss:$8 sps:$4 sm:$0xff]  }
 0x549   :  { %15589 = vmatprep.mubr.msk.f32.mxu1 %vm6737_vm4, %v16938_v42  ;;  %v13605_v42 = vld [vmem:[%s20812_s2 + $0x150] sm:$0xff] }
 0x54a   :  { %v16999_v6 = vld [vmem:[#allocation3 + $0xaa] ss:$8 sps:$4 sm:$0xff]  }
 0x54b   :  { %v17003_v58 = vld [vmem:[#allocation3 + $0x10a] ss:$8 sps:$4 sm:$0xff]  }
 0x54c   :  { %15590 = vmatmul.mubr.msk.f32.gmra.mrb[74].mxu1 %vm6737_vm4, %v16939_v57  ;;  %v13606_v57 = vld [vmem:[%s20812_s2 + $0x158] sm:$0xff]  ;;  %v17004_v59 = vld [vmem:[#allocation3 + $0x12a] ss:$8 sps:$4 sm:$0xff]  }
 0x54d   :  { %15592 = vmatprep.mubr.msk.f32.mxu1 %vm6737_vm4, %v16940_v61  ;;  %v16977_v61 = vld [vmem:[#allocation3 + $0x19] ss:$8 sps:$4 sm:$0xff]  }
 0x550   :  { %15593 = vmatmul.mubr.msk.f32.gmra.mrb[76].mxu1 %vm6737_vm4, %v16941_v27  ;;  %v16071_v27 = vpack.c.bf16 %v13606_v57, %v13605_v42  ;;  %v17011_v42 = vld [vmem:[#allocation3 + $0x50] ss:$8 sps:$4 sm:$0xff]  }
 0x551   :  { %15595 = vmatprep.mubr.msk.f32.mxu1 %vm6737_vm4, %v16942_v22  ;;  %v16978_v22 = vld [vmem:[#allocation3 + $0x39] ss:$8 sps:$4 sm:$0xff]  }
 0x554   :  { %15596 = vmatmul.mubr.msk.f32.gmra.mrb[78].mxu1 %vm6737_vm4, %v16943_v56  ;;  %v13607_v56 = vld [vmem:[%s20812_s2 + $0x160] sm:$0xff] }
 0x555   :  { %15614 = vmatprep.mubr.msk.f32.mxu1 %vm6737_vm4, %v16944_v45  ;;  %v13608_v45 = vld [vmem:[%s20812_s2 + $0x168] sm:$0xff] }
 0x556   :  { %v16075_v12 = vpack.c.bf16 %v13608_v45, %v13607_v56  ;;  %v17013_v56 = vld [vmem:[#allocation3 + $0x80] ss:$8 sps:$4 sm:$0xff]  }
 0x558   :  { %15615 = vmatmul.mubr.msk.f32.vlgmr.msra.gmra.mrb[64].mxu1 %vm6737_vm4, %v16945_v24  ;;  %v16980_v24 = vld [vmem:[#allocation3 + $0x69] ss:$8 sps:$4 sm:$0xff]  }
 0x559   :  { %16038 = vmatpush3.bf16.msra.mxu1 %v16035_v51  ;;  %15617 = vmatprep.mubr.msk.f32.mxu1 %vm6737_vm4, %v16946_v62  ;;  %v16974_v51 = vld [vmem:[#allocation3 + $0x158] ss:$8 sps:$4 sm:$0xff]  }
 0x55a   :  { %16040 = vmatprep.subr.bf16.mxu1 %v16039_v8  ;;  %v13610_v62 = vld [vmem:[%s20812_s2 + $0x178] sm:$0xff] }
 0x55c   :  { %15618 = vmatmul.mubr.msk.f32.gmra.mrb[66].mxu1 %vm6737_vm4, %v16947_v46  ;;  %v16982_v46 = vld [vmem:[#allocation3 + $0x99] ss:$8 sps:$4 sm:$0xff]  }
 0x55d   :  { %15620 = vmatprep.mubr.msk.f32.mxu1 %vm6737_vm4, %v16948_v7  ;;  %16042 = vmatpush3.bf16.msra.mxu1 %v16039_v8  ;;  %v13609_v8 = vld [vmem:[%s20812_s2 + $0x170] sm:$0xff]  ;;  %v13628_v7 = vld [vmem:[%s20812_s2 + $0x188] sm:$0xff] }
 0x55e   :  { %16044 = vmatprep.subr.bf16.mxu1 %v16043_v3  ;;  %v16079_v39 = vpack.c.bf16 %v13610_v62, %v13609_v8  ;;  %v17015_v8 = vld [vmem:[#allocation3 + $0xb0] ss:$8 sps:$4 sm:$0xff]  }
 0x560   :  { %15621 = vmatmul.mubr.msk.f32.gmra.mrb[68].mxu1 %vm6737_vm4, %v16949_v35  ;;  %v16984_v35 = vld [vmem:[#allocation3 + $0xc9] ss:$8 sps:$4 sm:$0xff]  }
 0x561   :  { %15623 = vmatprep.mubr.msk.f32.mxu1 %vm6737_vm4, %v16950_v32  ;;  %16046 = vmatpush3.bf16.msra.mxu1 %v16043_v3  ;;  %v13627_v3 = vld [vmem:[%s20812_s2 + $0x180] sm:$0xff] }
 0x562   :  { %16048 = vmatprep.subr.bf16.mxu1 %v16047_v0  ;;  %v16083_v29 = vpack.c.bf16 %v13628_v7, %v13627_v3  ;;  %v16986_v32 = vld [vmem:[#allocation3 + $0xf9] ss:$8 sps:$4 sm:$0xff]  }
 0x563   :  { %v17019_v3 = vld [vmem:[#allocation3 + $0x110] ss:$8 sps:$4 sm:$0xff]  }
 0x564   :  { %15624 = vmatmul.mubr.msk.f32.gmra.mrb[70].mxu1 %vm6737_vm4, %v16951_v38  ;;  %v16989_v38 = vld [vmem:[#allocation3 + $0x139] ss:$8 sps:$4 sm:$0xff]  }
 0x565   :  { %15626 = vmatprep.mubr.msk.f32.mxu1 %vm6737_vm4, %v16952_v11  ;;  %16050 = vmatpush3.bf16.msra.mxu1 %v16047_v0  ;;  %v16985_v0 = vld [vmem:[#allocation3 + $0xd9] ss:$8 sps:$4 sm:$0xff]   ;;  %v16991_v11 = vld [vmem:[#allocation3 + $0x169] ss:$8 sps:$4 sm:$0xff]  }
 0x566   :  { %16052 = vmatprep.subr.bf16.mxu1 %v16051_v17  ;;  %v17020_v7 = vld [vmem:[#allocation3 + $0x130] ss:$8 sps:$4 sm:$0xff]  }
 0x568   :  { %15627 = vmatmul.mubr.msk.f32.gmra.mrb[72].mxu1 %vm6737_vm4, %v16953_v44  ;;  %v16992_v44 = vld [vmem:[#allocation3 + $0xa] ss:$8 sps:$4 sm:$0xff]  }
 0x569   :  { %15629 = vmatprep.mubr.msk.f32.mxu1 %vm6737_vm4, %v16954_v13  ;;  %v13629_v13 = vld [vmem:[%s20812_s2 + $0x190] sm:$0xff] }
 0x56c   :  { %15630 = vmatmul.mubr.msk.f32.gmra.mrb[74].mxu1 %vm6737_vm4, %v16955_v43  ;;  %v13630_v43 = vld [vmem:[%s20812_s2 + $0x198] sm:$0xff] }
 0x56d   :  { %15632 = vmatprep.mubr.msk.f32.mxu1 %vm6737_vm4, %v16956_v1  ;;  %v16993_v1 = vld [vmem:[#allocation3 + $0x1a] ss:$8 sps:$4 sm:$0xff]  }
 0x570   :  { %15633 = vmatmul.mubr.msk.f32.gmra.mrb[76].mxu1 %vm6737_vm4, %v16957_v52  ;;  %v16087_v52 = vpack.c.bf16 %v13630_v43, %v13629_v13  ;;  %v17027_v13 = vld [vmem:[#allocation3 + $0x51] ss:$8 sps:$4 sm:$0xff]  }
 0x571   :  { %15635 = vmatprep.mubr.msk.f32.mxu1 %vm6737_vm4, %v16958_v40  ;;  %v16994_v40 = vld [vmem:[#allocation3 + $0x3a] ss:$8 sps:$4 sm:$0xff]  }
 0x574   :  { %15636 = vmatmul.mubr.msk.f32.gmra.mrb[78].mxu1 %vm6737_vm4, %v16959_v34  ;;  %v13631_v34 = vld [vmem:[%s20812_s2 + $0x1a0] sm:$0xff] }
 0x575   :  { %15654 = vmatprep.mubr.msk.f32.mxu1 %vm6737_vm4, %v16960_v53  ;;  %v13632_v53 = vld [vmem:[%s20812_s2 + $0x1a8] sm:$0xff] }
 0x576   :  { %v16091_v10 = vpack.c.bf16 %v13632_v53, %v13631_v34  ;;  %v17029_v34 = vld [vmem:[#allocation3 + $0x81] ss:$8 sps:$4 sm:$0xff]  }
 0x578   :  { %15655 = vmatmul.mubr.msk.f32.vlgmr.msra.gmra.mrb[64].mxu1 %vm6737_vm4, %v16961_v23  ;;  %v16996_v23 = vld [vmem:[#allocation3 + $0x6a] ss:$8 sps:$4 sm:$0xff]  }
 0x579   :  { %16054 = vmatpush3.bf16.msra.mxu1 %v16051_v17  ;;  %15657 = vmatprep.mubr.msk.f32.mxu1 %vm6737_vm4, %v16962_v14  ;;  %v16990_v17 = vld [vmem:[#allocation3 + $0x159] ss:$8 sps:$4 sm:$0xff]  }
 0x57a   :  { %16056 = vmatprep.subr.bf16.mxu1 %v16055_v16  ;;  %v13634_v14 = vld [vmem:[%s20812_s2 + $0x1b8] sm:$0xff] }
 0x57c   :  { %15658 = vmatmul.mubr.msk.f32.gmra.mrb[66].mxu1 %vm6737_vm4, %v16963_v30  ;;  %v16998_v30 = vld [vmem:[#allocation3 + $0x9a] ss:$8 sps:$4 sm:$0xff]  }
 0x57d   :  { %15660 = vmatprep.mubr.msk.f32.mxu1 %vm6737_vm4, %v16964_v37  ;;  %16058 = vmatpush3.bf16.msra.mxu1 %v16055_v16  ;;  %v13633_v16 = vld [vmem:[%s20812_s2 + $0x1b0] sm:$0xff]  ;;  %v13652_v37 = vld [vmem:[%s20812_s2 + $0x1c8] sm:$0xff] }
 0x57e   :  { %16060 = vmatprep.subr.bf16.mxu1 %v16059_v28  ;;  %v16095_v15 = vpack.c.bf16 %v13634_v14, %v13633_v16  ;;  %v17033_v16 = vld [vmem:[#allocation3 + $0xe1] ss:$8 sps:$4 sm:$0xff]  }
 0x57f   :  { %v17034_v14 = vld [vmem:[#allocation3 + $0x101] ss:$8 sps:$4 sm:$0xff]  }
 0x580   :  { %15661 = vmatmul.mubr.msk.f32.gmra.mrb[68].mxu1 %vm6737_vm4, %v16965_v31  ;;  %v17000_v31 = vld [vmem:[#allocation3 + $0xca] ss:$8 sps:$4 sm:$0xff]  }
 0x581   :  { %15663 = vmatprep.mubr.msk.f32.mxu1 %vm6737_vm4, %v16966_v5  ;;  %16062 = vmatpush3.bf16.msra.mxu1 %v16059_v28  ;;  %v13651_v28 = vld [vmem:[%s20812_s2 + $0x1c0] sm:$0xff] }
 0x582   :  { %16064 = vmatprep.subr.bf16.mxu1 %v16063_v48  ;;  %v16099_v21 = vpack.c.bf16 %v13652_v37, %v13651_v28  ;;  %v17002_v5 = vld [vmem:[#allocation3 + $0xfa] ss:$8 sps:$4 sm:$0xff]  }
 0x583   :  { %v17038_v28 = vld [vmem:[#allocation3 + $0x161] ss:$8 sps:$4 sm:$0xff]   ;;  %v17039_v37 = vld [vmem:[#allocation3 + $0x171] ss:$8 sps:$4 sm:$0xff]  }
 0x584   :  { %15664 = vmatmul.mubr.msk.f32.gmra.mrb[70].mxu1 %vm6737_vm4, %v16967_v36  ;;  %v17005_v36 = vld [vmem:[#allocation3 + $0x13a] ss:$8 sps:$4 sm:$0xff]  }
 0x585   :  { %15666 = vmatprep.mubr.msk.f32.mxu1 %vm6737_vm4, %v16968_v63  ;;  %16066 = vmatpush3.bf16.msra.mxu1 %v16063_v48  ;;  %v17001_v48 = vld [vmem:[#allocation3 + $0xda] ss:$8 sps:$4 sm:$0xff]   ;;  %v17007_v63 = vld [vmem:[#allocation3 + $0x16a] ss:$8 sps:$4 sm:$0xff]  }
 0x586   :  { %16068 = vmatprep.subr.bf16.mxu1 %v16067_v4 }
 0x588   :  { %15667 = vmatmul.mubr.msk.f32.gmra.mrb[72].mxu1 %vm6737_vm4, %v16969_v26  ;;  %v17008_v26 = vld [vmem:[#allocation3 + $0x10] ss:$8 sps:$4 sm:$0xff]  }
 0x589   :  { %15669 = vmatprep.mubr.msk.f32.mxu1 %vm6737_vm4, %v16970_v41  ;;  %v13653_v41 = vld [vmem:[%s20812_s2 + $0x1d0] sm:$0xff] }
 0x58c   :  { %15670 = vmatmul.mubr.msk.f32.gmra.mrb[74].mxu1 %vm6737_vm4, %v16971_v49  ;;  %v13654_v49 = vld [vmem:[%s20812_s2 + $0x1d8] sm:$0xff] }
 0x58d   :  { %15672 = vmatprep.mubr.msk.f32.mxu1 %vm6737_vm4, %v16972_v18  ;;  %v17009_v18 = vld [vmem:[#allocation3 + $0x20] ss:$8 sps:$4 sm:$0xff]  }
 0x590   :  { %15673 = vmatmul.mubr.msk.f32.gmra.mrb[76].mxu1 %vm6737_vm4, %v16973_v25  ;;  %v16103_v25 = vpack.c.bf16 %v13654_v49, %v13653_v41  ;;  %v17051_v41 = vld [vmem:[#allocation3 + $0x112] ss:$8 sps:$4 sm:$0xff]  }
 0x591   :  { %15675 = vmatprep.mubr.msk.f32.mxu1 %vm6737_vm4, %v16974_v51  ;;  %v17010_v51 = vld [vmem:[#allocation3 + $0x40] ss:$8 sps:$4 sm:$0xff]   ;;  %v17052_v49 = vld [vmem:[#allocation3 + $0x132] ss:$8 sps:$4 sm:$0xff]  }
 0x594   :  { %15676 = vmatmul.mubr.msk.f32.gmra.mrb[78].mxu1 %vm6737_vm4, %v16975_v20  ;;  %v13655_v20 = vld [vmem:[%s20812_s2 + $0x1e0] sm:$0xff] }
 0x595   :  { %15694 = vmatprep.mubr.msk.f32.mxu1 %vm6737_vm4, %v16976_v47  ;;  %v13656_v47 = vld [vmem:[%s20812_s2 + $0x1e8] sm:$0xff] }
 0x596   :  { %v16107_v57 = vpack.c.bf16 %v13656_v47, %v13655_v20  ;;  %v11932_v20 = vld [vmem:[%s20815_s5 + $0x80] sm:$0xff]  ;;  %v11933_v47 = vld [vmem:[%s20815_s5 + $0x88] sm:$0xff] }
 0x598   :  { %15695 = vmatmul.mubr.msk.f32.vlgmr.msra.gmra.mrb[64].mxu1 %vm6737_vm4, %v16977_v61  ;;  %v17012_v61 = vld [vmem:[#allocation3 + $0x70] ss:$8 sps:$4 sm:$0xff]  }
 0x599   :  { %16070 = vmatpush3.bf16.msra.mxu1 %v16067_v4  ;;  %15697 = vmatprep.mubr.msk.f32.mxu1 %vm6737_vm4, %v16978_v22  ;;  %v17006_v4 = vld [vmem:[#allocation3 + $0x15a] ss:$8 sps:$4 sm:$0xff]  }
 0x59a   :  { %16072 = vmatprep.subr.bf16.mxu1 %v16071_v27  ;;  %v13658_v22 = vld [vmem:[%s20812_s2 + $0x1f8] sm:$0xff] }
 0x59c   :  { %15698 = vmatmul.mubr.msk.f32.gmra.mrb[66].mxu1 %vm6737_vm4, %v16979_v2  ;;  %v17014_v2 = vld [vmem:[#allocation3 + $0xa0] ss:$8 sps:$4 sm:$0xff]  }
 0x59d   :  { %15700 = vmatprep.mubr.msk.f32.mxu1 %vm6737_vm4, %v16980_v24  ;;  %16074 = vmatpush3.bf16.msra.mxu1 %v16071_v27  ;;  %v13657_v27 = vld [vmem:[%s20812_s2 + $0x1f0] sm:$0xff]  ;;  %v13676_v24 = vld [vmem:[%s20812_s2 + $0x208] sm:$0xff] }
 0x59e   :  { %16076 = vmatprep.subr.bf16.mxu1 %v16075_v12  ;;  %v16111_v45 = vpack.c.bf16 %v13658_v22, %v13657_v27  ;;  %v11934_v22 = vld [vmem:[%s20815_s5 + $0x90] sm:$0xff] }
 0x5a0   :  { %15701 = vmatmul.mubr.msk.f32.gmra.mrb[68].mxu1 %vm6737_vm4, %v16981_v55  ;;  %v17016_v55 = vld [vmem:[#allocation3 + $0xd0] ss:$8 sps:$4 sm:$0xff]  }
 0x5a1   :  { %15703 = vmatprep.mubr.msk.f32.mxu1 %vm6737_vm4, %v16982_v46  ;;  %16078 = vmatpush3.bf16.msra.mxu1 %v16075_v12  ;;  %v13675_v12 = vld [vmem:[%s20812_s2 + $0x200] sm:$0xff] }
 0x5a2   :  { %16080 = vmatprep.subr.bf16.mxu1 %v16079_v39  ;;  %v16115_v62 = vpack.c.bf16 %v13676_v24, %v13675_v12  ;;  %v17018_v46 = vld [vmem:[#allocation3 + $0x100] ss:$8 sps:$4 sm:$0xff]   ;;  %v11919_v12 = vld [vmem:[%s20815_s5 + $0x18] sm:$0xff] }
 0x5a4   :  { %15704 = vmatmul.mubr.msk.f32.gmra.mrb[70].mxu1 %vm6737_vm4, %v16983_v50  ;;  %v17021_v50 = vld [vmem:[#allocation3 + $0x140] ss:$8 sps:$4 sm:$0xff]  }
 0x5a5   :  { %15706 = vmatprep.mubr.msk.f32.mxu1 %vm6737_vm4, %v16984_v35  ;;  %16082 = vmatpush3.bf16.msra.mxu1 %v16079_v39  ;;  %v17017_v39 = vld [vmem:[#allocation3 + $0xe0] ss:$8 sps:$4 sm:$0xff]   ;;  %v17023_v35 = vld [vmem:[#allocation3 + $0x170] ss:$8 sps:$4 sm:$0xff]  }
 0x5a6   :  { %16084 = vmatprep.subr.bf16.mxu1 %v16083_v29 }
 0x5a8   :  { %15707 = vmatmul.mubr.msk.f32.gmra.mrb[72].mxu1 %vm6737_vm4, %v16985_v0  ;;  %v17024_v0 = vld [vmem:[#allocation3 + $0x11] ss:$8 sps:$4 sm:$0xff]  }
 0x5a9   :  { %15709 = vmatprep.mubr.msk.f32.mxu1 %vm6737_vm4, %v16986_v32  ;;  %v13677_v32 = vld [vmem:[%s20812_s2 + $0x210] sm:$0xff] }
 0x5ac   :  { %15710 = vmatmul.mubr.msk.f32.gmra.mrb[74].mxu1 %vm6737_vm4, %v16987_v9  ;;  %v13678_v9 = vld [vmem:[%s20812_s2 + $0x218] sm:$0xff] }
 0x5ad   :  { %15712 = vmatprep.mubr.msk.f32.mxu1 %vm6737_vm4, %v16988_v54  ;;  %v17025_v54 = vld [vmem:[#allocation3 + $0x21] ss:$8 sps:$4 sm:$0xff]  }
 0x5b0   :  { %15713 = vmatmul.mubr.msk.f32.gmra.mrb[76].mxu1 %vm6737_vm4, %v16989_v38  ;;  %v16119_v38 = vpack.c.bf16 %v13678_v9, %v13677_v32  ;;  %v11940_v9 = vld [vmem:[%s20815_s5 + $0xc0] sm:$0xff] }
 0x5b1   :  { %15715 = vmatprep.mubr.msk.f32.mxu1 %vm6737_vm4, %v16990_v17  ;;  %v17026_v17 = vld [vmem:[#allocation3 + $0x41] ss:$8 sps:$4 sm:$0xff]  }
 0x5b4   :  { %15716 = vmatmul.mubr.msk.f32.gmra.mrb[78].mxu1 %vm6737_vm4, %v16991_v11  ;;  %v13679_v11 = vld [vmem:[%s20812_s2 + $0x220] sm:$0xff] }
 0x5b5   :  { %15734 = vmatprep.mubr.msk.f32.mxu1 %vm6737_vm4, %v16992_v44  ;;  %v13680_v44 = vld [vmem:[%s20812_s2 + $0x228] sm:$0xff] }
 0x5b6   :  { %v16123_v43 = vpack.c.bf16 %v13680_v44, %v13679_v11  ;;  %v11925_v11 = vld [vmem:[%s20815_s5 + $0x48] sm:$0xff] }
 0x5b8   :  { %15735 = vmatmul.mubr.msk.f32.vlgmr.msra.gmra.mrb[64].mxu1 %vm6737_vm4, %v16993_v1  ;;  %v17028_v1 = vld [vmem:[#allocation3 + $0x71] ss:$8 sps:$4 sm:$0xff]  }
 0x5b9   :  { %16086 = vmatpush3.bf16.msra.mxu1 %v16083_v29  ;;  %15737 = vmatprep.mubr.msk.f32.mxu1 %vm6737_vm4, %v16994_v40  ;;  %v17022_v29 = vld [vmem:[#allocation3 + $0x160] ss:$8 sps:$4 sm:$0xff]   ;;  %v13682_v40 = vld [vmem:[%s20812_s2 + $0x238] sm:$0xff] }
 0x5ba   :  { %16088 = vmatprep.subr.bf16.mxu1 %v16087_v52 }
 0x5bc   :  { %15738 = vmatmul.mubr.msk.f32.gmra.mrb[66].mxu1 %vm6737_vm4, %v16995_v19  ;;  %v17030_v19 = vld [vmem:[#allocation3 + $0xa1] ss:$8 sps:$4 sm:$0xff]  }
 0x5bd   :  { %15740 = vmatprep.mubr.msk.f32.mxu1 %vm6737_vm4, %v16996_v23  ;;  %16090 = vmatpush3.bf16.msra.mxu1 %v16087_v52  ;;  %v13681_v52 = vld [vmem:[%s20812_s2 + $0x230] sm:$0xff] }
 0x5be   :  { %16092 = vmatprep.subr.bf16.mxu1 %v16091_v10  ;;  %v16127_v53 = vpack.c.bf16 %v13682_v40, %v13681_v52  ;;  %v17032_v23 = vld [vmem:[#allocation3 + $0xd1] ss:$8 sps:$4 sm:$0xff]  }
 0x5bf   :  { %v11926_v52 = vld [vmem:[%s20815_s5 + $0x50] sm:$0xff]  ;;  %v11927_v40 = vld [vmem:[%s20815_s5 + $0x58] sm:$0xff] }
 0x5c0   :  { %15741 = vmatmul.mubr.msk.f32.gmra.mrb[68].mxu1 %vm6737_vm4, %v16997_v60  ;;  %v17035_v60 = vld [vmem:[#allocation3 + $0x111] ss:$8 sps:$4 sm:$0xff]  }
 0x5c1   :  { %15743 = vmatprep.mubr.msk.f32.mxu1 %vm6737_vm4, %v16998_v30  ;;  %16094 = vmatpush3.bf16.msra.mxu1 %v16091_v10  ;;  %v17031_v10 = vld [vmem:[#allocation3 + $0xb1] ss:$8 sps:$4 sm:$0xff]   ;;  %v17037_v30 = vld [vmem:[#allocation3 + $0x141] ss:$8 sps:$4 sm:$0xff]  }
 0x5c2   :  { %16096 = vmatprep.subr.bf16.mxu1 %v16095_v15 }
 0x5c4   :  { %15744 = vmatmul.mubr.msk.f32.gmra.mrb[70].mxu1 %vm6737_vm4, %v16999_v6  ;;  %v17040_v6 = vld [vmem:[#allocation3 + $0x12] ss:$8 sps:$4 sm:$0xff]  }
 0x5c5   :  { %15746 = vmatprep.mubr.msk.f32.mxu1 %vm6737_vm4, %v17000_v31  ;;  %16098 = vmatpush3.bf16.msra.mxu1 %v16095_v15  ;;  %v17036_v15 = vld [vmem:[#allocation3 + $0x131] ss:$8 sps:$4 sm:$0xff]   ;;  %v17042_v31 = vld [vmem:[#allocation3 + $0x42] ss:$8 sps:$4 sm:$0xff]  }
 0x5c6   :  { %16100 = vmatprep.subr.bf16.mxu1 %v16099_v21 }
 0x5c8   :  { %15747 = vmatmul.mubr.msk.f32.gmra.mrb[72].mxu1 %vm6737_vm4, %v17001_v48  ;;  %v17043_v48 = vld [vmem:[#allocation3 + $0x52] ss:$8 sps:$4 sm:$0xff]  }
 0x5c9   :  { %15749 = vmatprep.mubr.msk.f32.mxu1 %vm6737_vm4, %v17002_v5  ;;  %v17044_v5 = vld [vmem:[#allocation3 + $0x72] ss:$8 sps:$4 sm:$0xff]  }
 0x5cc   :  { %15750 = vmatmul.mubr.msk.f32.gmra.mrb[74].mxu1 %vm6737_vm4, %v17003_v58  ;;  %v17045_v58 = vld [vmem:[#allocation3 + $0x82] ss:$8 sps:$4 sm:$0xff]  }
 0x5cd   :  { %15752 = vmatprep.mubr.msk.f32.mxu1 %vm6737_vm4, %v17004_v59  ;;  %v17046_v59 = vld [vmem:[#allocation3 + $0xa2] ss:$8 sps:$4 sm:$0xff]  }
 0x5d0   :  { %15753 = vmatmul.mubr.msk.f32.gmra.mrb[76].mxu1 %vm6737_vm4, %v17005_v36  ;;  %v17047_v36 = vld [vmem:[#allocation3 + $0xb2] ss:$8 sps:$4 sm:$0xff]  }
 0x5d1   :  { %15755 = vmatprep.mubr.msk.f32.mxu1 %vm6737_vm4, %v17006_v4  ;;  %v17048_v4 = vld [vmem:[#allocation3 + $0xd2] ss:$8 sps:$4 sm:$0xff]  }
 0x5d4   :  { %15756 = vmatmul.mubr.msk.f32.gmra.mrb[78].mxu1 %vm6737_vm4, %v17007_v63  ;;  %v17049_v63 = vld [vmem:[#allocation3 + $0xe2] ss:$8 sps:$4 sm:$0xff]  }
 0x5d5   :  { %15774 = vmatprep.mubr.msk.f32.mxu1 %vm6737_vm4, %v17008_v26  ;;  %v17050_v26 = vld [vmem:[#allocation3 + $0x102] ss:$8 sps:$4 sm:$0xff]  }
 0x5d8   :  { %15775 = vmatmul.mubr.msk.f32.vlgmr.msra.gmra.mrb[64].mxu1 %vm6737_vm4, %v17009_v18  ;;  %v17053_v18 = vld [vmem:[#allocation3 + $0x142] ss:$8 sps:$4 sm:$0xff]  }
 0x5d9   :  { %16102 = vmatpush3.bf16.msra.mxu1 %v16099_v21  ;;  %15777 = vmatprep.mubr.msk.f32.mxu1 %vm6737_vm4, %v17010_v51  ;;  %v17041_v21 = vld [vmem:[#allocation3 + $0x22] ss:$8 sps:$4 sm:$0xff]   ;;  %v17055_v51 = vld [vmem:[#allocation3 + $0x172] ss:$8 sps:$4 sm:$0xff]  }
 0x5da   :  { %16104 = vmatprep.subr.bf16.mxu1 %v16103_v25 }
 0x5dc   :  { %15778 = vmatmul.mubr.msk.f32.gmra.mrb[66].mxu1 %vm6737_vm4, %v17011_v42  ;;  %v16131_v42 = vpack.c.bf16 %v11933_v47, %v11932_v20 }
 0x5dd   :  { %15780 = vmatprep.mubr.msk.f32.mxu1 %vm6737_vm4, %v17012_v61  ;;  %16106 = vmatpush3.bf16.msra.mxu1 %v16103_v25  ;;  %v17054_v25 = vld [vmem:[#allocation3 + $0x162] ss:$8 sps:$4 sm:$0xff]  }
 0x5de   :  { %16108 = vmatprep.subr.bf16.mxu1 %v16107_v57  ;;  %v11917_v61 = vld [vmem:[%s20815_s5 + $0x8] sm:$0xff] }
 0x5e0   :  { %15781 = vmatmul.mubr.msk.f32.gmra.mrb[68].mxu1 %vm6737_vm4, %v17013_v56  ;;  %v11935_v56 = vld [vmem:[%s20815_s5 + $0x98] sm:$0xff] }
 0x5e1   :  { %15783 = vmatprep.mubr.msk.f32.mxu1 %vm6737_vm4, %v17014_v2  ;;  %16110 = vmatpush3.bf16.msra.mxu1 %v16107_v57  ;;  %v11916_v57 = vld [vmem:[%s20815_s5] sm:$0xff]  ;;  %v11918_v2 = vld [vmem:[%s20815_s5 + $0x10] sm:$0xff] }
 0x5e2   :  { %16112 = vmatprep.subr.bf16.mxu1 %v16111_v45  ;;  %v16133_v27 = vpack.c.bf16 %v11917_v61, %v11916_v57  ;;  %v16137_v24 = vpack.c.bf16 %v11919_v12, %v11918_v2 }
 0x5e4   :  { %15784 = vmatmul.mubr.msk.f32.gmra.mrb[70].mxu1 %vm6737_vm4, %v17015_v8  ;;  %v11936_v8 = vld [vmem:[%s20815_s5 + $0xa0] sm:$0xff] }
 0x5e5   :  { %15786 = vmatprep.mubr.msk.f32.mxu1 %vm6737_vm4, %v17016_v55  ;;  %16114 = vmatpush3.bf16.msra.mxu1 %v16111_v45  ;;  %v16135_v45 = vpack.c.bf16 %v11935_v56, %v11934_v22 }
 0x5e6   :  { %16116 = vmatprep.subr.bf16.mxu1 %v16115_v62 }
 0x5e8   :  { %15787 = vmatmul.mubr.msk.f32.gmra.mrb[72].mxu1 %vm6737_vm4, %v17017_v39  ;;  %v11920_v39 = vld [vmem:[%s20815_s5 + $0x20] sm:$0xff] }
 0x5e9   :  { %15789 = vmatprep.mubr.msk.f32.mxu1 %vm6737_vm4, %v17018_v46  ;;  %v11921_v46 = vld [vmem:[%s20815_s5 + $0x28] sm:$0xff] }
 0x5ec   :  { %15790 = vmatmul.mubr.msk.f32.gmra.mrb[74].mxu1 %vm6737_vm4, %v17019_v3  ;;  %v16141_v3 = vpack.c.bf16 %v11921_v46, %v11920_v39  ;;  %v20909_v46 = vld [vmem:[#allocation42_spill] sm:$0xff] }
 0x5ed   :  { %15792 = vmatprep.mubr.msk.f32.mxu1 %vm6737_vm4, %v17020_v7  ;;  %v11938_v7 = vld [vmem:[%s20815_s5 + $0xb0] sm:$0xff] }
 0x5f0   :  { %15793 = vmatmul.mubr.msk.f32.gmra.mrb[76].mxu1 %vm6737_vm4, %v17021_v50  ;;  %v11939_v50 = vld [vmem:[%s20815_s5 + $0xb8] sm:$0xff] }
 0x5f1   :  { %15795 = vmatprep.mubr.msk.f32.mxu1 %vm6737_vm4, %v17022_v29  ;;  %v16143_v29 = vpack.c.bf16 %v11939_v50, %v11938_v7 }
 0x5f4   :  { %15796 = vmatmul.mubr.msk.f32.gmra.mrb[78].mxu1 %vm6737_vm4, %v17023_v35  ;;  %v11922_v35 = vld [vmem:[%s20815_s5 + $0x30] sm:$0xff] }
 0x5f5   :  { %15814 = vmatprep.mubr.msk.f32.mxu1 %vm6737_vm4, %v17024_v0  ;;  %v11923_v0 = vld [vmem:[%s20815_s5 + $0x38] sm:$0xff] }
 0x5f6   :  { %v16145_v32 = vpack.c.bf16 %v11923_v0, %v11922_v35 }
 0x5f8   :  { %15815 = vmatmul.mubr.msk.f32.vlgmr.msra.gmra.mrb[64].mxu1 %vm6737_vm4, %v17025_v54  ;;  %v11941_v54 = vld [vmem:[%s20815_s5 + $0xc8] sm:$0xff] }
 0x5f9   :  { %16118 = vmatpush3.bf16.msra.mxu1 %v16115_v62  ;;  %15817 = vmatprep.mubr.msk.f32.mxu1 %vm6737_vm4, %v17026_v17  ;;  %v11937_v62 = vld [vmem:[%s20815_s5 + $0xa8] sm:$0xff]  ;;  %v11924_v17 = vld [vmem:[%s20815_s5 + $0x40] sm:$0xff] }
 0x5fa   :  { %16120 = vmatprep.subr.bf16.mxu1 %v16119_v38  ;;  %v16139_v55 = vpack.c.bf16 %v11937_v62, %v11936_v8  ;;  %v16149_v44 = vpack.c.bf16 %v11925_v11, %v11924_v17 }
 0x5fc   :  { %15818 = vmatmul.mubr.msk.f32.gmra.mrb[66].mxu1 %vm6737_vm4, %v17027_v13  ;;  %v11942_v13 = vld [vmem:[%s20815_s5 + $0xd0] sm:$0xff] }
 0x5fd   :  { %15820 = vmatprep.mubr.msk.f32.mxu1 %vm6737_vm4, %v17028_v1  ;;  %16122 = vmatpush3.bf16.msra.mxu1 %v16119_v38  ;;  %v16147_v38 = vpack.c.bf16 %v11941_v54, %v11940_v9 }
 0x5fe   :  { %16124 = vmatprep.subr.bf16.mxu1 %v16123_v43 }
 0x600   :  { %15821 = vmatmul.mubr.msk.f32.gmra.mrb[68].mxu1 %vm6737_vm4, %v17029_v34  ;;  %v16153_v34 = vpack.c.bf16 %v11927_v40, %v11926_v52 }
 0x601   :  { %15823 = vmatprep.mubr.msk.f32.mxu1 %vm6737_vm4, %v17030_v19  ;;  %16126 = vmatpush3.bf16.msra.mxu1 %v16123_v43  ;;  %v11943_v43 = vld [vmem:[%s20815_s5 + $0xd8] sm:$0xff]  ;;  %v11945_v19 = vld [vmem:[%s20815_s5 + $0xe8] sm:$0xff] }
 0x602   :  { %16128 = vmatprep.subr.bf16.mxu1 %v16127_v53  ;;  %v16151_v1 = vpack.c.bf16 %v11943_v43, %v11942_v13 }
 0x604   :  { %15824 = vmatmul.mubr.msk.f32.gmra.mrb[70].mxu1 %vm6737_vm4, %v17031_v10  ;;  %v11928_v10 = vld [vmem:[%s20815_s5 + $0x60] sm:$0xff] }
 0x605   :  { %15826 = vmatprep.mubr.msk.f32.mxu1 %vm6737_vm4, %v17032_v23  ;;  %16130 = vmatpush3.bf16.msra.mxu1 %v16127_v53  ;;  %v11944_v53 = vld [vmem:[%s20815_s5 + $0xe0] sm:$0xff] }
 0x606   :  { %16132 = vmatprep.subr.bf16.mxu1 %v16131_v42  ;;  %v16155_v23 = vpack.c.bf16 %v11945_v19, %v11944_v53 }
 0x608   :  { %15827 = vmatmul.mubr.msk.f32.gmra.mrb[72].mxu1 %vm6737_vm4, %v17033_v16  ;;  %v11929_v16 = vld [vmem:[%s20815_s5 + $0x68] sm:$0xff] }
 0x609   :  { %15829 = vmatprep.mubr.msk.f32.mxu1 %vm6737_vm4, %v17034_v14  ;;  %v11946_v14 = vld [vmem:[%s20815_s5 + $0xf0] sm:$0xff] }
 0x60c   :  { %15830 = vmatmul.mubr.msk.f32.gmra.mrb[74].mxu1 %vm6737_vm4, %v17035_v60  ;;  %v11947_v60 = vld [vmem:[%s20815_s5 + $0xf8] sm:$0xff] }
 0x60d   :  { %15832 = vmatprep.mubr.msk.f32.mxu1 %vm6737_vm4, %v17036_v15  ;;  %v16157_v15 = vpack.c.bf16 %v11929_v16, %v11928_v10 }
 0x610   :  { %15833 = vmatmul.mubr.msk.f32.gmra.mrb[76].mxu1 %vm6737_vm4, %v17037_v30  ;;  %v16159_v30 = vpack.c.bf16 %v11947_v60, %v11946_v14 }
 0x611   :  { %15835 = vmatprep.mubr.msk.f32.mxu1 %vm6737_vm4, %v17038_v28  ;;  %v11930_v28 = vld [vmem:[%s20815_s5 + $0x70] sm:$0xff] }
 0x614   :  { %15836 = vmatmul.mubr.msk.f32.gmra.mrb[78].mxu1 %vm6737_vm4, %v17039_v37  ;;  %v11931_v37 = vld [vmem:[%s20815_s5 + $0x78] sm:$0xff] }
 0x615   :  { %15854 = vmatprep.mubr.msk.f32.mxu1 %vm6737_vm4, %v17040_v6  ;;  %v16161_v6 = vpack.c.bf16 %v11931_v37, %v11930_v28 }
 0x618   :  { %15855 = vmatmul.mubr.msk.f32.vlgmr.msra.gmra.mrb[64].mxu1 %vm6737_vm4, %v17041_v21  ;;  %v11964_v21 = vld [vmem:[%s20815_s5 + $0x180] sm:$0xff] }
 0x619   :  { %15857 = vmatprep.mubr.msk.f32.mxu1 %vm6737_vm4, %v17042_v31  ;;  %16134 = vmatpush3.bf16.msra.mxu1 %v16133_v27  ;;  %v11965_v31 = vld [vmem:[%s20815_s5 + $0x188] sm:$0xff] }
 0x61a   :  { %16136 = vmatprep.subr.bf16.mxu1 %v16135_v45 }
 0x61c   :  { %15858 = vmatmul.mubr.msk.f32.gmra.mrb[66].mxu1 %vm6737_vm4, %v17043_v48  ;;  %v16163_v48 = vpack.c.bf16 %v11965_v31, %v11964_v21 }
 0x61d   :  { %15860 = vmatprep.mubr.msk.f32.mxu1 %vm6737_vm4, %v17044_v5  ;;  %16138 = vmatpush3.bf16.msra.mxu1 %v16137_v24  ;;  %v20294_v5 = vld [vmem:[%s20814_s4] ss:$0 sm:$0xff]  ;;  %s17134_s4 = smov 96  }
 0x61e   :  { %16140 = vmatprep.subr.bf16.mxu1 %v16139_v55 }
 0x620   :  { %15861 = vmatmul.mubr.msk.f32.gmra.mrb[68].mxu1 %vm6737_vm4, %v17045_v58 }
 0x621   :  { %15863 = vmatprep.mubr.msk.f32.mxu1 %vm6737_vm4, %v17046_v59  ;;  %16142 = vmatpush3.bf16.msra.mxu1 %v16141_v3 }
 0x622   :  { %16144 = vmatprep.subr.bf16.mxu1 %v16143_v29 }
 0x624   :  { %15864 = vmatmul.mubr.msk.f32.gmra.mrb[70].mxu1 %vm6737_vm4, %v17047_v36 }
 0x625   :  { %15866 = vmatprep.mubr.msk.f32.mxu1 %vm6737_vm4, %v17048_v4  ;;  %16146 = vmatpush3.bf16.msra.mxu1 %v16145_v32  ;;  %v17129_v4 = vmov 1935823168  }
 0x626   :  { %16148 = vmatprep.subr.bf16.mxu1 %v16147_v38 }
 0x628   :  { %15867 = vmatmul.mubr.msk.f32.gmra.mrb[72].mxu1 %vm6737_vm4, %v17049_v63  ;;  %v11889_v63 = vunpack.c.l.s4 %v17129_v4 }
 0x629   :  { %15869 = vmatprep.mubr.msk.f32.mxu1 %vm6737_vm4, %v17050_v26  ;;  %16150 = vmatpush3.bf16.msra.mxu1 %v16149_v44 }
 0x62a   :  { %16152 = vmatprep.subr.bf16.mxu1 %v16151_v1  ;;  %v11890_v47 = vunpack.c.0.s8 %v11889_v63 }
 0x62c   :  { %15870 = vmatmul.mubr.msk.f32.gmra.mrb[74].mxu1 %vm6737_vm4, %v17051_v41  ;;  %v20306_v3 = vsub.s32 %v11890_v47, %v20909_v46 }
 0x62d   :  { %15872 = vmatprep.mubr.msk.f32.mxu1 %vm6737_vm4, %v17052_v49  ;;  %16154 = vmatpush3.bf16.msra.mxu1 %v16153_v34 }
 0x62e   :  { %16156 = vmatprep.subr.bf16.mxu1 %v16155_v23 }
 0x630   :  { %15873 = vmatmul.mubr.msk.f32.gmra.mrb[76].mxu1 %vm6737_vm4, %v17053_v18 }
 0x631   :  { %15875 = vmatprep.mubr.msk.f32.mxu1 %vm6737_vm4, %v17054_v25  ;;  %16158 = vmatpush3.bf16.msra.mxu1 %v16157_v15 }
 0x632   :  { %16160 = vmatprep.subr.bf16.mxu1 %v16159_v30 }
 0x634   :  { %15876 = vmatmul.mubr.msk.f32.gmra.mrb[78].mxu1 %vm6737_vm4, %v17055_v51 }
 0x635   :  { %16162 = vmatpush3.bf16.msra.mxu1 %v16161_v6 }
 0x636   :  { %16164 = vmatprep.subr.bf16.mxu1 %v16163_v48 }
 0x6eb   :  { %v15856_v58 = vpop.f32.mrb[64].mxu1 }
 0x6ec   :  { %v11291_v59 = vadd.f32 %v15856_v58, %v20294_v5  ;;  %v11188_v36 = vpop.f32.mrb[65].mxu1 }
 0x6ed   :  { %v11290_v26 = vadd.f32 %v20294_v5, %v11188_v36 }
 0x6ee   :  { %v11307_v41 = vmax.f32 %v11291_v59, 0.0 }
 0x6ef   :  { %v11306_v49 = vmax.f32 %v11290_v26, 0.0  ;;  %v15859_v18 = vpop.f32.mrb[66].mxu1 }
 0x6f0   :  { %v11339_v25 = vcombine.high %v11307_v41, %v11307_v41  ;;  %v11293_v51 = vadd.f32 %v15859_v18, %v20294_v5  ;;  %v11198_v20 = vpop.f32.mrb[67].mxu1  ;;  %v11374_v61 = vsel %vm11370_vm10, %v11307_v41, -inf }
 0x6f1   :  { %v11338_v42 = vcombine.high %v11306_v49, %v11306_v49  ;;  %v11292_v57 = vadd.f32 %v20294_v5, %v11198_v20  ;;  %v11371_v45 = vsel %vm11370_vm10, %v11306_v49, -inf }
 0x6f2   :  { %v11375_v27 = vsel %vm11370_vm10, %v11339_v25, -inf  ;;  %v11309_v22 = vmax.f32 %v11293_v51, 0.0 }
 0x6f3   :  { %v11376_v56 = vmax.f32 %v11374_v61, %v11375_v27  ;;  %v11372_v2 = vsel %vm11370_vm10, %v11338_v42, -inf  ;;  %v11308_v12 = vmax.f32 %v11292_v57, 0.0  ;;  %v15862_v24 = vpop.f32.mrb[68].mxu1 }
 0x6f4   :  { %v11373_v8 = vmax.f32 %v11371_v45, %v11372_v2  ;;  %v11341_v62 = vcombine.high %v11309_v22, %v11309_v22  ;;  %v11295_v55 = vadd.f32 %v15862_v24, %v20294_v5  ;;  %v11208_v39 = vpop.f32.mrb[69].mxu1  ;;  %v11380_v50 = vsel %vm11370_vm10, %v11309_v22, -inf }
 0x6f5   :  { %v11449_v7 = vrot.slane %v11376_v56, %v19116_v33  ;;  %v11340_v29 = vcombine.high %v11308_v12, %v11308_v12  ;;  %v11377_v35 = vsel %vm11370_vm10, %v11308_v12, -inf  ;;  %v20316_v54 = vadd.f32 %v20294_v5, %v11208_v39 }
 0x6f6   :  { %v11441_v0 = vrot.slane %v11373_v8, %v19116_v33  ;;  %v11381_v32 = vsel %vm11370_vm10, %v11341_v62, -inf  ;;  %v20313_v9 = vmax.f32 %v11295_v55, 0.0 }
 0x6f7   :  { %v11450_v38 = vcombine.high %v11449_v7, %v11449_v7  ;;  %v11610_v17 = vsel %vm11595_vm11, %v11449_v7, -inf  ;;  %v11382_v11 = vmax.f32 %v11380_v50, %v11381_v32  ;;  %v11378_v44 = vsel %vm11370_vm10, %v11340_v29, -inf  ;;  %v20320_v13 = vpop.f32.mrb[70].mxu1 }
 0x6f8   :  { %v11611_v43 = vrot.slane %v11610_v17, 4  ;;  %v11442_v1 = vcombine.high %v11441_v0, %v11441_v0  ;;  %v11596_v52 = vsel %vm11595_vm11, %v11441_v0, -inf  ;;  %v11379_v40 = vmax.f32 %v11377_v35, %v11378_v44  ;;  %v20323_v34 = vpop.f32.mrb[71].mxu1 }
 0x6f9   :  { %v11617_v53 = vsel %vm11595_vm11, %v11450_v38, -inf  ;;  %v11597_v19 = vrot.slane %v11596_v52, 4  ;;  %v11465_v10 = vrot.slane %v11382_v11, %v19116_v33  ;;  %v11343_v23 = vcombine.high %v20313_v9, %v20313_v9 }
 0x6fa   :  { %v11612_v16 = vmax.f32 %v11610_v17, %v11611_v43  ;;  %v11618_v14 = vrot.slane %v11617_v53, 4  ;;  %v11603_v60 = vsel %vm11595_vm11, %v11442_v1, -inf  ;;  %v11457_v15 = vrot.slane %v11379_v40, %v19116_v33 }
 0x6fb   :  { %v11598_v30 = vmax.f32 %v11596_v52, %v11597_v19  ;;  %v11604_v28 = vrot.slane %v11603_v60, 4  ;;  %v11466_v37 = vcombine.high %v11465_v10, %v11465_v10  ;;  %v11638_v6 = vsel %vm11595_vm11, %v11465_v10, -inf  ;;  %v20332_v21 = vpop.f32.mrb[72].mxu1 }
 0x6fc   :  { %v11613_v31 = vrot.slane %v11612_v16, 2  ;;  %v11619_v48 = vmax.f32 %v11617_v53, %v11618_v14  ;;  %v11639_v58 = vrot.slane %v11638_v6, 4  ;;  %v11458_v59 = vcombine.high %v11457_v15, %v11457_v15  ;;  %v20334_v36 = vpop.f32.mrb[73].mxu1 }
 0x6fd   :  { %v11599_v4 = vrot.slane %v11598_v30, 2  ;;  %v11605_v63 = vmax.f32 %v11603_v60, %v11604_v28  ;;  %v11645_v26 = vsel %vm11595_vm11, %v11466_v37, -inf  ;;  %v11624_v41 = vsel %vm11595_vm11, %v11457_v15, -inf }
 0x6fe   :  { %v11614_v49 = vmax.f32 %v11612_v16, %v11613_v31  ;;  %v11620_v18 = vrot.slane %v11619_v48, 2  ;;  %v11640_v25 = vmax.f32 %v11638_v6, %v11639_v58  ;;  %v11646_v51 = vrot.slane %v11645_v26, 4 }
 0x6ff   :  { %v11600_v20 = vmax.f32 %v11598_v30, %v11599_v4  ;;  %v11606_v47 = vrot.slane %v11605_v63, 2  ;;  %v11625_v42 = vrot.slane %v11624_v41, 4  ;;  %v11631_v57 = vsel %vm11595_vm11, %v11458_v59, -inf  ;;  %v20339_v61 = vpop.f32.mrb[74].mxu1 }
 0x700   :  { %v11615_v27 = vrot.slane %v11614_v49, 1  ;;  %v11621_v22 = vmax.f32 %v11619_v48, %v11620_v18  ;;  %v11641_v56 = vrot.slane %v11640_v25, 2  ;;  %v11647_v45 = vmax.f32 %v11645_v26, %v11646_v51  ;;  %v20341_v2 = vpop.f32.mrb[75].mxu1 }
 0x701   :  { %v11601_v12 = vrot.slane %v11600_v20, 1  ;;  %v11607_v24 = vmax.f32 %v11605_v63, %v11606_v47  ;;  %v11626_v8 = vmax.f32 %v11624_v41, %v11625_v42  ;;  %v11632_v62 = vrot.slane %v11631_v57, 4 }
 0x702   :  { %v11616_v55 = vmax.f32 %v11614_v49, %v11615_v27  ;;  %v11622_v39 = vrot.slane %v11621_v22, 1  ;;  %v11642_v46 = vmax.f32 %v11640_v25, %v11641_v56  ;;  %v11648_v7 = vrot.slane %v11647_v45, 2 }
 0x703   :  { %v11602_v50 = vmax.f32 %v11600_v20, %v11601_v12  ;;  %v11608_v29 = vrot.slane %v11607_v24, 1  ;;  %v11627_v35 = vrot.slane %v11626_v8, 2  ;;  %v11633_v0 = vmax.f32 %v11631_v57, %v11632_v62  ;;  %v20343_v32 = vpop.f32.mrb[76].mxu1 }
 0x704   :  { %v11623_v38 = vmax.f32 %v11621_v22, %v11622_v39  ;;  %v11643_v17 = vrot.slane %v11642_v46, 1  ;;  %v11649_v11 = vmax.f32 %v11647_v45, %v11648_v7  ;;  %v11386_v44 = vsel %vm11370_vm10, %v20313_v9, -inf  ;;  %v20347_v43 = vpop.f32.mrb[77].mxu1 }
 0x705   :  { %v11609_v1 = vmax.f32 %v11607_v24, %v11608_v29  ;;  %v11628_v52 = vmax.f32 %v11626_v8, %v11627_v35  ;;  %v11634_v40 = vrot.slane %v11633_v0, 2  ;;  %v11387_v53 = vsel %vm11370_vm10, %v11343_v23, -inf }
 0x706   :  { %v20350_v19 = vmax.f32 %v11642_v46, %v11643_v17  ;;  %v11650_v10 = vrot.slane %v11649_v11, 1  ;;  %v11388_v16 = vmax.f32 %v11386_v44, %v11387_v53  ;;  %v11310_v14 = vmax.f32 %v20316_v54, 0.0 }
 0x707   :  { %v11852_v60 = vsel %vm8612_vm6, %v11609_v1, %v11602_v50  ;;  %v11629_v15 = vrot.slane %v11628_v52, 1  ;;  %v11635_v30 = vmax.f32 %v11633_v0, %v11634_v40  ;;  %v11297_v9 = vadd.f32 %v20320_v13, %v20294_v5  ;;  %v20356_v28 = vpop.f32.mrb[78].mxu1 }
 0x708   :  { %v11853_v37 = vsel %vm8614_vm7, %v11616_v55, %v11852_v60  ;;  %v20359_v6 = vmax.f32 %v11649_v11, %v11650_v10  ;;  %v11481_v23 = vrot.slane %v11388_v16, %v19116_v33  ;;  %v11342_v31 = vcombine.high %v11310_v14, %v11310_v14  ;;  %v20362_v48 = vpop.f32.mrb[79].mxu1 }
 0x709   :  { %v11630_v58 = vmax.f32 %v11628_v52, %v11629_v15  ;;  %v11636_v54 = vrot.slane %v11635_v30, 1  ;;  %v11854_v59 = vsel %vm8616_vm8, %v11623_v38, %v11853_v37  ;;  %v11383_v4 = vsel %vm11370_vm10, %v11310_v14, -inf }
 0x70a   :  { %v11482_v63 = vcombine.high %v11481_v23, %v11481_v23  ;;  %v11666_v13 = vsel %vm11595_vm11, %v11481_v23, -inf  ;;  %v11384_v26 = vsel %vm11370_vm10, %v11342_v31, -inf  ;;  %v11313_v41 = vmax.f32 %v11297_v9, 0.0 }
 0x70b   :  { %v20368_v49 = vmax.f32 %v11635_v30, %v11636_v54  ;;  %v20371_v18 = vsel %vm11855_vm12, %v11630_v58, %v11854_v59  ;;  %v11667_v25 = vrot.slane %v11666_v13, 4  ;;  %v11385_v51 = vmax.f32 %v11383_v4, %v11384_v26 }
 0x70c   :  { %v11673_v20 = vsel %vm11595_vm11, %v11482_v63, -inf  ;;  %v11345_v47 = vcombine.high %v11313_v41, %v11313_v41  ;;  %v11392_v42 = vsel %vm11370_vm10, %v11313_v41, -inf  ;;  %v11296_v57 = vadd.f32 %v20294_v5, %v20323_v34 }
 0x70d   :  { %v11668_v27 = vmax.f32 %v11666_v13, %v11667_v25  ;;  %v11674_v22 = vrot.slane %v11673_v20, 4  ;;  %v11473_v56 = vrot.slane %v11385_v51, %v19116_v33  ;;  %v11299_v45 = vadd.f32 %v20332_v21, %v20294_v5 }
 0x70e   :  { %v11393_v12 = vsel %vm11370_vm10, %v11345_v47, -inf  ;;  %v11312_v24 = vmax.f32 %v11296_v57, 0.0  ;;  %v11298_v8 = vadd.f32 %v20294_v5, %v20334_v36  ;;  %v11301_v62 = vadd.f32 %v20339_v61, %v20294_v5 }
 0x70f   :  { %v11669_v55 = vrot.slane %v11668_v27, 2  ;;  %v11675_v39 = vmax.f32 %v11673_v20, %v11674_v22  ;;  %v11474_v46 = vcombine.high %v11473_v56, %v11473_v56  ;;  %v11652_v34 = vsel %vm11595_vm11, %v11473_v56, -inf }
 0x710   :  { %v11653_v7 = vrot.slane %v11652_v34, 4  ;;  %v11394_v50 = vmax.f32 %v11392_v42, %v11393_v12  ;;  %v11344_v29 = vcombine.high %v11312_v24, %v11312_v24  ;;  %v11389_v35 = vsel %vm11370_vm10, %v11312_v24, -inf }
 0x711   :  { %v11670_v21 = vmax.f32 %v11668_v27, %v11669_v55  ;;  %v11676_v0 = vrot.slane %v11675_v39, 2  ;;  %v11659_v38 = vsel %vm11595_vm11, %v11474_v46, -inf  ;;  %v11315_v17 = vmax.f32 %v11299_v45, 0.0 }
 0x712   :  { %v11654_v11 = vmax.f32 %v11652_v34, %v11653_v7  ;;  %v11660_v36 = vrot.slane %v11659_v38, 4  ;;  %v11497_v44 = vrot.slane %v11394_v50, %v19116_v33  ;;  %v11390_v61 = vsel %vm11370_vm10, %v11344_v29, -inf }
 0x713   :  { %v11671_v1 = vrot.slane %v11670_v21, 1  ;;  %v11677_v52 = vmax.f32 %v11675_v39, %v11676_v0  ;;  %v11391_v40 = vmax.f32 %v11389_v35, %v11390_v61  ;;  %v11347_v53 = vcombine.high %v11315_v17, %v11315_v17 }
 0x714   :  { %v11655_v10 = vrot.slane %v11654_v11, 2  ;;  %v11661_v16 = vmax.f32 %v11659_v38, %v11660_v36  ;;  %v11498_v14 = vcombine.high %v11497_v44, %v11497_v44  ;;  %v11694_v60 = vsel %vm11595_vm11, %v11497_v44, -inf }
 0x715   :  { %v11672_v15 = vmax.f32 %v11670_v21, %v11671_v1  ;;  %v11678_v30 = vrot.slane %v11677_v52, 1  ;;  %v11695_v9 = vrot.slane %v11694_v60, 4  ;;  %v11489_v37 = vrot.slane %v11391_v40, %v19116_v33 }
 0x716   :  { %v11656_v23 = vmax.f32 %v11654_v11, %v11655_v10  ;;  %v11662_v31 = vrot.slane %v11661_v16, 2  ;;  %v11701_v58 = vsel %vm11595_vm11, %v11498_v14, -inf  ;;  %v11398_v54 = vsel %vm11370_vm10, %v11315_v17, -inf }
 0x717   :  { %v11679_v59 = vmax.f32 %v11677_v52, %v11678_v30  ;;  %v11696_v4 = vmax.f32 %v11694_v60, %v11695_v9  ;;  %v11702_v63 = vrot.slane %v11701_v58, 4  ;;  %v11490_v13 = vcombine.high %v11489_v37, %v11489_v37 }
 0x718   :  { %v11657_v26 = vrot.slane %v11656_v23, 1  ;;  %v11663_v41 = vmax.f32 %v11661_v16, %v11662_v31  ;;  %v11680_v25 = vsel %vm11595_vm11, %v11489_v37, -inf  ;;  %v11399_v51 = vsel %vm11370_vm10, %v11347_v53, -inf }
 0x719   :  { %v11697_v20 = vrot.slane %v11696_v4, 2  ;;  %v11703_v47 = vmax.f32 %v11701_v58, %v11702_v63  ;;  %v11681_v42 = vrot.slane %v11680_v25, 4  ;;  %v11687_v57 = vsel %vm11595_vm11, %v11490_v13, -inf }
 0x71a   :  { %v11658_v27 = vmax.f32 %v11656_v23, %v11657_v26  ;;  %v11664_v22 = vrot.slane %v11663_v41, 1  ;;  %v11688_v56 = vrot.slane %v11687_v57, 4  ;;  %v11400_v45 = vmax.f32 %v11398_v54, %v11399_v51 }
 0x71b   :  { %v11698_v12 = vmax.f32 %v11696_v4, %v11697_v20  ;;  %v11704_v24 = vrot.slane %v11703_v47, 2  ;;  %v11682_v55 = vmax.f32 %v11680_v25, %v11681_v42  ;;  %v11314_v39 = vmax.f32 %v11298_v8, 0.0 }
 0x71c   :  { %v11665_v46 = vmax.f32 %v11663_v41, %v11664_v22  ;;  %v11689_v34 = vmax.f32 %v11687_v57, %v11688_v56  ;;  %v11513_v7 = vrot.slane %v11400_v45, %v19116_v33  ;;  %v11317_v50 = vmax.f32 %v11301_v62, 0.0 }
 0x71d   :  { %v11699_v29 = vrot.slane %v11698_v12, 1  ;;  %v11705_v35 = vmax.f32 %v11703_v47, %v11704_v24  ;;  %v11683_v21 = vrot.slane %v11682_v55, 2  ;;  %v11346_v0 = vcombine.high %v11314_v39, %v11314_v39 }
 0x71e   :  { %v11863_v38 = vsel %vm8612_vm6, %v11665_v46, %v11658_v27  ;;  %v11690_v17 = vrot.slane %v11689_v34, 2  ;;  %v11514_v11 = vcombine.high %v11513_v7, %v11513_v7  ;;  %v11722_v36 = vsel %vm11595_vm11, %v11513_v7, -inf }
 0x71f   :  { %v11864_v44 = vsel %vm8614_vm7, %v11672_v15, %v11863_v38  ;;  %v20401_v61 = vmax.f32 %v11698_v12, %v11699_v29  ;;  %v11706_v8 = vrot.slane %v11705_v35, 1  ;;  %v11684_v1 = vmax.f32 %v11682_v55, %v11683_v21 }
 0x720   :  { %v11691_v52 = vmax.f32 %v11689_v34, %v11690_v17  ;;  %v11865_v40 = vsel %vm8616_vm8, %v11679_v59, %v11864_v44  ;;  %v11723_v62 = vrot.slane %v11722_v36, 4  ;;  %v11729_v53 = vsel %vm11595_vm11, %v11514_v11, -inf }
 0x721   :  { %v20405_v10 = vmax.f32 %v11705_v35, %v11706_v8  ;;  %v11685_v16 = vrot.slane %v11684_v1, 1  ;;  %v11730_v14 = vrot.slane %v11729_v53, 4  ;;  %v11395_v60 = vsel %vm11370_vm10, %v11314_v39, -inf }
 0x722   :  { %v11692_v30 = vrot.slane %v11691_v52, 1  ;;  %v11724_v9 = vmax.f32 %v11722_v36, %v11723_v62  ;;  %v11396_v15 = vsel %vm11370_vm10, %v11346_v0, -inf  ;;  %v11349_v37 = vcombine.high %v11317_v50, %v11317_v50 }
 0x723   :  { %v11686_v23 = vmax.f32 %v11684_v1, %v11685_v16  ;;  %v11731_v31 = vmax.f32 %v11729_v53, %v11730_v14  ;;  %v11397_v58 = vmax.f32 %v11395_v60, %v11396_v15  ;;  %v11404_v54 = vsel %vm11370_vm10, %v11317_v50, -inf }
 0x724   :  { %v20410_v59 = vmax.f32 %v11691_v52, %v11692_v30  ;;  %v11725_v4 = vrot.slane %v11724_v9, 2  ;;  %v11405_v63 = vsel %vm11370_vm10, %v11349_v37, -inf  ;;  %v11300_v13 = vadd.f32 %v20294_v5, %v20341_v2 }
 0x725   :  { %v20416_v26 = vsel %vm11855_vm12, %v11686_v23, %v11865_v40  ;;  %v11732_v41 = vrot.slane %v11731_v31, 2  ;;  %v11505_v25 = vrot.slane %v11397_v58, %v19116_v33  ;;  %v11406_v51 = vmax.f32 %v11404_v54, %v11405_v63 }
 0x726   :  { %v11726_v20 = vmax.f32 %v11724_v9, %v11725_v4  ;;  %v11316_v47 = vmax.f32 %v11300_v13, 0.0  ;;  %v11303_v42 = vadd.f32 %v20343_v32, %v20294_v5  ;;  %v11302_v57 = vadd.f32 %v20294_v5, %v20347_v43 }
 0x727   :  { %v11733_v27 = vmax.f32 %v11731_v31, %v11732_v41  ;;  %v11506_v22 = vcombine.high %v11505_v25, %v11505_v25  ;;  %v11708_v56 = vsel %vm11595_vm11, %v11505_v25, -inf  ;;  %v11529_v2 = vrot.slane %v11406_v51, %v19116_v33 }
 0x728   :  { %v11727_v45 = vrot.slane %v11726_v20, 1  ;;  %v11709_v12 = vrot.slane %v11708_v56, 4  ;;  %v11348_v24 = vcombine.high %v11316_v47, %v11316_v47  ;;  %v11401_v55 = vsel %vm11370_vm10, %v11316_v47, -inf }
 0x729   :  { %v11734_v39 = vrot.slane %v11733_v27, 1  ;;  %v11715_v46 = vsel %vm11595_vm11, %v11506_v22, -inf  ;;  %v11530_v34 = vcombine.high %v11529_v2, %v11529_v2  ;;  %v11750_v32 = vsel %vm11595_vm11, %v11529_v2, -inf }
 0x72a   :  { %v11728_v7 = vmax.f32 %v11726_v20, %v11727_v45  ;;  %v11710_v50 = vmax.f32 %v11708_v56, %v11709_v12  ;;  %v11716_v43 = vrot.slane %v11715_v46, 4  ;;  %v11751_v29 = vrot.slane %v11750_v32, 4 }
 0x72b   :  { %v11735_v35 = vmax.f32 %v11733_v27, %v11734_v39  ;;  %v11757_v21 = vsel %vm11595_vm11, %v11530_v34, -inf  ;;  %v11402_v0 = vsel %vm11370_vm10, %v11348_v24, -inf  ;;  %v11319_v38 = vmax.f32 %v11303_v42, 0.0 }
 0x72c   :  { %v11711_v17 = vrot.slane %v11710_v50, 2  ;;  %v11717_v11 = vmax.f32 %v11715_v46, %v11716_v43  ;;  %v11752_v36 = vmax.f32 %v11750_v32, %v11751_v29  ;;  %v11758_v44 = vrot.slane %v11757_v21, 4 }
 0x72d   :  { %v11403_v8 = vmax.f32 %v11401_v55, %v11402_v0  ;;  %v11351_v1 = vcombine.high %v11319_v38, %v11319_v38  ;;  %v11410_v52 = vsel %vm11370_vm10, %v11319_v38, -inf  ;;  %v11318_v40 = vmax.f32 %v11302_v57, 0.0 }
 0x72e   :  { %v11712_v62 = vmax.f32 %v11710_v50, %v11711_v17  ;;  %v11718_v53 = vrot.slane %v11717_v11, 2  ;;  %v11753_v16 = vrot.slane %v11752_v36, 2  ;;  %v11759_v14 = vmax.f32 %v11757_v21, %v11758_v44 }
 0x72f   :  { %v11521_v60 = vrot.slane %v11403_v8, %v19116_v33  ;;  %v11411_v30 = vsel %vm11370_vm10, %v11351_v1, -inf  ;;  %v11350_v9 = vcombine.high %v11318_v40, %v11318_v40  ;;  %v11407_v15 = vsel %vm11370_vm10, %v11318_v40, -inf }
 0x730   :  { %v11713_v37 = vrot.slane %v11712_v62, 1  ;;  %v11719_v23 = vmax.f32 %v11717_v11, %v11718_v53  ;;  %v11754_v31 = vmax.f32 %v11752_v36, %v11753_v16  ;;  %v11760_v58 = vrot.slane %v11759_v14, 2 }
 0x731   :  { %v11522_v54 = vcombine.high %v11521_v60, %v11521_v60  ;;  %v11736_v4 = vsel %vm11595_vm11, %v11521_v60, -inf  ;;  %v11412_v63 = vmax.f32 %v11410_v52, %v11411_v30  ;;  %v11408_v13 = vsel %vm11370_vm10, %v11350_v9, -inf }
 0x732   :  { %v11714_v41 = vmax.f32 %v11712_v62, %v11713_v37  ;;  %v11720_v25 = vrot.slane %v11719_v23, 1  ;;  %v11755_v51 = vrot.slane %v11754_v31, 1  ;;  %v11761_v20 = vmax.f32 %v11759_v14, %v11760_v58 }
 0x733   :  { %v11737_v47 = vrot.slane %v11736_v4, 4  ;;  %v11743_v42 = vsel %vm11595_vm11, %v11522_v54, -inf  ;;  %v11545_v57 = vrot.slane %v11412_v63, %v19116_v33  ;;  %v11409_v27 = vmax.f32 %v11407_v15, %v11408_v13 }
 0x734   :  { %v11721_v22 = vmax.f32 %v11719_v23, %v11720_v25  ;;  %v20438_v56 = vmax.f32 %v11754_v31, %v11755_v51  ;;  %v11762_v2 = vrot.slane %v11761_v20, 1  ;;  %v11744_v45 = vrot.slane %v11743_v42, 4 }
 0x735   :  { %v11738_v12 = vmax.f32 %v11736_v4, %v11737_v47  ;;  %v11546_v24 = vcombine.high %v11545_v57, %v11545_v57  ;;  %v11778_v55 = vsel %vm11595_vm11, %v11545_v57, -inf  ;;  %v11537_v39 = vrot.slane %v11409_v27, %v19116_v33 }
 0x736   :  { %v11870_v46 = vsel %vm8612_vm6, %v11721_v22, %v11714_v41  ;;  %v20443_v34 = vmax.f32 %v11761_v20, %v11762_v2  ;;  %v11745_v32 = vmax.f32 %v11743_v42, %v11744_v45  ;;  %v11779_v50 = vrot.slane %v11778_v55, 4 }
 0x737   :  { %v11871_v43 = vsel %vm8614_vm7, %v11728_v7, %v11870_v46  ;;  %v11739_v29 = vrot.slane %v11738_v12, 2  ;;  %v11785_v21 = vsel %vm11595_vm11, %v11546_v24, -inf  ;;  %v11538_v0 = vcombine.high %v11537_v39, %v11537_v39 }
 0x738   :  { %v11746_v38 = vrot.slane %v11745_v32, 2  ;;  %v11872_v17 = vsel %vm8616_vm8, %v11735_v35, %v11871_v43  ;;  %v11780_v11 = vmax.f32 %v11778_v55, %v11779_v50  ;;  %v11786_v36 = vrot.slane %v11785_v21, 4 }
 0x739   :  { %v11740_v44 = vmax.f32 %v11738_v12, %v11739_v29  ;;  %v11764_v8 = vsel %vm11595_vm11, %v11537_v39, -inf  ;;  %v11771_v1 = vsel %vm11595_vm11, %v11538_v0, -inf  ;;  %v11305_v52 = vadd.f32 %v20356_v28, %v20294_v5 }
 0x73a   :  { %v11747_v7 = vmax.f32 %v11745_v32, %v11746_v38  ;;  %v11781_v40 = vrot.slane %v11780_v11, 2  ;;  %v11787_v62 = vmax.f32 %v11785_v21, %v11786_v36  ;;  %v11765_v53 = vrot.slane %v11764_v8, 4 }
 0x73b   :  { %v11741_v16 = vrot.slane %v11740_v44, 1  ;;  %v11772_v14 = vrot.slane %v11771_v1, 4  ;;  %v11321_v60 = vmax.f32 %v11305_v52, 0.0  ;;  %v11304_v35 = vadd.f32 %v20294_v5, %v20362_v48 }
 0x73c   :  { %v11748_v30 = vrot.slane %v11747_v7, 1  ;;  %v11782_v9 = vmax.f32 %v11780_v11, %v11781_v40  ;;  %v11788_v15 = vrot.slane %v11787_v62, 2  ;;  %v11766_v37 = vmax.f32 %v11764_v8, %v11765_v53 }
 0x73d   :  { %v11742_v23 = vmax.f32 %v11740_v44, %v11741_v16  ;;  %v11773_v31 = vmax.f32 %v11771_v1, %v11772_v14  ;;  %v11353_v58 = vcombine.high %v11321_v60, %v11321_v60  ;;  %v11416_v54 = vsel %vm11370_vm10, %v11321_v60, -inf }
 0x73e   :  { %v11749_v28 = vmax.f32 %v11747_v7, %v11748_v30  ;;  %v11783_v4 = vrot.slane %v11782_v9, 1  ;;  %v11789_v63 = vmax.f32 %v11787_v62, %v11788_v15  ;;  %v11767_v13 = vrot.slane %v11766_v37, 2 }
 0x73f   :  { %v11873_v41 = vsel %vm11855_vm12, %v11742_v23, %v11872_v17  ;;  %v11774_v25 = vrot.slane %v11773_v31, 2  ;;  %v11417_v51 = vsel %vm11370_vm10, %v11353_v58, -inf  ;;  %v11320_v20 = vmax.f32 %v11304_v35, 0.0 }
 0x740   :  { %v11784_v5 = vmax.f32 %v11782_v9, %v11783_v4  ;;  %v11790_v48 = vrot.slane %v11789_v63, 1  ;;  %v11768_v47 = vmax.f32 %v11766_v37, %v11767_v13  ;;  %v11418_v42 = vmax.f32 %v11416_v54, %v11417_v51 }
 0x741   :  { %v11775_v57 = vmax.f32 %v11773_v31, %v11774_v25  ;;  %v11352_v27 = vcombine.high %v11320_v20, %v11320_v20  ;;  %v11413_v22 = vsel %vm11370_vm10, %v11320_v20, -inf  ;;  %v11858_v2 = vsel %vm11857_vm13, %v20368_v49, %v20371_v18 }
 0x742   :  { %v11791_v45 = vmax.f32 %v11789_v63, %v11790_v48  ;;  %v11769_v12 = vrot.slane %v11768_v47, 1  ;;  %v11561_v24 = vrot.slane %v11418_v42, %v19116_v33  ;;  %v11860_v55 = vsel %vm11859_vm14, %v20350_v19, %v11858_v2  ;;  %v11948_v2 = vld [vmem:[%s20815_s5 + $0x100] sm:$0xff] }
 0x743   :  { %v11776_v39 = vrot.slane %v11775_v57, 1  ;;  %v11414_v46 = vsel %vm11370_vm10, %v11352_v27, -inf  ;;  %v11862_v32 = vsel %vm11861_vm15, %v20359_v6, %v11860_v55  ;;  %v11867_v50 = vsel %vm11857_vm13, %v20410_v59, %v20416_v26 }
 0x744   :  { %v11770_v43 = vmax.f32 %v11768_v47, %v11769_v12  ;;  %v11562_v29 = vcombine.high %v11561_v24, %v11561_v24  ;;  %v11806_v49 = vsel %vm11595_vm11, %v11561_v24, -inf  ;;  %v11415_v18 = vmax.f32 %v11413_v22, %v11414_v46 }
 0x745   :  { %v11777_v21 = vmax.f32 %v11775_v57, %v11776_v39  ;;  %v11807_v0 = vrot.slane %v11806_v49, 4  ;;  %v11868_v19 = vsel %vm11859_vm14, %v20401_v61, %v11867_v50  ;;  %v11874_v38 = vsel %vm11857_vm13, %v11749_v28, %v11873_v41 }
 0x746   :  { %v11813_v17 = vsel %vm11595_vm11, %v11562_v29, -inf  ;;  %v11553_v6 = vrot.slane %v11415_v18, %v19116_v33  ;;  %v11869_v11 = vsel %vm11861_vm15, %v20405_v10, %v11868_v19  ;;  %v11875_v59 = vsel %vm11859_vm14, %v20438_v56, %v11874_v38  ;;  %v11968_v19 = vld [vmem:[%s20815_s5 + $0x1a0] sm:$0xff]  ;;  %v11969_v38 = vld [vmem:[%s20815_s5 + $0x1a8] sm:$0xff] }
 0x747   :  { %v11877_v26 = vsel %vm8612_vm6, %v11777_v21, %v11770_v43  ;;  %v11808_v36 = vmax.f32 %v11806_v49, %v11807_v0  ;;  %v11814_v44 = vrot.slane %v11813_v17, 4  ;;  %v11876_v8 = vsel %vm11861_vm15, %v20443_v34, %v11875_v59  ;;  %v11951_v0 = vld [vmem:[%s20815_s5 + $0x118] sm:$0xff]  ;;  %v11953_v59 = vld [vmem:[%s20815_s5 + $0x128] sm:$0xff] }
 0x748   :  { %v11878_v61 = vsel %vm8614_vm7, %v11784_v5, %v11877_v26  ;;  %v11554_v1 = vcombine.high %v11553_v6, %v11553_v6  ;;  %v11792_v52 = vsel %vm11595_vm11, %v11553_v6, -inf  ;;  %v11894_v56 = vrot.slane %v11862_v32, %v20306_v3  ;;  %v11967_v32 = vld [vmem:[%s20815_s5 + $0x198] sm:$0xff]  ;;  %v11970_v26 = vld [vmem:[%s20815_s5 + $0x1b0] sm:$0xff] }
 0x749   :  { %v11815_v7 = vmax.f32 %v11813_v17, %v11814_v44  ;;  %v11793_v40 = vrot.slane %v11792_v52, 4  ;;  %v11879_v62 = vsel %vm8616_vm8, %v11791_v45, %v11878_v61  ;;  %v11809_v10 = vrot.slane %v11808_v36, 2  ;;  %v11949_v45 = vld [vmem:[%s20815_s5 + $0x108] sm:$0xff]  ;;  %v11954_v61 = vld [vmem:[%s20815_s5 + $0x130] sm:$0xff] }
 0x74a   :  { %v11799_v53 = vsel %vm11595_vm11, %v11554_v1, -inf  ;;  %v11901_v16 = vrot.slane %v11869_v11, %v20306_v3  ;;  %v11908_v57 = vrot.slane %v11876_v8, %v20306_v3  ;;  %v16165_v50 = vpack.c.bf16 %v11949_v45, %v11948_v2  ;;  %v11952_v11 = vld [vmem:[%s20815_s5 + $0x120] sm:$0xff]  ;;  %v11955_v1 = vld [vmem:[%s20815_s5 + $0x138] sm:$0xff] }
 0x74b   :  { %v11816_v14 = vrot.slane %v11815_v7, 2  ;;  %v11794_v60 = vmax.f32 %v11792_v52, %v11793_v40  ;;  %v11800_v35 = vrot.slane %v11799_v53, 4  ;;  %v11810_v37 = vmax.f32 %v11808_v36, %v11809_v10  ;;  %v11971_v36 = vld [vmem:[%s20815_s5 + $0x1b8] sm:$0xff]  ;;  %v11972_v52 = vld [vmem:[%s20815_s5 + $0x1c0] sm:$0xff] }
 0x74c   :  { %v11991_v34 = vcombine.low %v11894_v56, %v11901_v16  ;;  %v11992_v30 = vcombine.high %v11894_v56, %v11901_v16  ;;  %v16171_v6 = vpack.c.bf16 %v11969_v38, %v11968_v19  ;;  %v16173_v44 = vpack.c.bf16 %v11953_v59, %v11952_v11  ;;  %v11956_v10 = vld [vmem:[%s20815_s5 + $0x140] sm:$0xff]  ;;  %v11974_v56 = vld [vmem:[%s20815_s5 + $0x1d0] sm:$0xff]  ;;  %v11975_v16 = vld [vmem:[%s20815_s5 + $0x1d8] sm:$0xff] }
 0x74d   :  { %v11795_v9 = vrot.slane %v11794_v60, 2  ;;  %v11801_v15 = vmax.f32 %v11799_v53, %v11800_v35  ;;  %v11817_v23 = vmax.f32 %v11815_v7, %v11816_v14  ;;  %v11811_v4 = vrot.slane %v11810_v37, 1  ;;  %v11973_v7 = vld [vmem:[%s20815_s5 + $0x1c8] sm:$0xff]  ;;  %v11958_v35 = vld [vmem:[%s20815_s5 + $0x150] sm:$0xff]  ;;  %v13700_v45 = vld [vmem:[%s20816_s6] ss:$0 sm:$0xff] }
 0x74e   :  { %v12001_v24 = vrot.slane %v11991_v34, %v19116_v33  ;;  %v20504_v39 = vrot.slane %v11992_v30, %v19116_v33  ;;  %v16175_v8 = vpack.c.bf16 %v11971_v36, %v11970_v26  ;;  %v16177_v40 = vpack.c.bf16 %v11955_v1, %v11954_v61  ;;  %v11957_v53 = vld [vmem:[%s20815_s5 + $0x148] sm:$0xff]  ;;  %v11959_v34 = vld [vmem:[%s20815_s5 + $0x158] sm:$0xff]  ;;  %v11976_v30 = vld [vmem:[%s20815_s5 + $0x1e0] sm:$0xff] }
 0x74f   :  { %v11796_v31 = vmax.f32 %v11794_v60, %v11795_v9  ;;  %v11802_v58 = vrot.slane %v11801_v15, 2  ;;  %v11818_v63 = vrot.slane %v11817_v23, 1  ;;  %v11812_v20 = vmax.f32 %v11810_v37, %v11811_v4  ;;  %v11977_v9 = vld [vmem:[%s20815_s5 + $0x1e8] sm:$0xff] }
 0x750   :  { %v16181_v14 = vpack.c.bf16 %v11957_v53, %v11956_v10  ;;  %v16183_v60 = vpack.c.bf16 %v11975_v16, %v11974_v56  ;;  %v16187_v37 = vpack.c.bf16 %v11977_v9, %v11976_v30 }
 0x751   :  { %v11797_v54 = vrot.slane %v11796_v31, 1  ;;  %v11803_v28 = vmax.f32 %v11801_v15, %v11802_v58  ;;  %v11819_v5 = vmax.f32 %v11817_v23, %v11818_v63  ;;  %v16185_v15 = vpack.c.bf16 %v11959_v34, %v11958_v35  ;;  %v11960_v23 = vld [vmem:[%s20815_s5 + $0x160] sm:$0xff]  ;;  %v11978_v58 = vld [vmem:[%s20815_s5 + $0x1f0] sm:$0xff] }
 0x752   :  { %v11962_v63 = vld [vmem:[%s20815_s5 + $0x170] sm:$0xff] }
 0x753   :  { %v11798_v13 = vmax.f32 %v11796_v31, %v11797_v54  ;;  %v11804_v41 = vrot.slane %v11803_v28, 1  ;;  %v11961_v31 = vld [vmem:[%s20815_s5 + $0x168] sm:$0xff]  ;;  %v11979_v54 = vld [vmem:[%s20815_s5 + $0x1f8] sm:$0xff] }
 0x754   :  { %v16191_v4 = vpack.c.bf16 %v11979_v54, %v11978_v58 }
 0x755   :  { %v11805_v25 = vmax.f32 %v11803_v28, %v11804_v41  ;;  %v11880_v51 = vsel %vm11855_vm12, %v11798_v13, %v11879_v62  ;;  %v16179_v62 = vpack.c.bf16 %v11973_v7, %v11972_v52  ;;  %v16189_v28 = vpack.c.bf16 %v11961_v31, %v11960_v23  ;;  %v11963_v13 = vld [vmem:[%s20815_s5 + $0x178] sm:$0xff] }
 0x756   :  { %v16193_v41 = vpack.c.bf16 %v11963_v13, %v11962_v63 }
 0x757   :  { %v11881_v48 = vsel %vm11857_vm13, %v11805_v25, %v11880_v51  ;;  %v17130_v25 = vmov 0.0|0.0   ;;  %v12176_v51 = vld [vmem:[%s20817_s7] sm:$0xff] }
 0x758   :  { %v11882_v47 = vsel %vm11859_vm14, %v11812_v20, %v11881_v48  ;;  %v12177_v20 = vld [vmem:[%s20817_s7 + $0x8] sm:$0xff]  ;;  %v12178_v48 = vld [vmem:[%s20817_s7 + $0x10] sm:$0xff] }
 0x759   :  { %v11883_v42 = vsel %vm11861_vm15, %v11819_v5, %v11882_v47  ;;  %v16196_v5 = vpack.c.bf16 %v12177_v20, %v12176_v51  ;;  %v12179_v47 = vld [vmem:[%s20817_s7 + $0x18] sm:$0xff] }
 0x75a   :  { %v11915_v27 = vrot.slane %v11883_v42, %v20306_v3  ;;  %v11966_v3 = vld [vmem:[%s20815_s5 + $0x190] sm:$0xff]  ;;  %v16199_v42 = vpack.c.bf16 %v12179_v47, %v12178_v48 }
 0x75b   :  { %v16167_v21 = vpack.c.bf16 %v11967_v32, %v11966_v3  ;;  %v12173_v3 = vld [vmem:[%s20818_s8 + $0x8] sm:$0xff] }
 0x75c   :  { %v11993_v22 = vcombine.low %v11908_v57, %v11915_v27  ;;  %v11994_v12 = vcombine.high %v11908_v57, %v11915_v27  ;;  %v20910_v57 = vmov 0.0  }
 0x75e   :  { %v12015_v55 = vrot.slane %v11993_v22, %v19116_v33  ;;  %v20507_v46 = vrot.slane %v11994_v12, %v19116_v33  ;;  %v11950_v33 = vld [vmem:[%s20815_s5 + $0x110] sm:$0xff] }
 0x75f   :  { %v16169_v17 = vpack.c.bf16 %v11951_v0, %v11950_v33  ;;  %v13701_v0 = vld [vmem:[%s20819_s9] ss:$0 sm:$0xff]  ;;  %s17133_s9 = smov 32  }
 0x760   :  { %v12023_v43 = vcombine.low %v12001_v24, %v12015_v55  ;;  %v12024_v29 = vcombine.high %v12001_v24, %v12015_v55  ;;  %v12026_v49 = vcombine.high %v20504_v39, %v20507_v46  ;;  %v12025_v18 = vcombine.low %v20504_v39, %v20507_v46  ;;  %v12172_v46 = vld [vmem:[%s20818_s8] sm:$0xff] }
 0x762   :  { %12095 = vmatprep.mubr.f32.mxu1 %v12024_v29  ;;  %v12174_v29 = vld [vmem:[%s20818_s8 + $0x10] sm:$0xff] }
 0x763   :  { %12096 = vmatmul.mubr.f32.vlgmr.msra.gmra.mrb[80].mxu1 %v12023_v43 }
 0x764   :  { %16166 = vmatpush3.bf16.msra.mxu1 %v16165_v50  ;;  %12165 = vmatprep.mubr.f32.mxu1 %v12026_v49  ;;  %v20623_v50 = vpack.c.bf16 %v12173_v3, %v12172_v46  ;;  %v12175_v49 = vld [vmem:[%s20818_s8 + $0x18] sm:$0xff] }
 0x765   :  { %16168 = vmatprep.subr.bf16.mxu1 %v16167_v21 }
 0x768   :  { %16170 = vmatpush3.bf16.msra.mxu1 %v16169_v17 }
 0x769   :  { %16172 = vmatprep.subr.bf16.mxu1 %v16171_v6 }
 0x76c   :  { %16174 = vmatpush3.bf16.msra.mxu1 %v16173_v44 }
 0x76d   :  { %16176 = vmatprep.subr.bf16.mxu1 %v16175_v8 }
 0x770   :  { %16178 = vmatpush3.bf16.msra.mxu1 %v16177_v40 }
 0x771   :  { %16180 = vmatprep.subr.bf16.mxu1 %v16179_v62 }
 0x774   :  { %16182 = vmatpush3.bf16.msra.mxu1 %v16181_v14 }
 0x775   :  { %16184 = vmatprep.subr.bf16.mxu1 %v16183_v60 }
 0x778   :  { %16186 = vmatpush3.bf16.msra.mxu1 %v16185_v15 }
 0x779   :  { %16188 = vmatprep.subr.bf16.mxu1 %v16187_v37 }
 0x77c   :  { %16190 = vmatpush3.bf16.msra.mxu1 %v16189_v28 }
 0x77d   :  { %16192 = vmatprep.subr.bf16.mxu1 %v16191_v4 }
 0x780   :  { %16194 = vmatpush3.bf16.msra.mxu1 %v16193_v41 }
 0x781   :  { %16195 = vmatprep.subr.bf16.mxu1 %v17130_v25 }
 0x783   :  { %12166 = vmatmul.mubr.f32.vlgmr.msra.gmra.mrb[82].mxu1 %v12025_v18  ;;  %v20633_v18 = vpack.c.bf16 %v12175_v49, %v12174_v29 }
 0x784   :  { %16197 = vmatpush3.bf16.msra.mxu1 %v16196_v5  ;;  %15886 = vmatprep.mubr.msk.f32.mxu1 %vm17131_vm0, %v20910_v57 }
 0x785   :  { %16198 = vmatprep.subr.bf16.mxu1 %v17130_v25 }
 0x788   :  { %16200 = vmatpush3.bf16.msra.mxu1 %v16199_v42 }
 0x789   :  { %16201 = vmatprep.subr.bf16.mxu1 %v17130_v25 }
 0x836   :  { %v14547_v27 = vpop.f32.mrb[80].mxu1 }
 0x837   :  { %v14548_v22 = vpop.f32.mrb[81].mxu1 }
 0x838   :  { %v14549_v2 = vadd.f32 %v14548_v22, %v14547_v27 }
 0x83a   :  { %v12098_v55 = vadd.f32 %v14549_v2, %v13700_v45 }
 0x856   :  { %v14582_v12 = vpop.f32.mrb[82].mxu1 }
 0x857   :  { %v14583_v24 = vpop.f32.mrb[83].mxu1 }
 0x858   :  { %v14584_v39 = vadd.f32 %v14583_v24, %v14582_v12 }
 0x85a   :  { %v12168_v32 = vadd.f32 %v14584_v39, %v12098_v55 }
 0x85c   :  { %v12171_v43 = vmax.f32 %v12168_v32, 0.0 }
 0x85e   :  { %15887 = vmatmul.mubr.msk.f32.vlgmr.msra.gmra.mrb[84].mxu1 %vm12187_vm1, %v12171_v43 }
 0x85f   :  { %16203 = vmatpush3.bf16.msra.mxu1 %v20623_v50  ;;  %15897 = vmatprep.mubr.msk.f32.mxu1 %vm17131_vm0, %v20910_v57 }
 0x860   :  { %16204 = vmatprep.subr.bf16.mxu1 %v17130_v25 }
 0x863   :  { %16206 = vmatpush3.bf16.msra.mxu1 %v20633_v18 }
 0x864   :  { %16207 = vmatprep.subr.bf16.mxu1 %v17130_v25 }
 0x866   :  { %15898 = vmatmul.mubr.f32.vlgmr.msra.gmra.mrb[86].mxu1 %v20910_v57 }
 0x867   :  { %16209 = vmatpush3.bf16.msra.mxu1 %v20623_v50  ;;  %15908 = vmatprep.mubr.msk.f32.mxu1 %vm17131_vm0, %v20910_v57 }
 0x868   :  { %16210 = vmatprep.subr.bf16.mxu1 %v17130_v25 }
 0x86b   :  { %16212 = vmatpush3.bf16.msra.mxu1 %v20633_v18 }
 0x86c   :  { %16213 = vmatprep.subr.bf16.mxu1 %v17130_v25 }
 0x931   :  { %v12257_v21 = vpop.f32.mrb[84].mxu1 }
 0x932   :  { %v15888_v33 = vpop.f32.mrb[85].mxu1  ;;  %v20650_v19 = vadd.f32 %v13701_v0, %v12257_v21 }
 0x939   :  { %v12330_v38 = vpop.f32.mrb[86].mxu1 }
 0x93a   :  { %v12334_v17 = vadd.f32 %v12330_v38, %v20650_v19  ;;  %v15899_v6 = vpop.f32.mrb[87].mxu1 }
 0x93c   :  { %17056 = vtanh.f32 %v12334_v17  ;;  %v13703_v59 = vmul.f32 -1.442695, %v12334_v17 }
 0x93e   :  { %17058 = vpow2.f32 %v13703_v59 }
 0x946   :  { %v17057_v11 = vpop.eup %17056 }
 0x947   :  { %12344 = vrot.lane.b32.xlu0 %v17057_v11, %s17132_s17 }
 0x948   :  { %v17059_v26 = vpop.eup %17058 }
 0x949   :  { %v12338_v36 = vadd.f32 1.0, %v17059_v26 }
 0x94b   :  { %17060 = vrcp.f32 %v12338_v36 }
 0x955   :  { %v17061_v44 = vpop.eup %17060 }
 0x956   :  { %v12342_v1 = vmul.f32 0.0, %v17061_v44 }
 0x9b9   :  { %v12345_v8 = vpop.permute.xlu0 %12344 }
 0x9ba   :  { %v12347_v61 = vmul.f32 %v17061_v44, %v12345_v8  ;;  %v12695_v8 = vld [vmem:[%s20820_s10 + $0x10] sm:$0xff] }
 0x9bc   :  { %12349 = vrot.lane.b32.xlu0 %v12347_v61, %s17133_s9 }
 0xa2e   :  { %v12350_v52 = vpop.permute.xlu0 %12349 }
 0xa2f   :  { %v12352_v7 = vadd.f32 %v12350_v52, %v12342_v1  ;;  %v12696_v1 = vld [vmem:[%s20820_s10 + $0x18] sm:$0xff] }
 0xa30   :  { %v16229_v52 = vpack.c.bf16 %v12696_v1, %v12695_v8 }
 0xa31   :  { %17062 = vtanh.f32 %v12352_v7  ;;  %v12446_v31 = vrot.slane %v12352_v7, 6  ;;  %v12697_v7 = vld [vmem:[%s20820_s10 + $0x20] sm:$0xff] }
 0xa3b   :  { %v17063_v40 = vpop.eup %17062 }
 0xa3c   :  { %12355 = vrot.lane.b32.xlu1 %v17063_v40, %s17132_s17  ;;  %v12698_v40 = vld [vmem:[%s20820_s10 + $0x28] sm:$0xff] }
 0xaae   :  { %v12356_v62 = vpop.permute.xlu1 %12355 }
 0xaaf   :  { %v12358_v10 = vmul.f32 %v17061_v44, %v12356_v62  ;;  %v12694_v44 = vld [vmem:[%s20820_s10 + $0x8] sm:$0xff]  ;;  %v16232_v62 = vpack.c.bf16 %v12698_v40, %v12697_v7 }
 0xab1   :  { %12360 = vrot.lane.b32.xlu1 %v12358_v10, %s17133_s9  ;;  %v12699_v10 = vld [vmem:[%s20820_s10 + $0x30] sm:$0xff] }
 0xb23   :  { %v20657_v53 = vpop.permute.xlu1 %12360 }
 0xb24   :  { %15909 = vmatmul.mubr.msk.f32.vlgmr.msra.gmra.mrb[88].mxu1 %vm12187_vm1, %v20657_v53 }
 0xb25   :  { %16215 = vmatpush3.bf16.msra.mxu1 %v20623_v50  ;;  %15919 = vmatprep.mubr.msk.f32.mxu1 %vm17131_vm0, %v20910_v57 }
 0xb26   :  { %16216 = vmatprep.subr.bf16.mxu1 %v17130_v25 }
 0xb29   :  { %16218 = vmatpush3.bf16.msra.mxu1 %v20633_v18 }
 0xb2a   :  { %16219 = vmatprep.subr.bf16.mxu1 %v17130_v25 }
 0xbf7   :  { %v12430_v56 = vpop.f32.mrb[88].mxu1 }
 0xbf8   :  { %v12435_v16 = vrot.slane %v12430_v56, 6  ;;  %v15910_v14 = vpop.f32.mrb[89].mxu1  ;;  %v12700_v56 = vld [vmem:[%s20820_s10 + $0x38] sm:$0xff] }
 0xbf9   :  { %v12701_v14 = vld [vmem:[%s20820_s10 + $0x40] sm:$0xff] }
 0xbfa   :  { %v12437_v60 = vadd.f32 %v12435_v16, %v20650_v19  ;;  %v16235_v16 = vpack.c.bf16 %v12700_v56, %v12699_v10 }
 0xbfc   :  { %17064 = vtanh.f32 %v12437_v60  ;;  %v13705_v34 = vmul.f32 -1.442695, %v12437_v60  ;;  %v12702_v60 = vld [vmem:[%s20820_s10 + $0x48] sm:$0xff] }
 0xbfe   :  { %17066 = vpow2.f32 %v13705_v34  ;;  %v12703_v34 = vld [vmem:[%s20820_s10 + $0x50] sm:$0xff] }
 0xc06   :  { %v17065_v35 = vpop.eup %17064 }
 0xc07   :  { %12450 = vrot.lane.b32.xlu0 %v17065_v35, %s17132_s17  ;;  %v16238_v35 = vpack.c.bf16 %v12702_v60, %v12701_v14 }
 0xc08   :  { %v17067_v30 = vpop.eup %17066 }
 0xc09   :  { %v12441_v9 = vadd.f32 1.0, %v17067_v30  ;;  %v12704_v30 = vld [vmem:[%s20820_s10 + $0x58] sm:$0xff] }
 0xc0b   :  { %17068 = vrcp.f32 %v12441_v9  ;;  %v16241_v9 = vpack.c.bf16 %v12704_v30, %v12703_v34 }
 0xc15   :  { %v17069_v15 = vpop.eup %17068 }
 0xc16   :  { %v12448_v58 = vmul.f32 %v17069_v15, %v12446_v31 }
 0xc79   :  { %v12451_v37 = vpop.permute.xlu0 %12450 }
 0xc7a   :  { %v12453_v23 = vmul.f32 %v17069_v15, %v12451_v37  ;;  %v12706_v37 = vld [vmem:[%s20820_s10 + $0x68] sm:$0xff] }
 0xc7c   :  { %12455 = vrot.lane.b32.xlu1 %v12453_v23, %s17133_s9 }
 0xcee   :  { %v12456_v54 = vpop.permute.xlu1 %12455 }
 0xcef   :  { %v12458_v28 = vadd.f32 %v12456_v54, %v12448_v58 }
 0xcf1   :  { %17070 = vtanh.f32 %v12458_v28  ;;  %v12553_v55 = vrot.slane %v12458_v28, 6 }
 0xcfb   :  { %v17071_v4 = vpop.eup %17070 }
 0xcfc   :  { %12461 = vrot.lane.b32.xlu0 %v17071_v4, %s17132_s17  ;;  %v12707_v4 = vld [vmem:[%s20820_s10 + $0x70] sm:$0xff] }
 0xd6e   :  { %v12462_v63 = vpop.permute.xlu0 %12461 }
 0xd6f   :  { %v12464_v13 = vmul.f32 %v17069_v15, %v12462_v63  ;;  %v12705_v15 = vld [vmem:[%s20820_s10 + $0x60] sm:$0xff]  ;;  %v12708_v63 = vld [vmem:[%s20820_s10 + $0x78] sm:$0xff] }
 0xd70   :  { %v16244_v23 = vpack.c.bf16 %v12706_v37, %v12705_v15 }
 0xd71   :  { %v12466_v41 = vrot.slane %v12464_v13, 2  ;;  %v16247_v13 = vpack.c.bf16 %v12708_v63, %v12707_v4 }
 0xd73   :  { %12467 = vrot.lane.b32.xlu1 %v12466_v41, %s17133_s9 }
 0xde5   :  { %v12468_v51 = vpop.permute.xlu1 %12467 }
 0xde6   :  { %15920 = vmatmul.mubr.msk.f32.vlgmr.msra.gmra.mrb[90].mxu1 %vm12187_vm1, %v12468_v51 }
 0xde7   :  { %16221 = vmatpush3.bf16.msra.mxu1 %v20623_v50  ;;  %15930 = vmatprep.mubr.msk.f32.mxu1 %vm17131_vm0, %v20910_v57 }
 0xde8   :  { %16222 = vmatprep.subr.bf16.mxu1 %v17130_v25 }
 0xdeb   :  { %16224 = vmatpush3.bf16.msra.mxu1 %v20633_v18 }
 0xdec   :  { %16225 = vmatprep.subr.bf16.mxu1 %v17130_v25 }
 0xeb9   :  { %v12537_v20 = vpop.f32.mrb[90].mxu1 }
 0xeba   :  { %v12542_v5 = vrot.slane %v12537_v20, 4  ;;  %v15921_v48 = vpop.f32.mrb[91].mxu1 }
 0xebb   :  { %v12787_v48 = vld [vmem:[%s20822_s12] sm:$0xff] }
 0xebc   :  { %v12544_v47 = vadd.f32 %v12542_v5, %v20650_v19 }
 0xebe   :  { %17072 = vtanh.f32 %v12544_v47  ;;  %v13707_v27 = vmul.f32 -1.442695, %v12544_v47  ;;  %v12788_v47 = vld [vmem:[%s20822_s12 + $0x8] sm:$0xff] }
 0xec0   :  { %17074 = vpow2.f32 %v13707_v27 }
 0xec8   :  { %v17073_v42 = vpop.eup %17072 }
 0xec9   :  { %12557 = vrot.lane.b32.xlu0 %v17073_v42, %s17132_s17 }
 0xeca   :  { %v17075_v22 = vpop.eup %17074 }
 0xecb   :  { %v12548_v2 = vadd.f32 1.0, %v17075_v22 }
 0xecd   :  { %17076 = vrcp.f32 %v12548_v2  ;;  %v16250_v2 = vpack.c.bf16 %v12788_v47, %v12787_v48 }
 0xed7   :  { %v17077_v45 = vpop.eup %17076 }
 0xed8   :  { %v12555_v39 = vmul.f32 %v17077_v45, %v12553_v55 }
 0xf3b   :  { %v12558_v12 = vpop.permute.xlu0 %12557 }
 0xf3c   :  { %v12560_v24 = vmul.f32 %v17077_v45, %v12558_v12  ;;  %v12789_v12 = vld [vmem:[%s20822_s12 + $0x10] sm:$0xff] }
 0xf3e   :  { %12562 = vrot.lane.b32.xlu1 %v12560_v24, %s17133_s9  ;;  %v12790_v24 = vld [vmem:[%s20822_s12 + $0x18] sm:$0xff] }
 0xfb0   :  { %v12563_v46 = vpop.permute.xlu1 %12562 }
 0xfb1   :  { %v20682_v3 = vadd.f32 %v12563_v46, %v12555_v39  ;;  %v16253_v39 = vpack.c.bf16 %v12790_v24, %v12789_v12  ;;  %v12792_v46 = vld [vmem:[%s20822_s12 + $0x28] sm:$0xff] }
 0xfb3   :  { %17078 = vtanh.f32 %v20682_v3  ;;  %v12660_v31 = vrot.slane %v20682_v3, 6 }
 0xfbd   :  { %v17079_v32 = vpop.eup %17078 }
 0xfbe   :  { %12568 = vrot.lane.b32.xlu0 %v17079_v32, %s17132_s17  ;;  %v12794_v32 = vld [vmem:[%s20822_s12 + $0x38] sm:$0xff] }
0x1030   :  { %v12569_v50 = vpop.permute.xlu0 %12568 }
0x1031   :  { %v20686_v43 = vmul.f32 %v17077_v45, %v12569_v50 }
0x1033   :  { %v12573_v29 = vrot.slane %v20686_v43, 4  ;;  %v13710_v43 = vld [vmem:[%s20821_s11] ss:$0 sm:$0xff] }
0x1035   :  { %12574 = vrot.lane.b32.xlu1 %v12573_v29, %s17133_s9 }
0x10a7   :  { %v12575_v49 = vpop.permute.xlu1 %12574 }
0x10a8   :  { %15931 = vmatmul.mubr.msk.f32.vlgmr.msra.gmra.mrb[92].mxu1 %vm12187_vm1, %v12575_v49 }
0x10a9   :  { %15965 = vmatprep.mubr.msk.f32.mxu1 %vm17131_vm0, %v20910_v57 }
0x117b   :  { %v12644_v18 = vpop.f32.mrb[92].mxu1 }
0x117c   :  { %v12649_v21 = vrot.slane %v12644_v18, 2  ;;  %v15932_v33 = vpop.f32.mrb[93].mxu1 }
0x117e   :  { %v12651_v0 = vadd.f32 %v12649_v21, %v20650_v19  ;;  %v12693_v19 = vld [vmem:[%s20820_s10] sm:$0xff] }
0x117f   :  { %v16226_v61 = vpack.c.bf16 %v12694_v44, %v12693_v19 }
0x1180   :  { %17080 = vtanh.f32 %v12651_v0  ;;  %v13709_v17 = vmul.f32 -1.442695, %v12651_v0 }
0x1181   :  { %16227 = vmatpush3.bf16.msra.mxu1 %v16226_v61 }
0x1182   :  { %17082 = vpow2.f32 %v13709_v17  ;;  %16228 = vmatprep.subr.bf16.mxu1 %v17130_v25 }
0x1185   :  { %16230 = vmatpush3.bf16.msra.mxu1 %v16229_v52 }
0x1186   :  { %16231 = vmatprep.subr.bf16.mxu1 %v17130_v25 }
0x1189   :  { %16233 = vmatpush3.bf16.msra.mxu1 %v16232_v62 }
0x118a   :  { %v17081_v38 = vpop.eup %17080  ;;  %16234 = vmatprep.subr.bf16.mxu1 %v17130_v25 }
0x118b   :  { %12664 = vrot.lane.b32.xlu0 %v17081_v38, %s17132_s17 }
0x118c   :  { %v17083_v6 = vpop.eup %17082 }
0x118d   :  { %v12655_v11 = vadd.f32 1.0, %v17083_v6  ;;  %16236 = vmatpush3.bf16.msra.mxu1 %v16235_v16 }
0x118e   :  { %16237 = vmatprep.subr.bf16.mxu1 %v17130_v25 }
0x118f   :  { %17084 = vrcp.f32 %v12655_v11 }
0x1191   :  { %16239 = vmatpush3.bf16.msra.mxu1 %v16238_v35 }
0x1192   :  { %16240 = vmatprep.subr.bf16.mxu1 %v17130_v25 }
0x1195   :  { %16242 = vmatpush3.bf16.msra.mxu1 %v16241_v9 }
0x1196   :  { %16243 = vmatprep.subr.bf16.mxu1 %v17130_v25 }
0x1199   :  { %v17085_v59 = vpop.eup %17084  ;;  %16245 = vmatpush3.bf16.msra.mxu1 %v16244_v23 }
0x119a   :  { %16246 = vmatprep.subr.bf16.mxu1 %v17130_v25  ;;  %v12662_v58 = vmul.f32 %v17085_v59, %v12660_v31 }
0x119d   :  { %16248 = vmatpush3.bf16.msra.mxu1 %v16247_v13 }
0x119e   :  { %16249 = vmatprep.subr.bf16.mxu1 %v17130_v25 }
0x11fd   :  { %v12665_v26 = vpop.permute.xlu0 %12664 }
0x11fe   :  { %v12667_v36 = vmul.f32 %v17085_v59, %v12665_v26 }
0x1200   :  { %12669 = vrot.lane.b32.xlu1 %v12667_v36, %s17133_s9 }
0x1204   :  { %12680 = vrot.lane.b32.xlu1 %v12466_v41, %s17132_s17 }
0x1272   :  { %v12670_v54 = vpop.permute.xlu1 %12669 }
0x1273   :  { %v12672_v28 = vadd.f32 %v12670_v54, %v12662_v58 }
0x1275   :  { %17086 = vtanh.f32 %v12672_v28 }
0x1276   :  { %v12681_v20 = vpop.permute.xlu1 %12680 }
0x1277   :  { %v12689_v27 = vsel %vm12187_vm1, %v20657_v53, %v12681_v20  ;;  %v12791_v53 = vld [vmem:[%s20822_s12 + $0x20] sm:$0xff] }
0x1278   :  { %v16256_v3 = vpack.c.bf16 %v12792_v46, %v12791_v53 }
0x127f   :  { %v17087_v41 = vpop.eup %17086 }
0x1280   :  { %12675 = vrot.lane.b32.xlu0 %v17087_v41, %s17132_s17 }
0x1284   :  { %12683 = vrot.lane.b32.xlu0 %v12573_v29, %s17134_s4 }
0x12f2   :  { %v12676_v51 = vpop.permute.xlu0 %12675 }
0x12f3   :  { %v12678_v5 = vmul.f32 %v17085_v59, %v12676_v51 }
0x12f5   :  { %v12687_v42 = vrot.slane %v12678_v5, 6 }
0x12f6   :  { %v12684_v22 = vpop.permute.xlu0 %12683 }
0x12f7   :  { %v12690_v45 = vsel %vm6737_vm4, %v12689_v27, %v12684_v22 }
0x12f8   :  { %v12692_v55 = vsel %vm12691_vm2, %v12690_v45, %v12687_v42 }
0x12f9   :  { %15966 = vmatmul.mubr.f32.vlgmr.msra.gmra.mrb[94].mxu1 %v12692_v55 }
0x12fa   :  { %16251 = vmatpush3.bf16.msra.mxu1 %v16250_v2  ;;  %15984 = vmatprep.mubr.msk.f32.mxu1 %vm17131_vm0, %v20910_v57  ;;  %v12793_v57 = vld [vmem:[%s20822_s12 + $0x30] sm:$0xff]  ;;  %s17135_s12 = smov [#allocation4]  }
0x12fb   :  { %16252 = vmatprep.subr.bf16.mxu1 %v17130_v25  ;;  %v16259_v50 = vpack.c.bf16 %v12794_v32, %v12793_v57  ;;  %s12889_s11 = sshll.u32 %s17135_s12, 4  ;;  %s12890_s11 = int_to_ptr.vmem [resolvable:$true] %s12889_s11 }
0x12fc   :  { %s17103_s19 = scalar_lea.vmem %s12890_s11, 32  ;;  %p17108_p1 = scmp.lt.s32.totalorder %s12890_s11, %s12890_s11 }
0x12fd   :  { %p17104_p0 = scmp.ne.s32.totalorder %s12890_s11, %s17103_s19  ;;  %p17109_p2 = scmp.lt.s32.totalorder %s17103_s19, %s17103_s19 }
0x12fe   :  { %16254 = vmatpush3.bf16.msra.mxu1 %v16253_v39 }
0x12ff   :  { %16255 = vmatprep.subr.bf16.mxu1 %v17130_v25  ;;  %p17110_p3 = por %p17109_p2, %p17108_p1 }
0x1301   :  { %p17111_p4 = pnand %p17110_p3, %p17104_p0 }
0x1302   :  { %16257 = vmatpush3.bf16.msra.mxu1 %v16256_v3 }
0x1303   :  { %16258 = vmatprep.subr.bf16.mxu1 %v17130_v25  ;;  %v13711_v25 = vld [vmem:[%s20823_s13] ss:$0 sm:$0xff] }
0x1306   :  { %16260 = vmatpush3.bf16.msra.mxu1 %v16259_v50 }
0x13cc   :  { %v12782_v29 = vpop.f32.mrb[94].mxu1 }
0x13cd   :  { %v12783_v49 = vadd.f32 %v13710_v43, %v12782_v29  ;;  %v15967_v18 = vpop.f32.mrb[95].mxu1 }
0x13cf   :  { %v12786_v21 = vmax.f32 %v12783_v49, 0.0 }
0x13d1   :  { %15985 = vmatmul.mubr.msk.f32.vlgmr.msra.gmra.mrb[96].mxu1 %vm6737_vm4, %v12786_v21 }
0x14a4   :  { %v12871_v33 = vpop.f32.mrb[96].mxu1 }
0x14a5   :  { %v12872_v0 = vadd.f32 %v13711_v25, %v12871_v33  ;;  %v15986_v38 = vpop.f32.mrb[97].mxu1 }
0x14a7   :  { %v13713_v17 = vmul.f32 -1.442695, %v12872_v0 }
0x14a9   :  { %17088 = vpow2.f32 %v13713_v17 }
0x14b3   :  { %v17089_v6 = vpop.eup %17088 }
0x14b4   :  { %v12878_v11 = vadd.f32 1.0, %v17089_v6 }
0x14b6   :  { %17090 = vrcp.f32 %v12878_v11 }
0x14c0   :  { %v17091_v59 = vpop.eup %17090 }
0x14c1   :  { %12882 = vst.msk [vmem:[#allocation4] sm:$0x3] %vm12881_vm3, %v17091_v59 }
0x14c2   :  { %17114 = shalt.err (!%p17111_p4)
}
0x14c3   :  { %s17115_s0 = scalar_lea.hbm %s20824_s14, 32 }
0x14c4   :  { %p17116_p5 = scmp.ne.s32.totalorder %s20824_s14, %s17115_s0  ;;  %p17119_p6 = scmp.lt.u32.totalorder %s17115_s0, %s20824_s14 }
0x14c6   :  { %p17121_p7 = pnand %p17119_p6, %p17116_p5 }
0x14c8   :  { %17124 = shalt.err (!%p17121_p7)
}
0x14c9   :  { %12892 = dma.vmem_to_hbm [thread:$0]  %s12890_s11, 32, %s20824_s14, [#allocation5]  }
0x14ca   :  { %17125 = dma.done.wait [#allocation5], 32  }
0x14cb   :  { %17126 = vsyncadd [#allocation5], 4294967264 }
0x14cc   :  { %12896 = vsyncpa [#allocation5], 1 }

</bundles_post_ra>
